<compile_context>
chip_gen: v5e
topology: v5e:2x2
jax: 0.10.0
libtpu: 0.0.40
codegen_flags: <defaults>
</compile_context>

<pallas_src>
import functools

import jax
import jax.numpy as jnp
from jax import lax
from jax.experimental import pallas as pl
from jax.experimental.pallas import tpu as pltpu


def _round_up(v, m):
    return -(-v // m) * m


def tabrnn_kernel(gi0_ref,
                  wcat1_ref, whh1_ref, gi1b_ref, bhh0n_ref, bhh1n_ref,
                  ln_g_ref, ln_b_ref,
                  fc1_w_ref, fc1_b_ref, fc2_w_ref, fc2_b_ref,
                  out_ref,
                  *, hidden, seq_len, matmul_dtype):
    H = hidden
    T = seq_len
    TB = out_ref.shape[0]

    # Weights stay VMEM-resident across the whole time loop (same block every grid step).
    wcat1 = wcat1_ref[...]                               # (H, 6H) = [W_ih1 | W_hh0]
    whh1 = whh1_ref[...]                                 # (H, 3H)

    # Bias broadcasts hoisted out of the unrolled loop (JAX does not CSE broadcast_in_dim).
    gi1b = jnp.broadcast_to(gi1b_ref[...], (TB, 3 * H))  # b_ih1 + [b_hh1_r, b_hh1_z, 0]
    bhh0n = jnp.broadcast_to(bhh0n_ref[...], (TB, H))    # b_hh0_n (scaled by r -> stays on gh side)
    bhh1n = jnp.broadcast_to(bhh1n_ref[...], (TB, H))    # b_hh1_n

    def sigmoid(a):
        # Single EUP tanh per gate instead of exp + divide on the serial recurrence.
        return 0.5 * (1.0 + jnp.tanh(0.5 * a))

    def gru_gates(gi, gh_raw, bhh_n, h_prev):
        # PyTorch GRU cell, gate order (r, z, n).  r/z recurrent biases are pre-folded into gi;
        # b_hh_n is added only to the n-gate slice (it is scaled by r).  All math in f32.
        r = sigmoid(gi[:, 0 * H:1 * H] + gh_raw[:, 0 * H:1 * H])
        z = sigmoid(gi[:, 1 * H:2 * H] + gh_raw[:, 1 * H:2 * H])
        n = jnp.tanh(gi[:, 2 * H:3 * H] + r * (gh_raw[:, 2 * H:3 * H] + bhh_n))
        return (1.0 - z) * n + z * h_prev

    h1 = jnp.zeros((TB, H), jnp.float32)
    h2 = jnp.zeros((TB, H), jnp.float32)
    gh0_raw = jnp.zeros((TB, 3 * H), jnp.float32)        # h1(-1) == 0  =>  h1(-1) @ W_hh0 == 0
    gh1_raw = jnp.zeros((TB, 3 * H), jnp.float32)        # h2(-1) == 0  =>  h2(-1) @ W_hh1 == 0

    # Time loop fully unrolled (T is a small compile-time constant) for scheduler visibility.
    # For T beyond ~32 features switch to lax.fori_loop(..., unroll=2..4); at T=8 keep the unroll.
    for t in range(T):
        # ---- GRU layer 0, step t ----
        h1 = gru_gates(gi0_ref[t], gh0_raw, bhh0n, h1)
        # One dense (TB,H)@(H,6H) matmul on the h1 chain: gi1(t) AND gh0(t+1) together.
        m1 = jnp.dot(h1.astype(matmul_dtype), wcat1,
                     preferred_element_type=jnp.float32)             # (TB, 6H)
        gi1 = m1[:, :3 * H] + gi1b
        # ---- GRU layer 1, step t ----
        h2 = gru_gates(gi1, gh1_raw, bhh1n, h2)
        if t + 1 < T:
            gh0_raw = m1[:, 3 * H:]                                  # layer-0 recurrence, step t+1
            # Independent chain: layer-1 recurrent projection for step t+1.
            gh1_raw = jnp.dot(h2.astype(matmul_dtype), whh1,
                              preferred_element_type=jnp.float32)    # (TB, 3H)

    # ---- classifier head on output[:, -1, :] == final hidden state of the top layer ----
    mean = jnp.mean(h2, axis=-1, keepdims=True)
    var = jnp.mean((h2 - mean) ** 2, axis=-1, keepdims=True)
    hn = (h2 - mean) * lax.rsqrt(var + 1e-5)
    hn = hn * ln_g_ref[...] + ln_b_ref[...]                          # LayerNorm(H)
    z1 = jnp.dot(hn.astype(matmul_dtype), fc1_w_ref[...],
                 preferred_element_type=jnp.float32) + fc1_b_ref[...]
    z1 = jnp.maximum(z1, 0.0)                                        # Linear + ReLU
    # Dropout = identity at inference; lane-dense (TB, 128) store, sliced outside the kernel.
    out_ref[...] = jnp.dot(z1.astype(matmul_dtype), fc2_w_ref[...],
                           preferred_element_type=jnp.float32) + fc2_b_ref[...]


def _pad_axis(a, size, axis):
    pad = size - a.shape[axis]
    if pad <= 0:
        return a
    widths = [(0, 0)] * a.ndim
    widths[axis] = (0, pad)
    return jnp.pad(a, widths)


def prepare_kernel_params(p, hidden, matmul_dtype):
    """Fold biases, concatenate [W_ih1 | W_hh0] densely, cast MXU weights, lane-pad the head."""
    H = hidden
    HP = max(128, _round_up(p["fc1_w"].shape[1], 128))   # lane-dense head width

    def fold_rz(bih, bhh):
        # b_hh_{r,z} add to b_ih_{r,z} before the sigmoid -> fold them together;
        # b_hh_n must stay on the recurrent side (it is scaled by r).
        return jnp.concatenate([bih[:, :2 * H] + bhh[:, :2 * H], bih[:, 2 * H:]], axis=1)

    return dict(
        wih0=p["wih0"],                                                      # (1, 3H)  f32
        gi0_bias=fold_rz(p["bih0"], p["bhh0"]),                              # (1, 3H)  f32
        wcat1=jnp.concatenate([p["wih1"], p["whh0"]], axis=1).astype(matmul_dtype),  # (H, 6H)
        whh1=p["whh1"].astype(matmul_dtype),                                 # (H, 3H)
        gi1_bias=fold_rz(p["bih1"], p["bhh1"]),                              # (1, 3H)  f32
        bhh0_n=p["bhh0"][:, 2 * H:],                                         # (1, H)   f32
        bhh1_n=p["bhh1"][:, 2 * H:],                                         # (1, H)   f32
        ln_g=p["ln_g"], ln_b=p["ln_b"],
        fc1_w=_pad_axis(p["fc1_w"], HP, 1).astype(matmul_dtype),             # (H, HP)
        fc1_b=_pad_axis(p["fc1_b"], HP, 1),                                  # (1, HP)  f32
        fc2_w=_pad_axis(_pad_axis(p["fc2_w"], HP, 0), 128, 1).astype(matmul_dtype),  # (HP, 128)
        fc2_b=_pad_axis(p["fc2_b"], 128, 1),                                 # (1, 128) f32
    )


def _batch_tiling(batch):
    """>= 2 'parallel' batch tiles whenever B >= 16 (engages v7x's 2nd TensorCore); TB <= 256."""
    if batch < 16:
        tb = max(8, _round_up(batch, 8))
        return tb, tb, 1
    tb = min(256, _round_up(_round_up(batch, 2) // 2, 8))
    n = _round_up(batch, tb) // tb
    return tb, n * tb, n


def tabrnn_forward(x, params, *, hidden, matmul_dtype=jnp.bfloat16):
    H = hidden
    B, T = x.shape
    kp = prepare_kernel_params(params, hidden, matmul_dtype)
    HP = kp["fc1_w"].shape[1]
    TB, B_pad, n_tiles = _batch_tiling(B)

    # Hoisted layer-0 input projection (input_size == 1): pure elementwise outer product done in
    # the wrapper, so the kernel has no lane<->sublane relayout of x and no per-step K=1 work.
    x_tm = jnp.zeros((T, B_pad), jnp.float32).at[:, :B].set(x.T)
    gi0_all = x_tm[:, :, None] * kp["wih0"][None] + kp["gi0_bias"][None]      # (T, B_pad, 3H) f32

    weights = (kp["wcat1"], kp["whh1"], kp["gi1_bias"], kp["bhh0_n"], kp["bhh1_n"],
               kp["ln_g"], kp["ln_b"],
               kp["fc1_w"], kp["fc1_b"], kp["fc2_w"], kp["fc2_b"])
    # Weights stay fully VMEM-resident (same block index every grid step).
    w_specs = [pl.BlockSpec(w.shape, lambda i: (0, 0)) for w in weights]

    flops = n_tiles * (T * (18 * TB * H * H + 30 * TB * H)
                       + 2 * TB * (H * HP + HP * 128))
    transcendentals = n_tiles * TB * (T * 6 * H + 1)
    bytes_accessed = (4 * int(gi0_all.size) + 4 * B_pad * 128
                      + sum(int(w.size) * w.dtype.itemsize for w in weights))

    out = pl.pallas_call(
        functools.partial(tabrnn_kernel, hidden=H, seq_len=T, matmul_dtype=matmul_dtype),
        out_shape=jax.ShapeDtypeStruct((B_pad, 128), jnp.float32),
        grid=(n_tiles,),
        in_specs=[pl.BlockSpec((T, TB, 3 * H), lambda i: (0, i, 0))] + w_specs,
        out_specs=pl.BlockSpec((TB, 128), lambda i: (i, 0)),
        compiler_params=pltpu.CompilerParams(dimension_semantics=("parallel",)),
        cost_estimate=pl.CostEstimate(flops=int(flops),
                                      transcendentals=int(transcendentals),
                                      bytes_accessed=int(bytes_accessed)),
    )(gi0_all, *weights)

    return out[:B, :2]


def init_params(key, hidden):
    H = hidden
    H2 = H // 2
    ks = jax.random.split(key, 12)
    s = 1.0 / jnp.sqrt(H)

    def u(k, shape):
        return jax.random.uniform(k, shape, jnp.float32, -s, s)

    return {
        # GRU layer 0 (input_size=1); stored transposed: (in, 3H), gate order (r, z, n)
        "wih0": u(ks[0], (1, 3 * H)),
        "whh0": u(ks[1], (H, 3 * H)),
        "bih0": u(ks[2], (1, 3 * H)),
        "bhh0": u(ks[3], (1, 3 * H)),
        # GRU layer 1 (input_size=H)
        "wih1": u(ks[4], (H, 3 * H)),
        "whh1": u(ks[5], (H, 3 * H)),
        "bih1": u(ks[6], (1, 3 * H)),
        "bhh1": u(ks[7], (1, 3 * H)),
        # LayerNorm(H)
        "ln_g": jnp.ones((1, H), jnp.float32),
        "ln_b": jnp.zeros((1, H), jnp.float32),
        # Linear(H, H//2), Linear(H//2, 2); stored transposed: (in, out)
        "fc1_w": u(ks[8], (H, H2)),
        "fc1_b": u(ks[9], (1, H2)),
        "fc2_w": u(ks[10], (H2, 2)),
        "fc2_b": u(ks[11], (1, 2)),
    }


def tabrnn_reference(x, p, hidden, matmul_dtype=jnp.float32):
    """Plain-JAX reference with exact PyTorch GRU/classifier semantics.  `matmul_dtype` casts the
    same matmul operands the kernel casts (everything except the K=1 input projection), so the
    kernel can be validated structurally at both f32 and bf16 MXU operand precision."""
    H = hidden
    B, T = x.shape

    def mm(a, b):
        return jnp.dot(a.astype(matmul_dtype), b.astype(matmul_dtype),
                       preferred_element_type=jnp.float32,
                       precision=lax.Precision.HIGHEST)

    def cell(gi, h, whh, bhh):
        gh = mm(h, whh) + bhh
        r = jax.nn.sigmoid(gi[:, :H] + gh[:, :H])
        z = jax.nn.sigmoid(gi[:, H:2 * H] + gh[:, H:2 * H])
        n = jnp.tanh(gi[:, 2 * H:] + r * gh[:, 2 * H:])
        return (1.0 - z) * n + z * h

    h1 = jnp.zeros((B, H), jnp.float32)
    h2 = jnp.zeros((B, H), jnp.float32)
    for t in range(T):
        xt = x[:, t:t + 1]
        gi0 = xt * p["wih0"] + p["bih0"]           # input_size == 1 -> exact f32 outer product
        h1 = cell(gi0, h1, p["whh0"], p["bhh0"])
        gi1 = mm(h1, p["wih1"]) + p["bih1"]
        h2 = cell(gi1, h2, p["whh1"], p["bhh1"])
    mean = jnp.mean(h2, axis=-1, keepdims=True)
    var = jnp.mean((h2 - mean) ** 2, axis=-1, keepdims=True)
    hn = (h2 - mean) * lax.rsqrt(var + 1e-5) * p["ln_g"] + p["ln_b"]
    z1 = jnp.maximum(mm(hn, p["fc1_w"]) + p["fc1_b"], 0.0)
    return mm(z1, p["fc2_w"]) + p["fc2_b"]


if __name__ == "__main__":
    BATCH = 32          # >= 16 so the wrapper emits 2 "parallel" batch tiles (v7x megacore)
    NUM_FEATURES = 8    # sequence length T: one timestep per tabular feature
    HIDDEN = 128        # PyTorch default hidden_size; lane-aligned gate slices

    key = jax.random.PRNGKey(0)
    k_x, k_p = jax.random.split(key)
    x = jax.random.normal(k_x, (BATCH, NUM_FEATURES), jnp.float32)
    params = init_params(k_p, HIDDEN)

    # 1) Strict structural check: f32 MXU operands vs. the exact PyTorch-semantics reference.
    out_f32 = jax.block_until_ready(
        tabrnn_forward(x, params, hidden=HIDDEN, matmul_dtype=jnp.float32))
    assert out_f32.shape == (BATCH, 2), out_f32.shape
    ref_f32 = tabrnn_reference(x, params, HIDDEN, matmul_dtype=jnp.float32)
    assert jnp.allclose(out_f32, ref_f32, atol=1e-3, rtol=1e-3), \
        float(jnp.max(jnp.abs(out_f32 - ref_f32)))

    # 2) Perf-default path: bf16 MXU operands (f32 accumulation + f32 gate math), validated
    #    against a reference that casts at exactly the same matmul inputs.
    out_bf16 = jax.block_until_ready(tabrnn_forward(x, params, hidden=HIDDEN))
    assert out_bf16.shape == (BATCH, 2), out_bf16.shape
    ref_bf16 = tabrnn_reference(x, params, HIDDEN, matmul_dtype=jnp.bfloat16)
    assert jnp.allclose(out_bf16, ref_bf16, atol=3e-3, rtol=3e-3), \
        float(jnp.max(jnp.abs(out_bf16 - ref_bf16)))

    print("KERNEL_OK")
</pallas_src>

<mosaic_0001>
module attributes {stable_mosaic.version = 11 : i64} {
  func.func @tabrnn_kernel(%arg0: i32, %arg1: memref<8x16x384xf32, #tpu.memory_space<vmem>>, %arg2: memref<128x768xf32, #tpu.memory_space<vmem>>, %arg3: memref<128x384xf32, #tpu.memory_space<vmem>>, %arg4: memref<1x384xf32, #tpu.memory_space<vmem>>, %arg5: memref<1x128xf32, #tpu.memory_space<vmem>>, %arg6: memref<1x128xf32, #tpu.memory_space<vmem>>, %arg7: memref<1x128xf32, #tpu.memory_space<vmem>>, %arg8: memref<1x128xf32, #tpu.memory_space<vmem>>, %arg9: memref<128x128xf32, #tpu.memory_space<vmem>>, %arg10: memref<1x128xf32, #tpu.memory_space<vmem>>, %arg11: memref<128x128xf32, #tpu.memory_space<vmem>>, %arg12: memref<1x128xf32, #tpu.memory_space<vmem>>, %arg13: memref<16x128xf32, #tpu.memory_space<vmem>>) attributes {dimension_semantics = [#tpu.dimension_semantics<parallel>], iteration_bounds = array<i64: 2>, scalar_prefetch = 0 : i64, scratch_operands = 0 : i64, tpu.core_type = #tpu.core_type<tc>, window_params = [{transform_indices = @transform_0, window_bounds = array<i64: 8, 16, 384>}, {pipeline_mode = #tpu.pipeline_mode<synchronous>, transform_indices = @transform_1, window_bounds = array<i64: 128, 768>}, {pipeline_mode = #tpu.pipeline_mode<synchronous>, transform_indices = @transform_2, window_bounds = array<i64: 128, 384>}, {pipeline_mode = #tpu.pipeline_mode<synchronous>, transform_indices = @transform_3, window_bounds = array<i64: 1, 384>}, {pipeline_mode = #tpu.pipeline_mode<synchronous>, transform_indices = @transform_4, window_bounds = array<i64: 1, 128>}, {pipeline_mode = #tpu.pipeline_mode<synchronous>, transform_indices = @transform_5, window_bounds = array<i64: 1, 128>}, {pipeline_mode = #tpu.pipeline_mode<synchronous>, transform_indices = @transform_6, window_bounds = array<i64: 1, 128>}, {pipeline_mode = #tpu.pipeline_mode<synchronous>, transform_indices = @transform_7, window_bounds = array<i64: 1, 128>}, {pipeline_mode = #tpu.pipeline_mode<synchronous>, transform_indices = @transform_8, window_bounds = array<i64: 128, 128>}, {pipeline_mode = #tpu.pipeline_mode<synchronous>, transform_indices = @transform_9, window_bounds = array<i64: 1, 128>}, {pipeline_mode = #tpu.pipeline_mode<synchronous>, transform_indices = @transform_10, window_bounds = array<i64: 128, 128>}, {pipeline_mode = #tpu.pipeline_mode<synchronous>, transform_indices = @transform_11, window_bounds = array<i64: 1, 128>}, {transform_indices = @transform_12, window_bounds = array<i64: 16, 128>}]} {
    %c0 = arith.constant 0 : index
    %c0_0 = arith.constant 0 : index
    %0 = vector.load %arg2[%c0, %c0_0] : memref<128x768xf32, #tpu.memory_space<vmem>>, vector<128x768xf32>
    %c0_1 = arith.constant 0 : index
    %c0_2 = arith.constant 0 : index
    %1 = vector.load %arg3[%c0_1, %c0_2] : memref<128x384xf32, #tpu.memory_space<vmem>>, vector<128x384xf32>
    %c0_3 = arith.constant 0 : index
    %c0_4 = arith.constant 0 : index
    %2 = vector.load %arg4[%c0_3, %c0_4] : memref<1x384xf32, #tpu.memory_space<vmem>>, vector<1x384xf32>
    %3 = vector.shape_cast %2 : vector<1x384xf32> to vector<1x384xf32>
    %4 = vector.broadcast %3 : vector<1x384xf32> to vector<16x384xf32>
    %c0_5 = arith.constant 0 : index
    %c0_6 = arith.constant 0 : index
    %5 = vector.load %arg5[%c0_5, %c0_6] : memref<1x128xf32, #tpu.memory_space<vmem>>, vector<1x128xf32>
    %6 = vector.shape_cast %5 : vector<1x128xf32> to vector<1x128xf32>
    %7 = vector.broadcast %6 : vector<1x128xf32> to vector<16x128xf32>
    %c0_7 = arith.constant 0 : index
    %c0_8 = arith.constant 0 : index
    %8 = vector.load %arg6[%c0_7, %c0_8] : memref<1x128xf32, #tpu.memory_space<vmem>>, vector<1x128xf32>
    %9 = vector.shape_cast %8 : vector<1x128xf32> to vector<1x128xf32>
    %10 = vector.broadcast %9 : vector<1x128xf32> to vector<16x128xf32>
    %cst = arith.constant 0.000000e+00 : f32
    %11 = vector.broadcast %cst : f32 to vector<16x128xf32>
    %cst_9 = arith.constant 0.000000e+00 : f32
    %12 = vector.broadcast %cst_9 : f32 to vector<16x128xf32>
    %cst_10 = arith.constant 0.000000e+00 : f32
    %13 = vector.broadcast %cst_10 : f32 to vector<16x384xf32>
    %cst_11 = arith.constant 0.000000e+00 : f32
    %14 = vector.broadcast %cst_11 : f32 to vector<16x384xf32>
    %c0_12 = arith.constant 0 : index
    %c0_13 = arith.constant 0 : index
    %c0_14 = arith.constant 0 : index
    %15 = vector.load %arg1[%c0_12, %c0_13, %c0_14] : memref<8x16x384xf32, #tpu.memory_space<vmem>>, vector<1x16x384xf32>
    %16 = vector.shape_cast %15 : vector<1x16x384xf32> to vector<16x384xf32>
    %17 = vector.extract_strided_slice %16 {offsets = [0, 0], sizes = [16, 128], strides = [1, 1]} : vector<16x384xf32> to vector<16x128xf32>
    %18 = vector.extract_strided_slice %13 {offsets = [0, 0], sizes = [16, 128], strides = [1, 1]} : vector<16x384xf32> to vector<16x128xf32>
    %19 = arith.addf %17, %18 : vector<16x128xf32>
    %cst_15 = arith.constant 5.000000e-01 : f32
    %20 = vector.broadcast %cst_15 : f32 to vector<16x128xf32>
    %21 = arith.mulf %20, %19 : vector<16x128xf32>
    %22 = math.tanh %21 : vector<16x128xf32>
    %cst_16 = arith.constant 1.000000e+00 : f32
    %23 = vector.broadcast %cst_16 : f32 to vector<16x128xf32>
    %24 = arith.addf %23, %22 : vector<16x128xf32>
    %cst_17 = arith.constant 5.000000e-01 : f32
    %25 = vector.broadcast %cst_17 : f32 to vector<16x128xf32>
    %26 = arith.mulf %25, %24 : vector<16x128xf32>
    %27 = vector.extract_strided_slice %16 {offsets = [0, 128], sizes = [16, 128], strides = [1, 1]} : vector<16x384xf32> to vector<16x128xf32>
    %28 = vector.extract_strided_slice %13 {offsets = [0, 128], sizes = [16, 128], strides = [1, 1]} : vector<16x384xf32> to vector<16x128xf32>
    %29 = arith.addf %27, %28 : vector<16x128xf32>
    %cst_18 = arith.constant 5.000000e-01 : f32
    %30 = vector.broadcast %cst_18 : f32 to vector<16x128xf32>
    %31 = arith.mulf %30, %29 : vector<16x128xf32>
    %32 = math.tanh %31 : vector<16x128xf32>
    %cst_19 = arith.constant 1.000000e+00 : f32
    %33 = vector.broadcast %cst_19 : f32 to vector<16x128xf32>
    %34 = arith.addf %33, %32 : vector<16x128xf32>
    %cst_20 = arith.constant 5.000000e-01 : f32
    %35 = vector.broadcast %cst_20 : f32 to vector<16x128xf32>
    %36 = arith.mulf %35, %34 : vector<16x128xf32>
    %37 = vector.extract_strided_slice %16 {offsets = [0, 256], sizes = [16, 128], strides = [1, 1]} : vector<16x384xf32> to vector<16x128xf32>
    %38 = vector.extract_strided_slice %13 {offsets = [0, 256], sizes = [16, 128], strides = [1, 1]} : vector<16x384xf32> to vector<16x128xf32>
    %39 = arith.addf %38, %7 : vector<16x128xf32>
    %40 = arith.mulf %26, %39 : vector<16x128xf32>
    %41 = arith.addf %37, %40 : vector<16x128xf32>
    %42 = math.tanh %41 : vector<16x128xf32>
    %cst_21 = arith.constant 1.000000e+00 : f32
    %43 = vector.broadcast %cst_21 : f32 to vector<16x128xf32>
    %44 = arith.subf %43, %36 : vector<16x128xf32>
    %45 = arith.mulf %44, %42 : vector<16x128xf32>
    %46 = arith.mulf %36, %11 : vector<16x128xf32>
    %47 = arith.addf %45, %46 : vector<16x128xf32>
    %cst_22 = arith.constant dense<0.000000e+00> : vector<16x768xf32>
    %48 = tpu.matmul %47, %0, %cst_22 {dimension_numbers = #tpu.dot_dimension_numbers<[1], [0], [0], [1], [0, 0, 1, 1], [], []>} : vector<16x128xf32>, vector<128x768xf32>, vector<16x768xf32> -> vector<16x768xf32>
    %49 = vector.extract_strided_slice %48 {offsets = [0, 0], sizes = [16, 384], strides = [1, 1]} : vector<16x768xf32> to vector<16x384xf32>
    %50 = arith.addf %49, %4 : vector<16x384xf32>
    %51 = vector.extract_strided_slice %50 {offsets = [0, 0], sizes = [16, 128], strides = [1, 1]} : vector<16x384xf32> to vector<16x128xf32>
    %52 = vector.extract_strided_slice %14 {offsets = [0, 0], sizes = [16, 128], strides = [1, 1]} : vector<16x384xf32> to vector<16x128xf32>
    %53 = arith.addf %51, %52 : vector<16x128xf32>
    %cst_23 = arith.constant 5.000000e-01 : f32
    %54 = vector.broadcast %cst_23 : f32 to vector<16x128xf32>
    %55 = arith.mulf %54, %53 : vector<16x128xf32>
    %56 = math.tanh %55 : vector<16x128xf32>
    %cst_24 = arith.constant 1.000000e+00 : f32
    %57 = vector.broadcast %cst_24 : f32 to vector<16x128xf32>
    %58 = arith.addf %57, %56 : vector<16x128xf32>
    %cst_25 = arith.constant 5.000000e-01 : f32
    %59 = vector.broadcast %cst_25 : f32 to vector<16x128xf32>
    %60 = arith.mulf %59, %58 : vector<16x128xf32>
    %61 = vector.extract_strided_slice %50 {offsets = [0, 128], sizes = [16, 128], strides = [1, 1]} : vector<16x384xf32> to vector<16x128xf32>
    %62 = vector.extract_strided_slice %14 {offsets = [0, 128], sizes = [16, 128], strides = [1, 1]} : vector<16x384xf32> to vector<16x128xf32>
    %63 = arith.addf %61, %62 : vector<16x128xf32>
    %cst_26 = arith.constant 5.000000e-01 : f32
    %64 = vector.broadcast %cst_26 : f32 to vector<16x128xf32>
    %65 = arith.mulf %64, %63 : vector<16x128xf32>
    %66 = math.tanh %65 : vector<16x128xf32>
    %cst_27 = arith.constant 1.000000e+00 : f32
    %67 = vector.broadcast %cst_27 : f32 to vector<16x128xf32>
    %68 = arith.addf %67, %66 : vector<16x128xf32>
    %cst_28 = arith.constant 5.000000e-01 : f32
    %69 = vector.broadcast %cst_28 : f32 to vector<16x128xf32>
    %70 = arith.mulf %69, %68 : vector<16x128xf32>
    %71 = vector.extract_strided_slice %50 {offsets = [0, 256], sizes = [16, 128], strides = [1, 1]} : vector<16x384xf32> to vector<16x128xf32>
    %72 = vector.extract_strided_slice %14 {offsets = [0, 256], sizes = [16, 128], strides = [1, 1]} : vector<16x384xf32> to vector<16x128xf32>
    %73 = arith.addf %72, %10 : vector<16x128xf32>
    %74 = arith.mulf %60, %73 : vector<16x128xf32>
    %75 = arith.addf %71, %74 : vector<16x128xf32>
    %76 = math.tanh %75 : vector<16x128xf32>
    %cst_29 = arith.constant 1.000000e+00 : f32
    %77 = vector.broadcast %cst_29 : f32 to vector<16x128xf32>
    %78 = arith.subf %77, %70 : vector<16x128xf32>
    %79 = arith.mulf %78, %76 : vector<16x128xf32>
    %80 = arith.mulf %70, %12 : vector<16x128xf32>
    %81 = arith.addf %79, %80 : vector<16x128xf32>
    %82 = vector.extract_strided_slice %48 {offsets = [0, 384], sizes = [16, 384], strides = [1, 1]} : vector<16x768xf32> to vector<16x384xf32>
    %cst_30 = arith.constant dense<0.000000e+00> : vector<16x384xf32>
    %83 = tpu.matmul %81, %1, %cst_30 {dimension_numbers = #tpu.dot_dimension_numbers<[1], [0], [0], [1], [0, 0, 1, 1], [], []>} : vector<16x128xf32>, vector<128x384xf32>, vector<16x384xf32> -> vector<16x384xf32>
    %c1 = arith.constant 1 : index
    %c0_31 = arith.constant 0 : index
    %c0_32 = arith.constant 0 : index
    %84 = vector.load %arg1[%c1, %c0_31, %c0_32] : memref<8x16x384xf32, #tpu.memory_space<vmem>>, vector<1x16x384xf32>
    %85 = vector.shape_cast %84 : vector<1x16x384xf32> to vector<16x384xf32>
    %86 = vector.extract_strided_slice %85 {offsets = [0, 0], sizes = [16, 128], strides = [1, 1]} : vector<16x384xf32> to vector<16x128xf32>
    %87 = vector.extract_strided_slice %82 {offsets = [0, 0], sizes = [16, 128], strides = [1, 1]} : vector<16x384xf32> to vector<16x128xf32>
    %88 = arith.addf %86, %87 : vector<16x128xf32>
    %cst_33 = arith.constant 5.000000e-01 : f32
    %89 = vector.broadcast %cst_33 : f32 to vector<16x128xf32>
    %90 = arith.mulf %89, %88 : vector<16x128xf32>
    %91 = math.tanh %90 : vector<16x128xf32>
    %cst_34 = arith.constant 1.000000e+00 : f32
    %92 = vector.broadcast %cst_34 : f32 to vector<16x128xf32>
    %93 = arith.addf %92, %91 : vector<16x128xf32>
    %cst_35 = arith.constant 5.000000e-01 : f32
    %94 = vector.broadcast %cst_35 : f32 to vector<16x128xf32>
    %95 = arith.mulf %94, %93 : vector<16x128xf32>
    %96 = vector.extract_strided_slice %85 {offsets = [0, 128], sizes = [16, 128], strides = [1, 1]} : vector<16x384xf32> to vector<16x128xf32>
    %97 = vector.extract_strided_slice %82 {offsets = [0, 128], sizes = [16, 128], strides = [1, 1]} : vector<16x384xf32> to vector<16x128xf32>
    %98 = arith.addf %96, %97 : vector<16x128xf32>
    %cst_36 = arith.constant 5.000000e-01 : f32
    %99 = vector.broadcast %cst_36 : f32 to vector<16x128xf32>
    %100 = arith.mulf %99, %98 : vector<16x128xf32>
    %101 = math.tanh %100 : vector<16x128xf32>
    %cst_37 = arith.constant 1.000000e+00 : f32
    %102 = vector.broadcast %cst_37 : f32 to vector<16x128xf32>
    %103 = arith.addf %102, %101 : vector<16x128xf32>
    %cst_38 = arith.constant 5.000000e-01 : f32
    %104 = vector.broadcast %cst_38 : f32 to vector<16x128xf32>
    %105 = arith.mulf %104, %103 : vector<16x128xf32>
    %106 = vector.extract_strided_slice %85 {offsets = [0, 256], sizes = [16, 128], strides = [1, 1]} : vector<16x384xf32> to vector<16x128xf32>
    %107 = vector.extract_strided_slice %82 {offsets = [0, 256], sizes = [16, 128], strides = [1, 1]} : vector<16x384xf32> to vector<16x128xf32>
    %108 = arith.addf %107, %7 : vector<16x128xf32>
    %109 = arith.mulf %95, %108 : vector<16x128xf32>
    %110 = arith.addf %106, %109 : vector<16x128xf32>
    %111 = math.tanh %110 : vector<16x128xf32>
    %cst_39 = arith.constant 1.000000e+00 : f32
    %112 = vector.broadcast %cst_39 : f32 to vector<16x128xf32>
    %113 = arith.subf %112, %105 : vector<16x128xf32>
    %114 = arith.mulf %113, %111 : vector<16x128xf32>
    %115 = arith.mulf %105, %47 : vector<16x128xf32>
    %116 = arith.addf %114, %115 : vector<16x128xf32>
    %cst_40 = arith.constant dense<0.000000e+00> : vector<16x768xf32>
    %117 = tpu.matmul %116, %0, %cst_40 {dimension_numbers = #tpu.dot_dimension_numbers<[1], [0], [0], [1], [0, 0, 1, 1], [], []>} : vector<16x128xf32>, vector<128x768xf32>, vector<16x768xf32> -> vector<16x768xf32>
    %118 = vector.extract_strided_slice %117 {offsets = [0, 0], sizes = [16, 384], strides = [1, 1]} : vector<16x768xf32> to vector<16x384xf32>
    %119 = arith.addf %118, %4 : vector<16x384xf32>
    %120 = vector.extract_strided_slice %119 {offsets = [0, 0], sizes = [16, 128], strides = [1, 1]} : vector<16x384xf32> to vector<16x128xf32>
    %121 = vector.extract_strided_slice %83 {offsets = [0, 0], sizes = [16, 128], strides = [1, 1]} : vector<16x384xf32> to vector<16x128xf32>
    %122 = arith.addf %120, %121 : vector<16x128xf32>
    %cst_41 = arith.constant 5.000000e-01 : f32
    %123 = vector.broadcast %cst_41 : f32 to vector<16x128xf32>
    %124 = arith.mulf %123, %122 : vector<16x128xf32>
    %125 = math.tanh %124 : vector<16x128xf32>
    %cst_42 = arith.constant 1.000000e+00 : f32
    %126 = vector.broadcast %cst_42 : f32 to vector<16x128xf32>
    %127 = arith.addf %126, %125 : vector<16x128xf32>
    %cst_43 = arith.constant 5.000000e-01 : f32
    %128 = vector.broadcast %cst_43 : f32 to vector<16x128xf32>
    %129 = arith.mulf %128, %127 : vector<16x128xf32>
    %130 = vector.extract_strided_slice %119 {offsets = [0, 128], sizes = [16, 128], strides = [1, 1]} : vector<16x384xf32> to vector<16x128xf32>
    %131 = vector.extract_strided_slice %83 {offsets = [0, 128], sizes = [16, 128], strides = [1, 1]} : vector<16x384xf32> to vector<16x128xf32>
    %132 = arith.addf %130, %131 : vector<16x128xf32>
    %cst_44 = arith.constant 5.000000e-01 : f32
    %133 = vector.broadcast %cst_44 : f32 to vector<16x128xf32>
    %134 = arith.mulf %133, %132 : vector<16x128xf32>
    %135 = math.tanh %134 : vector<16x128xf32>
    %cst_45 = arith.constant 1.000000e+00 : f32
    %136 = vector.broadcast %cst_45 : f32 to vector<16x128xf32>
    %137 = arith.addf %136, %135 : vector<16x128xf32>
    %cst_46 = arith.constant 5.000000e-01 : f32
    %138 = vector.broadcast %cst_46 : f32 to vector<16x128xf32>
    %139 = arith.mulf %138, %137 : vector<16x128xf32>
    %140 = vector.extract_strided_slice %119 {offsets = [0, 256], sizes = [16, 128], strides = [1, 1]} : vector<16x384xf32> to vector<16x128xf32>
    %141 = vector.extract_strided_slice %83 {offsets = [0, 256], sizes = [16, 128], strides = [1, 1]} : vector<16x384xf32> to vector<16x128xf32>
    %142 = arith.addf %141, %10 : vector<16x128xf32>
    %143 = arith.mulf %129, %142 : vector<16x128xf32>
    %144 = arith.addf %140, %143 : vector<16x128xf32>
    %145 = math.tanh %144 : vector<16x128xf32>
    %cst_47 = arith.constant 1.000000e+00 : f32
    %146 = vector.broadcast %cst_47 : f32 to vector<16x128xf32>
    %147 = arith.subf %146, %139 : vector<16x128xf32>
    %148 = arith.mulf %147, %145 : vector<16x128xf32>
    %149 = arith.mulf %139, %81 : vector<16x128xf32>
    %150 = arith.addf %148, %149 : vector<16x128xf32>
    %151 = vector.extract_strided_slice %117 {offsets = [0, 384], sizes = [16, 384], strides = [1, 1]} : vector<16x768xf32> to vector<16x384xf32>
    %cst_48 = arith.constant dense<0.000000e+00> : vector<16x384xf32>
    %152 = tpu.matmul %150, %1, %cst_48 {dimension_numbers = #tpu.dot_dimension_numbers<[1], [0], [0], [1], [0, 0, 1, 1], [], []>} : vector<16x128xf32>, vector<128x384xf32>, vector<16x384xf32> -> vector<16x384xf32>
    %c2 = arith.constant 2 : index
    %c0_49 = arith.constant 0 : index
    %c0_50 = arith.constant 0 : index
    %153 = vector.load %arg1[%c2, %c0_49, %c0_50] : memref<8x16x384xf32, #tpu.memory_space<vmem>>, vector<1x16x384xf32>
    %154 = vector.shape_cast %153 : vector<1x16x384xf32> to vector<16x384xf32>
    %155 = vector.extract_strided_slice %154 {offsets = [0, 0], sizes = [16, 128], strides = [1, 1]} : vector<16x384xf32> to vector<16x128xf32>
    %156 = vector.extract_strided_slice %151 {offsets = [0, 0], sizes = [16, 128], strides = [1, 1]} : vector<16x384xf32> to vector<16x128xf32>
    %157 = arith.addf %155, %156 : vector<16x128xf32>
    %cst_51 = arith.constant 5.000000e-01 : f32
    %158 = vector.broadcast %cst_51 : f32 to vector<16x128xf32>
    %159 = arith.mulf %158, %157 : vector<16x128xf32>
    %160 = math.tanh %159 : vector<16x128xf32>
    %cst_52 = arith.constant 1.000000e+00 : f32
    %161 = vector.broadcast %cst_52 : f32 to vector<16x128xf32>
    %162 = arith.addf %161, %160 : vector<16x128xf32>
    %cst_53 = arith.constant 5.000000e-01 : f32
    %163 = vector.broadcast %cst_53 : f32 to vector<16x128xf32>
    %164 = arith.mulf %163, %162 : vector<16x128xf32>
    %165 = vector.extract_strided_slice %154 {offsets = [0, 128], sizes = [16, 128], strides = [1, 1]} : vector<16x384xf32> to vector<16x128xf32>
    %166 = vector.extract_strided_slice %151 {offsets = [0, 128], sizes = [16, 128], strides = [1, 1]} : vector<16x384xf32> to vector<16x128xf32>
    %167 = arith.addf %165, %166 : vector<16x128xf32>
    %cst_54 = arith.constant 5.000000e-01 : f32
    %168 = vector.broadcast %cst_54 : f32 to vector<16x128xf32>
    %169 = arith.mulf %168, %167 : vector<16x128xf32>
    %170 = math.tanh %169 : vector<16x128xf32>
    %cst_55 = arith.constant 1.000000e+00 : f32
    %171 = vector.broadcast %cst_55 : f32 to vector<16x128xf32>
    %172 = arith.addf %171, %170 : vector<16x128xf32>
    %cst_56 = arith.constant 5.000000e-01 : f32
    %173 = vector.broadcast %cst_56 : f32 to vector<16x128xf32>
    %174 = arith.mulf %173, %172 : vector<16x128xf32>
    %175 = vector.extract_strided_slice %154 {offsets = [0, 256], sizes = [16, 128], strides = [1, 1]} : vector<16x384xf32> to vector<16x128xf32>
    %176 = vector.extract_strided_slice %151 {offsets = [0, 256], sizes = [16, 128], strides = [1, 1]} : vector<16x384xf32> to vector<16x128xf32>
    %177 = arith.addf %176, %7 : vector<16x128xf32>
    %178 = arith.mulf %164, %177 : vector<16x128xf32>
    %179 = arith.addf %175, %178 : vector<16x128xf32>
    %180 = math.tanh %179 : vector<16x128xf32>
    %cst_57 = arith.constant 1.000000e+00 : f32
    %181 = vector.broadcast %cst_57 : f32 to vector<16x128xf32>
    %182 = arith.subf %181, %174 : vector<16x128xf32>
    %183 = arith.mulf %182, %180 : vector<16x128xf32>
    %184 = arith.mulf %174, %116 : vector<16x128xf32>
    %185 = arith.addf %183, %184 : vector<16x128xf32>
    %cst_58 = arith.constant dense<0.000000e+00> : vector<16x768xf32>
    %186 = tpu.matmul %185, %0, %cst_58 {dimension_numbers = #tpu.dot_dimension_numbers<[1], [0], [0], [1], [0, 0, 1, 1], [], []>} : vector<16x128xf32>, vector<128x768xf32>, vector<16x768xf32> -> vector<16x768xf32>
    %187 = vector.extract_strided_slice %186 {offsets = [0, 0], sizes = [16, 384], strides = [1, 1]} : vector<16x768xf32> to vector<16x384xf32>
    %188 = arith.addf %187, %4 : vector<16x384xf32>
    %189 = vector.extract_strided_slice %188 {offsets = [0, 0], sizes = [16, 128], strides = [1, 1]} : vector<16x384xf32> to vector<16x128xf32>
    %190 = vector.extract_strided_slice %152 {offsets = [0, 0], sizes = [16, 128], strides = [1, 1]} : vector<16x384xf32> to vector<16x128xf32>
    %191 = arith.addf %189, %190 : vector<16x128xf32>
    %cst_59 = arith.constant 5.000000e-01 : f32
    %192 = vector.broadcast %cst_59 : f32 to vector<16x128xf32>
    %193 = arith.mulf %192, %191 : vector<16x128xf32>
    %194 = math.tanh %193 : vector<16x128xf32>
    %cst_60 = arith.constant 1.000000e+00 : f32
    %195 = vector.broadcast %cst_60 : f32 to vector<16x128xf32>
    %196 = arith.addf %195, %194 : vector<16x128xf32>
    %cst_61 = arith.constant 5.000000e-01 : f32
    %197 = vector.broadcast %cst_61 : f32 to vector<16x128xf32>
    %198 = arith.mulf %197, %196 : vector<16x128xf32>
    %199 = vector.extract_strided_slice %188 {offsets = [0, 128], sizes = [16, 128], strides = [1, 1]} : vector<16x384xf32> to vector<16x128xf32>
    %200 = vector.extract_strided_slice %152 {offsets = [0, 128], sizes = [16, 128], strides = [1, 1]} : vector<16x384xf32> to vector<16x128xf32>
    %201 = arith.addf %199, %200 : vector<16x128xf32>
    %cst_62 = arith.constant 5.000000e-01 : f32
    %202 = vector.broadcast %cst_62 : f32 to vector<16x128xf32>
    %203 = arith.mulf %202, %201 : vector<16x128xf32>
    %204 = math.tanh %203 : vector<16x128xf32>
    %cst_63 = arith.constant 1.000000e+00 : f32
    %205 = vector.broadcast %cst_63 : f32 to vector<16x128xf32>
    %206 = arith.addf %205, %204 : vector<16x128xf32>
    %cst_64 = arith.constant 5.000000e-01 : f32
    %207 = vector.broadcast %cst_64 : f32 to vector<16x128xf32>
    %208 = arith.mulf %207, %206 : vector<16x128xf32>
    %209 = vector.extract_strided_slice %188 {offsets = [0, 256], sizes = [16, 128], strides = [1, 1]} : vector<16x384xf32> to vector<16x128xf32>
    %210 = vector.extract_strided_slice %152 {offsets = [0, 256], sizes = [16, 128], strides = [1, 1]} : vector<16x384xf32> to vector<16x128xf32>
    %211 = arith.addf %210, %10 : vector<16x128xf32>
    %212 = arith.mulf %198, %211 : vector<16x128xf32>
    %213 = arith.addf %209, %212 : vector<16x128xf32>
    %214 = math.tanh %213 : vector<16x128xf32>
    %cst_65 = arith.constant 1.000000e+00 : f32
    %215 = vector.broadcast %cst_65 : f32 to vector<16x128xf32>
    %216 = arith.subf %215, %208 : vector<16x128xf32>
    %217 = arith.mulf %216, %214 : vector<16x128xf32>
    %218 = arith.mulf %208, %150 : vector<16x128xf32>
    %219 = arith.addf %217, %218 : vector<16x128xf32>
    %220 = vector.extract_strided_slice %186 {offsets = [0, 384], sizes = [16, 384], strides = [1, 1]} : vector<16x768xf32> to vector<16x384xf32>
    %cst_66 = arith.constant dense<0.000000e+00> : vector<16x384xf32>
    %221 = tpu.matmul %219, %1, %cst_66 {dimension_numbers = #tpu.dot_dimension_numbers<[1], [0], [0], [1], [0, 0, 1, 1], [], []>} : vector<16x128xf32>, vector<128x384xf32>, vector<16x384xf32> -> vector<16x384xf32>
    %c3 = arith.constant 3 : index
    %c0_67 = arith.constant 0 : index
    %c0_68 = arith.constant 0 : index
    %222 = vector.load %arg1[%c3, %c0_67, %c0_68] : memref<8x16x384xf32, #tpu.memory_space<vmem>>, vector<1x16x384xf32>
    %223 = vector.shape_cast %222 : vector<1x16x384xf32> to vector<16x384xf32>
    %224 = vector.extract_strided_slice %223 {offsets = [0, 0], sizes = [16, 128], strides = [1, 1]} : vector<16x384xf32> to vector<16x128xf32>
    %225 = vector.extract_strided_slice %220 {offsets = [0, 0], sizes = [16, 128], strides = [1, 1]} : vector<16x384xf32> to vector<16x128xf32>
    %226 = arith.addf %224, %225 : vector<16x128xf32>
    %cst_69 = arith.constant 5.000000e-01 : f32
    %227 = vector.broadcast %cst_69 : f32 to vector<16x128xf32>
    %228 = arith.mulf %227, %226 : vector<16x128xf32>
    %229 = math.tanh %228 : vector<16x128xf32>
    %cst_70 = arith.constant 1.000000e+00 : f32
    %230 = vector.broadcast %cst_70 : f32 to vector<16x128xf32>
    %231 = arith.addf %230, %229 : vector<16x128xf32>
    %cst_71 = arith.constant 5.000000e-01 : f32
    %232 = vector.broadcast %cst_71 : f32 to vector<16x128xf32>
    %233 = arith.mulf %232, %231 : vector<16x128xf32>
    %234 = vector.extract_strided_slice %223 {offsets = [0, 128], sizes = [16, 128], strides = [1, 1]} : vector<16x384xf32> to vector<16x128xf32>
    %235 = vector.extract_strided_slice %220 {offsets = [0, 128], sizes = [16, 128], strides = [1, 1]} : vector<16x384xf32> to vector<16x128xf32>
    %236 = arith.addf %234, %235 : vector<16x128xf32>
    %cst_72 = arith.constant 5.000000e-01 : f32
    %237 = vector.broadcast %cst_72 : f32 to vector<16x128xf32>
    %238 = arith.mulf %237, %236 : vector<16x128xf32>
    %239 = math.tanh %238 : vector<16x128xf32>
    %cst_73 = arith.constant 1.000000e+00 : f32
    %240 = vector.broadcast %cst_73 : f32 to vector<16x128xf32>
    %241 = arith.addf %240, %239 : vector<16x128xf32>
    %cst_74 = arith.constant 5.000000e-01 : f32
    %242 = vector.broadcast %cst_74 : f32 to vector<16x128xf32>
    %243 = arith.mulf %242, %241 : vector<16x128xf32>
    %244 = vector.extract_strided_slice %223 {offsets = [0, 256], sizes = [16, 128], strides = [1, 1]} : vector<16x384xf32> to vector<16x128xf32>
    %245 = vector.extract_strided_slice %220 {offsets = [0, 256], sizes = [16, 128], strides = [1, 1]} : vector<16x384xf32> to vector<16x128xf32>
    %246 = arith.addf %245, %7 : vector<16x128xf32>
    %247 = arith.mulf %233, %246 : vector<16x128xf32>
    %248 = arith.addf %244, %247 : vector<16x128xf32>
    %249 = math.tanh %248 : vector<16x128xf32>
    %cst_75 = arith.constant 1.000000e+00 : f32
    %250 = vector.broadcast %cst_75 : f32 to vector<16x128xf32>
    %251 = arith.subf %250, %243 : vector<16x128xf32>
    %252 = arith.mulf %251, %249 : vector<16x128xf32>
    %253 = arith.mulf %243, %185 : vector<16x128xf32>
    %254 = arith.addf %252, %253 : vector<16x128xf32>
    %cst_76 = arith.constant dense<0.000000e+00> : vector<16x768xf32>
    %255 = tpu.matmul %254, %0, %cst_76 {dimension_numbers = #tpu.dot_dimension_numbers<[1], [0], [0], [1], [0, 0, 1, 1], [], []>} : vector<16x128xf32>, vector<128x768xf32>, vector<16x768xf32> -> vector<16x768xf32>
    %256 = vector.extract_strided_slice %255 {offsets = [0, 0], sizes = [16, 384], strides = [1, 1]} : vector<16x768xf32> to vector<16x384xf32>
    %257 = arith.addf %256, %4 : vector<16x384xf32>
    %258 = vector.extract_strided_slice %257 {offsets = [0, 0], sizes = [16, 128], strides = [1, 1]} : vector<16x384xf32> to vector<16x128xf32>
    %259 = vector.extract_strided_slice %221 {offsets = [0, 0], sizes = [16, 128], strides = [1, 1]} : vector<16x384xf32> to vector<16x128xf32>
    %260 = arith.addf %258, %259 : vector<16x128xf32>
    %cst_77 = arith.constant 5.000000e-01 : f32
    %261 = vector.broadcast %cst_77 : f32 to vector<16x128xf32>
    %262 = arith.mulf %261, %260 : vector<16x128xf32>
    %263 = math.tanh %262 : vector<16x128xf32>
    %cst_78 = arith.constant 1.000000e+00 : f32
    %264 = vector.broadcast %cst_78 : f32 to vector<16x128xf32>
    %265 = arith.addf %264, %263 : vector<16x128xf32>
    %cst_79 = arith.constant 5.000000e-01 : f32
    %266 = vector.broadcast %cst_79 : f32 to vector<16x128xf32>
    %267 = arith.mulf %266, %265 : vector<16x128xf32>
    %268 = vector.extract_strided_slice %257 {offsets = [0, 128], sizes = [16, 128], strides = [1, 1]} : vector<16x384xf32> to vector<16x128xf32>
    %269 = vector.extract_strided_slice %221 {offsets = [0, 128], sizes = [16, 128], strides = [1, 1]} : vector<16x384xf32> to vector<16x128xf32>
    %270 = arith.addf %268, %269 : vector<16x128xf32>
    %cst_80 = arith.constant 5.000000e-01 : f32
    %271 = vector.broadcast %cst_80 : f32 to vector<16x128xf32>
    %272 = arith.mulf %271, %270 : vector<16x128xf32>
    %273 = math.tanh %272 : vector<16x128xf32>
    %cst_81 = arith.constant 1.000000e+00 : f32
    %274 = vector.broadcast %cst_81 : f32 to vector<16x128xf32>
    %275 = arith.addf %274, %273 : vector<16x128xf32>
    %cst_82 = arith.constant 5.000000e-01 : f32
    %276 = vector.broadcast %cst_82 : f32 to vector<16x128xf32>
    %277 = arith.mulf %276, %275 : vector<16x128xf32>
    %278 = vector.extract_strided_slice %257 {offsets = [0, 256], sizes = [16, 128], strides = [1, 1]} : vector<16x384xf32> to vector<16x128xf32>
    %279 = vector.extract_strided_slice %221 {offsets = [0, 256], sizes = [16, 128], strides = [1, 1]} : vector<16x384xf32> to vector<16x128xf32>
    %280 = arith.addf %279, %10 : vector<16x128xf32>
    %281 = arith.mulf %267, %280 : vector<16x128xf32>
    %282 = arith.addf %278, %281 : vector<16x128xf32>
    %283 = math.tanh %282 : vector<16x128xf32>
    %cst_83 = arith.constant 1.000000e+00 : f32
    %284 = vector.broadcast %cst_83 : f32 to vector<16x128xf32>
    %285 = arith.subf %284, %277 : vector<16x128xf32>
    %286 = arith.mulf %285, %283 : vector<16x128xf32>
    %287 = arith.mulf %277, %219 : vector<16x128xf32>
    %288 = arith.addf %286, %287 : vector<16x128xf32>
    %289 = vector.extract_strided_slice %255 {offsets = [0, 384], sizes = [16, 384], strides = [1, 1]} : vector<16x768xf32> to vector<16x384xf32>
    %cst_84 = arith.constant dense<0.000000e+00> : vector<16x384xf32>
    %290 = tpu.matmul %288, %1, %cst_84 {dimension_numbers = #tpu.dot_dimension_numbers<[1], [0], [0], [1], [0, 0, 1, 1], [], []>} : vector<16x128xf32>, vector<128x384xf32>, vector<16x384xf32> -> vector<16x384xf32>
    %c4 = arith.constant 4 : index
    %c0_85 = arith.constant 0 : index
    %c0_86 = arith.constant 0 : index
    %291 = vector.load %arg1[%c4, %c0_85, %c0_86] : memref<8x16x384xf32, #tpu.memory_space<vmem>>, vector<1x16x384xf32>
    %292 = vector.shape_cast %291 : vector<1x16x384xf32> to vector<16x384xf32>
    %293 = vector.extract_strided_slice %292 {offsets = [0, 0], sizes = [16, 128], strides = [1, 1]} : vector<16x384xf32> to vector<16x128xf32>
    %294 = vector.extract_strided_slice %289 {offsets = [0, 0], sizes = [16, 128], strides = [1, 1]} : vector<16x384xf32> to vector<16x128xf32>
    %295 = arith.addf %293, %294 : vector<16x128xf32>
    %cst_87 = arith.constant 5.000000e-01 : f32
    %296 = vector.broadcast %cst_87 : f32 to vector<16x128xf32>
    %297 = arith.mulf %296, %295 : vector<16x128xf32>
    %298 = math.tanh %297 : vector<16x128xf32>
    %cst_88 = arith.constant 1.000000e+00 : f32
    %299 = vector.broadcast %cst_88 : f32 to vector<16x128xf32>
    %300 = arith.addf %299, %298 : vector<16x128xf32>
    %cst_89 = arith.constant 5.000000e-01 : f32
    %301 = vector.broadcast %cst_89 : f32 to vector<16x128xf32>
    %302 = arith.mulf %301, %300 : vector<16x128xf32>
    %303 = vector.extract_strided_slice %292 {offsets = [0, 128], sizes = [16, 128], strides = [1, 1]} : vector<16x384xf32> to vector<16x128xf32>
    %304 = vector.extract_strided_slice %289 {offsets = [0, 128], sizes = [16, 128], strides = [1, 1]} : vector<16x384xf32> to vector<16x128xf32>
    %305 = arith.addf %303, %304 : vector<16x128xf32>
    %cst_90 = arith.constant 5.000000e-01 : f32
    %306 = vector.broadcast %cst_90 : f32 to vector<16x128xf32>
    %307 = arith.mulf %306, %305 : vector<16x128xf32>
    %308 = math.tanh %307 : vector<16x128xf32>
    %cst_91 = arith.constant 1.000000e+00 : f32
    %309 = vector.broadcast %cst_91 : f32 to vector<16x128xf32>
    %310 = arith.addf %309, %308 : vector<16x128xf32>
    %cst_92 = arith.constant 5.000000e-01 : f32
    %311 = vector.broadcast %cst_92 : f32 to vector<16x128xf32>
    %312 = arith.mulf %311, %310 : vector<16x128xf32>
    %313 = vector.extract_strided_slice %292 {offsets = [0, 256], sizes = [16, 128], strides = [1, 1]} : vector<16x384xf32> to vector<16x128xf32>
    %314 = vector.extract_strided_slice %289 {offsets = [0, 256], sizes = [16, 128], strides = [1, 1]} : vector<16x384xf32> to vector<16x128xf32>
    %315 = arith.addf %314, %7 : vector<16x128xf32>
    %316 = arith.mulf %302, %315 : vector<16x128xf32>
    %317 = arith.addf %313, %316 : vector<16x128xf32>
    %318 = math.tanh %317 : vector<16x128xf32>
    %cst_93 = arith.constant 1.000000e+00 : f32
    %319 = vector.broadcast %cst_93 : f32 to vector<16x128xf32>
    %320 = arith.subf %319, %312 : vector<16x128xf32>
    %321 = arith.mulf %320, %318 : vector<16x128xf32>
    %322 = arith.mulf %312, %254 : vector<16x128xf32>
    %323 = arith.addf %321, %322 : vector<16x128xf32>
    %cst_94 = arith.constant dense<0.000000e+00> : vector<16x768xf32>
    %324 = tpu.matmul %323, %0, %cst_94 {dimension_numbers = #tpu.dot_dimension_numbers<[1], [0], [0], [1], [0, 0, 1, 1], [], []>} : vector<16x128xf32>, vector<128x768xf32>, vector<16x768xf32> -> vector<16x768xf32>
    %325 = vector.extract_strided_slice %324 {offsets = [0, 0], sizes = [16, 384], strides = [1, 1]} : vector<16x768xf32> to vector<16x384xf32>
    %326 = arith.addf %325, %4 : vector<16x384xf32>
    %327 = vector.extract_strided_slice %326 {offsets = [0, 0], sizes = [16, 128], strides = [1, 1]} : vector<16x384xf32> to vector<16x128xf32>
    %328 = vector.extract_strided_slice %290 {offsets = [0, 0], sizes = [16, 128], strides = [1, 1]} : vector<16x384xf32> to vector<16x128xf32>
    %329 = arith.addf %327, %328 : vector<16x128xf32>
    %cst_95 = arith.constant 5.000000e-01 : f32
    %330 = vector.broadcast %cst_95 : f32 to vector<16x128xf32>
    %331 = arith.mulf %330, %329 : vector<16x128xf32>
    %332 = math.tanh %331 : vector<16x128xf32>
    %cst_96 = arith.constant 1.000000e+00 : f32
    %333 = vector.broadcast %cst_96 : f32 to vector<16x128xf32>
    %334 = arith.addf %333, %332 : vector<16x128xf32>
    %cst_97 = arith.constant 5.000000e-01 : f32
    %335 = vector.broadcast %cst_97 : f32 to vector<16x128xf32>
    %336 = arith.mulf %335, %334 : vector<16x128xf32>
    %337 = vector.extract_strided_slice %326 {offsets = [0, 128], sizes = [16, 128], strides = [1, 1]} : vector<16x384xf32> to vector<16x128xf32>
    %338 = vector.extract_strided_slice %290 {offsets = [0, 128], sizes = [16, 128], strides = [1, 1]} : vector<16x384xf32> to vector<16x128xf32>
    %339 = arith.addf %337, %338 : vector<16x128xf32>
    %cst_98 = arith.constant 5.000000e-01 : f32
    %340 = vector.broadcast %cst_98 : f32 to vector<16x128xf32>
    %341 = arith.mulf %340, %339 : vector<16x128xf32>
    %342 = math.tanh %341 : vector<16x128xf32>
    %cst_99 = arith.constant 1.000000e+00 : f32
    %343 = vector.broadcast %cst_99 : f32 to vector<16x128xf32>
    %344 = arith.addf %343, %342 : vector<16x128xf32>
    %cst_100 = arith.constant 5.000000e-01 : f32
    %345 = vector.broadcast %cst_100 : f32 to vector<16x128xf32>
    %346 = arith.mulf %345, %344 : vector<16x128xf32>
    %347 = vector.extract_strided_slice %326 {offsets = [0, 256], sizes = [16, 128], strides = [1, 1]} : vector<16x384xf32> to vector<16x128xf32>
    %348 = vector.extract_strided_slice %290 {offsets = [0, 256], sizes = [16, 128], strides = [1, 1]} : vector<16x384xf32> to vector<16x128xf32>
    %349 = arith.addf %348, %10 : vector<16x128xf32>
    %350 = arith.mulf %336, %349 : vector<16x128xf32>
    %351 = arith.addf %347, %350 : vector<16x128xf32>
    %352 = math.tanh %351 : vector<16x128xf32>
    %cst_101 = arith.constant 1.000000e+00 : f32
    %353 = vector.broadcast %cst_101 : f32 to vector<16x128xf32>
    %354 = arith.subf %353, %346 : vector<16x128xf32>
    %355 = arith.mulf %354, %352 : vector<16x128xf32>
    %356 = arith.mulf %346, %288 : vector<16x128xf32>
    %357 = arith.addf %355, %356 : vector<16x128xf32>
    %358 = vector.extract_strided_slice %324 {offsets = [0, 384], sizes = [16, 384], strides = [1, 1]} : vector<16x768xf32> to vector<16x384xf32>
    %cst_102 = arith.constant dense<0.000000e+00> : vector<16x384xf32>
    %359 = tpu.matmul %357, %1, %cst_102 {dimension_numbers = #tpu.dot_dimension_numbers<[1], [0], [0], [1], [0, 0, 1, 1], [], []>} : vector<16x128xf32>, vector<128x384xf32>, vector<16x384xf32> -> vector<16x384xf32>
    %c5 = arith.constant 5 : index
    %c0_103 = arith.constant 0 : index
    %c0_104 = arith.constant 0 : index
    %360 = vector.load %arg1[%c5, %c0_103, %c0_104] : memref<8x16x384xf32, #tpu.memory_space<vmem>>, vector<1x16x384xf32>
    %361 = vector.shape_cast %360 : vector<1x16x384xf32> to vector<16x384xf32>
    %362 = vector.extract_strided_slice %361 {offsets = [0, 0], sizes = [16, 128], strides = [1, 1]} : vector<16x384xf32> to vector<16x128xf32>
    %363 = vector.extract_strided_slice %358 {offsets = [0, 0], sizes = [16, 128], strides = [1, 1]} : vector<16x384xf32> to vector<16x128xf32>
    %364 = arith.addf %362, %363 : vector<16x128xf32>
    %cst_105 = arith.constant 5.000000e-01 : f32
    %365 = vector.broadcast %cst_105 : f32 to vector<16x128xf32>
    %366 = arith.mulf %365, %364 : vector<16x128xf32>
    %367 = math.tanh %366 : vector<16x128xf32>
    %cst_106 = arith.constant 1.000000e+00 : f32
    %368 = vector.broadcast %cst_106 : f32 to vector<16x128xf32>
    %369 = arith.addf %368, %367 : vector<16x128xf32>
    %cst_107 = arith.constant 5.000000e-01 : f32
    %370 = vector.broadcast %cst_107 : f32 to vector<16x128xf32>
    %371 = arith.mulf %370, %369 : vector<16x128xf32>
    %372 = vector.extract_strided_slice %361 {offsets = [0, 128], sizes = [16, 128], strides = [1, 1]} : vector<16x384xf32> to vector<16x128xf32>
    %373 = vector.extract_strided_slice %358 {offsets = [0, 128], sizes = [16, 128], strides = [1, 1]} : vector<16x384xf32> to vector<16x128xf32>
    %374 = arith.addf %372, %373 : vector<16x128xf32>
    %cst_108 = arith.constant 5.000000e-01 : f32
    %375 = vector.broadcast %cst_108 : f32 to vector<16x128xf32>
    %376 = arith.mulf %375, %374 : vector<16x128xf32>
    %377 = math.tanh %376 : vector<16x128xf32>
    %cst_109 = arith.constant 1.000000e+00 : f32
    %378 = vector.broadcast %cst_109 : f32 to vector<16x128xf32>
    %379 = arith.addf %378, %377 : vector<16x128xf32>
    %cst_110 = arith.constant 5.000000e-01 : f32
    %380 = vector.broadcast %cst_110 : f32 to vector<16x128xf32>
    %381 = arith.mulf %380, %379 : vector<16x128xf32>
    %382 = vector.extract_strided_slice %361 {offsets = [0, 256], sizes = [16, 128], strides = [1, 1]} : vector<16x384xf32> to vector<16x128xf32>
    %383 = vector.extract_strided_slice %358 {offsets = [0, 256], sizes = [16, 128], strides = [1, 1]} : vector<16x384xf32> to vector<16x128xf32>
    %384 = arith.addf %383, %7 : vector<16x128xf32>
    %385 = arith.mulf %371, %384 : vector<16x128xf32>
    %386 = arith.addf %382, %385 : vector<16x128xf32>
    %387 = math.tanh %386 : vector<16x128xf32>
    %cst_111 = arith.constant 1.000000e+00 : f32
    %388 = vector.broadcast %cst_111 : f32 to vector<16x128xf32>
    %389 = arith.subf %388, %381 : vector<16x128xf32>
    %390 = arith.mulf %389, %387 : vector<16x128xf32>
    %391 = arith.mulf %381, %323 : vector<16x128xf32>
    %392 = arith.addf %390, %391 : vector<16x128xf32>
    %cst_112 = arith.constant dense<0.000000e+00> : vector<16x768xf32>
    %393 = tpu.matmul %392, %0, %cst_112 {dimension_numbers = #tpu.dot_dimension_numbers<[1], [0], [0], [1], [0, 0, 1, 1], [], []>} : vector<16x128xf32>, vector<128x768xf32>, vector<16x768xf32> -> vector<16x768xf32>
    %394 = vector.extract_strided_slice %393 {offsets = [0, 0], sizes = [16, 384], strides = [1, 1]} : vector<16x768xf32> to vector<16x384xf32>
    %395 = arith.addf %394, %4 : vector<16x384xf32>
    %396 = vector.extract_strided_slice %395 {offsets = [0, 0], sizes = [16, 128], strides = [1, 1]} : vector<16x384xf32> to vector<16x128xf32>
    %397 = vector.extract_strided_slice %359 {offsets = [0, 0], sizes = [16, 128], strides = [1, 1]} : vector<16x384xf32> to vector<16x128xf32>
    %398 = arith.addf %396, %397 : vector<16x128xf32>
    %cst_113 = arith.constant 5.000000e-01 : f32
    %399 = vector.broadcast %cst_113 : f32 to vector<16x128xf32>
    %400 = arith.mulf %399, %398 : vector<16x128xf32>
    %401 = math.tanh %400 : vector<16x128xf32>
    %cst_114 = arith.constant 1.000000e+00 : f32
    %402 = vector.broadcast %cst_114 : f32 to vector<16x128xf32>
    %403 = arith.addf %402, %401 : vector<16x128xf32>
    %cst_115 = arith.constant 5.000000e-01 : f32
    %404 = vector.broadcast %cst_115 : f32 to vector<16x128xf32>
    %405 = arith.mulf %404, %403 : vector<16x128xf32>
    %406 = vector.extract_strided_slice %395 {offsets = [0, 128], sizes = [16, 128], strides = [1, 1]} : vector<16x384xf32> to vector<16x128xf32>
    %407 = vector.extract_strided_slice %359 {offsets = [0, 128], sizes = [16, 128], strides = [1, 1]} : vector<16x384xf32> to vector<16x128xf32>
    %408 = arith.addf %406, %407 : vector<16x128xf32>
    %cst_116 = arith.constant 5.000000e-01 : f32
    %409 = vector.broadcast %cst_116 : f32 to vector<16x128xf32>
    %410 = arith.mulf %409, %408 : vector<16x128xf32>
    %411 = math.tanh %410 : vector<16x128xf32>
    %cst_117 = arith.constant 1.000000e+00 : f32
    %412 = vector.broadcast %cst_117 : f32 to vector<16x128xf32>
    %413 = arith.addf %412, %411 : vector<16x128xf32>
    %cst_118 = arith.constant 5.000000e-01 : f32
    %414 = vector.broadcast %cst_118 : f32 to vector<16x128xf32>
    %415 = arith.mulf %414, %413 : vector<16x128xf32>
    %416 = vector.extract_strided_slice %395 {offsets = [0, 256], sizes = [16, 128], strides = [1, 1]} : vector<16x384xf32> to vector<16x128xf32>
    %417 = vector.extract_strided_slice %359 {offsets = [0, 256], sizes = [16, 128], strides = [1, 1]} : vector<16x384xf32> to vector<16x128xf32>
    %418 = arith.addf %417, %10 : vector<16x128xf32>
    %419 = arith.mulf %405, %418 : vector<16x128xf32>
    %420 = arith.addf %416, %419 : vector<16x128xf32>
    %421 = math.tanh %420 : vector<16x128xf32>
    %cst_119 = arith.constant 1.000000e+00 : f32
    %422 = vector.broadcast %cst_119 : f32 to vector<16x128xf32>
    %423 = arith.subf %422, %415 : vector<16x128xf32>
    %424 = arith.mulf %423, %421 : vector<16x128xf32>
    %425 = arith.mulf %415, %357 : vector<16x128xf32>
    %426 = arith.addf %424, %425 : vector<16x128xf32>
    %427 = vector.extract_strided_slice %393 {offsets = [0, 384], sizes = [16, 384], strides = [1, 1]} : vector<16x768xf32> to vector<16x384xf32>
    %cst_120 = arith.constant dense<0.000000e+00> : vector<16x384xf32>
    %428 = tpu.matmul %426, %1, %cst_120 {dimension_numbers = #tpu.dot_dimension_numbers<[1], [0], [0], [1], [0, 0, 1, 1], [], []>} : vector<16x128xf32>, vector<128x384xf32>, vector<16x384xf32> -> vector<16x384xf32>
    %c6 = arith.constant 6 : index
    %c0_121 = arith.constant 0 : index
    %c0_122 = arith.constant 0 : index
    %429 = vector.load %arg1[%c6, %c0_121, %c0_122] : memref<8x16x384xf32, #tpu.memory_space<vmem>>, vector<1x16x384xf32>
    %430 = vector.shape_cast %429 : vector<1x16x384xf32> to vector<16x384xf32>
    %431 = vector.extract_strided_slice %430 {offsets = [0, 0], sizes = [16, 128], strides = [1, 1]} : vector<16x384xf32> to vector<16x128xf32>
    %432 = vector.extract_strided_slice %427 {offsets = [0, 0], sizes = [16, 128], strides = [1, 1]} : vector<16x384xf32> to vector<16x128xf32>
    %433 = arith.addf %431, %432 : vector<16x128xf32>
    %cst_123 = arith.constant 5.000000e-01 : f32
    %434 = vector.broadcast %cst_123 : f32 to vector<16x128xf32>
    %435 = arith.mulf %434, %433 : vector<16x128xf32>
    %436 = math.tanh %435 : vector<16x128xf32>
    %cst_124 = arith.constant 1.000000e+00 : f32
    %437 = vector.broadcast %cst_124 : f32 to vector<16x128xf32>
    %438 = arith.addf %437, %436 : vector<16x128xf32>
    %cst_125 = arith.constant 5.000000e-01 : f32
    %439 = vector.broadcast %cst_125 : f32 to vector<16x128xf32>
    %440 = arith.mulf %439, %438 : vector<16x128xf32>
    %441 = vector.extract_strided_slice %430 {offsets = [0, 128], sizes = [16, 128], strides = [1, 1]} : vector<16x384xf32> to vector<16x128xf32>
    %442 = vector.extract_strided_slice %427 {offsets = [0, 128], sizes = [16, 128], strides = [1, 1]} : vector<16x384xf32> to vector<16x128xf32>
    %443 = arith.addf %441, %442 : vector<16x128xf32>
    %cst_126 = arith.constant 5.000000e-01 : f32
    %444 = vector.broadcast %cst_126 : f32 to vector<16x128xf32>
    %445 = arith.mulf %444, %443 : vector<16x128xf32>
    %446 = math.tanh %445 : vector<16x128xf32>
    %cst_127 = arith.constant 1.000000e+00 : f32
    %447 = vector.broadcast %cst_127 : f32 to vector<16x128xf32>
    %448 = arith.addf %447, %446 : vector<16x128xf32>
    %cst_128 = arith.constant 5.000000e-01 : f32
    %449 = vector.broadcast %cst_128 : f32 to vector<16x128xf32>
    %450 = arith.mulf %449, %448 : vector<16x128xf32>
    %451 = vector.extract_strided_slice %430 {offsets = [0, 256], sizes = [16, 128], strides = [1, 1]} : vector<16x384xf32> to vector<16x128xf32>
    %452 = vector.extract_strided_slice %427 {offsets = [0, 256], sizes = [16, 128], strides = [1, 1]} : vector<16x384xf32> to vector<16x128xf32>
    %453 = arith.addf %452, %7 : vector<16x128xf32>
    %454 = arith.mulf %440, %453 : vector<16x128xf32>
    %455 = arith.addf %451, %454 : vector<16x128xf32>
    %456 = math.tanh %455 : vector<16x128xf32>
    %cst_129 = arith.constant 1.000000e+00 : f32
    %457 = vector.broadcast %cst_129 : f32 to vector<16x128xf32>
    %458 = arith.subf %457, %450 : vector<16x128xf32>
    %459 = arith.mulf %458, %456 : vector<16x128xf32>
    %460 = arith.mulf %450, %392 : vector<16x128xf32>
    %461 = arith.addf %459, %460 : vector<16x128xf32>
    %cst_130 = arith.constant dense<0.000000e+00> : vector<16x768xf32>
    %462 = tpu.matmul %461, %0, %cst_130 {dimension_numbers = #tpu.dot_dimension_numbers<[1], [0], [0], [1], [0, 0, 1, 1], [], []>} : vector<16x128xf32>, vector<128x768xf32>, vector<16x768xf32> -> vector<16x768xf32>
    %463 = vector.extract_strided_slice %462 {offsets = [0, 0], sizes = [16, 384], strides = [1, 1]} : vector<16x768xf32> to vector<16x384xf32>
    %464 = arith.addf %463, %4 : vector<16x384xf32>
    %465 = vector.extract_strided_slice %464 {offsets = [0, 0], sizes = [16, 128], strides = [1, 1]} : vector<16x384xf32> to vector<16x128xf32>
    %466 = vector.extract_strided_slice %428 {offsets = [0, 0], sizes = [16, 128], strides = [1, 1]} : vector<16x384xf32> to vector<16x128xf32>
    %467 = arith.addf %465, %466 : vector<16x128xf32>
    %cst_131 = arith.constant 5.000000e-01 : f32
    %468 = vector.broadcast %cst_131 : f32 to vector<16x128xf32>
    %469 = arith.mulf %468, %467 : vector<16x128xf32>
    %470 = math.tanh %469 : vector<16x128xf32>
    %cst_132 = arith.constant 1.000000e+00 : f32
    %471 = vector.broadcast %cst_132 : f32 to vector<16x128xf32>
    %472 = arith.addf %471, %470 : vector<16x128xf32>
    %cst_133 = arith.constant 5.000000e-01 : f32
    %473 = vector.broadcast %cst_133 : f32 to vector<16x128xf32>
    %474 = arith.mulf %473, %472 : vector<16x128xf32>
    %475 = vector.extract_strided_slice %464 {offsets = [0, 128], sizes = [16, 128], strides = [1, 1]} : vector<16x384xf32> to vector<16x128xf32>
    %476 = vector.extract_strided_slice %428 {offsets = [0, 128], sizes = [16, 128], strides = [1, 1]} : vector<16x384xf32> to vector<16x128xf32>
    %477 = arith.addf %475, %476 : vector<16x128xf32>
    %cst_134 = arith.constant 5.000000e-01 : f32
    %478 = vector.broadcast %cst_134 : f32 to vector<16x128xf32>
    %479 = arith.mulf %478, %477 : vector<16x128xf32>
    %480 = math.tanh %479 : vector<16x128xf32>
    %cst_135 = arith.constant 1.000000e+00 : f32
    %481 = vector.broadcast %cst_135 : f32 to vector<16x128xf32>
    %482 = arith.addf %481, %480 : vector<16x128xf32>
    %cst_136 = arith.constant 5.000000e-01 : f32
    %483 = vector.broadcast %cst_136 : f32 to vector<16x128xf32>
    %484 = arith.mulf %483, %482 : vector<16x128xf32>
    %485 = vector.extract_strided_slice %464 {offsets = [0, 256], sizes = [16, 128], strides = [1, 1]} : vector<16x384xf32> to vector<16x128xf32>
    %486 = vector.extract_strided_slice %428 {offsets = [0, 256], sizes = [16, 128], strides = [1, 1]} : vector<16x384xf32> to vector<16x128xf32>
    %487 = arith.addf %486, %10 : vector<16x128xf32>
    %488 = arith.mulf %474, %487 : vector<16x128xf32>
    %489 = arith.addf %485, %488 : vector<16x128xf32>
    %490 = math.tanh %489 : vector<16x128xf32>
    %cst_137 = arith.constant 1.000000e+00 : f32
    %491 = vector.broadcast %cst_137 : f32 to vector<16x128xf32>
    %492 = arith.subf %491, %484 : vector<16x128xf32>
    %493 = arith.mulf %492, %490 : vector<16x128xf32>
    %494 = arith.mulf %484, %426 : vector<16x128xf32>
    %495 = arith.addf %493, %494 : vector<16x128xf32>
    %496 = vector.extract_strided_slice %462 {offsets = [0, 384], sizes = [16, 384], strides = [1, 1]} : vector<16x768xf32> to vector<16x384xf32>
    %cst_138 = arith.constant dense<0.000000e+00> : vector<16x384xf32>
    %497 = tpu.matmul %495, %1, %cst_138 {dimension_numbers = #tpu.dot_dimension_numbers<[1], [0], [0], [1], [0, 0, 1, 1], [], []>} : vector<16x128xf32>, vector<128x384xf32>, vector<16x384xf32> -> vector<16x384xf32>
    %c7 = arith.constant 7 : index
    %c0_139 = arith.constant 0 : index
    %c0_140 = arith.constant 0 : index
    %498 = vector.load %arg1[%c7, %c0_139, %c0_140] : memref<8x16x384xf32, #tpu.memory_space<vmem>>, vector<1x16x384xf32>
    %499 = vector.shape_cast %498 : vector<1x16x384xf32> to vector<16x384xf32>
    %500 = vector.extract_strided_slice %499 {offsets = [0, 0], sizes = [16, 128], strides = [1, 1]} : vector<16x384xf32> to vector<16x128xf32>
    %501 = vector.extract_strided_slice %496 {offsets = [0, 0], sizes = [16, 128], strides = [1, 1]} : vector<16x384xf32> to vector<16x128xf32>
    %502 = arith.addf %500, %501 : vector<16x128xf32>
    %cst_141 = arith.constant 5.000000e-01 : f32
    %503 = vector.broadcast %cst_141 : f32 to vector<16x128xf32>
    %504 = arith.mulf %503, %502 : vector<16x128xf32>
    %505 = math.tanh %504 : vector<16x128xf32>
    %cst_142 = arith.constant 1.000000e+00 : f32
    %506 = vector.broadcast %cst_142 : f32 to vector<16x128xf32>
    %507 = arith.addf %506, %505 : vector<16x128xf32>
    %cst_143 = arith.constant 5.000000e-01 : f32
    %508 = vector.broadcast %cst_143 : f32 to vector<16x128xf32>
    %509 = arith.mulf %508, %507 : vector<16x128xf32>
    %510 = vector.extract_strided_slice %499 {offsets = [0, 128], sizes = [16, 128], strides = [1, 1]} : vector<16x384xf32> to vector<16x128xf32>
    %511 = vector.extract_strided_slice %496 {offsets = [0, 128], sizes = [16, 128], strides = [1, 1]} : vector<16x384xf32> to vector<16x128xf32>
    %512 = arith.addf %510, %511 : vector<16x128xf32>
    %cst_144 = arith.constant 5.000000e-01 : f32
    %513 = vector.broadcast %cst_144 : f32 to vector<16x128xf32>
    %514 = arith.mulf %513, %512 : vector<16x128xf32>
    %515 = math.tanh %514 : vector<16x128xf32>
    %cst_145 = arith.constant 1.000000e+00 : f32
    %516 = vector.broadcast %cst_145 : f32 to vector<16x128xf32>
    %517 = arith.addf %516, %515 : vector<16x128xf32>
    %cst_146 = arith.constant 5.000000e-01 : f32
    %518 = vector.broadcast %cst_146 : f32 to vector<16x128xf32>
    %519 = arith.mulf %518, %517 : vector<16x128xf32>
    %520 = vector.extract_strided_slice %499 {offsets = [0, 256], sizes = [16, 128], strides = [1, 1]} : vector<16x384xf32> to vector<16x128xf32>
    %521 = vector.extract_strided_slice %496 {offsets = [0, 256], sizes = [16, 128], strides = [1, 1]} : vector<16x384xf32> to vector<16x128xf32>
    %522 = arith.addf %521, %7 : vector<16x128xf32>
    %523 = arith.mulf %509, %522 : vector<16x128xf32>
    %524 = arith.addf %520, %523 : vector<16x128xf32>
    %525 = math.tanh %524 : vector<16x128xf32>
    %cst_147 = arith.constant 1.000000e+00 : f32
    %526 = vector.broadcast %cst_147 : f32 to vector<16x128xf32>
    %527 = arith.subf %526, %519 : vector<16x128xf32>
    %528 = arith.mulf %527, %525 : vector<16x128xf32>
    %529 = arith.mulf %519, %461 : vector<16x128xf32>
    %530 = arith.addf %528, %529 : vector<16x128xf32>
    %cst_148 = arith.constant dense<0.000000e+00> : vector<16x768xf32>
    %531 = tpu.matmul %530, %0, %cst_148 {dimension_numbers = #tpu.dot_dimension_numbers<[1], [0], [0], [1], [0, 0, 1, 1], [], []>} : vector<16x128xf32>, vector<128x768xf32>, vector<16x768xf32> -> vector<16x768xf32>
    %532 = vector.extract_strided_slice %531 {offsets = [0, 0], sizes = [16, 384], strides = [1, 1]} : vector<16x768xf32> to vector<16x384xf32>
    %533 = arith.addf %532, %4 : vector<16x384xf32>
    %534 = vector.extract_strided_slice %533 {offsets = [0, 0], sizes = [16, 128], strides = [1, 1]} : vector<16x384xf32> to vector<16x128xf32>
    %535 = vector.extract_strided_slice %497 {offsets = [0, 0], sizes = [16, 128], strides = [1, 1]} : vector<16x384xf32> to vector<16x128xf32>
    %536 = arith.addf %534, %535 : vector<16x128xf32>
    %cst_149 = arith.constant 5.000000e-01 : f32
    %537 = vector.broadcast %cst_149 : f32 to vector<16x128xf32>
    %538 = arith.mulf %537, %536 : vector<16x128xf32>
    %539 = math.tanh %538 : vector<16x128xf32>
    %cst_150 = arith.constant 1.000000e+00 : f32
    %540 = vector.broadcast %cst_150 : f32 to vector<16x128xf32>
    %541 = arith.addf %540, %539 : vector<16x128xf32>
    %cst_151 = arith.constant 5.000000e-01 : f32
    %542 = vector.broadcast %cst_151 : f32 to vector<16x128xf32>
    %543 = arith.mulf %542, %541 : vector<16x128xf32>
    %544 = vector.extract_strided_slice %533 {offsets = [0, 128], sizes = [16, 128], strides = [1, 1]} : vector<16x384xf32> to vector<16x128xf32>
    %545 = vector.extract_strided_slice %497 {offsets = [0, 128], sizes = [16, 128], strides = [1, 1]} : vector<16x384xf32> to vector<16x128xf32>
    %546 = arith.addf %544, %545 : vector<16x128xf32>
    %cst_152 = arith.constant 5.000000e-01 : f32
    %547 = vector.broadcast %cst_152 : f32 to vector<16x128xf32>
    %548 = arith.mulf %547, %546 : vector<16x128xf32>
    %549 = math.tanh %548 : vector<16x128xf32>
    %cst_153 = arith.constant 1.000000e+00 : f32
    %550 = vector.broadcast %cst_153 : f32 to vector<16x128xf32>
    %551 = arith.addf %550, %549 : vector<16x128xf32>
    %cst_154 = arith.constant 5.000000e-01 : f32
    %552 = vector.broadcast %cst_154 : f32 to vector<16x128xf32>
    %553 = arith.mulf %552, %551 : vector<16x128xf32>
    %554 = vector.extract_strided_slice %533 {offsets = [0, 256], sizes = [16, 128], strides = [1, 1]} : vector<16x384xf32> to vector<16x128xf32>
    %555 = vector.extract_strided_slice %497 {offsets = [0, 256], sizes = [16, 128], strides = [1, 1]} : vector<16x384xf32> to vector<16x128xf32>
    %556 = arith.addf %555, %10 : vector<16x128xf32>
    %557 = arith.mulf %543, %556 : vector<16x128xf32>
    %558 = arith.addf %554, %557 : vector<16x128xf32>
    %559 = math.tanh %558 : vector<16x128xf32>
    %cst_155 = arith.constant 1.000000e+00 : f32
    %560 = vector.broadcast %cst_155 : f32 to vector<16x128xf32>
    %561 = arith.subf %560, %553 : vector<16x128xf32>
    %562 = arith.mulf %561, %559 : vector<16x128xf32>
    %563 = arith.mulf %553, %495 : vector<16x128xf32>
    %564 = arith.addf %562, %563 : vector<16x128xf32>
    %cst_156 = arith.constant dense<0.000000e+00> : vector<16xf32>
    %565 = vector.multi_reduction <add>, %564, %cst_156 [1] : vector<16x128xf32> to vector<16xf32>
    %566 = vector.shape_cast %565 : vector<16xf32> to vector<16x1xf32>
    %cst_157 = arith.constant 1.280000e+02 : f32
    %567 = vector.broadcast %cst_157 : f32 to vector<16x1xf32>
    %568 = arith.divf %566, %567 : vector<16x1xf32>
    %569 = vector.broadcast %568 : vector<16x1xf32> to vector<16x128xf32>
    %570 = arith.subf %564, %569 : vector<16x128xf32>
    %571 = arith.mulf %570, %570 : vector<16x128xf32>
    %cst_158 = arith.constant dense<0.000000e+00> : vector<16xf32>
    %572 = vector.multi_reduction <add>, %571, %cst_158 [1] : vector<16x128xf32> to vector<16xf32>
    %573 = vector.shape_cast %572 : vector<16xf32> to vector<16x1xf32>
    %cst_159 = arith.constant 1.280000e+02 : f32
    %574 = vector.broadcast %cst_159 : f32 to vector<16x1xf32>
    %575 = arith.divf %573, %574 : vector<16x1xf32>
    %576 = vector.broadcast %568 : vector<16x1xf32> to vector<16x128xf32>
    %577 = arith.subf %564, %576 : vector<16x128xf32>
    %cst_160 = arith.constant 9.99999974E-6 : f32
    %578 = vector.broadcast %cst_160 : f32 to vector<16x1xf32>
    %579 = arith.addf %575, %578 : vector<16x1xf32>
    %580 = math.rsqrt %579 : vector<16x1xf32>
    %581 = vector.broadcast %580 : vector<16x1xf32> to vector<16x128xf32>
    %582 = arith.mulf %577, %581 : vector<16x128xf32>
    %c0_161 = arith.constant 0 : index
    %c0_162 = arith.constant 0 : index
    %583 = vector.load %arg7[%c0_161, %c0_162] : memref<1x128xf32, #tpu.memory_space<vmem>>, vector<1x128xf32>
    %584 = vector.broadcast %583 : vector<1x128xf32> to vector<16x128xf32>
    %585 = arith.mulf %582, %584 : vector<16x128xf32>
    %c0_163 = arith.constant 0 : index
    %c0_164 = arith.constant 0 : index
    %586 = vector.load %arg8[%c0_163, %c0_164] : memref<1x128xf32, #tpu.memory_space<vmem>>, vector<1x128xf32>
    %587 = vector.broadcast %586 : vector<1x128xf32> to vector<16x128xf32>
    %588 = arith.addf %585, %587 : vector<16x128xf32>
    %c0_165 = arith.constant 0 : index
    %c0_166 = arith.constant 0 : index
    %589 = vector.load %arg9[%c0_165, %c0_166] : memref<128x128xf32, #tpu.memory_space<vmem>>, vector<128x128xf32>
    %cst_167 = arith.constant dense<0.000000e+00> : vector<16x128xf32>
    %590 = tpu.matmul %588, %589, %cst_167 {dimension_numbers = #tpu.dot_dimension_numbers<[1], [0], [0], [1], [0, 0, 1, 1], [], []>} : vector<16x128xf32>, vector<128x128xf32>, vector<16x128xf32> -> vector<16x128xf32>
    %c0_168 = arith.constant 0 : index
    %c0_169 = arith.constant 0 : index
    %591 = vector.load %arg10[%c0_168, %c0_169] : memref<1x128xf32, #tpu.memory_space<vmem>>, vector<1x128xf32>
    %592 = vector.broadcast %591 : vector<1x128xf32> to vector<16x128xf32>
    %593 = arith.addf %590, %592 : vector<16x128xf32>
    %cst_170 = arith.constant 0.000000e+00 : f32
    %594 = vector.broadcast %cst_170 : f32 to vector<16x128xf32>
    %595 = arith.maximumf %593, %594 : vector<16x128xf32>
    %c0_171 = arith.constant 0 : index
    %c0_172 = arith.constant 0 : index
    %596 = vector.load %arg11[%c0_171, %c0_172] : memref<128x128xf32, #tpu.memory_space<vmem>>, vector<128x128xf32>
    %cst_173 = arith.constant dense<0.000000e+00> : vector<16x128xf32>
    %597 = tpu.matmul %595, %596, %cst_173 {dimension_numbers = #tpu.dot_dimension_numbers<[1], [0], [0], [1], [0, 0, 1, 1], [], []>} : vector<16x128xf32>, vector<128x128xf32>, vector<16x128xf32> -> vector<16x128xf32>
    %c0_174 = arith.constant 0 : index
    %c0_175 = arith.constant 0 : index
    %598 = vector.load %arg12[%c0_174, %c0_175] : memref<1x128xf32, #tpu.memory_space<vmem>>, vector<1x128xf32>
    %599 = vector.broadcast %598 : vector<1x128xf32> to vector<16x128xf32>
    %600 = arith.addf %597, %599 : vector<16x128xf32>
    %c0_176 = arith.constant 0 : index
    %c0_177 = arith.constant 0 : index
    %601 = vector.load %arg13[%c0_176, %c0_177] : memref<16x128xf32, #tpu.memory_space<vmem>>, vector<16x128xf32>
    tpu.vector_store %arg13[%c0_176, %c0_177], %600 {strides = array<i32>} : memref<16x128xf32, #tpu.memory_space<vmem>>, vector<16x128xf32>,
    return
  }
  func.func @transform_0(%arg0: i32) -> (i32, i32, i32) {
    %c0_i32 = arith.constant 0 : i32
    %c0_i32_0 = arith.constant 0 : i32
    %c0_i32_1 = arith.constant 0 : i32
    return %c0_i32, %arg0, %c0_i32_0 : i32, i32, i32
  }
  func.func @transform_1(%arg0: i32) -> (i32, i32) {
    %c0_i32 = arith.constant 0 : i32
    %c0_i32_0 = arith.constant 0 : i32
    %c0_i32_1 = arith.constant 0 : i32
    return %c0_i32, %c0_i32_0 : i32, i32
  }
  func.func @transform_2(%arg0: i32) -> (i32, i32) {
    %c0_i32 = arith.constant 0 : i32
    %c0_i32_0 = arith.constant 0 : i32
    %c0_i32_1 = arith.constant 0 : i32
    return %c0_i32, %c0_i32_0 : i32, i32
  }
  func.func @transform_3(%arg0: i32) -> (i32, i32) {
    %c0_i32 = arith.constant 0 : i32
    %c0_i32_0 = arith.constant 0 : i32
    %c0_i32_1 = arith.constant 0 : i32
    return %c0_i32, %c0_i32_0 : i32, i32
  }
  func.func @transform_4(%arg0: i32) -> (i32, i32) {
    %c0_i32 = arith.constant 0 : i32
    %c0_i32_0 = arith.constant 0 : i32
    %c0_i32_1 = arith.constant 0 : i32
    return %c0_i32, %c0_i32_0 : i32, i32
  }
  func.func @transform_5(%arg0: i32) -> (i32, i32) {
    %c0_i32 = arith.constant 0 : i32
    %c0_i32_0 = arith.constant 0 : i32
    %c0_i32_1 = arith.constant 0 : i32
    return %c0_i32, %c0_i32_0 : i32, i32
  }
  func.func @transform_6(%arg0: i32) -> (i32, i32) {
    %c0_i32 = arith.constant 0 : i32
    %c0_i32_0 = arith.constant 0 : i32
    %c0_i32_1 = arith.constant 0 : i32
    return %c0_i32, %c0_i32_0 : i32, i32
  }
  func.func @transform_7(%arg0: i32) -> (i32, i32) {
    %c0_i32 = arith.constant 0 : i32
    %c0_i32_0 = arith.constant 0 : i32
    %c0_i32_1 = arith.constant 0 : i32
    return %c0_i32, %c0_i32_0 : i32, i32
  }
  func.func @transform_8(%arg0: i32) -> (i32, i32) {
    %c0_i32 = arith.constant 0 : i32
    %c0_i32_0 = arith.constant 0 : i32
    %c0_i32_1 = arith.constant 0 : i32
    return %c0_i32, %c0_i32_0 : i32, i32
  }
  func.func @transform_9(%arg0: i32) -> (i32, i32) {
    %c0_i32 = arith.constant 0 : i32
    %c0_i32_0 = arith.constant 0 : i32
    %c0_i32_1 = arith.constant 0 : i32
    return %c0_i32, %c0_i32_0 : i32, i32
  }
  func.func @transform_10(%arg0: i32) -> (i32, i32) {
    %c0_i32 = arith.constant 0 : i32
    %c0_i32_0 = arith.constant 0 : i32
    %c0_i32_1 = arith.constant 0 : i32
    return %c0_i32, %c0_i32_0 : i32, i32
  }
  func.func @transform_11(%arg0: i32) -> (i32, i32) {
    %c0_i32 = arith.constant 0 : i32
    %c0_i32_0 = arith.constant 0 : i32
    %c0_i32_1 = arith.constant 0 : i32
    return %c0_i32, %c0_i32_0 : i32, i32
  }
  func.func @transform_12(%arg0: i32) -> (i32, i32) {
    %c0_i32 = arith.constant 0 : i32
    %c0_i32_0 = arith.constant 0 : i32
    return %arg0, %c0_i32 : i32, i32
  }
}

</mosaic_0001>

<bundles_post_ra>
// kernel: tpu_custom_call.1
= control target key start
LH: loop header
LB: loop body
LE: loop exit
PB: predicated region body
PF: predicated region fallthrough
CT: control target
= control target key end

     0   :  { %s6832_s0 = inlined_call_operand.hbm [shape: f32[8,32,384], index: 0, kind: input, shape index: {}]   ;;  %s6833_s1 = inlined_call_operand.hbm [shape: f32[128,768], index: 1, kind: input, shape index: {}]   ;;  %s6834_s2 = inlined_call_operand.hbm [shape: f32[128,384], index: 2, kind: input, shape index: {}]   ;;  %s6835_s3 = inlined_call_operand.hbm [shape: f32[1,384], index: 3, kind: input, shape index: {}]   ;;  %s6836_s4 = inlined_call_operand.vmem [shape: f32[1,128], index: 4, kind: input, shape index: {}]   ;;  %s6837_s5 = inlined_call_operand.vmem [shape: f32[1,128], index: 5, kind: input, shape index: {}]   ;;  %s6838_s6 = inlined_call_operand.vmem [shape: f32[1,128], index: 6, kind: input, shape index: {}]   ;;  %s6839_s7 = inlined_call_operand.vmem [shape: f32[1,128], index: 7, kind: input, shape index: {}]   ;;  %s6840_s8 = inlined_call_operand.hbm [shape: f32[128,128], index: 8, kind: input, shape index: {}]   ;;  %s6841_s9 = inlined_call_operand.vmem [shape: f32[1,128], index: 9, kind: input, shape index: {}]   ;;  %s6842_s10 = inlined_call_operand.hbm [shape: f32[128,128], index: 10, kind: input, shape index: {}]   ;;  %s6843_s11 = inlined_call_operand.vmem [shape: f32[1,128], index: 11, kind: input, shape index: {}]   ;;  %s6844_s12 = inlined_call_operand.hbm [shape: f32[32,128], index: 12, kind: output, shape index: {}]  }
   0x1   :  { %7114 = sst [smem:[#allocation97_spill]] %s6833_s1 }
   0x2   :  { %7115 = sst [smem:[#allocation98_spill]] %s6834_s2 }
   0x3   :  { %7116 = sst [smem:[#allocation99_spill]] %s6835_s3 }
   0x4   :  { %7117 = sst [smem:[#allocation100_spill]] %s6841_s9 }
   0x5   :  { %7118 = sst [smem:[#allocation101_spill]] %s6843_s11 }
   0x6   :  { %7119 = sst [smem:[#allocation102_spill]] %s6844_s12 }
   0x7   :  { %17 = vsyncpa [#allocation3], 0 }
   0x8   :  { %19 = vsyncpa [#allocation3 + $0x1], 0 }
   0x9   :  { %20 = vsyncpa [#allocation6], 0 }
   0xa   :  { %21 = vsyncpa [#allocation9], 0 }
   0xb   :  { %22 = vsyncpa [#allocation12], 0 }
   0xc   :  { %23 = vsyncpa [#allocation4], 0 }
   0xd   :  { %25 = vsyncpa [#allocation4 + $0x1], 0  ;;  %s4314_s21 = smov 0   ;;  %s4316_s22 = smov 0  }
   0xe   :  { %s4318_s23 = smov 0   ;;  %s4320_s24 = smov 0  }
   0xf LB: > { %7120 = sst [smem:[#allocation22_spill]] %s4215_s21  ;;  %s4335_s25 = sadd.s32 4294967295, %s4227_s24   ;;  %s4227_s24 = sphi %s4320_s24, %s7646_s24   ;;  %s4223_s23 = sphi %s4318_s23, %s7650_s23   ;;  %s4219_s22 = sphi %s4316_s22, %s7649_s22   ;;  %s4215_s21 = sphi %s4314_s21, %s7648_s21  }
  0x10   : > { %s3184_s26 = sadd.s32 4294967294, %s4227_s24   ;;  %s4339_s27 = sadd.s32 1, %s4227_s24  }
  0x11   : > { %7121 = sst [smem:[#allocation23_spill]] %s4339_s27  ;;  %s38_s28 = sadd.s32 1, %s4223_s23 }
  0x12   : > { %s35_s29 = ssub.s32 %s4227_s24, %s4339_s27  ;;  %p45_p0 = scmp.ne.s32.totalorder %s4223_s23, %s4219_s22 }
  0x13   : > { %p36_p1 = scmp.eq.s32.totalorder %s35_s29, 0  ;;  %p46_p2 = scmp.eq.s32.totalorder %s4227_s24, 0 }
  0x14   : > { %p51_p3 = scmp.ne.s32.totalorder %s4219_s22, %s4215_s21  ;;  %p52_p4 = scmp.eq.s32.totalorder %s4335_s25, 0 }
  0x15   : > { %s4351_s30 = scalar_select %p36_p1, %s4223_s23, %s38_s28  }
  0x16   : > { %p4353_p5 = por %p46_p2, %p45_p0  ;;  %p4359_p6 = por %p52_p4, %p51_p3 }
  0x17   : > { %7122 = sst [smem:[#allocation24_spill]] %s4351_s30  ;;  %p306_p7 = scmp.eq.s32.totalorder %s4335_s25, 1 }
  0x18   : > { %p312_p8 = scmp.eq.s32.totalorder %s3184_s26, 1  ;;  %p3185_p9 = scmp.ge.s32.totalorder %s4227_s24, 1 }
  0x19   : > { %p319_p10 = scmp.lt.s32.totalorder %s4227_s24, 3  ;;  %p4366_p11 = por %p306_p7, %p45_p0 }
  0x1a   : > { %p4370_p12 = por %p312_p8, %p51_p3  ;;  %s7130_s1 = sld [smem:[#allocation97_spill]] }
  0x1b   : > { %s7125_s15 = scalar_select %p4366_p11, 1, 0 }
  0x1c   : > { %s7127_s16 = scalar_select %p4370_p12, 1, 0 }
  0x1d   : > { %7126 = sst [smem:[#allocation25_spill]] %s7125_s15  ;;  %p4374_p13 = pnand %p3185_p9, %p319_p10 }
  0x1e   : > { %7128 = sst [smem:[#allocation26_spill]] %s7127_s16  ;;  %s4229_s26 = smov [#allocation5]  }
  0x1f   : > { %p3286_p1 = pneg %p4374_p13  ;;  %s332_s28 = sshll.u32 %s4229_s26, 4  ;;  %s333_s28 = int_to_ptr.vmem [resolvable:$true] %s332_s28 }
  0x20   : > { %s330_s20 = sshll.u32 %s7130_s1, 4  ;;  %s7132_s3 = sld [smem:[#allocation99_spill]]  ;;  %s331_s20 = int_to_ptr.hbm [resolvable:$true] %s330_s20 }
  0x21   : > { %p4385_p0 = pnand %p3286_p1, %p52_p4  ;;  %s4230_s18 = smov 768  }
  0x22   : > { %s4231_s19 = smov 48   ;;  %s7133_s2 = sld [smem:[#allocation98_spill]] }
  0x23   : > { %3289 = dma.hbm_to_vmem [thread:$0]  (!%p4385_p0), %s331_s20, 12288, %s333_s28, [#allocation6], %s4230_s18, %s4230_s18, %s4231_s19  }
  0x24   : > { %s4232_s12 = smov [#allocation8]   ;;  %s4233_s27 = smov [#allocation7]  }
  0x25   : > { %s361_s15 = sshll.u32 %s4232_s12, 4  ;;  %s346_s30 = sshll.u32 %s4233_s27, 4  ;;  %s362_s15 = int_to_ptr.vmem [resolvable:$true] %s361_s15  ;;  %s347_s30 = int_to_ptr.vmem [resolvable:$true] %s346_s30 }
  0x26   : > { %s359_s16 = sshll.u32 %s7132_s3, 4  ;;  %s4234_s3 = smov 384   ;;  %s360_s16 = int_to_ptr.hbm [resolvable:$true] %s359_s16 }
  0x27   : > { %3295 = dma.hbm_to_vmem [thread:$0]  (!%p4385_p0), %s360_s16, 48, %s362_s15, [#allocation9]  }
  0x28   : > { %s344_s21 = sshll.u32 %s7133_s2, 4  ;;  %s4235_s11 = smov 24   ;;  %s345_s21 = int_to_ptr.hbm [resolvable:$true] %s344_s21 }
  0x29   : > { %3292 = dma.hbm_to_vmem [thread:$0]  (!%p4385_p0), %s345_s21, 6144, %s347_s30, [#allocation6], %s4234_s3, %s4234_s3, %s4235_s11  }
  0x2a   : > { %s382_s1 = sshll.u32 %s6840_s8, 4  ;;  %s4236_s18 = smov [#allocation10]   ;;  %s383_s1 = int_to_ptr.hbm [resolvable:$true] %s382_s1 }
  0x2b   : > { %s384_s12 = sshll.u32 %s4236_s18, 4  ;;  %s399_s15 = sshll.u32 %s6842_s10, 4  ;;  %s385_s12 = int_to_ptr.vmem [resolvable:$true] %s384_s12  ;;  %s400_s15 = int_to_ptr.hbm [resolvable:$true] %s399_s15 }
  0x2c   : > { %s4237_s16 = smov 128   ;;  %s4238_s27 = smov 8  }
  0x2d   : > { %3298 = dma.hbm_to_vmem [thread:$0]  (!%p4385_p0), %s383_s1, 2048, %s385_s12, [#allocation9], %s4237_s16, %s4237_s16, %s4238_s27  }
  0x2e   : > { %s4239_s2 = smov [#allocation11]   ;;  %p3191_p2 = scmp.ge.s32.totalorder %s4227_s24, 2 }
  0x2f   : > { %s401_s9 = sshll.u32 %s4239_s2, 4  ;;  %s402_s9 = int_to_ptr.vmem [resolvable:$true] %s401_s9 }
  0x30   : > { %3301 = dma.hbm_to_vmem [thread:$0]  (!%p4385_p0), %s400_s15, 2048, %s402_s9, [#allocation12], %s4237_s16, %s4237_s16, %s4238_s27  }
  0x31   : > { %414 = sbr.rel (%p3191_p2) target bundleno = 69 (0x45), region = 60 }
  0x36   : > { %s418_s3 = sand.u32 1, %s4223_s23   ;;  %s3253_s11 = smul.u32 48, %s4227_s24 }
  0x37   : > { %s3252_s21 = smul.u32 384, %s418_s3  ;;  %s4240_s12 = smov 1536  }
  0x38   : > { %s428_s2 = scalar_lea.hbm %s6832_s0, %s3253_s11  ;;  %3266 = sst [smem:[#allocation15]] (%p4353_p5), %s4240_s12 }
  0x39   : > { %s441_s9 = sshll.u32 %s428_s2, 4  ;;  %s422_s28 = scalar_lea.vmem [#allocation2], %s3252_s21  ;;  %s442_s9 = int_to_ptr.hbm [resolvable:$true] %s441_s9 }
  0x3a   : > { %s3265_s29 = scalar_select %p4353_p5, [#allocation0], [#allocation16] }
  0x3b   : > { %s443_s1 = sshll.u32 %s422_s28, 4  ;;  %s4241_s19 = smov 768   ;;  %s444_s1 = int_to_ptr.vmem [resolvable:$true] %s443_s1 }
  0x3c   : > { %s433_s18 = sld [smem:[%s3265_s29]]   ;;  %s4242_s26 = smov 2  }
  0x3d   : > { %3267 = sst [smem:[#allocation15 + $0x1]] (%p4353_p5), %s4241_s19  ;;  %s4243_s15 = smov 384  }
  0x3e   : > { %3268 = sst [smem:[#allocation15 + $0x2]] (%p4353_p5), %s4242_s26  ;;  %s4244_s27 = smov 24  }
  0x3f   : > { %3269 = sst [smem:[#allocation15 + $0x3]] (%p4353_p5), %s4243_s15  ;;  %s419_s21 = scalar_lea.sflag [#allocation3], %s418_s3 }
  0x40   : > { %3270 = sst [smem:[#allocation15 + $0x4]] (%p4353_p5), %s4243_s15  ;;  %s4245_s30 = smov [#allocation14]  }
  0x41   : > { %3271 = sst [smem:[#allocation15 + $0x5]] (%p4353_p5), %s4244_s27 }
  0x42   : > { %s3195_s16 = sshll.u32 %s433_s18, 26 }
  0x43   : > { %s3196_s11 = sadd.s32 134217728, %s3195_s16 }
  0x44   : > { %3272 = dma.general (%p4353_p5), %s442_s9, 6144, %s444_s1, %s419_s21, %s4245_s30, [#allocation15], %s3196_s11, 0  }
  0x45 PF: > { %468 = sbr.rel (%p4374_p13) target bundleno = 2041 (0x7f9), region = 68 }
  0x4a   : > { %s4438_s20 = sand.u32 1, %s4219_s22  }
  0x4b   : > { %s3254_s2 = smul.u32 384, %s4438_s20  ;;  %s471_s29 = scalar_lea.sflag [#allocation3], %s4438_s20 }
  0x4d   : > { %s4442_s28 = scalar_lea.vmem [#allocation2], %s3254_s2 }
  0x4e   : > { %4194 = dma.done.wait (%p4359_p6), %s471_s29, 6144  }
  0x4f   : > { %4196 = vsyncadd (%p4359_p6), %s471_s29, 4294961152 }
  0x50   : > { %4198 = dma.done.wait (%p52_p4), [#allocation6], 18432  }
  0x51   : > { %4200 = vsyncadd (%p52_p4), [#allocation6], 4294948864 }
  0x52   : > { %4202 = dma.done.wait (%p52_p4), [#allocation9], 2096  }
  0x53   : > { %4204 = vsyncadd (%p52_p4), [#allocation9], 4294965200 }
  0x54   : > { %4206 = dma.done.wait (%p52_p4), [#allocation12], 2048  }
  0x55   : > { %4208 = vsyncadd (%p52_p4), [#allocation12], 4294965248  ;;  %v4460_v0 = vld [vmem:[#allocation5 + $0x2d0] sm:$0xff]  ;;  %v4462_v1 = vld [vmem:[#allocation5 + $0x2a0] sm:$0xff]  ;;  %s7640_s3 = sld [smem:[#allocation100_spill]]  ;;  %s3203_s9 = sshll.u32 %s4438_s20, 4 }
  0x56   : > { %744 = vmatpush.msra.mxu0 %v4460_v0  ;;  %v4465_v2 = vld [vmem:[#allocation5 + $0x2d8] sm:$0xff]  ;;  %v4467_v3 = vld [vmem:[#allocation5 + $0x2a8] sm:$0xff]  ;;  %v4469_v4 = vld [vmem:[#allocation5 + $0x270] sm:$0xff]  ;;  %s7641_s12 = sld [smem:[#allocation101_spill]]  ;;  %s3251_s19 = sshll.u32 %s4335_s25, 4 }
  0x57   : > { %767 = vmatpush.msra.mxu1 %v4465_v2  ;;  %v4473_v5 = vld [vmem:[#allocation5 + $0x278] sm:$0xff]  ;;  %v4475_v6 = vld [vmem:[#allocation5 + $0x240] sm:$0xff]  ;;  %v4481_v8 = vld [vmem:[#allocation5 + $0x248] sm:$0xff]  ;;  %s540_s15 = scalar_lea.vmem [#allocation13], %s3203_s9  ;;  %s7643_s11 = sld [smem:[#allocation102_spill]] }
  0x58   : > { %745 = vmatpush.msra.mxu0 %v4462_v1  ;;  %v4478_v7 = vld [vmem:[#allocation5 + $0x2e0] sm:$0xff]  ;;  %v4484_v9 = vld [vmem:[#allocation5 + $0x2e8] sm:$0xff]  ;;  %v4486_v10 = vld [vmem:[#allocation5 + $0x210] sm:$0xff]  ;;  %s3060_s30 = sshll.u32 %s540_s15, 4  ;;  %s3048_s29 = scalar_lea.sflag [#allocation4], %s4438_s20  ;;  %s3061_s30 = int_to_ptr.vmem [resolvable:$true] %s3060_s30 }
  0x59   : > { %768 = vmatpush.msra.mxu1 %v4467_v3  ;;  %790 = vmatpush.msra.mxu2 %v4478_v7  ;;  %v4490_v11 = vld [vmem:[#allocation5 + $0x2b0] sm:$0xff]  ;;  %v4493_v12 = vld [vmem:[#allocation5 + $0x218] sm:$0xff]  ;;  %v4498_v14 = vld [vmem:[#allocation5 + $0x280] sm:$0xff] }
  0x5a   : > { %746 = vmatpush.msra.mxu0 %v4469_v4  ;;  %813 = vmatpush.msra.mxu3 %v4484_v9  ;;  %v4496_v13 = vld [vmem:[#allocation5 + $0x2b8] sm:$0xff]  ;;  %v4500_v15 = vld [vmem:[#allocation5 + $0x1e0] sm:$0xff]  ;;  %v4504_v16 = vld [vmem:[#allocation5 + $0x288] sm:$0xff] }
  0x5b   : > { %769 = vmatpush.msra.mxu1 %v4473_v5  ;;  %791 = vmatpush.msra.mxu2 %v4490_v11  ;;  %v4506_v17 = vld [vmem:[#allocation5 + $0x250] sm:$0xff]  ;;  %v4509_v18 = vld [vmem:[#allocation5 + $0x1e8] sm:$0xff]  ;;  %v4512_v19 = vld [vmem:[#allocation5 + $0x258] sm:$0xff] }
  0x5c   : > { %747 = vmatpush.msra.mxu0 %v4475_v6  ;;  %814 = vmatpush.msra.mxu3 %v4496_v13  ;;  %v4514_v20 = vld [vmem:[#allocation5 + $0x1b0] sm:$0xff]  ;;  %v4518_v21 = vld [vmem:[#allocation5 + $0x220] sm:$0xff]  ;;  %v4521_v22 = vld [vmem:[#allocation5 + $0x1b8] sm:$0xff] }
  0x5d   : > { %770 = vmatpush.msra.mxu1 %v4481_v8  ;;  %792 = vmatpush.msra.mxu2 %v4498_v14  ;;  %v4524_v23 = vld [vmem:[#allocation5 + $0x228] sm:$0xff]  ;;  %v4526_v24 = vld [vmem:[#allocation5 + $0x180] sm:$0xff]  ;;  %v4530_v25 = vld [vmem:[#allocation5 + $0x1f0] sm:$0xff]  ;;  %s3059_s21 = scalar_lea.hbm %s7643_s11, %s3251_s19  ;;  %s4169_s17 = scalar_lea.hbm %s7643_s11, 32 }
  0x5e   : > { %748 = vmatpush.msra.mxu0 %v4486_v10  ;;  %815 = vmatpush.msra.mxu3 %v4504_v16  ;;  %7134 = vst [vmem:[#allocation27_spill] sm:$0xff] %v4524_v23  ;;  %v4533_v26 = vld [vmem:[#allocation5 + $0x188] sm:$0xff]  ;;  %v4536_v27 = vld [vmem:[#allocation5 + $0x1f8] sm:$0xff]  ;;  %v4538_v28 = vld [vmem:[#allocation5 + $0x150] sm:$0xff]  ;;  %s3062_s2 = sshll.u32 %s3059_s21, 4  ;;  %s3063_s2 = int_to_ptr.hbm [resolvable:$true] %s3062_s2 }
  0x5f   : > { %771 = vmatpush.msra.mxu1 %v4493_v12  ;;  %793 = vmatpush.msra.mxu2 %v4506_v17  ;;  %7135 = vst [vmem:[#allocation28_spill] sm:$0xff] %v4530_v25  ;;  %v4542_v29 = vld [vmem:[#allocation5 + $0x1c0] sm:$0xff]  ;;  %v4545_v30 = vld [vmem:[#allocation5 + $0x158] sm:$0xff]  ;;  %v4548_v31 = vld [vmem:[#allocation5 + $0x1c8] sm:$0xff] }
  0x60   : > { %749 = vmatpush.msra.mxu0 %v4500_v15  ;;  %816 = vmatpush.msra.mxu3 %v4512_v19  ;;  %7136 = vst [vmem:[#allocation29_spill] sm:$0xff] %v4536_v27  ;;  %v4550_v32 = vld [vmem:[#allocation5 + $0x120] sm:$0xff]  ;;  %v4554_v33 = vld [vmem:[#allocation5 + $0x190] sm:$0xff]  ;;  %v4557_v34 = vld [vmem:[#allocation5 + $0x128] sm:$0xff] }
  0x61   : > { %772 = vmatpush.msra.mxu1 %v4509_v18  ;;  %794 = vmatpush.msra.mxu2 %v4518_v21  ;;  %7137 = vst [vmem:[#allocation30_spill] sm:$0xff] %v4542_v29  ;;  %v4560_v35 = vld [vmem:[#allocation5 + $0x198] sm:$0xff]  ;;  %v4562_v36 = vld [vmem:[#allocation5 + $0xf0] sm:$0xff]  ;;  %v4565_v37 = vld [vmem:[#allocation5 + $0xc0] sm:$0xff] }
  0x62   : > { %750 = vmatpush.msra.mxu0 %v4514_v20  ;;  %817 = vmatpush.msra.mxu3 %v4524_v23  ;;  %7138 = vst [vmem:[#allocation31_spill] sm:$0xff] %v4548_v31  ;;  %v4568_v38 = vld [vmem:[#allocation5 + $0x160] sm:$0xff]  ;;  %v4571_v39 = vld [vmem:[#allocation5 + $0xf8] sm:$0xff]  ;;  %v4574_v40 = vld [vmem:[#allocation5 + $0x168] sm:$0xff] }
  0x63   : > { %773 = vmatpush.msra.mxu1 %v4521_v22  ;;  %795 = vmatpush.msra.mxu2 %v4530_v25  ;;  %7139 = vst [vmem:[#allocation32_spill] sm:$0xff] %v4554_v33  ;;  %v4578_v41 = vld [vmem:[#allocation5 + $0x130] sm:$0xff]  ;;  %v703_v42 = vld [vmem:[%s4442_s28] sm:$0xff]  ;;  %v704_v43 = vld [vmem:[%s4442_s28 + $0x8] sm:$0xff] }
  0x64   : > { %751 = vmatpush.msra.mxu0 %v4526_v24  ;;  %818 = vmatpush.msra.mxu3 %v4536_v27  ;;  %7140 = vst [vmem:[#allocation33_spill] sm:$0xff] %v4560_v35  ;;  %v4583_v44 = vld [vmem:[#allocation5 + $0xc8] sm:$0xff]  ;;  %v4586_v45 = vld [vmem:[#allocation5 + $0x138] sm:$0xff]  ;;  %v711_v46 = vmul.f32 0.5, %v703_v42  ;;  %v721_v47 = vmul.f32 0.5, %v704_v43  ;;  %v4588_v48 = vld [vmem:[#allocation5 + $0x90] sm:$0xff] }
  0x65   : > { %774 = vmatpush.msra.mxu1 %v4533_v26  ;;  %796 = vmatpush.msra.mxu2 %v4542_v29  ;;  %7141 = vst [vmem:[#allocation34_spill] sm:$0xff] %v4568_v38  ;;  %v4592_v49 = vld [vmem:[#allocation5 + $0x100] sm:$0xff]  ;;  %v4595_v50 = vld [vmem:[#allocation5 + $0x98] sm:$0xff]  ;;  %v4598_v51 = vld [vmem:[#allocation5 + $0x108] sm:$0xff] }
  0x66   : > { %752 = vmatpush.msra.mxu0 %v4538_v28  ;;  %819 = vmatpush.msra.mxu3 %v4548_v31  ;;  %7142 = vst [vmem:[#allocation35_spill] sm:$0xff] %v4574_v40  ;;  %3375 = vtanh.f32 %v711_v46  ;;  %v4600_v52 = vld [vmem:[#allocation5 + $0x60] sm:$0xff]  ;;  %v4604_v53 = vld [vmem:[#allocation5 + $0xd0] sm:$0xff]  ;;  %v4609_v55 = vld [vmem:[#allocation5 + $0x68] sm:$0xff] }
  0x67   : > { %775 = vmatpush.msra.mxu1 %v4545_v30  ;;  %797 = vmatpush.msra.mxu2 %v4554_v33  ;;  %7143 = vst [vmem:[#allocation36_spill] sm:$0xff] %v4578_v41  ;;  %3377 = vtanh.f32 %v721_v47  ;;  %v4607_v54 = vld [vmem:[#allocation5 + $0x30] sm:$0xff]  ;;  %v4612_v56 = vld [vmem:[#allocation5 + $0xd8] sm:$0xff]  ;;  %v4616_v57 = vld [vmem:[#allocation5 + $0xa0] sm:$0xff] }
  0x68   : > { %753 = vmatpush.msra.mxu0 %v4550_v32  ;;  %820 = vmatpush.msra.mxu3 %v4560_v35  ;;  %7144 = vst [vmem:[#allocation37_spill] sm:$0xff] %v4586_v45  ;;  %v706_v58 = vld [vmem:[%s4442_s28 + $0x18] sm:$0xff]  ;;  %v707_v59 = vld [vmem:[%s4442_s28 + $0x20] sm:$0xff]  ;;  %v4624_v61 = vld [vmem:[#allocation5 + $0xa8] sm:$0xff] }
  0x69   : > { %776 = vmatpush.msra.mxu1 %v4557_v34  ;;  %798 = vmatpush.msra.mxu2 %v4568_v38  ;;  %7145 = vst [vmem:[#allocation38_spill] sm:$0xff] %v4592_v49  ;;  %v4621_v60 = vld [vmem:[#allocation5 + $0x38] sm:$0xff]  ;;  %v712_v62 = vmul.f32 0.5, %v706_v58  ;;  %v722_v63 = vmul.f32 0.5, %v707_v59  ;;  %v4626_v42 = vld [vmem:[#allocation5] sm:$0xff]  ;;  %v4630_v43 = vld [vmem:[#allocation5 + $0x70] sm:$0xff] }
  0x6a   : > { %754 = vmatpush.msra.mxu0 %v4562_v36  ;;  %821 = vmatpush.msra.mxu3 %v4574_v40  ;;  %7146 = vst [vmem:[#allocation39_spill] sm:$0xff] %v4595_v50  ;;  %v4633_v47 = vld [vmem:[#allocation5 + $0x2f0] sm:$0xff]  ;;  %v4639_v59 = vld [vmem:[#allocation5 + $0x2f8] sm:$0xff]  ;;  %v4675_v33 = vld [vmem:[#allocation5 + $0x260] sm:$0xff] }
  0x6b   : > { %777 = vmatpush.msra.mxu1 %v4571_v39  ;;  %799 = vmatpush.msra.mxu2 %v4578_v41  ;;  %7147 = vst [vmem:[#allocation40_spill] sm:$0xff] %v4598_v51  ;;  %3379 = vtanh.f32 %v712_v62  ;;  %v4650_v62 = vld [vmem:[#allocation5 + $0x2c0] sm:$0xff]  ;;  %v4657_v41 = vld [vmem:[#allocation5 + $0x2c8] sm:$0xff]  ;;  %v4751_v27 = vld [vmem:[#allocation5 + $0x118] sm:$0xff] }
  0x6c   : > { %755 = vmatpush.msra.mxu0 %v4565_v37  ;;  %822 = vmatpush.msra.mxu3 %v4586_v45  ;;  %7148 = vst [vmem:[#allocation41_spill] sm:$0xff] %v4604_v53  ;;  %v3376_v46 = vpop.eup %3375  ;;  %3381 = vtanh.f32 %v722_v63  ;;  %v705_v63 = vld [vmem:[%s4442_s28 + $0x10] sm:$0xff]  ;;  %v4690_v31 = vld [vmem:[#allocation5 + $0x200] sm:$0xff]  ;;  %v4805_v23 = vld [vmem:[#allocation5 + $0x58] sm:$0xff] }
  0x6d   : > { %778 = vmatpush.msra.mxu1 %v4583_v44  ;;  %7149 = vst [vmem:[#allocation42_spill] sm:$0xff] %v4609_v55  ;;  %800 = vmatpush.msra.mxu2 %v4592_v49  ;;  %v3378_v58 = vpop.eup %3377  ;;  %v4647_v49 = vld [vmem:[#allocation5 + $0x78] sm:$0xff]  ;;  %v4704_v29 = vld [vmem:[#allocation5 + $0x1a0] sm:$0xff] }
  0x6e   : > { %756 = vmatpush.msra.mxu0 %v4588_v48  ;;  %7150 = vst [vmem:[#allocation43_spill] sm:$0xff] %v4612_v56  ;;  %823 = vmatpush.msra.mxu3 %v4598_v51  ;;  %v4635_v51 = vld [vmem:[#allocation5 + $0x8] sm:$0xff]  ;;  %v725_v40 = vadd.f32 1.0, %v3378_v58 }
  0x6f   : > { %779 = vmatpush.msra.mxu1 %v4595_v50  ;;  %7151 = vst [vmem:[#allocation44_spill] sm:$0xff] %v4616_v57  ;;  %801 = vmatpush.msra.mxu2 %v4604_v53  ;;  %v715_v53 = vadd.f32 1.0, %v3376_v46  ;;  %v4659_v46 = vld [vmem:[#allocation5 + $0x48] sm:$0xff]  ;;  %v4801_v50 = vld [vmem:[#allocation7 + $0xe0] sm:$0xff] }
  0x70   : > { %757 = vmatpush.msra.mxu0 %v4600_v52  ;;  %7152 = vst [vmem:[#allocation45_spill] sm:$0xff] %v4621_v60  ;;  %824 = vmatpush.msra.mxu3 %v4612_v56  ;;  %v4644_v56 = vld [vmem:[%s6836_s4] ss:$0 sm:$0xff] }
  0x71   : > { %7153 = vst [vmem:[#allocation46_spill] sm:$0xff] %v4624_v61  ;;  %780 = vmatpush.msra.mxu1 %v4609_v55  ;;  %802 = vmatpush.msra.mxu2 %v4616_v57  ;;  %v4653_v57 = vld [vmem:[#allocation5 + $0x40] sm:$0xff]  ;;  %v717_v45 = vmul.f32 0.5, %v715_v53  ;;  %v4673_v53 = vld [vmem:[#allocation5 + $0x18] sm:$0xff]  ;;  %v3380_v35 = vpop.eup %3379 }
  0x72   : > { %7154 = vst [vmem:[#allocation47_spill] sm:$0xff] %v4630_v43  ;;  %758 = vmatpush.msra.mxu0 %v4607_v54  ;;  %825 = vmatpush.msra.mxu3 %v4624_v61  ;;  %v4661_v61 = vld [vmem:[#allocation5 + $0x290] sm:$0xff]  ;;  %v3382_v58 = vpop.eup %3381 }
  0x73   : > { %7155 = vst [vmem:[#allocation48_spill] sm:$0xff] %v4635_v51  ;;  %781 = vmatpush.msra.mxu1 %v4621_v60  ;;  %803 = vmatpush.msra.mxu2 %v4630_v43  ;;  %v4666_v43 = vld [vmem:[#allocation5 + $0x10] sm:$0xff]  ;;  %v730_v38 = vmul.f32 %v4644_v56, %v717_v45  ;;  %v716_v45 = vadd.f32 1.0, %v3380_v35  ;;  %v708_v35 = vld [vmem:[%s4442_s28 + $0x28] sm:$0xff] }
  0x74   : > { %7156 = vst [vmem:[#allocation49_spill] sm:$0xff] %v4639_v59  ;;  %759 = vmatpush.msra.mxu0 %v4626_v42  ;;  %826 = vmatpush.msra.mxu3 %v4647_v49  ;;  %v4683_v60 = vld [vmem:[#allocation5 + $0x230] sm:$0xff] }
  0x75   : > { %7157 = vst [vmem:[#allocation50_spill] sm:$0xff] %v4644_v56  ;;  %782 = vmatpush.msra.mxu1 %v4635_v51  ;;  %v4670_v51 = vld [vmem:[#allocation5 + $0x298] sm:$0xff]  ;;  %804 = vmatpush.msra.mxu2 %v4653_v57 }
  0x76   : > { %7158 = vst [vmem:[#allocation51_spill] sm:$0xff] %v4647_v49  ;;  %836 = vmatpush.msrb.mxu0 %v4633_v47  ;;  %827 = vmatpush.msra.mxu3 %v4659_v46  ;;  %v4680_v49 = vld [vmem:[#allocation5 + $0x268] sm:$0xff] }
  0x77   : > { %7159 = vst [vmem:[#allocation52_spill] sm:$0xff] %v4653_v57  ;;  %859 = vmatpush.msrb.mxu1 %v4639_v59  ;;  %v732_v59 = vadd.f32 %v730_v38, %v705_v63  ;;  %805 = vmatpush.msra.mxu2 %v4666_v43  ;;  %v727_v57 = vmul.f32 0.5, %v725_v40  ;;  %v726_v38 = vadd.f32 1.0, %v3382_v58  ;;  %v4696_v63 = vld [vmem:[#allocation5 + $0x208] sm:$0xff] }
  0x78   : > { %7160 = vst [vmem:[#allocation53_spill] sm:$0xff] %v4657_v41  ;;  %837 = vmatpush.msrb.mxu0 %v4650_v62  ;;  %828 = vmatpush.msra.mxu3 %v4673_v53 }
  0x79   : > { %7161 = vst [vmem:[#allocation54_spill] sm:$0xff] %v4659_v46  ;;  %860 = vmatpush.msrb.mxu1 %v4657_v41  ;;  %3383 = vtanh.f32 %v732_v59  ;;  %v4688_v41 = vld [vmem:[#allocation5 + $0x238] sm:$0xff]  ;;  %v718_v46 = vmul.f32 0.5, %v716_v45 }
  0x7a   : > { %7162 = vst [vmem:[#allocation55_spill] sm:$0xff] %v4666_v43  ;;  %838 = vmatpush.msrb.mxu0 %v4661_v61  ;;  %v4702_v45 = vld [vmem:[#allocation5 + $0x1d8] sm:$0xff]  ;;  %v740_v43 = vmul.f32 0.0, %v727_v57 }
  0x7b   : > { %7163 = vst [vmem:[#allocation56_spill] sm:$0xff] %v4670_v51  ;;  %861 = vmatpush.msrb.mxu1 %v4670_v51  ;;  %v731_v40 = vmul.f32 %v4644_v56, %v718_v46  ;;  %v736_v51 = vsub.f32 1.0, %v727_v57  ;;  %v4708_v46 = vld [vmem:[#allocation5 + $0x1a8] sm:$0xff]  ;;  %v4719_v57 = vld [vmem:[#allocation7 + $0x170] sm:$0xff] }
  0x7c   : > { %7164 = vst [vmem:[#allocation57_spill] sm:$0xff] %v4673_v53  ;;  %839 = vmatpush.msrb.mxu0 %v4675_v33  ;;  %v4698_v53 = vld [vmem:[#allocation5 + $0x1d0] sm:$0xff]  ;;  %v4710_v56 = vld [vmem:[#allocation7 + $0x168] sm:$0xff]  ;;  %946 = vmatpush.msrb.mxu3 %v4719_v57 }
  0x7d   : > { %7165 = vst [vmem:[#allocation58_spill] sm:$0xff] %v4680_v49  ;;  %862 = vmatpush.msrb.mxu1 %v4680_v49  ;;  %v733_v59 = vadd.f32 %v731_v40, %v708_v35  ;;  %v728_v49 = vmul.f32 0.5, %v726_v38  ;;  %v4714_v35 = vld [vmem:[#allocation5 + $0x170] sm:$0xff]  ;;  %923 = vmatpush.msrb.mxu2 %v4710_v56 }
  0x7e   : > { %7166 = vst [vmem:[#allocation59_spill] sm:$0xff] %v4688_v41  ;;  %840 = vmatpush.msrb.mxu0 %v4683_v60 }
  0x7f   : > { %7167 = vst [vmem:[#allocation60_spill] sm:$0xff] %v4696_v63  ;;  %863 = vmatpush.msrb.mxu1 %v4688_v41  ;;  %v3384_v58 = vpop.eup %3383  ;;  %3385 = vtanh.f32 %v733_v59  ;;  %v4712_v41 = vld [vmem:[#allocation7 + $0x150] sm:$0xff]  ;;  %v737_v40 = vsub.f32 1.0, %v728_v49  ;;  %v4728_v59 = vld [vmem:[#allocation5 + $0x178] sm:$0xff] }
  0x80   : > { %841 = vmatpush.msrb.mxu0 %v4690_v31  ;;  %7168 = vst [vmem:[#allocation61_spill] sm:$0xff] %v4702_v45  ;;  %v738_v55 = vmul.f32 %v3384_v58, %v736_v51  ;;  %924 = vmatpush.msrb.mxu2 %v4712_v41  ;;  %v4726_v51 = vld [vmem:[#allocation5 + $0x140] sm:$0xff]  ;;  %v741_v58 = vmul.f32 0.0, %v728_v49 }
  0x81   : > { %864 = vmatpush.msrb.mxu1 %v4696_v63  ;;  %7169 = vst [vmem:[#allocation62_spill] sm:$0xff] %v4708_v46  ;;  %v4741_v63 = vld [vmem:[#allocation5 + $0x148] sm:$0xff]  ;;  %v4745_v49 = vld [vmem:[#allocation7 + $0x120] sm:$0xff] }
  0x82   : > { %842 = vmatpush.msrb.mxu0 %v4698_v53  ;;  %7170 = vst [vmem:[#allocation63_spill] sm:$0xff] %v4710_v56  ;;  %v4721_v38 = vadd.f32 %v740_v43, %v738_v55  ;;  %v4733_v55 = vld [vmem:[#allocation7 + $0x138] sm:$0xff]  ;;  %v4749_v56 = vld [vmem:[#allocation5 + $0xe0] sm:$0xff] }
  0x83   : > { %7171 = vst [vmem:[#allocation64_spill] sm:$0xff] %v4712_v41  ;;  %865 = vmatpush.msrb.mxu1 %v4702_v45  ;;  %v4735_v43 = vld [vmem:[#allocation7 + $0x158] sm:$0xff]  ;;  %v4739_v45 = vld [vmem:[#allocation5 + $0x110] sm:$0xff]  ;;  %925 = vmatpush.msrb.mxu2 %v4733_v55 }
  0x84   : > { %843 = vmatpush.msrb.mxu0 %v4704_v29  ;;  %7172 = vst [vmem:[#allocation65_spill] sm:$0xff] %v4719_v57  ;;  %783 = vmatmul.f32.vlgmr.msra.gmra.mxu1 %v4721_v38  ;;  %v4747_v57 = vld [vmem:[#allocation7 + $0x140] sm:$0xff] }
  0x85   : > { %866 = vmatpush.msrb.mxu1 %v4708_v46  ;;  %7173 = vst [vmem:[#allocation66_spill] sm:$0xff] %v4728_v59  ;;  %760 = vmatmul.f32.vlgmr.msra.gmra.mxu0 %v4721_v38  ;;  %v3386_v46 = vpop.eup %3385 }
  0x86   : > { %844 = vmatpush.msrb.mxu0 %v4714_v35  ;;  %7174 = vst [vmem:[#allocation67_spill] sm:$0xff] %v4733_v55  ;;  %806 = vmatmul.f32.vlgmr.msra.gmra.mxu2 %v4721_v38  ;;  %v739_v41 = vmul.f32 %v3386_v46, %v737_v40  ;;  %v4759_v46 = vld [vmem:[#allocation7 + $0x108] sm:$0xff] }
  0x87   : > { %7175 = vst [vmem:[#allocation68_spill] sm:$0xff] %v4735_v43  ;;  %829 = vmatmul.f32.vlgmr.msra.gmra.mxu3 %v4721_v38  ;;  %867 = vmatpush.msrb.mxu1 %v4728_v59  ;;  %v4761_v40 = vld [vmem:[#allocation7 + $0x128] sm:$0xff]  ;;  %v4767_v59 = vld [vmem:[#allocation5 + $0xb0] sm:$0xff] }
  0x88   : > { %7176 = vst [vmem:[#allocation69_spill] sm:$0xff] %v4741_v63  ;;  %845 = vmatpush.msrb.mxu0 %v4726_v51  ;;  %947 = vmatpush.msrb.mxu3 %v4735_v43  ;;  %v4755_v25 = vadd.f32 %v741_v58, %v739_v41  ;;  %v4769_v41 = vld [vmem:[#allocation5 + $0xe8] sm:$0xff]  ;;  %v4775_v58 = vld [vmem:[#allocation7 + $0xf0] sm:$0xff]  ;;  %v4799_v43 = vld [vmem:[#allocation7 + $0xc0] sm:$0xff] }
  0x89   : > { %7177 = vst [vmem:[#allocation70_spill] sm:$0xff] %v4745_v49  ;;  %868 = vmatpush.msrb.mxu1 %v4741_v63  ;;  %926 = vmatpush.msrb.mxu2 %v4745_v49  ;;  %v4777_v63 = vld [vmem:[#allocation7 + $0x110] sm:$0xff]  ;;  %v4783_v49 = vld [vmem:[#allocation5 + $0xb8] sm:$0xff]  ;;  %v4793_v55 = vld [vmem:[#allocation5 + $0x88] sm:$0xff] }
  0x8a   : > { %7178 = vst [vmem:[#allocation71_spill] sm:$0xff] %v4747_v57  ;;  %846 = vmatpush.msrb.mxu0 %v4739_v45  ;;  %948 = vmatpush.msrb.mxu3 %v4747_v57  ;;  %v4791_v57 = vld [vmem:[#allocation5 + $0x50] sm:$0xff] }
  0x8b   : > { %7179 = vst [vmem:[#allocation72_spill] sm:$0xff] %v4749_v56  ;;  %869 = vmatpush.msrb.mxu1 %v4751_v27  ;;  %927 = vmatpush.msrb.mxu2 %v4759_v46 }
  0x8c   : > { %7180 = vst [vmem:[#allocation73_spill] sm:$0xff] %v4751_v27  ;;  %847 = vmatpush.msrb.mxu0 %v4749_v56  ;;  %949 = vmatpush.msrb.mxu3 %v4761_v40  ;;  %v4781_v27 = vld [vmem:[#allocation5 + $0x80] sm:$0xff] }
  0x8d   : > { %7181 = vst [vmem:[#allocation74_spill] sm:$0xff] %v4759_v46  ;;  %763 = vmatmul.f32.gmra.mxu0 %v4755_v25  ;;  %786 = vmatmul.f32.gmra.mxu1 %v4755_v25  ;;  %v4789_v46 = vld [vmem:[#allocation7 + $0xf8] sm:$0xff] }
  0x8e   : > { %7182 = vst [vmem:[#allocation75_spill] sm:$0xff] %v4761_v40  ;;  %809 = vmatmul.f32.gmra.mxu2 %v4755_v25  ;;  %848 = vmatpush.msrb.mxu0 %v4767_v59  ;;  %v4787_v40 = vld [vmem:[#allocation7 + $0xd8] sm:$0xff] }
  0x8f   : > { %7183 = vst [vmem:[#allocation76_spill] sm:$0xff] %v4767_v59  ;;  %832 = vmatmul.f32.gmra.mxu3 %v4755_v25  ;;  %870 = vmatpush.msrb.mxu1 %v4769_v41 }
  0x90   : > { %7184 = vst [vmem:[#allocation77_spill] sm:$0xff] %v4769_v41  ;;  %928 = vmatpush.msrb.mxu2 %v4775_v58  ;;  %950 = vmatpush.msrb.mxu3 %v4777_v63  ;;  %v4803_v41 = vld [vmem:[#allocation5 + $0x20] sm:$0xff] }
  0x91   : > { %7185 = vst [vmem:[#allocation78_spill] sm:$0xff] %v4775_v58  ;;  %849 = vmatpush.msrb.mxu0 %v4781_v27  ;;  %871 = vmatpush.msrb.mxu1 %v4783_v49  ;;  %v4813_v58 = vld [vmem:[#allocation5 + $0x28] sm:$0xff] }
  0x92   : > { %7186 = vst [vmem:[#allocation79_spill] sm:$0xff] %v4777_v63  ;;  %929 = vmatpush.msrb.mxu2 %v4787_v40  ;;  %951 = vmatpush.msrb.mxu3 %v4789_v46  ;;  %v4811_v63 = vld [vmem:[#allocation7 + $0xa8] sm:$0xff] }
  0x93   : > { %7187 = vst [vmem:[#allocation80_spill] sm:$0xff] %v4781_v27  ;;  %850 = vmatpush.msrb.mxu0 %v4791_v57  ;;  %872 = vmatpush.msrb.mxu1 %v4793_v55 }
  0x94   : > { %7188 = vst [vmem:[#allocation81_spill] sm:$0xff] %v4783_v49  ;;  %930 = vmatpush.msrb.mxu2 %v4799_v43  ;;  %v4816_v49 = vld [vmem:[#allocation7 + $0x178] sm:$0xff]  ;;  %952 = vmatpush.msrb.mxu3 %v4801_v50 }
  0x95   : > { %7189 = vst [vmem:[#allocation82_spill] sm:$0xff] %v4787_v40  ;;  %851 = vmatpush.msrb.mxu0 %v4803_v41  ;;  %873 = vmatpush.msrb.mxu1 %v4805_v23  ;;  %v4821_v40 = vld [vmem:[#allocation7 + $0x90] sm:$0xff] }
  0x96   : > { %7190 = vst [vmem:[#allocation83_spill] sm:$0xff] %v4789_v46  ;;  %852 = vmatmul.f32.vlgmr.msrb.gmra.mxu0 %v4721_v38  ;;  %931 = vmatpush.msrb.mxu2 %v4811_v63  ;;  %v4827_v46 = vld [vmem:[#allocation7 + $0xc8] sm:$0xff] }
  0x97   : > { %7191 = vst [vmem:[#allocation84_spill] sm:$0xff] %v4791_v57  ;;  %874 = vmatpush.msrb.mxu1 %v4813_v58  ;;  %969 = vmatpush.msra.mxu0 %v4816_v49 }
  0x98   : > { %7192 = vst [vmem:[#allocation85_spill] sm:$0xff] %v4793_v55  ;;  %v4825_v55 = vld [vmem:[#allocation7 + $0x160] sm:$0xff]  ;;  %875 = vmatmul.f32.vlgmr.msrb.gmra.mxu1 %v4721_v38  ;;  %932 = vmatpush.msrb.mxu2 %v4821_v40 }
  0x99   : > { %7193 = vst [vmem:[#allocation86_spill] sm:$0xff] %v4799_v43  ;;  %v4831_v43 = vld [vmem:[#allocation7 + $0x78] sm:$0xff]  ;;  %970 = vmatpush.msra.mxu0 %v4825_v55  ;;  %953 = vmatpush.msrb.mxu3 %v4827_v46 }
  0x9a   : > { %7194 = vst [vmem:[#allocation87_spill] sm:$0xff] %v4801_v50  ;;  %v4838_v50 = vld [vmem:[#allocation7 + $0x60] sm:$0xff]  ;;  %933 = vmatpush.msrb.mxu2 %v4831_v43  ;;  %1035 = vmatpush.msra.mxu1 %v4460_v0  ;;  %v4860_v0 = vld [vmem:[#allocation7 + $0x18] sm:$0xff] }
  0x9b   : > { %7195 = vst [vmem:[#allocation88_spill] sm:$0xff] %v4803_v41 }
  0x9c   : > { %7196 = vst [vmem:[#allocation89_spill] sm:$0xff] %v4805_v23  ;;  %v4835_v23 = vld [vmem:[#allocation7 + $0x148] sm:$0xff]  ;;  %934 = vmatpush.msrb.mxu2 %v4838_v50  ;;  %1036 = vmatpush.msra.mxu1 %v4462_v1 }
  0x9d   : > { %7197 = vst [vmem:[#allocation90_spill] sm:$0xff] %v4811_v63  ;;  %v4842_v63 = vld [vmem:[#allocation7 + $0x130] sm:$0xff]  ;;  %971 = vmatpush.msra.mxu0 %v4835_v23  ;;  %v4865_v1 = vld [vmem:[#allocation7 + $0xe8] sm:$0xff] }
  0x9e   : > { %7198 = vst [vmem:[#allocation91_spill] sm:$0xff] %v4813_v58  ;;  %v4846_v58 = vld [vmem:[#allocation7 + $0x48] sm:$0xff]  ;;  %855 = vmatmul.f32.gmra.mxu0 %v4755_v25  ;;  %1037 = vmatpush.msra.mxu1 %v4469_v4  ;;  %v4902_v4 = vld [vmem:[#allocation7] sm:$0xff] }
  0x9f   : > { %7199 = vst [vmem:[#allocation92_spill] sm:$0xff] %v4821_v40  ;;  %v4849_v40 = vld [vmem:[#allocation7 + $0x118] sm:$0xff]  ;;  %972 = vmatpush.msra.mxu0 %v4842_v63  ;;  %935 = vmatpush.msrb.mxu2 %v4846_v58 }
  0xa0   : > { %7200 = vst [vmem:[#allocation93_spill] sm:$0xff] %v4825_v55  ;;  %v4853_v55 = vld [vmem:[#allocation7 + $0x30] sm:$0xff]  ;;  %878 = vmatmul.f32.gmra.mxu1 %v4755_v25 }
  0xa1   : > { %7201 = vst [vmem:[#allocation94_spill] sm:$0xff] %v4827_v46  ;;  %v4857_v46 = vld [vmem:[#allocation7 + $0x100] sm:$0xff]  ;;  %973 = vmatpush.msra.mxu0 %v4849_v40  ;;  %936 = vmatpush.msrb.mxu2 %v4853_v55 }
  0xa2   : > { %7202 = vst [vmem:[#allocation95_spill] sm:$0xff] %v4846_v58  ;;  %1038 = vmatpush.msra.mxu1 %v4475_v6  ;;  %v4870_v58 = vld [vmem:[#allocation7 + $0xd0] sm:$0xff] }
  0xa3   : > { %974 = vmatpush.msra.mxu0 %v4857_v46  ;;  %937 = vmatpush.msrb.mxu2 %v4860_v0  ;;  %v4905_v6 = vld [vmem:[#allocation7 + $0xb0] sm:$0xff] }
  0xa4   : > { %1039 = vmatpush.msra.mxu1 %v4486_v10  ;;  %v4907_v10 = vld [vmem:[#allocation7 + $0xb8] sm:$0xff]  ;;  %954 = vmatpush.msrb.mxu3 %v4905_v6 }
  0xa5   : > { %975 = vmatpush.msra.mxu0 %v4865_v1  ;;  %938 = vmatpush.msrb.mxu2 %v4902_v4 }
  0xa6   : > { %1040 = vmatpush.msra.mxu1 %v4500_v15  ;;  %v4912_v15 = vld [vmem:[#allocation7 + $0x98] sm:$0xff] }
  0xa7   : > { %976 = vmatpush.msra.mxu0 %v4870_v58  ;;  %1058 = vmatpush.msra.mxu2 %v4465_v2  ;;  %v4926_v2 = vld [vmem:[#allocation7 + $0x68] sm:$0xff] }
  0xa8   : > { %1041 = vmatpush.msra.mxu1 %v4514_v20  ;;  %v4914_v20 = vld [vmem:[#allocation7 + $0xa0] sm:$0xff]  ;;  %955 = vmatpush.msrb.mxu3 %v4912_v15 }
  0xa9   : > { %977 = vmatpush.msra.mxu0 %v4907_v10  ;;  %1059 = vmatpush.msra.mxu2 %v4467_v3  ;;  %v4933_v3 = vld [vmem:[#allocation7 + $0x50] sm:$0xff] }
  0xaa   : > { %1042 = vmatpush.msra.mxu1 %v4526_v24  ;;  %v4919_v24 = vld [vmem:[#allocation7 + $0x80] sm:$0xff] }
  0xab   : > { %978 = vmatpush.msra.mxu0 %v4914_v20  ;;  %956 = vmatpush.msrb.mxu3 %v4919_v24 }
  0xac   : > { %1043 = vmatpush.msra.mxu1 %v4538_v28  ;;  %v4921_v28 = vld [vmem:[#allocation7 + $0x88] sm:$0xff]  ;;  %1060 = vmatpush.msra.mxu2 %v4473_v5  ;;  %v4940_v5 = vld [vmem:[#allocation7 + $0x38] sm:$0xff] }
  0xad   : > { %979 = vmatpush.msra.mxu0 %v4921_v28  ;;  %957 = vmatpush.msrb.mxu3 %v4926_v2 }
  0xae   : > { %1044 = vmatpush.msra.mxu1 %v4550_v32  ;;  %v4928_v32 = vld [vmem:[#allocation7 + $0x70] sm:$0xff]  ;;  %1061 = vmatpush.msra.mxu2 %v4481_v8  ;;  %v4947_v8 = vld [vmem:[#allocation7 + $0x20] sm:$0xff] }
  0xaf   : > { %980 = vmatpush.msra.mxu0 %v4928_v32  ;;  %958 = vmatpush.msrb.mxu3 %v4933_v3 }
  0xb0   : > { %1045 = vmatpush.msra.mxu1 %v4562_v36  ;;  %1062 = vmatpush.msra.mxu2 %v4493_v12  ;;  %v4942_v36 = vld [vmem:[#allocation7 + $0x40] sm:$0xff]  ;;  %v4954_v12 = vld [vmem:[#allocation7 + $0x8] sm:$0xff] }
  0xb1   : > { %959 = vmatpush.msrb.mxu3 %v4940_v5 }
  0xb2   : > { %1046 = vmatpush.msra.mxu1 %v4565_v37  ;;  %1063 = vmatpush.msra.mxu2 %v4509_v18  ;;  %v4949_v37 = vld [vmem:[#allocation7 + $0x28] sm:$0xff]  ;;  %v7208_v18 = vld [vmem:[#allocation30_spill] sm:$0xff] }
  0xb3   : > { %960 = vmatpush.msrb.mxu3 %v4947_v8 }
  0xb4   : > { %1047 = vmatpush.msra.mxu1 %v4588_v48  ;;  %1064 = vmatpush.msra.mxu2 %v4521_v22  ;;  %v4956_v48 = vld [vmem:[#allocation7 + $0x10] sm:$0xff]  ;;  %v7211_v22 = vld [vmem:[#allocation31_spill] sm:$0xff] }
  0xb5   : > { %961 = vmatpush.msrb.mxu3 %v4954_v12 }
  0xb6   : > { %1048 = vmatpush.msra.mxu1 %v4600_v52  ;;  %1065 = vmatpush.msra.mxu2 %v4533_v26  ;;  %v7213_v26 = vld [vmem:[#allocation32_spill] sm:$0xff]  ;;  %v7216_v52 = vld [vmem:[#allocation34_spill] sm:$0xff] }
  0xb7   : > { %1081 = vmatpush.msra.mxu3 %v4478_v7  ;;  %v7203_v7 = vld [vmem:[#allocation27_spill] sm:$0xff] }
  0xb8   : > { %1049 = vmatpush.msra.mxu1 %v4607_v54  ;;  %1066 = vmatpush.msra.mxu2 %v4545_v30  ;;  %v7214_v30 = vld [vmem:[#allocation33_spill] sm:$0xff] }
  0xb9   : > { %1082 = vmatpush.msra.mxu3 %v4490_v11  ;;  %v7204_v11 = vld [vmem:[#allocation39_spill] sm:$0xff] }
  0xba   : > { %1050 = vmatpush.msra.mxu1 %v4626_v42  ;;  %1067 = vmatpush.msra.mxu2 %v4557_v34  ;;  %v7217_v42 = vld [vmem:[#allocation35_spill] sm:$0xff] }
  0xbb   : > { %1083 = vmatpush.msra.mxu3 %v4498_v14  ;;  %v7206_v14 = vld [vmem:[#allocation29_spill] sm:$0xff] }
  0xbc   : > { %1127 = vmatpush.msrb.mxu1 %v4633_v47  ;;  %1068 = vmatpush.msra.mxu2 %v4571_v39  ;;  %v7218_v47 = vld [vmem:[#allocation36_spill] sm:$0xff] }
  0xbd   : > { %1084 = vmatpush.msra.mxu3 %v4506_v17 }
  0xbe   : > { %1128 = vmatpush.msrb.mxu1 %v4650_v62  ;;  %1069 = vmatpush.msra.mxu2 %v4583_v44  ;;  %v7215_v44 = vld [vmem:[#allocation48_spill] sm:$0xff] }
  0xbf   : > { %1085 = vmatpush.msra.mxu3 %v4518_v21  ;;  %v7212_v21 = vld [vmem:[#allocation45_spill] sm:$0xff] }
  0xc0   : > { %1129 = vmatpush.msrb.mxu1 %v4661_v61  ;;  %1070 = vmatpush.msra.mxu2 %v7204_v11  ;;  %v7219_v11 = vld [vmem:[#allocation37_spill] sm:$0xff] }
  0xc2   : > { %1130 = vmatpush.msrb.mxu1 %v4675_v33  ;;  %v4935_v33 = vld [vmem:[#allocation7 + $0x58] sm:$0xff] }
  0xc3   : > { %981 = vmatpush.msra.mxu0 %v4935_v33 }
  0xc4   : > { %1131 = vmatpush.msrb.mxu1 %v4683_v60 }
  0xc5   : > { %982 = vmatpush.msra.mxu0 %v4942_v36 }
  0xc6   : > { %1132 = vmatpush.msrb.mxu1 %v4690_v31 }
  0xc7   : > { %983 = vmatpush.msra.mxu0 %v4949_v37 }
  0xc8   : > { %1133 = vmatpush.msrb.mxu1 %v4698_v53 }
  0xc9   : > { %984 = vmatpush.msra.mxu0 %v4956_v48 }
  0xca   : > { %1134 = vmatpush.msrb.mxu1 %v4704_v29 }
  0xcb   : > { %1104 = vmatpush.msrb.mxu0 %v4484_v9  ;;  %v687_v9 = vld [vmem:[#allocation8] sm:$0x7] }
  0xcc   : > { %1135 = vmatpush.msrb.mxu1 %v4714_v35  ;;  %v4980_v17 = vperm.slane %v687_v9, 0 }
  0xcd   : > { %1105 = vmatpush.msrb.mxu0 %v4496_v13  ;;  %v7205_v13 = vld [vmem:[#allocation28_spill] sm:$0xff] }
  0xce   : > { %1136 = vmatpush.msrb.mxu1 %v4726_v51  ;;  %1086 = vmatpush.msra.mxu3 %v7205_v13  ;;  %7209 = vst [vmem:[#allocation27_spill] sm:$0xff] %v4980_v17  ;;  %v7220_v13 = vld [vmem:[#allocation38_spill] sm:$0xff] }
  0xcf   : > { %1106 = vmatpush.msrb.mxu0 %v4504_v16  ;;  %v7207_v16 = vld [vmem:[#allocation42_spill] sm:$0xff] }
  0xd0   : > { %1137 = vmatpush.msrb.mxu1 %v4739_v45  ;;  %1071 = vmatpush.msra.mxu2 %v7207_v16  ;;  %v7221_v16 = vld [vmem:[#allocation40_spill] sm:$0xff] }
  0xd1   : > { %1107 = vmatpush.msrb.mxu0 %v4512_v19  ;;  %1087 = vmatpush.msra.mxu3 %v7208_v18  ;;  %v4982_v19 = vperm.slane %v687_v9, 1  ;;  %v7222_v18 = vld [vmem:[#allocation41_spill] sm:$0xff] }
  0xd2   : > { %1138 = vmatpush.msrb.mxu1 %v4749_v56  ;;  %1072 = vmatpush.msra.mxu2 %v7212_v21  ;;  %v7223_v21 = vld [vmem:[#allocation43_spill] sm:$0xff] }
  0xd3   : > { %1108 = vmatpush.msrb.mxu0 %v7203_v7  ;;  %7210 = vst [vmem:[#allocation39_spill] sm:$0xff] %v4982_v19  ;;  %1088 = vmatpush.msra.mxu3 %v7213_v26 }
  0xd4   : > { %1139 = vmatpush.msrb.mxu1 %v4767_v59  ;;  %1073 = vmatpush.msra.mxu2 %v7215_v44 }
  0xd5   : > { %1109 = vmatpush.msrb.mxu0 %v7206_v14  ;;  %1089 = vmatpush.msra.mxu3 %v7216_v52  ;;  %v3204_v14 = vld [vmem:[%s4442_s28 + $0x30] sm:$0xff] }
  0xd6   : > { %1140 = vmatpush.msrb.mxu1 %v4781_v27 }
  0xd7   : > { %1110 = vmatpush.msrb.mxu0 %v7211_v22  ;;  %1090 = vmatpush.msra.mxu3 %v7218_v47 }
  0xd8   : > { %1141 = vmatpush.msrb.mxu1 %v4791_v57 }
  0xd9   : > { %1111 = vmatpush.msrb.mxu0 %v7214_v30  ;;  %1091 = vmatpush.msra.mxu3 %v7220_v13 }
  0xda   : > { %1142 = vmatpush.msrb.mxu1 %v4803_v41 }
  0xdb   : > { %1112 = vmatpush.msrb.mxu0 %v7217_v42  ;;  %1092 = vmatpush.msra.mxu3 %v7222_v18  ;;  %v5004_v42 = vperm.slane %v687_v9, 2  ;;  %v3207_v9 = vld [vmem:[%s4442_s28 + $0x48] sm:$0xff] }
  0xdd   : > { %1113 = vmatpush.msrb.mxu0 %v7219_v11 }
  0xdf   : > { %1114 = vmatpush.msrb.mxu0 %v7221_v16 }
  0xe1   : > { %1115 = vmatpush.msrb.mxu0 %v7223_v21  ;;  %v7228_v21 = vld [vmem:[#allocation52_spill] sm:$0xff] }
 0x101   : > { %v784_v39 = vpop.f32.mrf.mxu1 }
 0x102   : > { %v761_v34 = vpop.f32.mrf.mxu0  ;;  %v883_v61 = vadd.f32 %v784_v39, %v4982_v19  ;;  %v7224_v39 = vld [vmem:[#allocation44_spill] sm:$0xff] }
 0x103   : > { %v882_v54 = vadd.f32 %v761_v34, %v4980_v17  ;;  %1093 = vmatpush.msra.mxu3 %v7224_v39  ;;  %v7230_v39 = vld [vmem:[#allocation55_spill] sm:$0xff] }
 0x104   : > { %v900_v7 = vmul.f32 0.5, %v883_v61  ;;  %v7225_v61 = vld [vmem:[#allocation46_spill] sm:$0xff] }
 0x105   : > { %v890_v62 = vmul.f32 0.5, %v882_v54  ;;  %1116 = vmatpush.msrb.mxu0 %v7225_v61  ;;  %v3205_v61 = vld [vmem:[%s4442_s28 + $0x38] sm:$0xff] }
 0x107   : > { %3387 = vtanh.f32 %v890_v62  ;;  %v7226_v62 = vld [vmem:[#allocation47_spill] sm:$0xff] }
 0x108   : > { %3389 = vtanh.f32 %v900_v7  ;;  %1094 = vmatpush.msra.mxu3 %v7226_v62  ;;  %v7231_v62 = vld [vmem:[#allocation57_spill] sm:$0xff] }
 0x109   : > { %v807_v52 = vpop.f32.mrf.mxu2 }
 0x10a   : > { %v830_v22 = vpop.f32.mrf.mxu3  ;;  %v764_v26 = vpop.f32.mrf.mxu0  ;;  %1095 = vmatpush.msra.mxu3 %v7228_v21 }
 0x10b   : > { %v999_v30 = vadd.f32 %v3204_v14, %v830_v22  ;;  %v787_v34 = vpop.f32.mrf.mxu1  ;;  %v885_v44 = vadd.f32 %v764_v26, %v4980_v17  ;;  %v7227_v14 = vld [vmem:[#allocation51_spill] sm:$0xff]  ;;  %v5011_v22 = vld [vmem:[%s6837_s5] ss:$0 sm:$0xff] }
 0x10c   : > { %v886_v54 = vadd.f32 %v787_v34, %v4982_v19  ;;  %1117 = vmatpush.msrb.mxu0 %v7227_v14  ;;  %v7229_v26 = vld [vmem:[#allocation54_spill] sm:$0xff]  ;;  %v884_v34 = vadd.f32 %v807_v52, %v5004_v42  ;;  %1096 = vmatpush.msra.mxu3 %v7230_v39 }
 0x10d   : > { %v1001_v47 = vmul.f32 0.5, %v999_v30  ;;  %v3388_v7 = vpop.eup %3387  ;;  %v891_v11 = vmul.f32 0.5, %v885_v44 }
 0x10e   : > { %v901_v13 = vmul.f32 0.5, %v886_v54  ;;  %v3390_v16 = vpop.eup %3389  ;;  %v894_v18 = vadd.f32 1.0, %v3388_v7  ;;  %1118 = vmatpush.msrb.mxu0 %v7229_v26 }
 0x10f   : > { %3391 = vtanh.f32 %v1001_v47  ;;  %v904_v44 = vadd.f32 1.0, %v3390_v16 }
 0x110   : > { %3393 = vtanh.f32 %v891_v11  ;;  %v896_v30 = vmul.f32 0.5, %v894_v18  ;;  %1119 = vmatpush.msrb.mxu0 %v7231_v62  ;;  %v7232_v62 = vld [vmem:[#allocation50_spill] sm:$0xff] }
 0x111   : > { %3395 = vtanh.f32 %v901_v13  ;;  %v906_v26 = vmul.f32 0.5, %v904_v44  ;;  %v810_v13 = vpop.f32.mrf.mxu2 }
 0x112   : > { %v833_v54 = vpop.f32.mrf.mxu3  ;;  %v909_v7 = vmul.f32 %v5011_v22, %v896_v30 }
 0x113   : > { %v1000_v47 = vadd.f32 %v3207_v9, %v833_v54  ;;  %v853_v14 = vpop.f32.mrf.mxu0  ;;  %v3206_v54 = vld [vmem:[%s4442_s28 + $0x40] sm:$0xff] }
 0x114   : > { %v911_v11 = vadd.f32 %v909_v7, %v884_v34  ;;  %v1009_v17 = vadd.f32 %v3205_v61, %v853_v14  ;;  %v887_v34 = vadd.f32 %v810_v13, %v5004_v42  ;;  %v915_v61 = vsub.f32 1.0, %v906_v26 }
 0x115   : > { %v3392_v21 = vpop.eup %3391  ;;  %v1002_v19 = vmul.f32 0.5, %v1000_v47  ;;  %v876_v39 = vpop.f32.mrf.mxu1  ;;  %v3208_v47 = vld [vmem:[%s4442_s28 + $0x50] sm:$0xff] }
 0x116   : > { %v3394_v18 = vpop.eup %3393  ;;  %v1005_v52 = vadd.f32 1.0, %v3392_v21  ;;  %3397 = vtanh.f32 %v911_v11  ;;  %v1011_v57 = vmul.f32 0.5, %v1009_v17  ;;  %v1019_v27 = vadd.f32 %v7232_v62, %v876_v39 }
 0x117   : > { %v3396_v16 = vpop.eup %3395  ;;  %v895_v41 = vadd.f32 1.0, %v3394_v18  ;;  %3399 = vtanh.f32 %v1002_v19  ;;  %v919_v21 = vmul.f32 0.0, %v906_v26 }
 0x118   : > { %v1007_v30 = vmul.f32 0.5, %v1005_v52  ;;  %3401 = vtanh.f32 %v1011_v57  ;;  %v905_v7 = vadd.f32 1.0, %v3396_v16 }
 0x119   : > { %v897_v9 = vmul.f32 0.5, %v895_v41 }
 0x11a   : > { %v1021_v44 = vmul.f32 %v1019_v27, %v1007_v30  ;;  %v907_v52 = vmul.f32 0.5, %v905_v7 }
 0x11b   : > { %v910_v14 = vmul.f32 %v5011_v22, %v897_v9  ;;  %v856_v18 = vpop.f32.mrf.mxu0 }
 0x11c   : > { %v1023_v59 = vadd.f32 %v3206_v54, %v1021_v44  ;;  %v3398_v11 = vpop.eup %3397  ;;  %v1010_v56 = vadd.f32 %v3208_v47, %v856_v18  ;;  %v916_v54 = vsub.f32 1.0, %v907_v52  ;;  %v920_v44 = vmul.f32 0.0, %v907_v52  ;;  %v7234_v47 = vld [vmem:[#allocation63_spill] sm:$0xff]  ;;  %v7236_v18 = vld [vmem:[#allocation53_spill] sm:$0xff] }
 0x11d   : > { %v912_v17 = vadd.f32 %v910_v14, %v887_v34  ;;  %v3400_v39 = vpop.eup %3399  ;;  %v917_v41 = vmul.f32 %v3398_v11, %v915_v61  ;;  %v879_v19 = vpop.f32.mrf.mxu1  ;;  %v7233_v61 = vld [vmem:[#allocation49_spill] sm:$0xff] }
 0x11e   : > { %3403 = vtanh.f32 %v1023_v59  ;;  %v3402_v57 = vpop.eup %3401  ;;  %v1006_v13 = vadd.f32 1.0, %v3400_v39  ;;  %v1012_v16 = vmul.f32 0.5, %v1010_v56  ;;  %v1020_v27 = vadd.f32 %v7232_v62, %v879_v19  ;;  %v3209_v59 = vld [vmem:[%s4442_s28 + $0x58] sm:$0xff]  ;;  %v7237_v19 = vld [vmem:[#allocation64_spill] sm:$0xff] }
 0x11f   : > { %3405 = vtanh.f32 %v912_v17  ;;  %v1015_v30 = vadd.f32 1.0, %v3402_v57  ;;  %v5027_v9 = vadd.f32 %v919_v21, %v917_v41  ;;  %v7235_v14 = vld [vmem:[#allocation65_spill] sm:$0xff]  ;;  %v7238_v57 = vld [vmem:[#allocation68_spill] sm:$0xff] }
 0x120   : > { %v1008_v26 = vmul.f32 0.5, %v1006_v13  ;;  %3407 = vtanh.f32 %v1012_v16  ;;  %v7239_v16 = vld [vmem:[#allocation56_spill] sm:$0xff] }
 0x121   : > { %v1017_v34 = vmul.f32 0.5, %v1015_v30  ;;  %939 = vmatmul.f32.vlgmr.msrb.gmra.mxu2 %v5027_v9  ;;  %962 = vmatmul.f32.vlgmr.msrb.gmra.mxu3 %v5027_v9 }
 0x122   : > { %985 = vmatmul.f32.vlgmr.msra.gmra.mxu0 %v5027_v9  ;;  %1150 = vmatpush.msrb.mxu2 %v7233_v61  ;;  %v1022_v7 = vmul.f32 %v1020_v27, %v1008_v26  ;;  %v7240_v26 = vld [vmem:[#allocation67_spill] sm:$0xff] }
 0x123   : > { %v1027_v62 = vsub.f32 1.0, %v1017_v34  ;;  %1215 = vmatpush.msrb.mxu3 %v7234_v47  ;;  %1238 = vmatpush.msra.mxu0 %v7235_v14  ;;  %v1031_v17 = vmul.f32 %v1017_v34, %v4721_v38  ;;  %v7242_v38 = vld [vmem:[#allocation58_spill] sm:$0xff]  ;;  %v7243_v34 = vld [vmem:[#allocation59_spill] sm:$0xff] }
 0x124   : > { %v3404_v56 = vpop.eup %3403  ;;  %1151 = vmatpush.msrb.mxu2 %v7236_v18  ;;  %v1024_v11 = vadd.f32 %v3209_v59, %v1022_v7  ;;  %v7241_v59 = vld [vmem:[#allocation71_spill] sm:$0xff]  ;;  %v7244_v7 = vld [vmem:[#allocation70_spill] sm:$0xff]  ;;  %v7248_v18 = vld [vmem:[#allocation61_spill] sm:$0xff] }
 0x125   : > { %v3406_v21 = vpop.eup %3405  ;;  %v1029_v39 = vmul.f32 %v3404_v56, %v1027_v62  ;;  %1216 = vmatpush.msrb.mxu3 %v7237_v19  ;;  %1239 = vmatpush.msra.mxu0 %v7238_v57  ;;  %v7246_v14 = vld [vmem:[#allocation74_spill] sm:$0xff]  ;;  %v7255_v57 = vld [vmem:[#allocation69_spill] sm:$0xff] }
 0x126   : > { %v918_v41 = vmul.f32 %v3406_v21, %v916_v54  ;;  %v3408_v13 = vpop.eup %3407  ;;  %1152 = vmatpush.msrb.mxu2 %v7239_v16  ;;  %3409 = vtanh.f32 %v1024_v11  ;;  %v7247_v21 = vld [vmem:[#allocation75_spill] sm:$0xff]  ;;  %v7249_v11 = vld [vmem:[#allocation93_spill] sm:$0xff]  ;;  %v7252_v19 = vld [vmem:[#allocation62_spill] sm:$0xff] }
 0x127   : > { %v5041_v52 = vadd.f32 %v1031_v17, %v1029_v39  ;;  %v1016_v27 = vadd.f32 1.0, %v3408_v13  ;;  %1217 = vmatpush.msrb.mxu3 %v7240_v26  ;;  %1240 = vmatpush.msra.mxu0 %v7241_v59  ;;  %v7250_v39 = vld [vmem:[#allocation78_spill] sm:$0xff]  ;;  %v7257_v16 = vld [vmem:[#allocation83_spill] sm:$0xff]  ;;  %v7261_v59 = vld [vmem:[#allocation77_spill] sm:$0xff] }
 0x128   : > { %v5043_v30 = vadd.f32 %v920_v44, %v918_v41  ;;  %1153 = vmatpush.msrb.mxu2 %v7242_v38  ;;  %v7245_v44 = vld [vmem:[#allocation60_spill] sm:$0xff]  ;;  %v7251_v41 = vld [vmem:[#allocation79_spill] sm:$0xff]  ;;  %v7256_v13 = vld [vmem:[#allocation86_spill] sm:$0xff] }
 0x129   : > { %v1018_v54 = vmul.f32 0.5, %v1016_v27  ;;  %1051 = vmatmul.f32.vlgmr.msra.gmra.mxu1 %v5041_v52  ;;  %1218 = vmatpush.msrb.mxu3 %v7244_v7  ;;  %v7259_v27 = vld [vmem:[#allocation90_spill] sm:$0xff]  ;;  %v7260_v26 = vld [vmem:[#allocation87_spill] sm:$0xff]  ;;  %v7263_v38 = vld [vmem:[#allocation92_spill] sm:$0xff] }
 0x12a   : > { %942 = vmatmul.f32.gmra.mxu2 %v5043_v30  ;;  %965 = vmatmul.f32.gmra.mxu3 %v5043_v30  ;;  %v5189_v7 = vld [vmem:[#allocation5 + $0x280] sm:$0xff] }
 0x12b   : > { %988 = vmatmul.f32.gmra.mxu0 %v5043_v30  ;;  %1154 = vmatpush.msrb.mxu2 %v7243_v34  ;;  %v1028_v61 = vsub.f32 1.0, %v1018_v54  ;;  %v1032_v62 = vmul.f32 %v1018_v54, %v4755_v25  ;;  %v7253_v25 = vld [vmem:[#allocation66_spill] sm:$0xff]  ;;  %v7267_v34 = vld [vmem:[#allocation91_spill] sm:$0xff] }
 0x12c   : > { %v3410_v56 = vpop.eup %3409  ;;  %1261 = vmatpush.msra.mxu1 %v4816_v49  ;;  %1219 = vmatpush.msrb.mxu3 %v7246_v14  ;;  %v7254_v49 = vld [vmem:[#allocation82_spill] sm:$0xff] }
 0x12d   : > { %1155 = vmatpush.msrb.mxu2 %v7245_v44  ;;  %v1030_v47 = vmul.f32 %v3410_v56, %v1028_v61  ;;  %1241 = vmatpush.msra.mxu0 %v7247_v21  ;;  %v7265_v54 = vld [vmem:[#allocation94_spill] sm:$0xff]  ;;  %v7268_v61 = vld [vmem:[#allocation95_spill] sm:$0xff]  ;;  %v5207_v21 = vld [vmem:[#allocation5 + $0x90] sm:$0xff] }
 0x12e   : > { %1262 = vmatpush.msra.mxu1 %v7249_v11  ;;  %1220 = vmatpush.msrb.mxu3 %v7250_v39  ;;  %v5192_v56 = vld [vmem:[#allocation5 + $0x288] sm:$0xff]  ;;  %v5195_v44 = vld [vmem:[#allocation5 + $0xc0] sm:$0xff]  ;;  %v5204_v14 = vld [vmem:[#allocation5 + $0x258] sm:$0xff] }
 0x12f   : > { %1156 = vmatpush.msrb.mxu2 %v7248_v18  ;;  %v5061_v17 = vadd.f32 %v1032_v62, %v1030_v47  ;;  %1242 = vmatpush.msra.mxu0 %v7251_v41  ;;  %v5198_v62 = vld [vmem:[#allocation5 + $0x158] sm:$0xff]  ;;  %v5201_v47 = vld [vmem:[#allocation5 + $0x250] sm:$0xff]  ;;  %v5210_v18 = vld [vmem:[#allocation5 + $0x128] sm:$0xff] }
 0x130   : > { %1263 = vmatpush.msra.mxu1 %v4835_v23  ;;  %1221 = vmatpush.msrb.mxu3 %v7254_v49  ;;  %v7258_v23 = vld [vmem:[#allocation73_spill] sm:$0xff]  ;;  %v5213_v11 = vld [vmem:[#allocation5 + $0x220] sm:$0xff]  ;;  %v5216_v39 = vld [vmem:[#allocation5 + $0x228] sm:$0xff] }
 0x131   : > { %1157 = vmatpush.msrb.mxu2 %v7252_v19  ;;  %1054 = vmatmul.f32.gmra.mxu1 %v5061_v17  ;;  %7269 = vst [vmem:[#allocation28_spill] sm:$0xff] %v5216_v39  ;;  %v5219_v41 = vld [vmem:[#allocation5 + $0x60] sm:$0xff]  ;;  %v5222_v19 = vld [vmem:[#allocation5 + $0xf8] sm:$0xff] }
 0x132   : > { %1074 = vmatmul.f32.vlgmr.msra.gmra.mxu2 %v5041_v52  ;;  %1097 = vmatmul.f32.vlgmr.msra.gmra.mxu3 %v5041_v52  ;;  %7270 = vst [vmem:[#allocation29_spill] sm:$0xff] %v5219_v41  ;;  %v5228_v49 = vld [vmem:[#allocation5 + $0x1f8] sm:$0xff] }
 0x133   : > { %1120 = vmatmul.f32.vlgmr.msrb.gmra.mxu0 %v5041_v52  ;;  %1158 = vmatpush.msrb.mxu2 %v7253_v25  ;;  %7271 = vst [vmem:[#allocation42_spill] sm:$0xff] %v5222_v19  ;;  %v5225_v25 = vld [vmem:[#allocation5 + $0x1f0] sm:$0xff] }
 0x134   : > { %1264 = vmatpush.msra.mxu1 %v4842_v63  ;;  %1222 = vmatpush.msrb.mxu3 %v7256_v13  ;;  %v7262_v63 = vld [vmem:[#allocation81_spill] sm:$0xff]  ;;  %7272 = vst [vmem:[#allocation30_spill] sm:$0xff] %v5225_v25  ;;  %v5234_v13 = vld [vmem:[#allocation5 + $0xc8] sm:$0xff] }
 0x135   : > { %1159 = vmatpush.msrb.mxu2 %v7255_v57  ;;  %1243 = vmatpush.msra.mxu0 %v7257_v16  ;;  %7273 = vst [vmem:[#allocation31_spill] sm:$0xff] %v5228_v49  ;;  %v5231_v57 = vld [vmem:[#allocation5 + $0x30] sm:$0xff]  ;;  %v5237_v16 = vld [vmem:[#allocation5 + $0x1c0] sm:$0xff] }
 0x136   : > { %1265 = vmatpush.msra.mxu1 %v4849_v40  ;;  %1223 = vmatpush.msrb.mxu3 %v7259_v27  ;;  %v7264_v40 = vld [vmem:[#allocation85_spill] sm:$0xff]  ;;  %7274 = vst [vmem:[#allocation45_spill] sm:$0xff] %v5231_v57  ;;  %v5243_v27 = vld [vmem:[#allocation5] sm:$0xff] }
 0x137   : > { %1160 = vmatpush.msrb.mxu2 %v7258_v23  ;;  %1244 = vmatpush.msra.mxu0 %v7260_v26  ;;  %7275 = vst [vmem:[#allocation32_spill] sm:$0xff] %v5234_v13  ;;  %v5240_v23 = vld [vmem:[#allocation5 + $0x1c8] sm:$0xff]  ;;  %v5246_v26 = vld [vmem:[#allocation5 + $0x98] sm:$0xff] }
 0x138   : > { %1266 = vmatpush.msra.mxu1 %v4857_v46  ;;  %1224 = vmatpush.msrb.mxu3 %v7263_v38  ;;  %v7266_v46 = vld [vmem:[#allocation89_spill] sm:$0xff]  ;;  %7276 = vst [vmem:[#allocation33_spill] sm:$0xff] %v5237_v16  ;;  %v5255_v38 = vld [vmem:[#allocation5 + $0x68] sm:$0xff] }
 0x139   : > { %1161 = vmatpush.msrb.mxu2 %v7261_v59  ;;  %1143 = vmatmul.f32.vlgmr.msrb.gmra.mxu1 %v5041_v52  ;;  %7277 = vst [vmem:[#allocation48_spill] sm:$0xff] %v5240_v23  ;;  %v5249_v59 = vld [vmem:[#allocation5 + $0x2f0] sm:$0xff] }
 0x13a   : > { %1077 = vmatmul.f32.gmra.mxu2 %v5061_v17  ;;  %1100 = vmatmul.f32.gmra.mxu3 %v5061_v17  ;;  %7278 = vst [vmem:[#allocation34_spill] sm:$0xff] %v5243_v27 }
 0x13b   : > { %1123 = vmatmul.f32.gmra.mxu0 %v5061_v17  ;;  %1162 = vmatpush.msrb.mxu2 %v7262_v63  ;;  %7279 = vst [vmem:[#allocation35_spill] sm:$0xff] %v5246_v26  ;;  %v5252_v63 = vld [vmem:[#allocation5 + $0x190] sm:$0xff] }
 0x13c   : > { %1267 = vmatpush.msra.mxu1 %v4865_v1  ;;  %1225 = vmatpush.msrb.mxu3 %v4831_v43  ;;  %v5101_v1 = vld [vmem:[#allocation5 + $0x2d0] sm:$0xff]  ;;  %7280 = vst [vmem:[#allocation36_spill] sm:$0xff] %v5249_v59 }
 0x13d   : > { %1163 = vmatpush.msrb.mxu2 %v7264_v40  ;;  %1245 = vmatpush.msra.mxu0 %v7265_v54  ;;  %v5113_v43 = vld [vmem:[#allocation5 + $0x270] sm:$0xff]  ;;  %7281 = vst [vmem:[#allocation37_spill] sm:$0xff] %v5252_v63  ;;  %v5258_v40 = vld [vmem:[#allocation5 + $0x198] sm:$0xff]  ;;  %v5261_v54 = vld [vmem:[#allocation5 + $0x2c0] sm:$0xff] }
 0x13e   : > { %1268 = vmatpush.msra.mxu1 %v4870_v58  ;;  %1226 = vmatpush.msrb.mxu3 %v4838_v50  ;;  %v5107_v50 = vld [vmem:[#allocation5 + $0x2a0] sm:$0xff]  ;;  %v5122_v58 = vld [vmem:[#allocation5 + $0x2d8] sm:$0xff]  ;;  %7282 = vst [vmem:[#allocation38_spill] sm:$0xff] %v5255_v38 }
 0x13f   : > { %1164 = vmatpush.msrb.mxu2 %v7266_v46  ;;  %1246 = vmatpush.msra.mxu0 %v4905_v6  ;;  %v5130_v6 = vld [vmem:[#allocation5 + $0x2a8] sm:$0xff]  ;;  %7283 = vst [vmem:[#allocation40_spill] sm:$0xff] %v5258_v40  ;;  %v5264_v46 = vld [vmem:[#allocation5 + $0x160] sm:$0xff] }
 0x140   : > { %1269 = vmatpush.msra.mxu1 %v4907_v10  ;;  %1227 = vmatpush.msrb.mxu3 %v7268_v61  ;;  %v5138_v10 = vld [vmem:[#allocation5 + $0x278] sm:$0xff]  ;;  %7284 = vst [vmem:[#allocation41_spill] sm:$0xff] %v5261_v54  ;;  %v5270_v61 = vld [vmem:[#allocation5 + $0x168] sm:$0xff] }
 0x141   : > { %1165 = vmatpush.msrb.mxu2 %v7267_v34  ;;  %1247 = vmatpush.msra.mxu0 %v4912_v15  ;;  %v5143_v15 = vld [vmem:[#allocation5 + $0x1b0] sm:$0xff]  ;;  %7285 = vst [vmem:[#allocation43_spill] sm:$0xff] %v5264_v46  ;;  %v5267_v34 = vld [vmem:[#allocation5 + $0x38] sm:$0xff] }
 0x142   : > { %1166 = vmatmul.f32.vlgmr.msrb.gmra.mxu2 %v5041_v52  ;;  %1146 = vmatmul.f32.gmra.mxu1 %v5061_v17  ;;  %7286 = vst [vmem:[#allocation44_spill] sm:$0xff] %v5267_v34 }
 0x143   : > { %1327 = vmatpush.msra.mxu2 %v5101_v1  ;;  %1228 = vmatpush.msrb.mxu3 %v4853_v55  ;;  %v5119_v55 = vld [vmem:[#allocation5 + $0x240] sm:$0xff]  ;;  %7287 = vst [vmem:[#allocation46_spill] sm:$0xff] %v5270_v61 }
 0x144   : > { %1270 = vmatpush.msra.mxu1 %v4914_v20  ;;  %1248 = vmatpush.msra.mxu0 %v4919_v24  ;;  %v5146_v20 = vld [vmem:[#allocation5 + $0x248] sm:$0xff]  ;;  %v5151_v24 = vld [vmem:[#allocation5 + $0x180] sm:$0xff] }
 0x145   : > { %1328 = vmatpush.msra.mxu2 %v5107_v50  ;;  %1229 = vmatpush.msrb.mxu3 %v4860_v0  ;;  %v5127_v0 = vld [vmem:[#allocation5 + $0x210] sm:$0xff] }
 0x146   : > { %1271 = vmatpush.msra.mxu1 %v4921_v28  ;;  %1249 = vmatpush.msra.mxu0 %v4926_v2  ;;  %v5154_v28 = vld [vmem:[#allocation5 + $0x218] sm:$0xff]  ;;  %v5159_v2 = vld [vmem:[#allocation5 + $0x150] sm:$0xff] }
 0x147   : > { %1329 = vmatpush.msra.mxu2 %v5113_v43  ;;  %1230 = vmatpush.msrb.mxu3 %v4902_v4  ;;  %v5135_v4 = vld [vmem:[#allocation5 + $0x1e0] sm:$0xff] }
 0x148   : > { %1272 = vmatpush.msra.mxu1 %v4928_v32  ;;  %1250 = vmatpush.msra.mxu0 %v4933_v3  ;;  %v5162_v32 = vld [vmem:[#allocation5 + $0x1e8] sm:$0xff]  ;;  %v5165_v3 = vld [vmem:[#allocation5 + $0x2e0] sm:$0xff] }
 0x149   : > { %1330 = vmatpush.msra.mxu2 %v5119_v55  ;;  %1350 = vmatpush.msra.mxu3 %v5122_v58 }
 0x14a   : > { %1169 = vmatmul.f32.gmra.mxu2 %v5061_v17  ;;  %1273 = vmatpush.msra.mxu1 %v4935_v33  ;;  %v5168_v33 = vld [vmem:[#allocation5 + $0x2e8] sm:$0xff] }
 0x14b   : > { %1331 = vmatpush.msra.mxu2 %v5127_v0  ;;  %1351 = vmatpush.msra.mxu3 %v5130_v6 }
 0x14c   : > { %1251 = vmatpush.msra.mxu0 %v4940_v5  ;;  %1274 = vmatpush.msra.mxu1 %v4942_v36  ;;  %v5171_v5 = vld [vmem:[#allocation5 + $0x120] sm:$0xff]  ;;  %v5174_v36 = vld [vmem:[#allocation5 + $0x1b8] sm:$0xff] }
 0x14d   : > { %1332 = vmatpush.msra.mxu2 %v5135_v4  ;;  %1352 = vmatpush.msra.mxu3 %v5138_v10 }
 0x14e   : > { %1252 = vmatpush.msra.mxu0 %v4947_v8  ;;  %1275 = vmatpush.msra.mxu1 %v4949_v37  ;;  %v5177_v8 = vld [vmem:[#allocation5 + $0x2b0] sm:$0xff]  ;;  %v5180_v37 = vld [vmem:[#allocation5 + $0x2b8] sm:$0xff] }
 0x14f   : > { %1333 = vmatpush.msra.mxu2 %v5143_v15  ;;  %1353 = vmatpush.msra.mxu3 %v5146_v20 }
 0x150   : > { %1253 = vmatpush.msra.mxu0 %v4954_v12  ;;  %1276 = vmatpush.msra.mxu1 %v4956_v48  ;;  %v5183_v12 = vld [vmem:[#allocation5 + $0xf0] sm:$0xff]  ;;  %v5186_v48 = vld [vmem:[#allocation5 + $0x188] sm:$0xff] }
 0x151   : > { %1334 = vmatpush.msra.mxu2 %v5151_v24  ;;  %1354 = vmatpush.msra.mxu3 %v5154_v28 }
 0x152   : > { %1373 = vmatpush.msrb.mxu0 %v5165_v3  ;;  %1396 = vmatpush.msrb.mxu1 %v5168_v33 }
 0x153   : > { %1335 = vmatpush.msra.mxu2 %v5159_v2  ;;  %1355 = vmatpush.msra.mxu3 %v5162_v32 }
 0x154   : > { %1374 = vmatpush.msrb.mxu0 %v5177_v8  ;;  %1397 = vmatpush.msrb.mxu1 %v5180_v37 }
 0x155   : > { %1336 = vmatpush.msra.mxu2 %v5171_v5  ;;  %1356 = vmatpush.msra.mxu3 %v5174_v36 }
 0x156   : > { %1375 = vmatpush.msrb.mxu0 %v5189_v7  ;;  %1398 = vmatpush.msrb.mxu1 %v5192_v56 }
 0x157   : > { %1337 = vmatpush.msra.mxu2 %v5183_v12  ;;  %1357 = vmatpush.msra.mxu3 %v5186_v48 }
 0x158   : > { %1376 = vmatpush.msrb.mxu0 %v5201_v47  ;;  %1399 = vmatpush.msrb.mxu1 %v5204_v14 }
 0x159   : > { %1338 = vmatpush.msra.mxu2 %v5195_v44  ;;  %1358 = vmatpush.msra.mxu3 %v5198_v62 }
 0x15a   : > { %1377 = vmatpush.msrb.mxu0 %v5213_v11  ;;  %1400 = vmatpush.msrb.mxu1 %v5216_v39 }
 0x15b   : > { %1339 = vmatpush.msra.mxu2 %v5207_v21  ;;  %1359 = vmatpush.msra.mxu3 %v5210_v18 }
 0x15c   : > { %1378 = vmatpush.msrb.mxu0 %v5225_v25  ;;  %1401 = vmatpush.msrb.mxu1 %v5228_v49 }
 0x15d   : > { %1340 = vmatpush.msra.mxu2 %v5219_v41  ;;  %1360 = vmatpush.msra.mxu3 %v5222_v19  ;;  %v3211_v19 = vld [vmem:[%s4442_s28 + $0x68] sm:$0xff] }
 0x15e   : > { %1379 = vmatpush.msrb.mxu0 %v5237_v16  ;;  %1402 = vmatpush.msrb.mxu1 %v5240_v23 }
 0x15f   : > { %1341 = vmatpush.msra.mxu2 %v5231_v57  ;;  %1361 = vmatpush.msra.mxu3 %v5234_v13  ;;  %v7311_v57 = vld [vmem:[#allocation39_spill] sm:$0xff] }
 0x160   : > { %1380 = vmatpush.msrb.mxu0 %v5252_v63  ;;  %1403 = vmatpush.msrb.mxu1 %v5258_v40  ;;  %v5276_v40 = vld [vmem:[#allocation5 + $0x130] sm:$0xff] }
 0x161   : > { %1342 = vmatpush.msra.mxu2 %v5243_v27  ;;  %1362 = vmatpush.msra.mxu3 %v5246_v26  ;;  %7289 = vst [vmem:[#allocation51_spill] sm:$0xff] %v5276_v40 }
 0x162   : > { %1381 = vmatpush.msrb.mxu0 %v5264_v46  ;;  %1404 = vmatpush.msrb.mxu1 %v5270_v61  ;;  %v5282_v46 = vld [vmem:[#allocation5 + $0x138] sm:$0xff]  ;;  %v5288_v61 = vld [vmem:[#allocation5 + $0x100] sm:$0xff] }
 0x163   : > { %1419 = vmatpush.msrb.mxu2 %v5249_v59  ;;  %1363 = vmatpush.msra.mxu3 %v5255_v38  ;;  %v5273_v38 = vld [vmem:[#allocation5 + $0x290] sm:$0xff]  ;;  %7291 = vst [vmem:[#allocation54_spill] sm:$0xff] %v5282_v46 }
 0x164   : > { %7288 = vst [vmem:[#allocation47_spill] sm:$0xff] %v5273_v38  ;;  %1382 = vmatpush.msrb.mxu0 %v5276_v40  ;;  %1405 = vmatpush.msrb.mxu1 %v5282_v46  ;;  %v5295_v40 = vld [vmem:[#allocation5 + $0xd0] sm:$0xff]  ;;  %v7310_v46 = vld [vmem:[#allocation27_spill] sm:$0xff] }
 0x165   : > { %1420 = vmatpush.msrb.mxu2 %v5261_v54  ;;  %1364 = vmatpush.msra.mxu3 %v5267_v34  ;;  %v5279_v54 = vld [vmem:[#allocation5 + $0x8] sm:$0xff]  ;;  %v5285_v34 = vld [vmem:[#allocation5 + $0x260] sm:$0xff]  ;;  %7293 = vst [vmem:[#allocation57_spill] sm:$0xff] %v5288_v61 }
 0x166   : > { %7290 = vst [vmem:[#allocation52_spill] sm:$0xff] %v5279_v54  ;;  %1383 = vmatpush.msrb.mxu0 %v5288_v61  ;;  %v5305_v61 = vld [vmem:[#allocation5 + $0xa8] sm:$0xff] }
 0x167   : > { %1421 = vmatpush.msrb.mxu2 %v5273_v38  ;;  %1365 = vmatpush.msra.mxu3 %v5279_v54  ;;  %7292 = vst [vmem:[#allocation55_spill] sm:$0xff] %v5285_v34  ;;  %v5291_v38 = vld [vmem:[#allocation5 + $0x108] sm:$0xff]  ;;  %v5298_v54 = vld [vmem:[#allocation5 + $0xd8] sm:$0xff] }
 0x168   : > { %7294 = vst [vmem:[#allocation50_spill] sm:$0xff] %v5291_v38  ;;  %1406 = vmatpush.msrb.mxu1 %v5291_v38  ;;  %1384 = vmatpush.msrb.mxu0 %v5295_v40 }
 0x169   : > { %1422 = vmatpush.msrb.mxu2 %v5285_v34  ;;  %7295 = vst [vmem:[#allocation49_spill] sm:$0xff] %v5295_v40  ;;  %v5302_v34 = vld [vmem:[#allocation5 + $0xa0] sm:$0xff]  ;;  %v5312_v40 = vld [vmem:[#allocation5 + $0x78] sm:$0xff] }
 0x16a   : > { %7296 = vst [vmem:[#allocation63_spill] sm:$0xff] %v5298_v54  ;;  %1407 = vmatpush.msrb.mxu1 %v5298_v54  ;;  %1385 = vmatpush.msrb.mxu0 %v5302_v34 }
 0x16b   : > { %1423 = vmatpush.msrb.mxu2 %v4683_v60  ;;  %7297 = vst [vmem:[#allocation65_spill] sm:$0xff] %v5302_v34  ;;  %v5309_v60 = vld [vmem:[#allocation5 + $0x70] sm:$0xff]  ;;  %v5319_v34 = vld [vmem:[#allocation5 + $0x48] sm:$0xff] }
 0x16c   : > { %7298 = vst [vmem:[#allocation53_spill] sm:$0xff] %v5305_v61  ;;  %1408 = vmatpush.msrb.mxu1 %v5305_v61  ;;  %1386 = vmatpush.msrb.mxu0 %v5309_v60 }
 0x16d   : > { %1424 = vmatpush.msrb.mxu2 %v4690_v31  ;;  %7299 = vst [vmem:[#allocation64_spill] sm:$0xff] %v5309_v60  ;;  %v5316_v31 = vld [vmem:[#allocation5 + $0x40] sm:$0xff]  ;;  %v5326_v60 = vld [vmem:[#allocation5 + $0x18] sm:$0xff] }
 0x16e   : > { %7300 = vst [vmem:[#allocation68_spill] sm:$0xff] %v5312_v40  ;;  %1409 = vmatpush.msrb.mxu1 %v5312_v40  ;;  %1387 = vmatpush.msrb.mxu0 %v5316_v31  ;;  %v7309_v40 = vld [vmem:[#allocation88_spill] sm:$0xff] }
 0x16f   : > { %1425 = vmatpush.msrb.mxu2 %v4698_v53  ;;  %7301 = vst [vmem:[#allocation56_spill] sm:$0xff] %v5316_v31  ;;  %v5323_v53 = vld [vmem:[#allocation5 + $0x10] sm:$0xff] }
 0x170   : > { %7302 = vst [vmem:[#allocation67_spill] sm:$0xff] %v5319_v34  ;;  %1410 = vmatpush.msrb.mxu1 %v5319_v34  ;;  %1388 = vmatpush.msrb.mxu0 %v5323_v53  ;;  %v7306_v31 = vld [vmem:[#allocation76_spill] sm:$0xff] }
 0x171   : > { %1426 = vmatpush.msrb.mxu2 %v4704_v29  ;;  %7303 = vst [vmem:[#allocation71_spill] sm:$0xff] %v5323_v53  ;;  %v7305_v29 = vld [vmem:[#allocation72_spill] sm:$0xff] }
 0x172   : > { %7304 = vst [vmem:[#allocation58_spill] sm:$0xff] %v5326_v60  ;;  %1411 = vmatpush.msrb.mxu1 %v5326_v60  ;;  %v7307_v34 = vld [vmem:[#allocation80_spill] sm:$0xff] }
 0x173   : > { %1427 = vmatpush.msrb.mxu2 %v4714_v35  ;;  %v7308_v35 = vld [vmem:[#allocation84_spill] sm:$0xff] }
 0x175   : > { %1428 = vmatpush.msrb.mxu2 %v4726_v51 }
 0x177   : > { %1429 = vmatpush.msrb.mxu2 %v4739_v45 }
 0x179   : > { %1430 = vmatpush.msrb.mxu2 %v7305_v29 }
 0x17b   : > { %1431 = vmatpush.msrb.mxu2 %v7306_v31  ;;  %v3210_v31 = vld [vmem:[%s4442_s28 + $0x60] sm:$0xff] }
 0x17d   : > { %1432 = vmatpush.msrb.mxu2 %v7307_v34 }
 0x17f   : > { %1433 = vmatpush.msrb.mxu2 %v7308_v35 }
 0x181   : > { %1434 = vmatpush.msrb.mxu2 %v7309_v40 }
 0x19f   : > { %v986_v53 = vpop.f32.mrf.mxu0 }
 0x1a4   : > { %v940_v61 = vpop.f32.mrf.mxu2  ;;  %v963_v54 = vpop.f32.mrf.mxu3 }
 0x1a6   : > { %v1052_v60 = vpop.f32.mrf.mxu1 }
 0x1a7   : > { %v1173_v51 = vadd.f32 %v1052_v60, %v7310_v46 }
 0x1a8   : > { %v989_v38 = vpop.f32.mrf.mxu0 }
 0x1a9   : > { %v1179_v63 = vadd.f32 %v1173_v51, %v940_v61  ;;  %v3213_v51 = vld [vmem:[%s4442_s28 + $0x78] sm:$0xff] }
 0x1ab   : > { %v1181_v29 = vmul.f32 0.5, %v1179_v63 }
 0x1ad   : > { %v943_v45 = vpop.f32.mrf.mxu2  ;;  %v966_v59 = vpop.f32.mrf.mxu3  ;;  %3411 = vtanh.f32 %v1181_v29  ;;  %v1199_v29 = vadd.f32 %v5011_v22, %v986_v53 }
 0x1ae   : > { %v1055_v35 = vpop.f32.mrf.mxu1 }
 0x1af   : > { %v1176_v40 = vadd.f32 %v1055_v35, %v7310_v46 }
 0x1b0   : > { %v1121_v34 = vpop.f32.mrf.mxu0 }
 0x1b1   : > { %v1291_v26 = vadd.f32 %v3210_v31, %v1121_v34  ;;  %v1180_v27 = vadd.f32 %v1176_v40, %v943_v45 }
 0x1b3   : > { %v1293_v23 = vmul.f32 0.5, %v1291_v26  ;;  %v3412_v13 = vpop.eup %3411  ;;  %v1182_v61 = vmul.f32 0.5, %v1180_v27 }
 0x1b4   : > { %v1185_v25 = vadd.f32 1.0, %v3412_v13 }
 0x1b5   : > { %v1075_v16 = vpop.f32.mrf.mxu2  ;;  %v1098_v60 = vpop.f32.mrf.mxu3  ;;  %3413 = vtanh.f32 %v1182_v61 }
 0x1b6   : > { %v1174_v49 = vadd.f32 %v1075_v16, %v7311_v57  ;;  %v1187_v31 = vmul.f32 0.5, %v1185_v25  ;;  %3415 = vtanh.f32 %v1293_v23  ;;  %v1144_v45 = vpop.f32.mrf.mxu1  ;;  %v1175_v40 = vadd.f32 %v1098_v60, %v5004_v42  ;;  %v3214_v25 = vld [vmem:[%s4442_s28 + $0x80] sm:$0xff] }
 0x1b7   : > { %v1301_v35 = vadd.f32 %v3211_v19, %v1144_v45  ;;  %v1200_v19 = vadd.f32 %v5011_v22, %v989_v38  ;;  %v5351_v38 = vld [vmem:[%s6836_s4] ss:$0 sm:$0xff] }
 0x1b8   : > { %v1189_v63 = vadd.f32 %v1174_v49, %v963_v54  ;;  %v1124_v41 = vpop.f32.mrf.mxu0  ;;  %v1201_v16 = vmul.f32 %v1199_v29, %v1187_v31 }
 0x1b9   : > { %v1292_v34 = vadd.f32 %v3213_v51, %v1124_v41  ;;  %v1303_v27 = vmul.f32 0.5, %v1301_v35 }
 0x1ba   : > { %v1191_v26 = vmul.f32 0.5, %v1189_v63  ;;  %v1203_v46 = vadd.f32 %v1201_v16, %v1175_v40 }
 0x1bb   : > { %v1294_v13 = vmul.f32 0.5, %v1292_v34  ;;  %v3414_v49 = vpop.eup %3413 }
 0x1bc   : > { %3417 = vtanh.f32 %v1191_v26  ;;  %v3416_v61 = vpop.eup %3415  ;;  %v1186_v53 = vadd.f32 1.0, %v3414_v49 }
 0x1bd   : > { %v1078_v39 = vpop.f32.mrf.mxu2  ;;  %3419 = vtanh.f32 %v1303_v27  ;;  %v1101_v23 = vpop.f32.mrf.mxu3  ;;  %v1297_v29 = vadd.f32 1.0, %v3416_v61  ;;  %v3212_v61 = vld [vmem:[%s4442_s28 + $0x70] sm:$0xff] }
 0x1be   : > { %v1177_v54 = vadd.f32 %v1078_v39, %v7311_v57  ;;  %3421 = vtanh.f32 %v1203_v46  ;;  %v1188_v51 = vmul.f32 0.5, %v1186_v53  ;;  %v1178_v39 = vadd.f32 %v1101_v23, %v5004_v42 }
 0x1bf   : > { %3423 = vtanh.f32 %v1294_v13  ;;  %v1147_v60 = vpop.f32.mrf.mxu1  ;;  %v1299_v22 = vmul.f32 0.5, %v1297_v29 }
 0x1c0   : > { %v1190_v41 = vadd.f32 %v1177_v54, %v966_v59  ;;  %v1302_v34 = vadd.f32 %v3214_v25, %v1147_v60  ;;  %v1202_v26 = vmul.f32 %v1200_v19, %v1188_v51 }
 0x1c2   : > { %v3418_v63 = vpop.eup %3417  ;;  %v1192_v31 = vmul.f32 0.5, %v1190_v41  ;;  %v1304_v35 = vmul.f32 0.5, %v1302_v34  ;;  %v1204_v59 = vadd.f32 %v1202_v26, %v1178_v39 }
 0x1c3   : > { %v1195_v45 = vadd.f32 1.0, %v3418_v63  ;;  %v3420_v40 = vpop.eup %3419 }
 0x1c4   : > { %3425 = vtanh.f32 %v1192_v31  ;;  %v3422_v27 = vpop.eup %3421  ;;  %v1307_v41 = vadd.f32 1.0, %v3420_v40  ;;  %v5362_v40 = vld [vmem:[#allocation5 + $0x2f8] sm:$0xff] }
 0x1c5   : > { %v1197_v46 = vmul.f32 0.5, %v1195_v45  ;;  %v1167_v16 = vpop.f32.mrf.mxu2  ;;  %v3424_v49 = vpop.eup %3423  ;;  %3427 = vtanh.f32 %v1304_v35 }
 0x1c6   : > { %v1311_v13 = vadd.f32 %v5351_v38, %v1167_v16  ;;  %3429 = vtanh.f32 %v1204_v59  ;;  %v1298_v51 = vadd.f32 1.0, %v3424_v49  ;;  %v1309_v45 = vmul.f32 0.5, %v1307_v41  ;;  %v3215_v59 = vld [vmem:[%s4442_s28 + $0x88] sm:$0xff]  ;;  %v5379_v41 = vld [vmem:[#allocation7 + $0x158] sm:$0xff] }
 0x1c7   : > { %v1207_v54 = vsub.f32 1.0, %v1197_v46  ;;  %v1211_v25 = vmul.f32 %v1197_v46, %v5027_v9  ;;  %v5366_v16 = vld [vmem:[#allocation7 + $0x168] sm:$0xff] }
 0x1c8   : > { %v1313_v53 = vmul.f32 %v1311_v13, %v1299_v22  ;;  %v1300_v9 = vmul.f32 0.5, %v1298_v51  ;;  %v5372_v13 = vld [vmem:[#allocation5 + $0x2c8] sm:$0xff]  ;;  %v5382_v51 = vld [vmem:[#allocation5 + $0x298] sm:$0xff] }
 0x1c9   : > { %v1209_v23 = vmul.f32 %v3422_v27, %v1207_v54  ;;  %v5369_v27 = vld [vmem:[#allocation7 + $0x170] sm:$0xff]  ;;  %v1319_v54 = vsub.f32 1.0, %v1309_v45 }
 0x1ca   : > { %v3426_v19 = vpop.eup %3425  ;;  %v1315_v60 = vadd.f32 %v3212_v61, %v1313_v53 }
 0x1cb   : > { %v1196_v63 = vadd.f32 1.0, %v3426_v19  ;;  %v5356_v29 = vadd.f32 %v1211_v25, %v1209_v23  ;;  %v3428_v31 = vpop.eup %3427  ;;  %v5376_v25 = vld [vmem:[#allocation7 + $0x150] sm:$0xff] }
 0x1cc   : > { %3431 = vtanh.f32 %v1315_v60  ;;  %v3430_v26 = vpop.eup %3429  ;;  %v1308_v61 = vadd.f32 1.0, %v3428_v31  ;;  %v1323_v60 = vmul.f32 %v1309_v45, %v5041_v52  ;;  %v5388_v31 = vld [vmem:[#allocation7 + $0x138] sm:$0xff]  ;;  %v5406_v45 = vld [vmem:[#allocation7 + $0x120] sm:$0xff] }
 0x1cd   : > { %v1198_v34 = vmul.f32 0.5, %v1196_v63  ;;  %v1170_v39 = vpop.f32.mrf.mxu2  ;;  %1231 = vmatmul.f32.vlgmr.msrb.gmra.mxu3 %v5356_v29  ;;  %1254 = vmatmul.f32.vlgmr.msra.gmra.mxu0 %v5356_v29  ;;  %v5402_v52 = vld [vmem:[#allocation5 + $0x238] sm:$0xff] }
 0x1ce   : > { %v1312_v35 = vadd.f32 %v5351_v38, %v1170_v39  ;;  %1277 = vmatmul.f32.vlgmr.msra.gmra.mxu1 %v5356_v29  ;;  %1442 = vmatpush.msrb.mxu3 %v5362_v40  ;;  %v5394_v39 = vld [vmem:[#allocation5 + $0x268] sm:$0xff] }
 0x1cf   : > { %v1208_v46 = vsub.f32 1.0, %v1198_v34  ;;  %1507 = vmatpush.msra.mxu0 %v5366_v16  ;;  %1530 = vmatpush.msra.mxu1 %v5369_v27  ;;  %v1212_v49 = vmul.f32 %v1198_v34, %v5043_v30  ;;  %v5391_v34 = vld [vmem:[#allocation7 + $0x140] sm:$0xff] }
 0x1d0   : > { %v1314_v22 = vmul.f32 %v1312_v35, %v1300_v9  ;;  %1443 = vmatpush.msrb.mxu3 %v5372_v13  ;;  %v1310_v9 = vmul.f32 0.5, %v1308_v61  ;;  %v5409_v35 = vld [vmem:[#allocation5 + $0x208] sm:$0xff]  ;;  %v5421_v61 = vld [vmem:[#allocation5 + $0x1d8] sm:$0xff] }
 0x1d1   : > { %v1210_v53 = vmul.f32 %v3430_v26, %v1208_v46  ;;  %1508 = vmatpush.msra.mxu0 %v5376_v25  ;;  %1531 = vmatpush.msra.mxu1 %v5379_v41  ;;  %v5412_v46 = vld [vmem:[#allocation7 + $0x178] sm:$0xff]  ;;  %7313 = vst [vmem:[#allocation70_spill] sm:$0xff] %v5421_v61 }
 0x1d2   : > { %v3432_v23 = vpop.eup %3431  ;;  %v1316_v19 = vadd.f32 %v3215_v59, %v1314_v22  ;;  %1444 = vmatpush.msrb.mxu3 %v5382_v51  ;;  %v1320_v59 = vsub.f32 1.0, %v1310_v9  ;;  %v5415_v22 = vld [vmem:[#allocation7 + $0x108] sm:$0xff] }
 0x1d3   : > { %v1321_v30 = vmul.f32 %v3432_v23, %v1319_v54  ;;  %v5386_v63 = vadd.f32 %v1212_v49, %v1210_v53  ;;  %1509 = vmatpush.msra.mxu0 %v5388_v31  ;;  %1532 = vmatpush.msra.mxu1 %v5391_v34  ;;  %v5418_v49 = vld [vmem:[#allocation7 + $0x128] sm:$0xff]  ;;  %v5424_v53 = vld [vmem:[#allocation7 + $0x160] sm:$0xff]  ;;  %v1324_v23 = vmul.f32 %v1310_v9, %v5061_v17  ;;  %v5445_v17 = vld [vmem:[#allocation5 + $0x178] sm:$0xff] }
 0x1d4   : > { %3433 = vtanh.f32 %v1316_v19  ;;  %1445 = vmatpush.msrb.mxu3 %v5394_v39  ;;  %7312 = vst [vmem:[#allocation59_spill] sm:$0xff] %v5418_v49  ;;  %v5449_v9 = vld [vmem:[#allocation7 + $0xd8] sm:$0xff] }
 0x1d5   : > { %v5397_v26 = vadd.f32 %v1323_v60, %v1321_v30  ;;  %1234 = vmatmul.f32.gmra.mxu3 %v5386_v63  ;;  %1257 = vmatmul.f32.gmra.mxu0 %v5386_v63  ;;  %7314 = vst [vmem:[#allocation60_spill] sm:$0xff] %v5424_v53  ;;  %v5428_v60 = vld [vmem:[#allocation7 + $0xf0] sm:$0xff] }
 0x1d6   : > { %1280 = vmatmul.f32.gmra.mxu1 %v5386_v63  ;;  %1446 = vmatpush.msrb.mxu3 %v5402_v52  ;;  %v5431_v30 = vld [vmem:[#allocation7 + $0x110] sm:$0xff]  ;;  %7315 = vst [vmem:[#allocation74_spill] sm:$0xff] %v5445_v17 }
 0x1d7   : > { %1343 = vmatmul.f32.vlgmr.msra.gmra.mxu2 %v5397_v26  ;;  %1510 = vmatpush.msra.mxu0 %v5406_v45  ;;  %7316 = vst [vmem:[#allocation75_spill] sm:$0xff] %v5449_v9 }
 0x1d8   : > { %1447 = vmatpush.msrb.mxu3 %v5409_v35  ;;  %1553 = vmatpush.msra.mxu2 %v5412_v46 }
 0x1d9   : > { %1511 = vmatpush.msra.mxu0 %v5415_v22  ;;  %1533 = vmatpush.msra.mxu1 %v5418_v49  ;;  %v5434_v49 = vld [vmem:[#allocation5 + $0x1a8] sm:$0xff] }
 0x1da   : > { %v3434_v54 = vpop.eup %3433  ;;  %1448 = vmatpush.msrb.mxu3 %v5421_v61  ;;  %1554 = vmatpush.msra.mxu2 %v5424_v53  ;;  %v5437_v61 = vld [vmem:[#allocation7 + $0x148] sm:$0xff] }
 0x1db   : > { %v1322_v19 = vmul.f32 %v3434_v54, %v1320_v59  ;;  %1512 = vmatpush.msra.mxu0 %v5428_v60  ;;  %1534 = vmatpush.msra.mxu1 %v5431_v30  ;;  %v5452_v59 = vld [vmem:[#allocation5 + $0x148] sm:$0xff]  ;;  %v5455_v54 = vld [vmem:[#allocation7 + $0x130] sm:$0xff] }
 0x1dc   : > { %1449 = vmatpush.msrb.mxu3 %v5434_v49  ;;  %1555 = vmatpush.msra.mxu2 %v5437_v61  ;;  %7317 = vst [vmem:[#allocation61_spill] sm:$0xff] %v5452_v59 }
 0x1dd   : > { %v5440_v53 = vadd.f32 %v1324_v23, %v1322_v19  ;;  %1366 = vmatmul.f32.vlgmr.msra.gmra.mxu3 %v5397_v26  ;;  %1389 = vmatmul.f32.vlgmr.msrb.gmra.mxu0 %v5397_v26  ;;  %7318 = vst [vmem:[#allocation93_spill] sm:$0xff] %v5455_v54  ;;  %v5458_v23 = vld [vmem:[#allocation7 + $0xc0] sm:$0xff]  ;;  %v5461_v19 = vld [vmem:[#allocation7 + $0xf8] sm:$0xff] }
 0x1de   : > { %1412 = vmatmul.f32.vlgmr.msrb.gmra.mxu1 %v5397_v26  ;;  %1450 = vmatpush.msrb.mxu3 %v5445_v17  ;;  %7319 = vst [vmem:[#allocation78_spill] sm:$0xff] %v5458_v23  ;;  %v5464_v17 = vld [vmem:[#allocation5 + $0x118] sm:$0xff] }
 0x1df   : > { %1346 = vmatmul.f32.gmra.mxu2 %v5440_v53  ;;  %1513 = vmatpush.msra.mxu0 %v5449_v9  ;;  %7320 = vst [vmem:[#allocation79_spill] sm:$0xff] %v5461_v19  ;;  %v5467_v9 = vld [vmem:[#allocation7 + $0x118] sm:$0xff] }
 0x1e0   : > { %1451 = vmatpush.msrb.mxu3 %v5452_v59  ;;  %1556 = vmatpush.msra.mxu2 %v5455_v54  ;;  %7321 = vst [vmem:[#allocation62_spill] sm:$0xff] %v5464_v17  ;;  %v5470_v59 = vld [vmem:[#allocation7 + $0xa8] sm:$0xff]  ;;  %v5473_v54 = vld [vmem:[#allocation7 + $0xe0] sm:$0xff] }
 0x1e1   : > { %1514 = vmatpush.msra.mxu0 %v5458_v23  ;;  %1535 = vmatpush.msra.mxu1 %v5461_v19  ;;  %7322 = vst [vmem:[#allocation66_spill] sm:$0xff] %v5467_v9  ;;  %v5476_v23 = vld [vmem:[#allocation5 + $0xe8] sm:$0xff]  ;;  %v5479_v19 = vld [vmem:[#allocation7 + $0x100] sm:$0xff] }
 0x1e2   : > { %1452 = vmatpush.msrb.mxu3 %v5464_v17  ;;  %1557 = vmatpush.msra.mxu2 %v5467_v9  ;;  %7323 = vst [vmem:[#allocation82_spill] sm:$0xff] %v5470_v59  ;;  %v5485_v9 = vld [vmem:[#allocation5 + $0xb8] sm:$0xff]  ;;  %v5501_v17 = vld [vmem:[#allocation7 + $0xc8] sm:$0xff] }
 0x1e3   : > { %1515 = vmatpush.msra.mxu0 %v5470_v59  ;;  %7324 = vst [vmem:[#allocation69_spill] sm:$0xff] %v5473_v54  ;;  %1536 = vmatpush.msra.mxu1 %v5473_v54  ;;  %v5489_v54 = vld [vmem:[#allocation7 + $0x90] sm:$0xff]  ;;  %v5498_v59 = vld [vmem:[#allocation7 + $0x78] sm:$0xff] }
 0x1e4   : > { %7325 = vst [vmem:[#allocation86_spill] sm:$0xff] %v5476_v23  ;;  %1453 = vmatpush.msrb.mxu3 %v5476_v23  ;;  %1558 = vmatpush.msra.mxu2 %v5479_v19  ;;  %v5492_v23 = vld [vmem:[#allocation5 + $0x88] sm:$0xff] }
 0x1e5   : > { %7326 = vst [vmem:[#allocation83_spill] sm:$0xff] %v5479_v19  ;;  %1369 = vmatmul.f32.gmra.mxu3 %v5440_v53  ;;  %1392 = vmatmul.f32.gmra.mxu0 %v5440_v53  ;;  %v5495_v19 = vld [vmem:[#allocation7 + $0xe8] sm:$0xff] }
 0x1e6   : > { %1415 = vmatmul.f32.gmra.mxu1 %v5440_v53  ;;  %7327 = vst [vmem:[#allocation73_spill] sm:$0xff] %v5485_v9  ;;  %1454 = vmatpush.msrb.mxu3 %v5485_v9  ;;  %v5504_v9 = vld [vmem:[#allocation5 + $0x58] sm:$0xff] }
 0x1e7   : > { %1435 = vmatmul.f32.vlgmr.msrb.gmra.mxu2 %v5397_v26  ;;  %7328 = vst [vmem:[#allocation90_spill] sm:$0xff] %v5489_v54  ;;  %1516 = vmatpush.msra.mxu0 %v5489_v54  ;;  %v5507_v54 = vld [vmem:[#allocation7 + $0xd0] sm:$0xff] }
 0x1e8   : > { %7329 = vst [vmem:[#allocation87_spill] sm:$0xff] %v5492_v23  ;;  %1455 = vmatpush.msrb.mxu3 %v5492_v23  ;;  %1559 = vmatpush.msra.mxu2 %v5495_v19  ;;  %v5510_v23 = vld [vmem:[#allocation7 + $0x60] sm:$0xff] }
 0x1e9   : > { %7330 = vst [vmem:[#allocation77_spill] sm:$0xff] %v5495_v19  ;;  %1517 = vmatpush.msra.mxu0 %v5498_v59  ;;  %1537 = vmatpush.msra.mxu1 %v5501_v17  ;;  %v5513_v19 = vld [vmem:[#allocation7 + $0xb0] sm:$0xff] }
 0x1ea   : > { %7331 = vst [vmem:[#allocation81_spill] sm:$0xff] %v5498_v59  ;;  %1456 = vmatpush.msrb.mxu3 %v5504_v9  ;;  %1560 = vmatpush.msra.mxu2 %v5507_v54  ;;  %v5516_v59 = vld [vmem:[#allocation5 + $0x28] sm:$0xff] }
 0x1eb   : > { %7332 = vst [vmem:[#allocation92_spill] sm:$0xff] %v5501_v17  ;;  %1518 = vmatpush.msra.mxu0 %v5510_v23  ;;  %1538 = vmatpush.msra.mxu1 %v5513_v19  ;;  %v5519_v17 = vld [vmem:[#allocation7 + $0xb8] sm:$0xff] }
 0x1ec   : > { %7333 = vst [vmem:[#allocation85_spill] sm:$0xff] %v5504_v9  ;;  %1457 = vmatpush.msrb.mxu3 %v5516_v59  ;;  %1561 = vmatpush.msra.mxu2 %v5519_v17  ;;  %v5523_v9 = vld [vmem:[#allocation7 + $0x48] sm:$0xff] }
 0x1ed   : > { %7334 = vst [vmem:[#allocation94_spill] sm:$0xff] %v5510_v23  ;;  %1458 = vmatmul.f32.vlgmr.msrb.gmra.mxu3 %v5397_v26  ;;  %1519 = vmatpush.msra.mxu0 %v5523_v9  ;;  %v5527_v23 = vld [vmem:[#allocation7 + $0x98] sm:$0xff] }
 0x1ee   : > { %7335 = vst [vmem:[#allocation89_spill] sm:$0xff] %v5513_v19  ;;  %1619 = vmatpush.msra.mxu3 %v5101_v1  ;;  %1539 = vmatpush.msra.mxu1 %v5527_v23  ;;  %v5531_v19 = vld [vmem:[#allocation7 + $0x30] sm:$0xff]  ;;  %v5541_v1 = vld [vmem:[#allocation7 + $0x80] sm:$0xff] }
 0x1ef   : > { %7336 = vst [vmem:[#allocation91_spill] sm:$0xff] %v5516_v59  ;;  %1438 = vmatmul.f32.gmra.mxu2 %v5440_v53  ;;  %1520 = vmatpush.msra.mxu0 %v5531_v19  ;;  %v5538_v59 = vld [vmem:[#allocation7 + $0x18] sm:$0xff] }
 0x1f0   : > { %7337 = vst [vmem:[#allocation95_spill] sm:$0xff] %v5519_v17  ;;  %1620 = vmatpush.msra.mxu3 %v5107_v50  ;;  %v5535_v17 = vld [vmem:[#allocation7 + $0xa0] sm:$0xff]  ;;  %1540 = vmatpush.msra.mxu1 %v5541_v1  ;;  %v5551_v50 = vld [vmem:[#allocation7 + $0x68] sm:$0xff] }
 0x1f1   : > { %7338 = vst [vmem:[#allocation72_spill] sm:$0xff] %v5527_v23  ;;  %1562 = vmatpush.msra.mxu2 %v5535_v17  ;;  %1521 = vmatpush.msra.mxu0 %v5538_v59  ;;  %v5545_v23 = vld [vmem:[#allocation7 + $0x88] sm:$0xff] }
 0x1f2   : > { %7339 = vst [vmem:[#allocation76_spill] sm:$0xff] %v5531_v19  ;;  %1621 = vmatpush.msra.mxu3 %v5113_v43  ;;  %v5548_v19 = vld [vmem:[#allocation7] sm:$0xff]  ;;  %1541 = vmatpush.msra.mxu1 %v5551_v50  ;;  %v5562_v43 = vld [vmem:[#allocation7 + $0x50] sm:$0xff] }
 0x1f3   : > { %7340 = vst [vmem:[#allocation80_spill] sm:$0xff] %v5541_v1  ;;  %1563 = vmatpush.msra.mxu2 %v5545_v23  ;;  %1522 = vmatpush.msra.mxu0 %v5548_v19  ;;  %v5557_v1 = vld [vmem:[#allocation7 + $0x70] sm:$0xff] }
 0x1f4   : > { %7341 = vst [vmem:[#allocation84_spill] sm:$0xff] %v5548_v19  ;;  %1622 = vmatpush.msra.mxu3 %v5119_v55  ;;  %1542 = vmatpush.msra.mxu1 %v5562_v43  ;;  %v5565_v19 = vld [vmem:[#allocation7 + $0x58] sm:$0xff] }
 0x1f5   : > { %1642 = vmatpush.msrb.mxu0 %v5122_v58  ;;  %1461 = vmatmul.f32.gmra.mxu3 %v5440_v53  ;;  %v5570_v55 = vld [vmem:[#allocation7 + $0x38] sm:$0xff]  ;;  %v5573_v58 = vld [vmem:[#allocation7 + $0x40] sm:$0xff] }
 0x1f6   : > { %1564 = vmatpush.msra.mxu2 %v5557_v1  ;;  %1623 = vmatpush.msra.mxu3 %v5127_v0  ;;  %v5578_v0 = vld [vmem:[#allocation7 + $0x20] sm:$0xff] }
 0x1f7   : > { %1643 = vmatpush.msrb.mxu0 %v5130_v6  ;;  %1543 = vmatpush.msra.mxu1 %v5570_v55  ;;  %v5581_v6 = vld [vmem:[#allocation7 + $0x28] sm:$0xff] }
 0x1f8   : > { %1565 = vmatpush.msra.mxu2 %v5565_v19  ;;  %1624 = vmatpush.msra.mxu3 %v5135_v4  ;;  %v5586_v4 = vld [vmem:[#allocation7 + $0x8] sm:$0xff] }
 0x1f9   : > { %1644 = vmatpush.msrb.mxu0 %v5138_v10  ;;  %1544 = vmatpush.msra.mxu1 %v5578_v0  ;;  %7342 = vst [vmem:[#allocation88_spill] sm:$0xff] %v5586_v4  ;;  %v5589_v10 = vld [vmem:[#allocation7 + $0x10] sm:$0xff] }
 0x1fa   : > { %1566 = vmatpush.msra.mxu2 %v5573_v58  ;;  %1625 = vmatpush.msra.mxu3 %v5143_v15  ;;  %7343 = vst [vmem:[#allocation96_spill] sm:$0xff] %v5589_v10  ;;  %v7344_v15 = vld [vmem:[#allocation28_spill] sm:$0xff] }
 0x1fb   : > { %1645 = vmatpush.msrb.mxu0 %v5146_v20  ;;  %1545 = vmatpush.msra.mxu1 %v5586_v4  ;;  %v7345_v20 = vld [vmem:[#allocation29_spill] sm:$0xff] }
 0x1fc   : > { %1567 = vmatpush.msra.mxu2 %v5581_v6  ;;  %1626 = vmatpush.msra.mxu3 %v5151_v24  ;;  %v7346_v24 = vld [vmem:[#allocation42_spill] sm:$0xff] }
 0x1fd   : > { %1646 = vmatpush.msrb.mxu0 %v5154_v28  ;;  %1665 = vmatpush.msrb.mxu1 %v5165_v3  ;;  %v7347_v28 = vld [vmem:[#allocation30_spill] sm:$0xff]  ;;  %v7350_v3 = vld [vmem:[#allocation32_spill] sm:$0xff] }
 0x1fe   : > { %1568 = vmatpush.msra.mxu2 %v5589_v10  ;;  %1627 = vmatpush.msra.mxu3 %v5159_v2  ;;  %v7348_v2 = vld [vmem:[#allocation31_spill] sm:$0xff] }
 0x1ff   : > { %1647 = vmatpush.msrb.mxu0 %v5162_v32  ;;  %1666 = vmatpush.msrb.mxu1 %v5177_v8  ;;  %v7349_v32 = vld [vmem:[#allocation45_spill] sm:$0xff]  ;;  %v7354_v8 = vld [vmem:[#allocation35_spill] sm:$0xff] }
 0x200   : > { %1688 = vmatpush.msrb.mxu2 %v5168_v33  ;;  %1628 = vmatpush.msra.mxu3 %v5171_v5  ;;  %v7351_v33 = vld [vmem:[#allocation33_spill] sm:$0xff]  ;;  %v7352_v5 = vld [vmem:[#allocation48_spill] sm:$0xff] }
 0x201   : > { %1648 = vmatpush.msrb.mxu0 %v5174_v36  ;;  %1667 = vmatpush.msrb.mxu1 %v5189_v7  ;;  %v7353_v36 = vld [vmem:[#allocation34_spill] sm:$0xff]  ;;  %v7358_v7 = vld [vmem:[#allocation40_spill] sm:$0xff] }
 0x202   : > { %1689 = vmatpush.msrb.mxu2 %v5180_v37  ;;  %1629 = vmatpush.msra.mxu3 %v5183_v12  ;;  %v7355_v37 = vld [vmem:[#allocation36_spill] sm:$0xff]  ;;  %v7356_v12 = vld [vmem:[#allocation37_spill] sm:$0xff] }
 0x203   : > { %1649 = vmatpush.msrb.mxu0 %v5186_v48  ;;  %1668 = vmatpush.msrb.mxu1 %v5201_v47  ;;  %v7357_v48 = vld [vmem:[#allocation38_spill] sm:$0xff] }
 0x204   : > { %1690 = vmatpush.msrb.mxu2 %v5192_v56  ;;  %1630 = vmatpush.msra.mxu3 %v5195_v44  ;;  %v7359_v56 = vld [vmem:[#allocation41_spill] sm:$0xff]  ;;  %v7360_v44 = vld [vmem:[#allocation43_spill] sm:$0xff]  ;;  %v7362_v47 = vld [vmem:[#allocation46_spill] sm:$0xff] }
 0x205   : > { %1650 = vmatpush.msrb.mxu0 %v5198_v62  ;;  %1669 = vmatpush.msrb.mxu1 %v5213_v11  ;;  %v7361_v62 = vld [vmem:[#allocation44_spill] sm:$0xff]  ;;  %v7366_v11 = vld [vmem:[#allocation54_spill] sm:$0xff] }
 0x206   : > { %1691 = vmatpush.msrb.mxu2 %v5204_v14  ;;  %1631 = vmatpush.msra.mxu3 %v5207_v21  ;;  %v7363_v14 = vld [vmem:[#allocation47_spill] sm:$0xff] }
 0x207   : > { %1651 = vmatpush.msrb.mxu0 %v5210_v18  ;;  %1670 = vmatpush.msrb.mxu1 %v7347_v28  ;;  %v7364_v21 = vld [vmem:[#allocation51_spill] sm:$0xff]  ;;  %v7365_v18 = vld [vmem:[#allocation52_spill] sm:$0xff] }
 0x208   : > { %1692 = vmatpush.msrb.mxu2 %v7344_v15  ;;  %1632 = vmatpush.msra.mxu3 %v7345_v20  ;;  %v7367_v15 = vld [vmem:[#allocation55_spill] sm:$0xff]  ;;  %v7368_v20 = vld [vmem:[#allocation57_spill] sm:$0xff] }
 0x209   : > { %1652 = vmatpush.msrb.mxu0 %v7346_v24  ;;  %1671 = vmatpush.msrb.mxu1 %v7351_v33  ;;  %v7369_v24 = vld [vmem:[#allocation50_spill] sm:$0xff]  ;;  %v5637_v28 = vld [vmem:[#allocation5 + $0x230] sm:$0xff] }
 0x20a   : > { %1693 = vmatpush.msrb.mxu2 %v7348_v2  ;;  %1633 = vmatpush.msra.mxu3 %v7349_v32  ;;  %7370 = vst [vmem:[#allocation28_spill] sm:$0xff] %v5637_v28  ;;  %v7371_v2 = vld [vmem:[#allocation49_spill] sm:$0xff]  ;;  %v7372_v32 = vld [vmem:[#allocation63_spill] sm:$0xff] }
 0x20b   : > { %1653 = vmatpush.msrb.mxu0 %v7350_v3  ;;  %1672 = vmatpush.msrb.mxu1 %v7356_v12  ;;  %v5642_v3 = vld [vmem:[#allocation5 + $0x200] sm:$0xff]  ;;  %v7374_v33 = vld [vmem:[#allocation65_spill] sm:$0xff] }
 0x20c   : > { %1694 = vmatpush.msrb.mxu2 %v7352_v5  ;;  %1634 = vmatpush.msra.mxu3 %v7353_v36  ;;  %7373 = vst [vmem:[#allocation29_spill] sm:$0xff] %v5642_v3  ;;  %v7375_v5 = vld [vmem:[#allocation53_spill] sm:$0xff]  ;;  %v5652_v12 = vld [vmem:[#allocation5 + $0x1a0] sm:$0xff] }
 0x20d   : > { %1654 = vmatpush.msrb.mxu0 %v7354_v8  ;;  %1673 = vmatpush.msrb.mxu1 %v7360_v44  ;;  %v5647_v36 = vld [vmem:[#allocation5 + $0x1d0] sm:$0xff]  ;;  %7379 = vst [vmem:[#allocation30_spill] sm:$0xff] %v5652_v12  ;;  %v7383_v44 = vld [vmem:[#allocation71_spill] sm:$0xff] }
 0x20e   : > { %1711 = vmatpush.msrb.mxu3 %v7355_v37  ;;  %1695 = vmatpush.msrb.mxu2 %v7358_v7  ;;  %7376 = vst [vmem:[#allocation42_spill] sm:$0xff] %v5647_v36  ;;  %v7377_v8 = vld [vmem:[#allocation64_spill] sm:$0xff]  ;;  %v7381_v7 = vld [vmem:[#allocation67_spill] sm:$0xff] }
 0x20f   : > { %1655 = vmatpush.msrb.mxu0 %v7357_v48  ;;  %1674 = vmatpush.msrb.mxu1 %v7364_v21  ;;  %v7378_v37 = vld [vmem:[#allocation68_spill] sm:$0xff]  ;;  %v5668_v21 = vld [vmem:[#allocation5 + $0xe0] sm:$0xff] }
 0x210   : > { %1712 = vmatpush.msrb.mxu3 %v7359_v56  ;;  %1696 = vmatpush.msrb.mxu2 %v7362_v47  ;;  %v7380_v48 = vld [vmem:[#allocation56_spill] sm:$0xff]  ;;  %v5662_v47 = vld [vmem:[#allocation5 + $0x140] sm:$0xff]  ;;  %7387 = vst [vmem:[#allocation33_spill] sm:$0xff] %v5668_v21 }
 0x211   : > { %1656 = vmatpush.msrb.mxu0 %v7361_v62  ;;  %1675 = vmatpush.msrb.mxu1 %v7368_v20  ;;  %v5657_v56 = vld [vmem:[#allocation5 + $0x170] sm:$0xff]  ;;  %v7384_v62 = vld [vmem:[#allocation58_spill] sm:$0xff]  ;;  %7385 = vst [vmem:[#allocation45_spill] sm:$0xff] %v5662_v47 }
 0x212   : > { %1713 = vmatpush.msrb.mxu3 %v7363_v14  ;;  %1697 = vmatpush.msrb.mxu2 %v7366_v11  ;;  %7382 = vst [vmem:[#allocation31_spill] sm:$0xff] %v5657_v56  ;;  %v5665_v14 = vld [vmem:[#allocation5 + $0x110] sm:$0xff]  ;;  %v5674_v11 = vld [vmem:[#allocation5 + $0x80] sm:$0xff] }
 0x213   : > { %1657 = vmatpush.msrb.mxu0 %v7365_v18  ;;  %1676 = vmatpush.msrb.mxu1 %v7371_v2  ;;  %7386 = vst [vmem:[#allocation32_spill] sm:$0xff] %v5665_v14  ;;  %v5671_v18 = vld [vmem:[#allocation5 + $0xb0] sm:$0xff]  ;;  %v5680_v20 = vld [vmem:[#allocation5 + $0x20] sm:$0xff] }
 0x214   : > { %1714 = vmatpush.msrb.mxu3 %v7367_v15  ;;  %1698 = vmatpush.msrb.mxu2 %v7369_v24  ;;  %7388 = vst [vmem:[#allocation48_spill] sm:$0xff] %v5671_v18  ;;  %v5677_v15 = vld [vmem:[#allocation5 + $0x50] sm:$0xff] }
 0x215   : > { %1677 = vmatpush.msrb.mxu1 %v7374_v33  ;;  %7389 = vst [vmem:[#allocation34_spill] sm:$0xff] %v5674_v11 }
 0x216   : > { %1715 = vmatpush.msrb.mxu3 %v5637_v28  ;;  %1699 = vmatpush.msrb.mxu2 %v7372_v32  ;;  %7390 = vst [vmem:[#allocation35_spill] sm:$0xff] %v5677_v15 }
 0x217   : > { %1678 = vmatpush.msrb.mxu1 %v7377_v8  ;;  %7391 = vst [vmem:[#allocation36_spill] sm:$0xff] %v5680_v20  ;;  %v3216_v8 = vld [vmem:[%s4442_s28 + $0x90] sm:$0xff] }
 0x218   : > { %1716 = vmatpush.msrb.mxu3 %v5642_v3  ;;  %1700 = vmatpush.msrb.mxu2 %v7375_v5 }
 0x219   : > { %1679 = vmatpush.msrb.mxu1 %v7380_v48  ;;  %v7392_v48 = vld [vmem:[#allocation27_spill] sm:$0xff] }
 0x21a   : > { %1717 = vmatpush.msrb.mxu3 %v5647_v36  ;;  %1701 = vmatpush.msrb.mxu2 %v7378_v37 }
 0x21b   : > { %1680 = vmatpush.msrb.mxu1 %v7383_v44 }
 0x21c   : > { %1718 = vmatpush.msrb.mxu3 %v5652_v12  ;;  %1702 = vmatpush.msrb.mxu2 %v7381_v7 }
 0x21e   : > { %1719 = vmatpush.msrb.mxu3 %v5657_v56  ;;  %1703 = vmatpush.msrb.mxu2 %v7384_v62 }
 0x220   : > { %1720 = vmatpush.msrb.mxu3 %v5662_v47  ;;  %v3219_v47 = vld [vmem:[%s4442_s28 + $0xa8] sm:$0xff] }
 0x222   : > { %1721 = vmatpush.msrb.mxu3 %v5665_v14 }
 0x224   : > { %1722 = vmatpush.msrb.mxu3 %v5668_v21 }
 0x226   : > { %1723 = vmatpush.msrb.mxu3 %v5671_v18 }
 0x228   : > { %1724 = vmatpush.msrb.mxu3 %v5674_v11 }
 0x22a   : > { %1725 = vmatpush.msrb.mxu3 %v5677_v15 }
 0x22c   : > { %1726 = vmatpush.msrb.mxu3 %v5680_v20 }
 0x24a   : > { %v1255_v32 = vpop.f32.mrf.mxu0 }
 0x24b   : > { %v1278_v24 = vpop.f32.mrf.mxu1 }
 0x250   : > { %v1232_v2 = vpop.f32.mrf.mxu3 }
 0x252   : > { %v1258_v11 = vpop.f32.mrf.mxu0 }
 0x253   : > { %v1281_v33 = vpop.f32.mrf.mxu1 }
 0x258   : > { %v1235_v5 = vpop.f32.mrf.mxu3 }
 0x25a   : > { %v1344_v37 = vpop.f32.mrf.mxu2 }
 0x25b   : > { %v1465_v7 = vadd.f32 %v1344_v37, %v7392_v48  ;;  %v1413_v44 = vpop.f32.mrf.mxu1 }
 0x25c   : > { %v1583_v62 = vadd.f32 %v3216_v8, %v1413_v44  ;;  %v1390_v44 = vpop.f32.mrf.mxu0 }
 0x25d   : > { %v1471_v18 = vadd.f32 %v1465_v7, %v1232_v2 }
 0x25e   : > { %v1585_v15 = vmul.f32 0.5, %v1583_v62 }
 0x25f   : > { %v1473_v21 = vmul.f32 0.5, %v1471_v18 }
 0x260   : > { %v1367_v14 = vpop.f32.mrf.mxu3 }
 0x261   : > { %3435 = vtanh.f32 %v1473_v21  ;;  %v1466_v20 = vadd.f32 %v1367_v14, %v7311_v57  ;;  %v3217_v21 = vld [vmem:[%s4442_s28 + $0x98] sm:$0xff] }
 0x262   : > { %v1347_v56 = vpop.f32.mrf.mxu2  ;;  %3437 = vtanh.f32 %v1585_v15 }
 0x263   : > { %v1468_v12 = vadd.f32 %v1347_v56, %v7392_v48  ;;  %v1481_v36 = vadd.f32 %v1466_v20, %v1255_v32  ;;  %v1416_v3 = vpop.f32.mrf.mxu1  ;;  %v5693_v56 = vld [vmem:[%s6837_s5] ss:$0 sm:$0xff] }
 0x264   : > { %v1584_v28 = vadd.f32 %v3219_v47, %v1416_v3  ;;  %7393 = vst [vmem:[#allocation37_spill] sm:$0xff] %v5693_v56  ;;  %v1491_v3 = vadd.f32 %v5693_v56, %v1278_v24 }
 0x265   : > { %v1472_v37 = vadd.f32 %v1468_v12, %v1235_v5  ;;  %v1483_v10 = vmul.f32 0.5, %v1481_v36 }
 0x266   : > { %v1586_v7 = vmul.f32 0.5, %v1584_v28  ;;  %v1467_v28 = vadd.f32 %v1390_v44, %v5004_v42 }
 0x267   : > { %v3436_v8 = vpop.eup %3435  ;;  %v1474_v2 = vmul.f32 0.5, %v1472_v37  ;;  %3439 = vtanh.f32 %v1483_v10 }
 0x268   : > { %v1477_v18 = vadd.f32 1.0, %v3436_v8  ;;  %v1370_v62 = vpop.f32.mrf.mxu3  ;;  %v3438_v4 = vpop.eup %3437 }
 0x269   : > { %3441 = vtanh.f32 %v1474_v2  ;;  %v1469_v14 = vadd.f32 %v1370_v62, %v7311_v57  ;;  %v1589_v32 = vadd.f32 1.0, %v3438_v4  ;;  %v3220_v57 = vld [vmem:[%s4442_s28 + $0xb0] sm:$0xff]  ;;  %v1492_v4 = vadd.f32 %v5693_v56, %v1281_v33 }
 0x26a   : > { %v1479_v36 = vmul.f32 0.5, %v1477_v18  ;;  %v1436_v12 = vpop.f32.mrf.mxu2  ;;  %3443 = vtanh.f32 %v1586_v7 }
 0x26b   : > { %v1593_v47 = vadd.f32 %v3217_v21, %v1436_v12  ;;  %v1482_v10 = vadd.f32 %v1469_v14, %v1258_v11  ;;  %v1591_v12 = vmul.f32 0.5, %v1589_v32  ;;  %v1393_v11 = vpop.f32.mrf.mxu0 }
 0x26c   : > { %v1493_v15 = vmul.f32 %v1491_v3, %v1479_v36  ;;  %v3218_v36 = vld [vmem:[%s4442_s28 + $0xa0] sm:$0xff] }
 0x26d   : > { %v3440_v20 = vpop.eup %3439  ;;  %v1595_v5 = vmul.f32 0.5, %v1593_v47  ;;  %v1484_v37 = vmul.f32 0.5, %v1482_v10 }
 0x26e   : > { %v1495_v8 = vadd.f32 %v1493_v15, %v1467_v28  ;;  %v1487_v2 = vadd.f32 1.0, %v3440_v20  ;;  %v1470_v15 = vadd.f32 %v1393_v11, %v5004_v42 }
 0x26f   : > { %v3442_v62 = vpop.eup %3441  ;;  %3445 = vtanh.f32 %v1595_v5 }
 0x270   : > { %3447 = vtanh.f32 %v1495_v8  ;;  %v1478_v24 = vadd.f32 1.0, %v3442_v62  ;;  %v1489_v18 = vmul.f32 0.5, %v1487_v2  ;;  %v1459_v21 = vpop.f32.mrf.mxu3  ;;  %v3444_v7 = vpop.eup %3443 }
 0x271   : > { %3449 = vtanh.f32 %v1484_v37  ;;  %v1603_v44 = vadd.f32 %v5351_v38, %v1459_v21  ;;  %v1590_v8 = vadd.f32 1.0, %v3444_v7 }
 0x272   : > { %v1480_v14 = vmul.f32 0.5, %v1478_v24  ;;  %v1439_v3 = vpop.f32.mrf.mxu2  ;;  %v1499_v47 = vsub.f32 1.0, %v1489_v18  ;;  %v1503_v33 = vmul.f32 %v1489_v18, %v5356_v29 }
 0x273   : > { %v1594_v10 = vadd.f32 %v3220_v57, %v1439_v3  ;;  %v1605_v28 = vmul.f32 %v1603_v44, %v1591_v12  ;;  %v1592_v12 = vmul.f32 0.5, %v1590_v8  ;;  %v7409_v8 = vld [vmem:[#allocation73_spill] sm:$0xff] }
 0x274   : > { %v1494_v20 = vmul.f32 %v1492_v4, %v1480_v14  ;;  %v3221_v14 = vld [vmem:[%s4442_s28 + $0xb8] sm:$0xff] }
 0x275   : > { %v3446_v5 = vpop.eup %3445  ;;  %v1596_v2 = vmul.f32 0.5, %v1594_v10  ;;  %v1607_v32 = vadd.f32 %v3218_v36, %v1605_v28 }
 0x276   : > { %v3448_v62 = vpop.eup %3447  ;;  %v1496_v37 = vadd.f32 %v1494_v20, %v1470_v15  ;;  %v1599_v21 = vadd.f32 1.0, %v3446_v5  ;;  %v7407_v20 = vld [vmem:[#allocation86_spill] sm:$0xff]  ;;  %v7408_v5 = vld [vmem:[#allocation83_spill] sm:$0xff] }
 0x277   : > { %v3450_v48 = vpop.eup %3449  ;;  %3451 = vtanh.f32 %v1596_v2  ;;  %v1501_v24 = vmul.f32 %v3448_v62, %v1499_v47  ;;  %v7410_v2 = vld [vmem:[#allocation90_spill] sm:$0xff]  ;;  %v7412_v62 = vld [vmem:[#allocation77_spill] sm:$0xff] }
 0x278   : > { %3453 = vtanh.f32 %v1496_v37  ;;  %v1488_v56 = vadd.f32 1.0, %v3450_v48  ;;  %v1462_v57 = vpop.f32.mrf.mxu3  ;;  %v1601_v7 = vmul.f32 0.5, %v1599_v21  ;;  %v7413_v37 = vld [vmem:[#allocation81_spill] sm:$0xff]  ;;  %v7414_v21 = vld [vmem:[#allocation92_spill] sm:$0xff] }
 0x279   : > { %3455 = vtanh.f32 %v1607_v32  ;;  %v1604_v11 = vadd.f32 %v5351_v38, %v1462_v57  ;;  %v5704_v44 = vadd.f32 %v1503_v33, %v1501_v24  ;;  %v7411_v32 = vld [vmem:[#allocation87_spill] sm:$0xff]  ;;  %v7415_v33 = vld [vmem:[#allocation85_spill] sm:$0xff]  ;;  %v7416_v24 = vld [vmem:[#allocation94_spill] sm:$0xff] }
 0x27a   : > { %v1490_v4 = vmul.f32 0.5, %v1488_v56  ;;  %v1611_v36 = vsub.f32 1.0, %v1601_v7  ;;  %v7417_v57 = vld [vmem:[#allocation89_spill] sm:$0xff] }
 0x27b   : > { %v1606_v3 = vmul.f32 %v1604_v11, %v1592_v12  ;;  %1523 = vmatmul.f32.vlgmr.msra.gmra.mxu0 %v5704_v44  ;;  %1546 = vmatmul.f32.vlgmr.msra.gmra.mxu1 %v5704_v44  ;;  %v7418_v12 = vld [vmem:[#allocation91_spill] sm:$0xff] }
 0x27c   : > { %v1500_v29 = vsub.f32 1.0, %v1490_v4  ;;  %1569 = vmatmul.f32.vlgmr.msra.gmra.mxu2 %v5704_v44  ;;  %1734 = vmatpush.msra.mxu0 %v5362_v40  ;;  %v1504_v10 = vmul.f32 %v1490_v4, %v5386_v63  ;;  %v1615_v40 = vmul.f32 %v1601_v7, %v5397_v26  ;;  %v7419_v11 = vld [vmem:[#allocation95_spill] sm:$0xff]  ;;  %v5779_v7 = vld [vmem:[#allocation5 + $0x2d0] sm:$0xff] }
 0x27d   : > { %v3452_v48 = vpop.eup %3451  ;;  %v1608_v18 = vadd.f32 %v3221_v14, %v1606_v3  ;;  %1799 = vmatpush.msra.mxu1 %v5366_v16  ;;  %1822 = vmatpush.msra.mxu2 %v5369_v27  ;;  %v7420_v4 = vld [vmem:[#allocation72_spill] sm:$0xff]  ;;  %v5785_v14 = vld [vmem:[#allocation5 + $0x2a0] sm:$0xff] }
 0x27e   : > { %v3454_v38 = vpop.eup %3453  ;;  %v1600_v56 = vadd.f32 1.0, %v3452_v48  ;;  %1735 = vmatpush.msra.mxu0 %v5372_v13  ;;  %v7422_v3 = vld [vmem:[#allocation80_spill] sm:$0xff]  ;;  %v5797_v48 = vld [vmem:[#allocation5 + $0x240] sm:$0xff] }
 0x27f   : > { %v3456_v47 = vpop.eup %3455  ;;  %3457 = vtanh.f32 %v1608_v18  ;;  %v1502_v28 = vmul.f32 %v3454_v38, %v1500_v29  ;;  %1800 = vmatpush.msra.mxu1 %v5376_v25  ;;  %1823 = vmatpush.msra.mxu2 %v5379_v41  ;;  %v7423_v29 = vld [vmem:[#allocation84_spill] sm:$0xff]  ;;  %v5800_v18 = vld [vmem:[#allocation5 + $0x2d8] sm:$0xff] }
 0x280   : > { %v1602_v15 = vmul.f32 0.5, %v1600_v56  ;;  %v1613_v16 = vmul.f32 %v3456_v47, %v1611_v36  ;;  %1736 = vmatpush.msra.mxu0 %v5382_v51  ;;  %v5824_v38 = vld [vmem:[#allocation5 + $0x248] sm:$0xff]  ;;  %v5837_v36 = vld [vmem:[#allocation5 + $0x150] sm:$0xff]  ;;  %v5849_v47 = vld [vmem:[#allocation5 + $0x120] sm:$0xff] }
 0x281   : > { %v5719_v27 = vadd.f32 %v1504_v10, %v1502_v28  ;;  %1801 = vmatpush.msra.mxu1 %v5388_v31  ;;  %1824 = vmatpush.msra.mxu2 %v5391_v34  ;;  %v7394_v31 = vld [vmem:[#allocation59_spill] sm:$0xff]  ;;  %v7395_v34 = vld [vmem:[#allocation70_spill] sm:$0xff]  ;;  %v5855_v28 = vld [vmem:[#allocation5 + $0x2b0] sm:$0xff] }
 0x282   : > { %v5723_v13 = vadd.f32 %v1615_v40, %v1613_v16  ;;  %1737 = vmatpush.msra.mxu0 %v5394_v39  ;;  %v1612_v25 = vsub.f32 1.0, %v1602_v15  ;;  %v1616_v63 = vmul.f32 %v1602_v15, %v5440_v53  ;;  %v7396_v39 = vld [vmem:[#allocation60_spill] sm:$0xff]  ;;  %v7404_v53 = vld [vmem:[#allocation66_spill] sm:$0xff] }
 0x283   : > { %1526 = vmatmul.f32.gmra.mxu0 %v5719_v27  ;;  %1549 = vmatmul.f32.gmra.mxu1 %v5719_v27  ;;  %v5840_v56 = vld [vmem:[#allocation5 + $0x1e8] sm:$0xff]  ;;  %v5852_v10 = vld [vmem:[#allocation5 + $0x1b8] sm:$0xff]  ;;  %v5861_v15 = vld [vmem:[#allocation5 + $0xf0] sm:$0xff] }
 0x284   : > { %1572 = vmatmul.f32.gmra.mxu2 %v5719_v27  ;;  %1738 = vmatpush.msra.mxu0 %v5402_v52  ;;  %v7397_v52 = vld [vmem:[#allocation74_spill] sm:$0xff]  ;;  %v5864_v16 = vld [vmem:[#allocation5 + $0x188] sm:$0xff] }
 0x285   : > { %v3458_v41 = vpop.eup %3457  ;;  %1635 = vmatmul.f32.vlgmr.msra.gmra.mxu3 %v5723_v13  ;;  %1802 = vmatpush.msra.mxu1 %v5406_v45  ;;  %v7398_v45 = vld [vmem:[#allocation75_spill] sm:$0xff]  ;;  %v5858_v40 = vld [vmem:[#allocation5 + $0x2b8] sm:$0xff] }
 0x286   : > { %v1614_v51 = vmul.f32 %v3458_v41, %v1612_v25  ;;  %1739 = vmatpush.msra.mxu0 %v5409_v35  ;;  %1845 = vmatpush.msra.mxu3 %v5412_v46  ;;  %v7399_v35 = vld [vmem:[#allocation61_spill] sm:$0xff]  ;;  %v5867_v25 = vld [vmem:[#allocation5 + $0x280] sm:$0xff]  ;;  %v5870_v41 = vld [vmem:[#allocation5 + $0x288] sm:$0xff] }
 0x287   : > { %1803 = vmatpush.msra.mxu1 %v5415_v22  ;;  %1825 = vmatpush.msra.mxu2 %v7394_v31  ;;  %v7400_v46 = vld [vmem:[#allocation93_spill] sm:$0xff]  ;;  %v7401_v22 = vld [vmem:[#allocation78_spill] sm:$0xff] }
 0x288   : > { %1740 = vmatpush.msra.mxu0 %v7395_v34  ;;  %1846 = vmatpush.msra.mxu3 %v7396_v39  ;;  %v5739_v26 = vadd.f32 %v1616_v63, %v1614_v51  ;;  %v5873_v51 = vld [vmem:[#allocation5 + $0xc0] sm:$0xff]  ;;  %v5876_v63 = vld [vmem:[#allocation5 + $0x158] sm:$0xff]  ;;  %v5879_v31 = vld [vmem:[#allocation5 + $0x250] sm:$0xff] }
 0x289   : > { %1804 = vmatpush.msra.mxu1 %v5428_v60  ;;  %1826 = vmatpush.msra.mxu2 %v5431_v30  ;;  %v7405_v60 = vld [vmem:[#allocation82_spill] sm:$0xff]  ;;  %v7406_v30 = vld [vmem:[#allocation69_spill] sm:$0xff] }
 0x28a   : > { %1741 = vmatpush.msra.mxu0 %v5434_v49  ;;  %1847 = vmatpush.msra.mxu3 %v5437_v61  ;;  %v7402_v49 = vld [vmem:[#allocation79_spill] sm:$0xff]  ;;  %v7403_v61 = vld [vmem:[#allocation62_spill] sm:$0xff]  ;;  %v5885_v39 = vld [vmem:[#allocation5 + $0x90] sm:$0xff] }
 0x28b   : > { %1658 = vmatmul.f32.vlgmr.msrb.gmra.mxu0 %v5723_v13  ;;  %1681 = vmatmul.f32.vlgmr.msrb.gmra.mxu1 %v5723_v13  ;;  %v5882_v34 = vld [vmem:[#allocation5 + $0x258] sm:$0xff]  ;;  %7426 = vst [vmem:[#allocation38_spill] sm:$0xff] %v5885_v39 }
 0x28c   : > { %1704 = vmatmul.f32.vlgmr.msrb.gmra.mxu2 %v5723_v13  ;;  %1742 = vmatpush.msra.mxu0 %v7397_v52  ;;  %v5888_v52 = vld [vmem:[#allocation5 + $0x128] sm:$0xff] }
 0x28d   : > { %1638 = vmatmul.f32.gmra.mxu3 %v5739_v26  ;;  %1805 = vmatpush.msra.mxu1 %v7398_v45  ;;  %v5891_v45 = vld [vmem:[#allocation5 + $0x220] sm:$0xff] }
 0x28e   : > { %1743 = vmatpush.msra.mxu0 %v7399_v35  ;;  %1848 = vmatpush.msra.mxu3 %v7400_v46  ;;  %v5894_v35 = vld [vmem:[#allocation5 + $0x228] sm:$0xff]  ;;  %v5897_v46 = vld [vmem:[#allocation5 + $0x60] sm:$0xff] }
 0x28f   : > { %1806 = vmatpush.msra.mxu1 %v7401_v22  ;;  %1827 = vmatpush.msra.mxu2 %v7402_v49  ;;  %7427 = vst [vmem:[#allocation40_spill] sm:$0xff] %v5897_v46  ;;  %v5900_v22 = vld [vmem:[#allocation5 + $0xf8] sm:$0xff]  ;;  %v5903_v49 = vld [vmem:[#allocation5 + $0x1f0] sm:$0xff] }
 0x290   : > { %1744 = vmatpush.msra.mxu0 %v7403_v61  ;;  %1849 = vmatpush.msra.mxu3 %v7404_v53  ;;  %7428 = vst [vmem:[#allocation41_spill] sm:$0xff] %v5900_v22  ;;  %v5906_v61 = vld [vmem:[#allocation5 + $0x1f8] sm:$0xff]  ;;  %v5909_v53 = vld [vmem:[#allocation5 + $0x30] sm:$0xff] }
 0x291   : > { %1807 = vmatpush.msra.mxu1 %v7405_v60  ;;  %1828 = vmatpush.msra.mxu2 %v7406_v30  ;;  %7429 = vst [vmem:[#allocation43_spill] sm:$0xff] %v5903_v49  ;;  %v5912_v60 = vld [vmem:[#allocation5 + $0xc8] sm:$0xff]  ;;  %v5915_v30 = vld [vmem:[#allocation5 + $0x1c0] sm:$0xff] }
 0x292   : > { %1745 = vmatpush.msra.mxu0 %v7407_v20  ;;  %1850 = vmatpush.msra.mxu3 %v7408_v5  ;;  %7430 = vst [vmem:[#allocation44_spill] sm:$0xff] %v5906_v61  ;;  %v5918_v20 = vld [vmem:[#allocation5 + $0x1c8] sm:$0xff]  ;;  %v5921_v5 = vld [vmem:[#allocation5] sm:$0xff] }
 0x293   : > { %1661 = vmatmul.f32.gmra.mxu0 %v5739_v26  ;;  %1684 = vmatmul.f32.gmra.mxu1 %v5739_v26  ;;  %7431 = vst [vmem:[#allocation46_spill] sm:$0xff] %v5909_v53 }
 0x294   : > { %1707 = vmatmul.f32.gmra.mxu2 %v5739_v26  ;;  %1746 = vmatpush.msra.mxu0 %v7409_v8  ;;  %7432 = vst [vmem:[#allocation47_spill] sm:$0xff] %v5912_v60  ;;  %v5924_v8 = vld [vmem:[#allocation5 + $0x98] sm:$0xff] }
 0x295   : > { %1727 = vmatmul.f32.vlgmr.msrb.gmra.mxu3 %v5723_v13  ;;  %1808 = vmatpush.msra.mxu1 %v7410_v2  ;;  %7433 = vst [vmem:[#allocation51_spill] sm:$0xff] %v5915_v30  ;;  %v5927_v2 = vld [vmem:[#allocation5 + $0x2f0] sm:$0xff] }
 0x296   : > { %1747 = vmatpush.msra.mxu0 %v7411_v32  ;;  %1851 = vmatpush.msra.mxu3 %v7412_v62  ;;  %7434 = vst [vmem:[#allocation52_spill] sm:$0xff] %v5918_v20  ;;  %v5930_v32 = vld [vmem:[#allocation5 + $0x190] sm:$0xff]  ;;  %v5933_v62 = vld [vmem:[#allocation5 + $0x68] sm:$0xff] }
 0x297   : > { %1809 = vmatpush.msra.mxu1 %v7413_v37  ;;  %1829 = vmatpush.msra.mxu2 %v7414_v21  ;;  %7435 = vst [vmem:[#allocation54_spill] sm:$0xff] %v5921_v5  ;;  %v5936_v37 = vld [vmem:[#allocation5 + $0x198] sm:$0xff]  ;;  %v5939_v21 = vld [vmem:[#allocation5 + $0x2c0] sm:$0xff] }
 0x298   : > { %1748 = vmatpush.msra.mxu0 %v7415_v33  ;;  %1852 = vmatpush.msra.mxu3 %v5507_v54  ;;  %v7421_v54 = vld [vmem:[#allocation76_spill] sm:$0xff]  ;;  %7436 = vst [vmem:[#allocation55_spill] sm:$0xff] %v5924_v8  ;;  %v5942_v33 = vld [vmem:[#allocation5 + $0x160] sm:$0xff] }
 0x299   : > { %1810 = vmatpush.msra.mxu1 %v7416_v24  ;;  %1830 = vmatpush.msra.mxu2 %v7417_v57  ;;  %7437 = vst [vmem:[#allocation57_spill] sm:$0xff] %v5927_v2  ;;  %v5945_v24 = vld [vmem:[#allocation5 + $0x38] sm:$0xff]  ;;  %v5948_v57 = vld [vmem:[#allocation5 + $0x168] sm:$0xff] }
 0x29a   : > { %1749 = vmatpush.msra.mxu0 %v7418_v12  ;;  %1853 = vmatpush.msra.mxu3 %v7419_v11  ;;  %7438 = vst [vmem:[#allocation50_spill] sm:$0xff] %v5930_v32  ;;  %v5951_v12 = vld [vmem:[#allocation5 + $0x290] sm:$0xff] }
 0x29b   : > { %1750 = vmatmul.f32.vlgmr.msra.gmra.mxu0 %v5723_v13  ;;  %1811 = vmatpush.msra.mxu1 %v5523_v9  ;;  %v5791_v9 = vld [vmem:[#allocation5 + $0x270] sm:$0xff]  ;;  %7439 = vst [vmem:[#allocation49_spill] sm:$0xff] %v5933_v62 }
 0x29c   : > { %1911 = vmatpush.msrb.mxu0 %v5779_v7  ;;  %1831 = vmatpush.msra.mxu2 %v7420_v4  ;;  %7440 = vst [vmem:[#allocation63_spill] sm:$0xff] %v5936_v37  ;;  %v5954_v11 = vld [vmem:[#allocation5 + $0x130] sm:$0xff]  ;;  %v5957_v4 = vld [vmem:[#allocation5 + $0x8] sm:$0xff] }
 0x29d   : > { %1730 = vmatmul.f32.gmra.mxu3 %v5739_v26  ;;  %1812 = vmatpush.msra.mxu1 %v7421_v54  ;;  %7441 = vst [vmem:[#allocation65_spill] sm:$0xff] %v5939_v21  ;;  %v5960_v54 = vld [vmem:[#allocation5 + $0x138] sm:$0xff] }
 0x29e   : > { %1912 = vmatpush.msrb.mxu0 %v5785_v14  ;;  %1854 = vmatpush.msra.mxu3 %v5535_v17  ;;  %v5805_v17 = vld [vmem:[#allocation5 + $0x210] sm:$0xff]  ;;  %7442 = vst [vmem:[#allocation53_spill] sm:$0xff] %v5942_v33 }
 0x29f   : > { %1813 = vmatpush.msra.mxu1 %v5538_v59  ;;  %1832 = vmatpush.msra.mxu2 %v7422_v3  ;;  %v5808_v59 = vld [vmem:[#allocation5 + $0x2a8] sm:$0xff]  ;;  %7443 = vst [vmem:[#allocation64_spill] sm:$0xff] %v5945_v24  ;;  %v5963_v3 = vld [vmem:[#allocation5 + $0x260] sm:$0xff] }
 0x2a0   : > { %1913 = vmatpush.msrb.mxu0 %v5791_v9  ;;  %1855 = vmatpush.msra.mxu3 %v5545_v23  ;;  %v5813_v23 = vld [vmem:[#allocation5 + $0x1e0] sm:$0xff]  ;;  %7444 = vst [vmem:[#allocation68_spill] sm:$0xff] %v5948_v57 }
 0x2a1   : > { %1814 = vmatpush.msra.mxu1 %v7423_v29  ;;  %1833 = vmatpush.msra.mxu2 %v5551_v50  ;;  %v5816_v50 = vld [vmem:[#allocation5 + $0x278] sm:$0xff]  ;;  %7445 = vst [vmem:[#allocation56_spill] sm:$0xff] %v5951_v12  ;;  %v5966_v29 = vld [vmem:[#allocation5 + $0x100] sm:$0xff] }
 0x2a2   : > { %1914 = vmatpush.msrb.mxu0 %v5797_v48  ;;  %1856 = vmatpush.msra.mxu3 %v5557_v1  ;;  %v5821_v1 = vld [vmem:[#allocation5 + $0x1b0] sm:$0xff]  ;;  %7446 = vst [vmem:[#allocation67_spill] sm:$0xff] %v5954_v11 }
 0x2a3   : > { %1934 = vmatpush.msrb.mxu1 %v5800_v18  ;;  %1753 = vmatmul.f32.gmra.mxu0 %v5739_v26  ;;  %7447 = vst [vmem:[#allocation71_spill] sm:$0xff] %v5957_v4 }
 0x2a4   : > { %1915 = vmatpush.msrb.mxu0 %v5805_v17  ;;  %1834 = vmatpush.msra.mxu2 %v5562_v43  ;;  %v5832_v43 = vld [vmem:[#allocation5 + $0x218] sm:$0xff]  ;;  %7448 = vst [vmem:[#allocation58_spill] sm:$0xff] %v5960_v54 }
 0x2a5   : > { %1935 = vmatpush.msrb.mxu1 %v5808_v59  ;;  %1857 = vmatpush.msra.mxu3 %v5565_v19  ;;  %v5829_v19 = vld [vmem:[#allocation5 + $0x180] sm:$0xff]  ;;  %7449 = vst [vmem:[#allocation59_spill] sm:$0xff] %v5963_v3 }
 0x2a6   : > { %1916 = vmatpush.msrb.mxu0 %v5813_v23  ;;  %1835 = vmatpush.msra.mxu2 %v5570_v55  ;;  %v7424_v55 = vld [vmem:[#allocation88_spill] sm:$0xff]  ;;  %7450 = vst [vmem:[#allocation70_spill] sm:$0xff] %v5966_v29 }
 0x2a7   : > { %1936 = vmatpush.msrb.mxu1 %v5816_v50  ;;  %1858 = vmatpush.msra.mxu3 %v5573_v58  ;;  %v7425_v58 = vld [vmem:[#allocation96_spill] sm:$0xff] }
 0x2a8   : > { %1917 = vmatpush.msrb.mxu0 %v5821_v1  ;;  %1836 = vmatpush.msra.mxu2 %v5578_v0  ;;  %v5843_v0 = vld [vmem:[#allocation5 + $0x2e0] sm:$0xff] }
 0x2a9   : > { %1937 = vmatpush.msrb.mxu1 %v5824_v38  ;;  %1859 = vmatpush.msra.mxu3 %v5581_v6  ;;  %v5846_v6 = vld [vmem:[#allocation5 + $0x2e8] sm:$0xff] }
 0x2aa   : > { %1918 = vmatpush.msrb.mxu0 %v5829_v19  ;;  %1837 = vmatpush.msra.mxu2 %v7424_v55  ;;  %v5969_v55 = vld [vmem:[#allocation5 + $0x108] sm:$0xff] }
 0x2ab   : > { %1938 = vmatpush.msrb.mxu1 %v5832_v43  ;;  %1860 = vmatpush.msra.mxu3 %v7425_v58  ;;  %7451 = vst [vmem:[#allocation60_spill] sm:$0xff] %v5969_v55  ;;  %v7452_v58 = vld [vmem:[#allocation28_spill] sm:$0xff] }
 0x2ac   : > { %1919 = vmatpush.msrb.mxu0 %v5837_v36  ;;  %1957 = vmatpush.msrb.mxu2 %v5843_v0 }
 0x2ad   : > { %1939 = vmatpush.msrb.mxu1 %v5840_v56  ;;  %1980 = vmatpush.msrb.mxu3 %v5846_v6 }
 0x2ae   : > { %1920 = vmatpush.msrb.mxu0 %v5849_v47  ;;  %1958 = vmatpush.msrb.mxu2 %v5855_v28 }
 0x2af   : > { %1940 = vmatpush.msrb.mxu1 %v5852_v10  ;;  %1981 = vmatpush.msrb.mxu3 %v5858_v40 }
 0x2b0   : > { %1921 = vmatpush.msrb.mxu0 %v5861_v15  ;;  %1959 = vmatpush.msrb.mxu2 %v5867_v25 }
 0x2b1   : > { %1941 = vmatpush.msrb.mxu1 %v5864_v16  ;;  %1982 = vmatpush.msrb.mxu3 %v5870_v41 }
 0x2b2   : > { %1922 = vmatpush.msrb.mxu0 %v5873_v51  ;;  %1960 = vmatpush.msrb.mxu2 %v5879_v31 }
 0x2b3   : > { %1942 = vmatpush.msrb.mxu1 %v5876_v63  ;;  %1983 = vmatpush.msrb.mxu3 %v5882_v34 }
 0x2b4   : > { %1923 = vmatpush.msrb.mxu0 %v5885_v39  ;;  %1961 = vmatpush.msrb.mxu2 %v5891_v45 }
 0x2b5   : > { %1943 = vmatpush.msrb.mxu1 %v5888_v52  ;;  %1984 = vmatpush.msrb.mxu3 %v5894_v35 }
 0x2b6   : > { %1924 = vmatpush.msrb.mxu0 %v5897_v46  ;;  %1962 = vmatpush.msrb.mxu2 %v5903_v49 }
 0x2b7   : > { %1944 = vmatpush.msrb.mxu1 %v5900_v22  ;;  %1985 = vmatpush.msrb.mxu3 %v5906_v61  ;;  %v7476_v61 = vld [vmem:[#allocation37_spill] sm:$0xff] }
 0x2b8   : > { %1925 = vmatpush.msrb.mxu0 %v5909_v53  ;;  %1963 = vmatpush.msrb.mxu2 %v5915_v30 }
 0x2b9   : > { %1945 = vmatpush.msrb.mxu1 %v5912_v60  ;;  %1986 = vmatpush.msrb.mxu3 %v5918_v20 }
 0x2ba   : > { %1926 = vmatpush.msrb.mxu0 %v5921_v5  ;;  %1964 = vmatpush.msrb.mxu2 %v5930_v32  ;;  %v7475_v5 = vld [vmem:[#allocation39_spill] sm:$0xff] }
 0x2bb   : > { %1946 = vmatpush.msrb.mxu1 %v5924_v8  ;;  %1987 = vmatpush.msrb.mxu3 %v5936_v37  ;;  %v3222_v32 = vld [vmem:[%s4442_s28 + $0xc0] sm:$0xff] }
 0x2bc   : > { %2003 = vmatpush.msra.mxu0 %v5927_v2  ;;  %1965 = vmatpush.msrb.mxu2 %v5942_v33  ;;  %v7474_v2 = vld [vmem:[#allocation27_spill] sm:$0xff] }
 0x2bd   : > { %1947 = vmatpush.msrb.mxu1 %v5933_v62  ;;  %1988 = vmatpush.msrb.mxu3 %v5948_v57 }
 0x2be   : > { %2004 = vmatpush.msra.mxu0 %v5939_v21  ;;  %1966 = vmatpush.msrb.mxu2 %v5954_v11  ;;  %v7471_v11 = vld [vmem:[#allocation34_spill] sm:$0xff] }
 0x2bf   : > { %1948 = vmatpush.msrb.mxu1 %v5945_v24  ;;  %1989 = vmatpush.msrb.mxu3 %v5960_v54  ;;  %v7455_v54 = vld [vmem:[#allocation29_spill] sm:$0xff] }
 0x2c0   : > { %2005 = vmatpush.msra.mxu0 %v5951_v12  ;;  %1967 = vmatpush.msrb.mxu2 %v5966_v29  ;;  %v5973_v12 = vld [vmem:[#allocation5 + $0xd0] sm:$0xff]  ;;  %v5983_v29 = vld [vmem:[#allocation5 + $0xa8] sm:$0xff] }
 0x2c1   : > { %1949 = vmatpush.msrb.mxu1 %v5957_v4  ;;  %1990 = vmatpush.msrb.mxu3 %v5969_v55  ;;  %7453 = vst [vmem:[#allocation74_spill] sm:$0xff] %v5973_v12  ;;  %v5976_v4 = vld [vmem:[#allocation5 + $0xd8] sm:$0xff] }
 0x2c2   : > { %2006 = vmatpush.msra.mxu0 %v5963_v3  ;;  %1968 = vmatpush.msrb.mxu2 %v5973_v12  ;;  %7454 = vst [vmem:[#allocation75_spill] sm:$0xff] %v5976_v4  ;;  %v5980_v3 = vld [vmem:[#allocation5 + $0xa0] sm:$0xff]  ;;  %v5990_v12 = vld [vmem:[#allocation5 + $0x78] sm:$0xff] }
 0x2c3   : > { %1991 = vmatpush.msrb.mxu3 %v5976_v4  ;;  %7456 = vst [vmem:[#allocation61_spill] sm:$0xff] %v5980_v3  ;;  %v7458_v55 = vld [vmem:[#allocation42_spill] sm:$0xff]  ;;  %v7469_v24 = vld [vmem:[#allocation33_spill] sm:$0xff] }
 0x2c4   : > { %2007 = vmatpush.msra.mxu0 %v7452_v58  ;;  %1969 = vmatpush.msrb.mxu2 %v5980_v3  ;;  %7457 = vst [vmem:[#allocation93_spill] sm:$0xff] %v5983_v29  ;;  %v5987_v58 = vld [vmem:[#allocation5 + $0x70] sm:$0xff]  ;;  %v7461_v4 = vld [vmem:[#allocation30_spill] sm:$0xff]  ;;  %v5997_v3 = vld [vmem:[#allocation5 + $0x48] sm:$0xff] }
 0x2c5   : > { %1992 = vmatpush.msrb.mxu3 %v5983_v29  ;;  %7459 = vst [vmem:[#allocation78_spill] sm:$0xff] %v5987_v58  ;;  %v7464_v29 = vld [vmem:[#allocation31_spill] sm:$0xff] }
 0x2c6   : > { %2008 = vmatpush.msra.mxu0 %v7455_v54  ;;  %1970 = vmatpush.msrb.mxu2 %v5987_v58  ;;  %7460 = vst [vmem:[#allocation79_spill] sm:$0xff] %v5990_v12  ;;  %v5994_v54 = vld [vmem:[#allocation5 + $0x40] sm:$0xff]  ;;  %v6004_v58 = vld [vmem:[#allocation5 + $0x18] sm:$0xff] }
 0x2c7   : > { %1993 = vmatpush.msrb.mxu3 %v5990_v12  ;;  %7462 = vst [vmem:[#allocation62_spill] sm:$0xff] %v5994_v54  ;;  %v7467_v12 = vld [vmem:[#allocation45_spill] sm:$0xff] }
 0x2c8   : > { %2009 = vmatpush.msra.mxu0 %v7458_v55  ;;  %1971 = vmatpush.msrb.mxu2 %v5994_v54  ;;  %7463 = vst [vmem:[#allocation66_spill] sm:$0xff] %v5997_v3  ;;  %v6001_v55 = vld [vmem:[#allocation5 + $0x10] sm:$0xff] }
 0x2c9   : > { %1994 = vmatpush.msrb.mxu3 %v5997_v3  ;;  %7465 = vst [vmem:[#allocation82_spill] sm:$0xff] %v6001_v55  ;;  %v7470_v54 = vld [vmem:[#allocation48_spill] sm:$0xff]  ;;  %v7472_v3 = vld [vmem:[#allocation35_spill] sm:$0xff] }
 0x2ca   : > { %2010 = vmatpush.msra.mxu0 %v7461_v4  ;;  %1972 = vmatpush.msrb.mxu2 %v6001_v55  ;;  %7466 = vst [vmem:[#allocation69_spill] sm:$0xff] %v6004_v58  ;;  %v7468_v4 = vld [vmem:[#allocation32_spill] sm:$0xff] }
 0x2cb   : > { %1995 = vmatpush.msrb.mxu3 %v6004_v58 }
 0x2cc   : > { %2011 = vmatpush.msra.mxu0 %v7464_v29  ;;  %v7473_v29 = vld [vmem:[#allocation36_spill] sm:$0xff] }
 0x2ce   : > { %2012 = vmatpush.msra.mxu0 %v7467_v12 }
 0x2d0   : > { %2013 = vmatpush.msra.mxu0 %v7468_v4 }
 0x2d2   : > { %2014 = vmatpush.msra.mxu0 %v7469_v24 }
 0x2d4   : > { %2015 = vmatpush.msra.mxu0 %v7470_v54 }
 0x2d6   : > { %2016 = vmatpush.msra.mxu0 %v7471_v11 }
 0x2d8   : > { %2017 = vmatpush.msra.mxu0 %v7472_v3 }
 0x2da   : > { %2018 = vmatpush.msra.mxu0 %v7473_v29 }
 0x2f8   : > { %v1524_v55 = vpop.f32.mrf.mxu0  ;;  %v1547_v62 = vpop.f32.mrf.mxu1 }
 0x2ff   : > { %v1570_v21 = vpop.f32.mrf.mxu2 }
 0x300   : > { %v1527_v57 = vpop.f32.mrf.mxu0  ;;  %v1550_v8 = vpop.f32.mrf.mxu1  ;;  %v1783_v49 = vadd.f32 %v7476_v61, %v1570_v21 }
 0x307   : > { %v1573_v58 = vpop.f32.mrf.mxu2 }
 0x308   : > { %v1636_v33 = vpop.f32.mrf.mxu3  ;;  %v1659_v12 = vpop.f32.mrf.mxu0 }
 0x309   : > { %v1757_v4 = vadd.f32 %v1636_v33, %v7474_v2  ;;  %v1758_v24 = vadd.f32 %v1659_v12, %v7475_v5 }
 0x30b   : > { %v1763_v54 = vadd.f32 %v1757_v4, %v1524_v55  ;;  %v1773_v37 = vadd.f32 %v1758_v24, %v1547_v62  ;;  %v1682_v55 = vpop.f32.mrf.mxu1 }
 0x30d   : > { %v1765_v11 = vmul.f32 0.5, %v1763_v54  ;;  %v1775_v53 = vmul.f32 0.5, %v1773_v37  ;;  %v3225_v37 = vld [vmem:[%s4442_s28 + $0xd8] sm:$0xff] }
 0x30f   : > { %3459 = vtanh.f32 %v1765_v11  ;;  %v1705_v3 = vpop.f32.mrf.mxu2  ;;  %v3223_v11 = vld [vmem:[%s4442_s28 + $0xc8] sm:$0xff] }
 0x310   : > { %v1875_v29 = vadd.f32 %v3222_v32, %v1705_v3  ;;  %v1639_v60 = vpop.f32.mrf.mxu3  ;;  %v1662_v20 = vpop.f32.mrf.mxu0  ;;  %3461 = vtanh.f32 %v1775_v53 }
 0x311   : > { %v1760_v30 = vadd.f32 %v1639_v60, %v7474_v2  ;;  %v1761_v46 = vadd.f32 %v1662_v20, %v7475_v5 }
 0x312   : > { %v1877_v33 = vmul.f32 0.5, %v1875_v29 }
 0x313   : > { %v1764_v12 = vadd.f32 %v1760_v30, %v1527_v57  ;;  %v1774_v22 = vadd.f32 %v1761_v46, %v1550_v8  ;;  %v1759_v46 = vadd.f32 %v1682_v55, %v5004_v42 }
 0x314   : > { %3463 = vtanh.f32 %v1877_v33 }
 0x315   : > { %v3460_v62 = vpop.eup %3459  ;;  %v1766_v4 = vmul.f32 0.5, %v1764_v12  ;;  %v1776_v54 = vmul.f32 0.5, %v1774_v22 }
 0x316   : > { %v1769_v24 = vadd.f32 1.0, %v3460_v62  ;;  %v3462_v3 = vpop.eup %3461 }
 0x317   : > { %3465 = vtanh.f32 %v1766_v4  ;;  %v1708_v32 = vpop.f32.mrf.mxu2  ;;  %v1779_v22 = vadd.f32 1.0, %v3462_v3 }
 0x318   : > { %v1771_v60 = vmul.f32 0.5, %v1769_v24  ;;  %v1876_v2 = vadd.f32 %v3225_v37, %v1708_v32  ;;  %v1728_v20 = vpop.f32.mrf.mxu3  ;;  %v1751_v53 = vpop.f32.mrf.mxu0  ;;  %3467 = vtanh.f32 %v1776_v54  ;;  %v6026_v37 = vld [vmem:[%s6836_s4] ss:$0 sm:$0xff]  ;;  %v3224_v24 = vld [vmem:[%s4442_s28 + $0xd0] sm:$0xff] }
 0x319   : > { %v1885_v29 = vadd.f32 %v3223_v11, %v1728_v20  ;;  %v1895_v55 = vadd.f32 %v6026_v37, %v1751_v53  ;;  %v3226_v54 = vld [vmem:[%s4442_s28 + $0xe0] sm:$0xff]  ;;  %v1685_v11 = vpop.f32.mrf.mxu1 }
 0x31a   : > { %v3464_v30 = vpop.eup %3463  ;;  %v1785_v8 = vmul.f32 %v1783_v49, %v1771_v60  ;;  %v1878_v57 = vmul.f32 0.5, %v1876_v2  ;;  %v1781_v2 = vmul.f32 0.5, %v1779_v22  ;;  %v1784_v60 = vadd.f32 %v7476_v61, %v1573_v58 }
 0x31b   : > { %v1881_v33 = vadd.f32 1.0, %v3464_v30  ;;  %v1887_v12 = vmul.f32 0.5, %v1885_v29 }
 0x31c   : > { %v1787_v62 = vadd.f32 %v1785_v8, %v1759_v46  ;;  %3469 = vtanh.f32 %v1878_v57  ;;  %v1762_v57 = vadd.f32 %v1685_v11, %v5004_v42  ;;  %v1795_v61 = vmul.f32 %v1781_v2, %v5704_v44  ;;  %v3227_v11 = vld [vmem:[%s4442_s28 + $0xe8] sm:$0xff] }
 0x31d   : > { %v3466_v4 = vpop.eup %3465  ;;  %v1883_v21 = vmul.f32 0.5, %v1881_v33  ;;  %3471 = vtanh.f32 %v1887_v12 }
 0x31e   : > { %3473 = vtanh.f32 %v1787_v62  ;;  %v1770_v49 = vadd.f32 1.0, %v3466_v4  ;;  %v3468_v3 = vpop.eup %3467  ;;  %v1791_v62 = vsub.f32 1.0, %v1781_v2  ;;  %v6042_v2 = vld [vmem:[#allocation5 + $0x2f8] sm:$0xff] }
 0x31f   : > { %v1897_v32 = vmul.f32 %v1895_v55, %v1883_v21  ;;  %v1780_v4 = vadd.f32 1.0, %v3468_v3 }
 0x320   : > { %v1772_v20 = vmul.f32 0.5, %v1770_v49  ;;  %v1731_v29 = vpop.f32.mrf.mxu3  ;;  %v1754_v12 = vpop.f32.mrf.mxu0 }
 0x321   : > { %v1899_v30 = vadd.f32 %v3224_v24, %v1897_v32  ;;  %v1886_v46 = vadd.f32 %v3226_v54, %v1731_v29  ;;  %v1896_v49 = vadd.f32 %v6026_v37, %v1754_v12  ;;  %v1782_v32 = vmul.f32 0.5, %v1780_v4  ;;  %v6057_v4 = vld [vmem:[#allocation7 + $0x150] sm:$0xff] }
 0x322   : > { %v3470_v8 = vpop.eup %3469  ;;  %v1786_v33 = vmul.f32 %v1784_v60, %v1772_v20 }
 0x323   : > { %v3472_v53 = vpop.eup %3471  ;;  %v1882_v5 = vadd.f32 1.0, %v3470_v8  ;;  %3475 = vtanh.f32 %v1899_v30  ;;  %v1888_v39 = vmul.f32 0.5, %v1886_v46  ;;  %v6045_v46 = vld [vmem:[#allocation7 + $0x168] sm:$0xff]  ;;  %v6048_v8 = vld [vmem:[#allocation7 + $0x170] sm:$0xff] }
 0x324   : > { %v3474_v22 = vpop.eup %3473  ;;  %v1788_v21 = vadd.f32 %v1786_v33, %v1762_v57  ;;  %v1891_v55 = vadd.f32 1.0, %v3472_v53  ;;  %v1796_v53 = vmul.f32 %v1782_v32, %v5719_v27  ;;  %v6072_v27 = vld [vmem:[#allocation7 + $0x178] sm:$0xff] }
 0x325   : > { %v1884_v58 = vmul.f32 0.5, %v1882_v5  ;;  %v1793_v24 = vmul.f32 %v3474_v22, %v1791_v62  ;;  %v6060_v22 = vld [vmem:[#allocation7 + $0x158] sm:$0xff]  ;;  %7477 = vst [vmem:[#allocation86_spill] sm:$0xff] %v6072_v27 }
 0x326   : > { %3477 = vtanh.f32 %v1788_v21  ;;  %v1893_v54 = vmul.f32 0.5, %v1891_v55  ;;  %v6064_v55 = vld [vmem:[#allocation5 + $0x298] sm:$0xff] }
 0x327   : > { %3479 = vtanh.f32 %v1888_v39  ;;  %v1898_v60 = vmul.f32 %v1896_v49, %v1884_v58  ;;  %v6036_v20 = vadd.f32 %v1795_v61, %v1793_v24  ;;  %v1792_v39 = vsub.f32 1.0, %v1782_v32  ;;  %v6069_v58 = vld [vmem:[#allocation7 + $0x138] sm:$0xff]  ;;  %v6075_v24 = vld [vmem:[#allocation5 + $0x268] sm:$0xff] }
 0x328   : > { %v1903_v3 = vsub.f32 1.0, %v1893_v54  ;;  %v1907_v44 = vmul.f32 %v1893_v54, %v5723_v13  ;;  %v6053_v13 = vld [vmem:[#allocation5 + $0x2c8] sm:$0xff]  ;;  %v6078_v54 = vld [vmem:[#allocation7 + $0x140] sm:$0xff] }
 0x329   : > { %v3476_v29 = vpop.eup %3475  ;;  %v1900_v30 = vadd.f32 %v3227_v11, %v1898_v60  ;;  %1815 = vmatmul.f32.vlgmr.msra.gmra.mxu1 %v6036_v20  ;;  %1838 = vmatmul.f32.vlgmr.msra.gmra.mxu2 %v6036_v20  ;;  %v6084_v60 = vld [vmem:[#allocation5 + $0x238] sm:$0xff] }
 0x32a   : > { %v1905_v5 = vmul.f32 %v3476_v29, %v1903_v3  ;;  %1861 = vmatmul.f32.vlgmr.msra.gmra.mxu3 %v6036_v20  ;;  %2026 = vmatpush.msra.mxu1 %v6042_v2  ;;  %v6087_v3 = vld [vmem:[#allocation7 + $0x120] sm:$0xff] }
 0x32b   : > { %3481 = vtanh.f32 %v1900_v30  ;;  %2091 = vmatpush.msra.mxu2 %v6045_v46  ;;  %2114 = vmatpush.msra.mxu3 %v6048_v8  ;;  %v6090_v29 = vld [vmem:[#allocation7 + $0x160] sm:$0xff] }
 0x32c   : > { %v3478_v57 = vpop.eup %3477  ;;  %v6051_v33 = vadd.f32 %v1907_v44, %v1905_v5  ;;  %2027 = vmatpush.msra.mxu1 %v6053_v13  ;;  %7478 = vst [vmem:[#allocation83_spill] sm:$0xff] %v6090_v29  ;;  %v6094_v5 = vld [vmem:[#allocation5 + $0x208] sm:$0xff] }
 0x32d   : > { %v3480_v12 = vpop.eup %3479  ;;  %v1794_v62 = vmul.f32 %v3478_v57, %v1792_v39  ;;  %2092 = vmatpush.msra.mxu2 %v6057_v4  ;;  %2115 = vmatpush.msra.mxu3 %v6060_v22  ;;  %v6097_v39 = vld [vmem:[#allocation7 + $0x128] sm:$0xff] }
 0x32e   : > { %v1892_v21 = vadd.f32 1.0, %v3480_v12  ;;  %1927 = vmatmul.f32.vlgmr.msrb.gmra.mxu0 %v6051_v33  ;;  %2028 = vmatpush.msra.mxu1 %v6064_v55  ;;  %v6100_v57 = vld [vmem:[#allocation7 + $0x108] sm:$0xff] }
 0x32f   : > { %v6067_v61 = vadd.f32 %v1796_v53, %v1794_v62  ;;  %2093 = vmatpush.msra.mxu2 %v6069_v58  ;;  %2137 = vmatpush.msrb.mxu0 %v6072_v27  ;;  %v6103_v12 = vld [vmem:[#allocation7 + $0x148] sm:$0xff]  ;;  %v6111_v62 = vld [vmem:[#allocation7 + $0x110] sm:$0xff]  ;;  %v6145_v27 = vld [vmem:[#allocation7 + $0x100] sm:$0xff] }
 0x330   : > { %v1894_v49 = vmul.f32 0.5, %v1892_v21  ;;  %2029 = vmatpush.msra.mxu1 %v6075_v24  ;;  %2116 = vmatpush.msra.mxu3 %v6078_v54  ;;  %7479 = vst [vmem:[#allocation73_spill] sm:$0xff] %v6103_v12  ;;  %v6114_v21 = vld [vmem:[#allocation7 + $0xf0] sm:$0xff] }
 0x331   : > { %v3482_v11 = vpop.eup %3481  ;;  %1818 = vmatmul.f32.gmra.mxu1 %v6067_v61  ;;  %1841 = vmatmul.f32.gmra.mxu2 %v6067_v61  ;;  %7486 = vst [vmem:[#allocation94_spill] sm:$0xff] %v6145_v27 }
 0x332   : > { %v1904_v32 = vsub.f32 1.0, %v1894_v49  ;;  %1864 = vmatmul.f32.gmra.mxu3 %v6067_v61  ;;  %2030 = vmatpush.msra.mxu1 %v6084_v60  ;;  %v1908_v30 = vmul.f32 %v1894_v49, %v5739_v26  ;;  %v6108_v26 = vld [vmem:[#allocation5 + $0x1d8] sm:$0xff]  ;;  %v6117_v49 = vld [vmem:[#allocation7 + $0x130] sm:$0xff] }
 0x333   : > { %2094 = vmatpush.msra.mxu2 %v6087_v3  ;;  %2138 = vmatpush.msrb.mxu0 %v6090_v29  ;;  %7480 = vst [vmem:[#allocation90_spill] sm:$0xff] %v6117_v49  ;;  %v6142_v29 = vld [vmem:[#allocation7 + $0xc0] sm:$0xff] }
 0x334   : > { %v1906_v44 = vmul.f32 %v3482_v11, %v1904_v32  ;;  %2031 = vmatpush.msra.mxu1 %v6094_v5  ;;  %2117 = vmatpush.msra.mxu3 %v6097_v39  ;;  %v6121_v11 = vld [vmem:[#allocation5 + $0x1a8] sm:$0xff]  ;;  %v6127_v32 = vld [vmem:[#allocation5 + $0x178] sm:$0xff]  ;;  %7485 = vst [vmem:[#allocation85_spill] sm:$0xff] %v6142_v29 }
 0x335   : > { %2095 = vmatpush.msra.mxu2 %v6100_v57  ;;  %2139 = vmatpush.msrb.mxu0 %v6103_v12  ;;  %7481 = vst [vmem:[#allocation87_spill] sm:$0xff] %v6127_v32  ;;  %v6139_v12 = vld [vmem:[#allocation7 + $0xf8] sm:$0xff] }
 0x336   : > { %v6106_v53 = vadd.f32 %v1908_v30, %v1906_v44  ;;  %2032 = vmatpush.msra.mxu1 %v6108_v26  ;;  %2118 = vmatpush.msra.mxu3 %v6111_v62  ;;  %v6130_v30 = vld [vmem:[#allocation7 + $0xd8] sm:$0xff] }
 0x337   : > { %2096 = vmatpush.msra.mxu2 %v6114_v21  ;;  %2140 = vmatpush.msrb.mxu0 %v6117_v49  ;;  %7482 = vst [vmem:[#allocation77_spill] sm:$0xff] %v6130_v30  ;;  %v6133_v44 = vld [vmem:[#allocation7 + $0x118] sm:$0xff]  ;;  %v6136_v49 = vld [vmem:[#allocation5 + $0x148] sm:$0xff] }
 0x338   : > { %1930 = vmatmul.f32.gmra.mxu0 %v6106_v53  ;;  %2033 = vmatpush.msra.mxu1 %v6121_v11  ;;  %7483 = vst [vmem:[#allocation81_spill] sm:$0xff] %v6133_v44 }
 0x339   : > { %1950 = vmatmul.f32.vlgmr.msrb.gmra.mxu1 %v6051_v33  ;;  %1973 = vmatmul.f32.vlgmr.msrb.gmra.mxu2 %v6051_v33  ;;  %7484 = vst [vmem:[#allocation92_spill] sm:$0xff] %v6136_v49 }
 0x33a   : > { %1996 = vmatmul.f32.vlgmr.msrb.gmra.mxu3 %v6051_v33  ;;  %2034 = vmatpush.msra.mxu1 %v6127_v32  ;;  %v6157_v32 = vld [vmem:[#allocation7 + $0xe8] sm:$0xff] }
 0x33b   : > { %2097 = vmatpush.msra.mxu2 %v6130_v30  ;;  %2141 = vmatpush.msrb.mxu0 %v6133_v44  ;;  %v6148_v30 = vld [vmem:[#allocation5 + $0x118] sm:$0xff]  ;;  %v6151_v44 = vld [vmem:[#allocation7 + $0xe0] sm:$0xff]  ;;  %7490 = vst [vmem:[#allocation72_spill] sm:$0xff] %v6157_v32 }
 0x33c   : > { %2035 = vmatpush.msra.mxu1 %v6136_v49  ;;  %2119 = vmatpush.msra.mxu3 %v6139_v12  ;;  %7487 = vst [vmem:[#allocation89_spill] sm:$0xff] %v6148_v30  ;;  %v6154_v49 = vld [vmem:[#allocation7 + $0xa8] sm:$0xff] }
 0x33d   : > { %2098 = vmatpush.msra.mxu2 %v6142_v29  ;;  %2142 = vmatpush.msrb.mxu0 %v6145_v27  ;;  %7488 = vst [vmem:[#allocation91_spill] sm:$0xff] %v6151_v44  ;;  %v6161_v29 = vld [vmem:[#allocation5 + $0xe8] sm:$0xff]  ;;  %v6167_v27 = vld [vmem:[#allocation5 + $0xb8] sm:$0xff] }
 0x33e   : > { %2036 = vmatpush.msra.mxu1 %v6148_v30  ;;  %2120 = vmatpush.msra.mxu3 %v6151_v44  ;;  %7489 = vst [vmem:[#allocation95_spill] sm:$0xff] %v6154_v49  ;;  %v6176_v30 = vld [vmem:[#allocation5 + $0x88] sm:$0xff]  ;;  %v6182_v44 = vld [vmem:[#allocation7 + $0x78] sm:$0xff] }
 0x33f   : > { %2099 = vmatpush.msra.mxu2 %v6154_v49  ;;  %2143 = vmatpush.msrb.mxu0 %v6157_v32  ;;  %7491 = vst [vmem:[#allocation76_spill] sm:$0xff] %v6161_v29  ;;  %v6170_v49 = vld [vmem:[#allocation7 + $0x90] sm:$0xff]  ;;  %v6173_v32 = vld [vmem:[#allocation7 + $0xc8] sm:$0xff] }
 0x340   : > { %2019 = vmatmul.f32.vlgmr.msra.gmra.mxu0 %v6051_v33  ;;  %2037 = vmatpush.msra.mxu1 %v6161_v29  ;;  %7492 = vst [vmem:[#allocation80_spill] sm:$0xff] %v6167_v27  ;;  %v6179_v29 = vld [vmem:[#allocation7 + $0xd0] sm:$0xff] }
 0x341   : > { %1953 = vmatmul.f32.gmra.mxu1 %v6106_v53  ;;  %1976 = vmatmul.f32.gmra.mxu2 %v6106_v53  ;;  %7493 = vst [vmem:[#allocation84_spill] sm:$0xff] %v6170_v49 }
 0x342   : > { %1999 = vmatmul.f32.gmra.mxu3 %v6106_v53  ;;  %2038 = vmatpush.msra.mxu1 %v6167_v27  ;;  %7494 = vst [vmem:[#allocation88_spill] sm:$0xff] %v6173_v32  ;;  %v6185_v27 = vld [vmem:[#allocation7 + $0xb0] sm:$0xff] }
 0x343   : > { %2100 = vmatpush.msra.mxu2 %v6170_v49  ;;  %2121 = vmatpush.msra.mxu3 %v6173_v32  ;;  %7495 = vst [vmem:[#allocation96_spill] sm:$0xff] %v6176_v30  ;;  %v6188_v49 = vld [vmem:[#allocation5 + $0x58] sm:$0xff] }
 0x344   : > { %2039 = vmatpush.msra.mxu1 %v6176_v30  ;;  %7496 = vst [vmem:[#allocation28_spill] sm:$0xff] %v6179_v29  ;;  %2144 = vmatpush.msrb.mxu0 %v6179_v29  ;;  %v6191_v32 = vld [vmem:[#allocation7 + $0xb8] sm:$0xff]  ;;  %v6194_v30 = vld [vmem:[#allocation7 + $0x60] sm:$0xff] }
 0x345   : > { %7497 = vst [vmem:[#allocation29_spill] sm:$0xff] %v6182_v44  ;;  %2101 = vmatpush.msra.mxu2 %v6182_v44  ;;  %2122 = vmatpush.msra.mxu3 %v6185_v27  ;;  %v6197_v29 = vld [vmem:[#allocation7 + $0x98] sm:$0xff]  ;;  %v6201_v44 = vld [vmem:[#allocation5 + $0x28] sm:$0xff] }
 0x346   : > { %7498 = vst [vmem:[#allocation42_spill] sm:$0xff] %v6188_v49  ;;  %2040 = vmatpush.msra.mxu1 %v6188_v49  ;;  %2145 = vmatpush.msrb.mxu0 %v6191_v32  ;;  %v6205_v49 = vld [vmem:[#allocation7 + $0x48] sm:$0xff] }
 0x347   : > { %7499 = vst [vmem:[#allocation30_spill] sm:$0xff] %v6191_v32  ;;  %2102 = vmatpush.msra.mxu2 %v6194_v30  ;;  %2123 = vmatpush.msra.mxu3 %v6197_v29  ;;  %v6209_v32 = vld [vmem:[#allocation7 + $0xa0] sm:$0xff] }
 0x348   : > { %7500 = vst [vmem:[#allocation31_spill] sm:$0xff] %v6194_v30  ;;  %2022 = vmatmul.f32.gmra.mxu0 %v6106_v53  ;;  %2041 = vmatpush.msra.mxu1 %v6201_v44  ;;  %v6212_v30 = vld [vmem:[#allocation7 + $0x30] sm:$0xff] }
 0x349   : > { %7501 = vst [vmem:[#allocation45_spill] sm:$0xff] %v6197_v29  ;;  %2042 = vmatmul.f32.vlgmr.msra.gmra.mxu1 %v6051_v33  ;;  %2103 = vmatpush.msra.mxu2 %v6205_v49  ;;  %v6215_v29 = vld [vmem:[#allocation7 + $0x80] sm:$0xff] }
 0x34a   : > { %7502 = vst [vmem:[#allocation32_spill] sm:$0xff] %v6201_v44  ;;  %2203 = vmatpush.msrb.mxu1 %v5779_v7  ;;  %2146 = vmatpush.msrb.mxu0 %v6209_v32  ;;  %v6219_v44 = vld [vmem:[#allocation7 + $0x88] sm:$0xff] }
 0x34b   : > { %7503 = vst [vmem:[#allocation33_spill] sm:$0xff] %v6205_v49  ;;  %2104 = vmatpush.msra.mxu2 %v6212_v30  ;;  %2124 = vmatpush.msra.mxu3 %v6215_v29  ;;  %v6222_v49 = vld [vmem:[#allocation7 + $0x18] sm:$0xff]  ;;  %v6225_v7 = vld [vmem:[#allocation7 + $0x68] sm:$0xff] }
 0x34c   : > { %7504 = vst [vmem:[#allocation48_spill] sm:$0xff] %v6209_v32  ;;  %2204 = vmatpush.msrb.mxu1 %v5785_v14  ;;  %2147 = vmatpush.msrb.mxu0 %v6219_v44  ;;  %v6229_v32 = vld [vmem:[#allocation7 + $0x70] sm:$0xff] }
 0x34d   : > { %7505 = vst [vmem:[#allocation34_spill] sm:$0xff] %v6212_v30  ;;  %2105 = vmatpush.msra.mxu2 %v6222_v49  ;;  %2125 = vmatpush.msra.mxu3 %v6225_v7  ;;  %v6232_v30 = vld [vmem:[#allocation7] sm:$0xff]  ;;  %v6235_v14 = vld [vmem:[#allocation7 + $0x50] sm:$0xff] }
 0x34e   : > { %7506 = vst [vmem:[#allocation35_spill] sm:$0xff] %v6219_v44  ;;  %2205 = vmatpush.msrb.mxu1 %v5791_v9  ;;  %2148 = vmatpush.msrb.mxu0 %v6229_v32  ;;  %v6241_v44 = vld [vmem:[#allocation7 + $0x58] sm:$0xff] }
 0x34f   : > { %7507 = vst [vmem:[#allocation36_spill] sm:$0xff] %v6229_v32  ;;  %2106 = vmatpush.msra.mxu2 %v6232_v30  ;;  %2126 = vmatpush.msra.mxu3 %v6235_v14  ;;  %v6246_v9 = vld [vmem:[#allocation7 + $0x38] sm:$0xff]  ;;  %v6249_v32 = vld [vmem:[#allocation7 + $0x40] sm:$0xff] }
 0x350   : > { %2206 = vmatpush.msrb.mxu1 %v5797_v48  ;;  %2149 = vmatpush.msrb.mxu0 %v6241_v44  ;;  %v6254_v48 = vld [vmem:[#allocation7 + $0x20] sm:$0xff] }
 0x351   : > { %2226 = vmatpush.msrb.mxu2 %v5800_v18  ;;  %2045 = vmatmul.f32.gmra.mxu1 %v6106_v53  ;;  %v6257_v18 = vld [vmem:[#allocation7 + $0x28] sm:$0xff] }
 0x352   : > { %2207 = vmatpush.msrb.mxu1 %v5805_v17  ;;  %2127 = vmatpush.msra.mxu3 %v6246_v9  ;;  %v6262_v17 = vld [vmem:[#allocation7 + $0x8] sm:$0xff] }
 0x353   : > { %2227 = vmatpush.msrb.mxu2 %v5808_v59  ;;  %2150 = vmatpush.msrb.mxu0 %v6249_v32  ;;  %v6265_v59 = vld [vmem:[#allocation7 + $0x10] sm:$0xff] }
 0x354   : > { %2208 = vmatpush.msrb.mxu1 %v5813_v23  ;;  %2128 = vmatpush.msra.mxu3 %v6254_v48  ;;  %7508 = vst [vmem:[#allocation37_spill] sm:$0xff] %v6265_v59  ;;  %v7509_v23 = vld [vmem:[#allocation38_spill] sm:$0xff] }
 0x355   : > { %2228 = vmatpush.msrb.mxu2 %v5816_v50  ;;  %2151 = vmatpush.msrb.mxu0 %v6257_v18  ;;  %v7510_v50 = vld [vmem:[#allocation43_spill] sm:$0xff] }
 0x356   : > { %2209 = vmatpush.msrb.mxu1 %v5821_v1  ;;  %2129 = vmatpush.msra.mxu3 %v6262_v17  ;;  %v7511_v1 = vld [vmem:[#allocation44_spill] sm:$0xff] }
 0x357   : > { %2229 = vmatpush.msrb.mxu2 %v5824_v38  ;;  %2152 = vmatpush.msrb.mxu0 %v6265_v59  ;;  %v7512_v38 = vld [vmem:[#allocation41_spill] sm:$0xff] }
 0x358   : > { %2210 = vmatpush.msrb.mxu1 %v5829_v19  ;;  %2249 = vmatpush.msrb.mxu3 %v5843_v0  ;;  %v7513_v19 = vld [vmem:[#allocation40_spill] sm:$0xff]  ;;  %v7517_v0 = vld [vmem:[#allocation46_spill] sm:$0xff] }
 0x359   : > { %2230 = vmatpush.msrb.mxu2 %v5832_v43  ;;  %2272 = vmatpush.msra.mxu0 %v5846_v6  ;;  %v7514_v43 = vld [vmem:[#allocation51_spill] sm:$0xff]  ;;  %v7518_v6 = vld [vmem:[#allocation50_spill] sm:$0xff] }
 0x35a   : > { %2211 = vmatpush.msrb.mxu1 %v5837_v36  ;;  %2250 = vmatpush.msrb.mxu3 %v5855_v28  ;;  %v7515_v36 = vld [vmem:[#allocation52_spill] sm:$0xff]  ;;  %v7521_v28 = vld [vmem:[#allocation54_spill] sm:$0xff] }
 0x35b   : > { %2231 = vmatpush.msrb.mxu2 %v5840_v56  ;;  %2273 = vmatpush.msra.mxu0 %v5858_v40  ;;  %v7516_v56 = vld [vmem:[#allocation47_spill] sm:$0xff]  ;;  %v7522_v40 = vld [vmem:[#allocation57_spill] sm:$0xff] }
 0x35c   : > { %2212 = vmatpush.msrb.mxu1 %v5849_v47  ;;  %2251 = vmatpush.msrb.mxu3 %v5867_v25  ;;  %v7519_v47 = vld [vmem:[#allocation63_spill] sm:$0xff]  ;;  %v7525_v25 = vld [vmem:[#allocation68_spill] sm:$0xff] }
 0x35d   : > { %2232 = vmatpush.msrb.mxu2 %v5852_v10  ;;  %2274 = vmatpush.msra.mxu0 %v5870_v41  ;;  %v7520_v10 = vld [vmem:[#allocation55_spill] sm:$0xff]  ;;  %v7526_v41 = vld [vmem:[#allocation65_spill] sm:$0xff] }
 0x35e   : > { %2213 = vmatpush.msrb.mxu1 %v5861_v15  ;;  %2252 = vmatpush.msrb.mxu3 %v5879_v31  ;;  %v7523_v15 = vld [vmem:[#allocation53_spill] sm:$0xff]  ;;  %v7529_v31 = vld [vmem:[#allocation58_spill] sm:$0xff] }
 0x35f   : > { %2233 = vmatpush.msrb.mxu2 %v5864_v16  ;;  %2275 = vmatpush.msra.mxu0 %v5882_v34  ;;  %v7524_v16 = vld [vmem:[#allocation49_spill] sm:$0xff]  ;;  %v7530_v34 = vld [vmem:[#allocation56_spill] sm:$0xff] }
 0x360   : > { %2214 = vmatpush.msrb.mxu1 %v5873_v51  ;;  %2253 = vmatpush.msrb.mxu3 %v5891_v45  ;;  %v7527_v51 = vld [vmem:[#allocation67_spill] sm:$0xff] }
 0x361   : > { %2234 = vmatpush.msrb.mxu2 %v5876_v63  ;;  %2276 = vmatpush.msra.mxu0 %v5894_v35  ;;  %v7528_v63 = vld [vmem:[#allocation64_spill] sm:$0xff]  ;;  %v7532_v45 = vld [vmem:[#allocation71_spill] sm:$0xff] }
 0x362   : > { %2215 = vmatpush.msrb.mxu1 %v7509_v23  ;;  %2254 = vmatpush.msrb.mxu3 %v7510_v50  ;;  %v7533_v35 = vld [vmem:[#allocation60_spill] sm:$0xff]  ;;  %v7534_v23 = vld [vmem:[#allocation59_spill] sm:$0xff]  ;;  %v7535_v50 = vld [vmem:[#allocation74_spill] sm:$0xff] }
 0x363   : > { %2235 = vmatpush.msrb.mxu2 %v5888_v52  ;;  %2277 = vmatpush.msra.mxu0 %v7511_v1  ;;  %v7531_v52 = vld [vmem:[#allocation70_spill] sm:$0xff]  ;;  %v7536_v1 = vld [vmem:[#allocation75_spill] sm:$0xff] }
 0x364   : > { %2216 = vmatpush.msrb.mxu1 %v7513_v19  ;;  %2255 = vmatpush.msrb.mxu3 %v7514_v43  ;;  %v7538_v19 = vld [vmem:[#allocation61_spill] sm:$0xff] }
 0x365   : > { %2236 = vmatpush.msrb.mxu2 %v7512_v38  ;;  %2278 = vmatpush.msra.mxu0 %v7515_v36  ;;  %v6317_v38 = vld [vmem:[#allocation5 + $0x230] sm:$0xff]  ;;  %v6322_v36 = vld [vmem:[#allocation5 + $0x200] sm:$0xff] }
 0x366   : > { %2217 = vmatpush.msrb.mxu1 %v7517_v0  ;;  %2256 = vmatpush.msrb.mxu3 %v7518_v6  ;;  %7537 = vst [vmem:[#allocation38_spill] sm:$0xff] %v6317_v38  ;;  %v7539_v43 = vld [vmem:[#allocation93_spill] sm:$0xff]  ;;  %v7542_v0 = vld [vmem:[#allocation79_spill] sm:$0xff] }
 0x367   : > { %2237 = vmatpush.msrb.mxu2 %v7516_v56  ;;  %2279 = vmatpush.msra.mxu0 %v7519_v47  ;;  %7540 = vst [vmem:[#allocation43_spill] sm:$0xff] %v6322_v36  ;;  %v7541_v56 = vld [vmem:[#allocation78_spill] sm:$0xff]  ;;  %v6327_v6 = vld [vmem:[#allocation5 + $0x1d0] sm:$0xff] }
 0x368   : > { %2218 = vmatpush.msrb.mxu1 %v7521_v28  ;;  %2257 = vmatpush.msrb.mxu3 %v7523_v15  ;;  %7543 = vst [vmem:[#allocation44_spill] sm:$0xff] %v6327_v6  ;;  %v7544_v47 = vld [vmem:[#allocation62_spill] sm:$0xff]  ;;  %v7548_v15 = vld [vmem:[#allocation69_spill] sm:$0xff] }
 0x369   : > { %2238 = vmatpush.msrb.mxu2 %v7520_v10  ;;  %2280 = vmatpush.msra.mxu0 %v7525_v25  ;;  %v7545_v10 = vld [vmem:[#allocation66_spill] sm:$0xff] }
 0x36a   : > { %2295 = vmatpush.msra.mxu1 %v7522_v40  ;;  %2258 = vmatpush.msrb.mxu3 %v7527_v51  ;;  %v6332_v28 = vld [vmem:[#allocation5 + $0x1a0] sm:$0xff] }
 0x36b   : > { %2239 = vmatpush.msrb.mxu2 %v7524_v16  ;;  %2281 = vmatpush.msra.mxu0 %v7529_v31  ;;  %7546 = vst [vmem:[#allocation41_spill] sm:$0xff] %v6332_v28  ;;  %v7547_v40 = vld [vmem:[#allocation82_spill] sm:$0xff]  ;;  %v6337_v16 = vld [vmem:[#allocation5 + $0x170] sm:$0xff] }
 0x36c   : > { %2296 = vmatpush.msra.mxu1 %v7526_v41  ;;  %2259 = vmatpush.msrb.mxu3 %v7531_v52  ;;  %7549 = vst [vmem:[#allocation40_spill] sm:$0xff] %v6337_v16  ;;  %v6340_v25 = vld [vmem:[#allocation5 + $0x140] sm:$0xff]  ;;  %v6343_v41 = vld [vmem:[#allocation5 + $0x110] sm:$0xff] }
 0x36d   : > { %2240 = vmatpush.msrb.mxu2 %v7528_v63  ;;  %2282 = vmatpush.msra.mxu0 %v7533_v35  ;;  %7550 = vst [vmem:[#allocation51_spill] sm:$0xff] %v6340_v25  ;;  %v6346_v51 = vld [vmem:[#allocation5 + $0xe0] sm:$0xff]  ;;  %v6349_v63 = vld [vmem:[#allocation5 + $0xb0] sm:$0xff] }
 0x36e   : > { %2297 = vmatpush.msra.mxu1 %v7530_v34  ;;  %2260 = vmatpush.msrb.mxu3 %v7535_v50  ;;  %7551 = vst [vmem:[#allocation52_spill] sm:$0xff] %v6343_v41  ;;  %v6352_v31 = vld [vmem:[#allocation5 + $0x80] sm:$0xff]  ;;  %v6355_v34 = vld [vmem:[#allocation5 + $0x50] sm:$0xff] }
 0x36f   : > { %2241 = vmatpush.msrb.mxu2 %v7532_v45  ;;  %2283 = vmatpush.msra.mxu0 %v7536_v1  ;;  %7552 = vst [vmem:[#allocation47_spill] sm:$0xff] %v6346_v51  ;;  %v6358_v52 = vld [vmem:[#allocation5 + $0x20] sm:$0xff] }
 0x370   : > { %2298 = vmatpush.msra.mxu1 %v7534_v23  ;;  %2261 = vmatpush.msrb.mxu3 %v7538_v19  ;;  %7553 = vst [vmem:[#allocation46_spill] sm:$0xff] %v6349_v63  ;;  %v7557_v23 = vld [vmem:[#allocation27_spill] sm:$0xff] }
 0x371   : > { %2284 = vmatpush.msra.mxu0 %v7539_v43  ;;  %7554 = vst [vmem:[#allocation50_spill] sm:$0xff] %v6352_v31 }
 0x372   : > { %2299 = vmatpush.msra.mxu1 %v6317_v38  ;;  %2262 = vmatpush.msrb.mxu3 %v7541_v56  ;;  %7555 = vst [vmem:[#allocation63_spill] sm:$0xff] %v6355_v34  ;;  %v3232_v38 = vld [vmem:[%s4442_s28 + $0x110] sm:$0xff] }
 0x373   : > { %2285 = vmatpush.msra.mxu0 %v7542_v0  ;;  %7556 = vst [vmem:[#allocation55_spill] sm:$0xff] %v6358_v52 }
 0x374   : > { %2300 = vmatpush.msra.mxu1 %v6322_v36  ;;  %2263 = vmatpush.msrb.mxu3 %v7544_v47 }
 0x375   : > { %2286 = vmatpush.msra.mxu0 %v7545_v10 }
 0x376   : > { %2301 = vmatpush.msra.mxu1 %v6327_v6  ;;  %2264 = vmatpush.msrb.mxu3 %v7547_v40 }
 0x377   : > { %2287 = vmatpush.msra.mxu0 %v7548_v15 }
 0x378   : > { %2302 = vmatpush.msra.mxu1 %v6332_v28  ;;  %v3228_v28 = vld [vmem:[%s4442_s28 + $0xf0] sm:$0xff] }
 0x37a   : > { %2303 = vmatpush.msra.mxu1 %v6337_v16 }
 0x37c   : > { %2304 = vmatpush.msra.mxu1 %v6340_v25 }
 0x37e   : > { %2305 = vmatpush.msra.mxu1 %v6343_v41 }
 0x380   : > { %2306 = vmatpush.msra.mxu1 %v6346_v51 }
 0x382   : > { %2307 = vmatpush.msra.mxu1 %v6349_v63 }
 0x384   : > { %2308 = vmatpush.msra.mxu1 %v6352_v31  ;;  %v7558_v31 = vld [vmem:[#allocation39_spill] sm:$0xff] }
 0x386   : > { %2309 = vmatpush.msra.mxu1 %v6355_v34 }
 0x388   : > { %2310 = vmatpush.msra.mxu1 %v6358_v52 }
 0x3a6   : > { %v1816_v45 = vpop.f32.mrf.mxu1 }
 0x3ab   : > { %v1928_v35 = vpop.f32.mrf.mxu0 }
 0x3ac   : > { %v2049_v50 = vadd.f32 %v1928_v35, %v7557_v23  ;;  %v1839_v1 = vpop.f32.mrf.mxu2 }
 0x3ad   : > { %v1862_v19 = vpop.f32.mrf.mxu3 }
 0x3ae   : > { %v2055_v43 = vadd.f32 %v2049_v50, %v1816_v45  ;;  %v1819_v56 = vpop.f32.mrf.mxu1  ;;  %v6367_v45 = vld [vmem:[%s6837_s5] ss:$0 sm:$0xff] }
 0x3af   : > { %7559 = vst [vmem:[#allocation54_spill] sm:$0xff] %v6367_v45  ;;  %v2075_v50 = vadd.f32 %v6367_v45, %v1862_v19 }
 0x3b0   : > { %v2057_v0 = vmul.f32 0.5, %v2055_v43 }
 0x3b2   : > { %3483 = vtanh.f32 %v2057_v0  ;;  %v3229_v0 = vld [vmem:[%s4442_s28 + $0xf8] sm:$0xff] }
 0x3b4   : > { %v1842_v47 = vpop.f32.mrf.mxu2 }
 0x3b5   : > { %v1931_v10 = vpop.f32.mrf.mxu0  ;;  %v1865_v40 = vpop.f32.mrf.mxu3 }
 0x3b6   : > { %v2052_v15 = vadd.f32 %v1931_v10, %v7557_v23  ;;  %v1951_v34 = vpop.f32.mrf.mxu1 }
 0x3b7   : > { %v2050_v52 = vadd.f32 %v1951_v34, %v7558_v31 }
 0x3b8   : > { %v3484_v63 = vpop.eup %3483  ;;  %v2056_v51 = vadd.f32 %v2052_v15, %v1819_v56 }
 0x3b9   : > { %v2061_v41 = vadd.f32 1.0, %v3484_v63  ;;  %v2065_v35 = vadd.f32 %v2050_v52, %v1839_v1 }
 0x3ba   : > { %v2058_v25 = vmul.f32 0.5, %v2056_v51 }
 0x3bb   : > { %v2063_v16 = vmul.f32 0.5, %v2061_v41  ;;  %v2067_v43 = vmul.f32 0.5, %v2065_v35 }
 0x3bc   : > { %3485 = vtanh.f32 %v2058_v25  ;;  %v1974_v10 = vpop.f32.mrf.mxu2 }
 0x3bd   : > { %v2077_v23 = vmul.f32 %v2075_v50, %v2063_v16  ;;  %3487 = vtanh.f32 %v2067_v43  ;;  %v2020_v34 = vpop.f32.mrf.mxu0  ;;  %v2051_v63 = vadd.f32 %v1974_v10, %v5004_v42  ;;  %v1997_v51 = vpop.f32.mrf.mxu3  ;;  %v3231_v43 = vld [vmem:[%s4442_s28 + $0x108] sm:$0xff] }
 0x3be   : > { %v2177_v41 = vadd.f32 %v3229_v0, %v2020_v34  ;;  %v2167_v52 = vadd.f32 %v3228_v28, %v1997_v51  ;;  %v1954_v1 = vpop.f32.mrf.mxu1  ;;  %v2076_v28 = vadd.f32 %v6367_v45, %v1865_v40 }
 0x3bf   : > { %v2079_v56 = vadd.f32 %v2077_v23, %v2051_v63  ;;  %v2053_v15 = vadd.f32 %v1954_v1, %v7558_v31 }
 0x3c0   : > { %v2169_v19 = vmul.f32 0.5, %v2167_v52  ;;  %v2179_v36 = vmul.f32 0.5, %v2177_v41 }
 0x3c1   : > { %v2066_v35 = vadd.f32 %v2053_v15, %v1842_v47  ;;  %3489 = vtanh.f32 %v2079_v56 }
 0x3c2   : > { %v3486_v6 = vpop.eup %3485  ;;  %3491 = vtanh.f32 %v2169_v19 }
 0x3c3   : > { %v3488_v25 = vpop.eup %3487  ;;  %v2062_v16 = vadd.f32 1.0, %v3486_v6  ;;  %v2068_v50 = vmul.f32 0.5, %v2066_v35 }
 0x3c4   : > { %v2071_v10 = vadd.f32 1.0, %v3488_v25  ;;  %v1977_v59 = vpop.f32.mrf.mxu2 }
 0x3c5   : > { %v2064_v0 = vmul.f32 0.5, %v2062_v16  ;;  %3493 = vtanh.f32 %v2068_v50  ;;  %v2023_v23 = vpop.f32.mrf.mxu0  ;;  %v2054_v34 = vadd.f32 %v1977_v59, %v5004_v42  ;;  %v2000_v63 = vpop.f32.mrf.mxu3 }
 0x3c6   : > { %v2073_v47 = vmul.f32 0.5, %v2071_v10  ;;  %3495 = vtanh.f32 %v2179_v36  ;;  %v2168_v51 = vadd.f32 %v3231_v43, %v2000_v63  ;;  %v2178_v52 = vadd.f32 %v3232_v38, %v2023_v23  ;;  %v2043_v15 = vpop.f32.mrf.mxu1 }
 0x3c7   : > { %v2078_v41 = vmul.f32 %v2076_v28, %v2064_v0  ;;  %v3490_v6 = vpop.eup %3489  ;;  %v2187_v59 = vadd.f32 %v6026_v37, %v2043_v15  ;;  %v3230_v0 = vld [vmem:[%s4442_s28 + $0x100] sm:$0xff] }
 0x3c8   : > { %v2083_v1 = vsub.f32 1.0, %v2073_v47  ;;  %v2170_v56 = vmul.f32 0.5, %v2168_v51  ;;  %v3492_v19 = vpop.eup %3491  ;;  %v2087_v25 = vmul.f32 %v2073_v47, %v6036_v20  ;;  %v2180_v45 = vmul.f32 0.5, %v2178_v52  ;;  %v7566_v15 = vld [vmem:[#allocation83_spill] sm:$0xff] }
 0x3c9   : > { %v2080_v35 = vadd.f32 %v2078_v41, %v2054_v34  ;;  %v2173_v40 = vadd.f32 1.0, %v3492_v19  ;;  %v7567_v19 = vld [vmem:[#allocation89_spill] sm:$0xff] }
 0x3ca   : > { %v2085_v16 = vmul.f32 %v3490_v6, %v2083_v1  ;;  %v3233_v1 = vld [vmem:[%s4442_s28 + $0x118] sm:$0xff] }
 0x3cb   : > { %v3494_v50 = vpop.eup %3493  ;;  %3497 = vtanh.f32 %v2080_v35  ;;  %v2175_v43 = vmul.f32 0.5, %v2173_v40  ;;  %v7568_v35 = vld [vmem:[#allocation88_spill] sm:$0xff]  ;;  %v7569_v40 = vld [vmem:[#allocation95_spill] sm:$0xff] }
 0x3cc   : > { %v3496_v36 = vpop.eup %3495  ;;  %v2072_v10 = vadd.f32 1.0, %v3494_v50  ;;  %3499 = vtanh.f32 %v2170_v56  ;;  %v6380_v38 = vadd.f32 %v2087_v25, %v2085_v16  ;;  %v7570_v16 = vld [vmem:[#allocation73_spill] sm:$0xff]  ;;  %v7571_v50 = vld [vmem:[#allocation76_spill] sm:$0xff] }
 0x3cd   : > { %v2189_v23 = vmul.f32 %v2187_v59, %v2175_v43  ;;  %v2183_v20 = vadd.f32 1.0, %v3496_v36  ;;  %3501 = vtanh.f32 %v2180_v45  ;;  %v7573_v59 = vld [vmem:[#allocation84_spill] sm:$0xff]  ;;  %v7574_v36 = vld [vmem:[#allocation90_spill] sm:$0xff]  ;;  %v7575_v43 = vld [vmem:[#allocation45_spill] sm:$0xff] }
 0x3ce   : > { %v2074_v28 = vmul.f32 0.5, %v2072_v10  ;;  %2107 = vmatmul.f32.vlgmr.msra.gmra.mxu2 %v6380_v38  ;;  %2130 = vmatmul.f32.vlgmr.msra.gmra.mxu3 %v6380_v38  ;;  %v2046_v52 = vpop.f32.mrf.mxu1  ;;  %v7576_v10 = vld [vmem:[#allocation96_spill] sm:$0xff] }
 0x3cf   : > { %2153 = vmatmul.f32.vlgmr.msrb.gmra.mxu0 %v6380_v38  ;;  %2318 = vmatpush.msra.mxu2 %v6042_v2  ;;  %v2191_v63 = vadd.f32 %v3230_v0, %v2189_v23  ;;  %v2185_v2 = vmul.f32 0.5, %v2183_v20  ;;  %v7577_v0 = vld [vmem:[#allocation29_spill] sm:$0xff]  ;;  %v7580_v23 = vld [vmem:[#allocation31_spill] sm:$0xff]  ;;  %v7581_v20 = vld [vmem:[#allocation94_spill] sm:$0xff] }
 0x3d0   : > { %v2084_v34 = vsub.f32 1.0, %v2074_v28  ;;  %2383 = vmatpush.msra.mxu3 %v6045_v46  ;;  %2406 = vmatpush.msrb.mxu0 %v6048_v8  ;;  %v2088_v41 = vmul.f32 %v2074_v28, %v6067_v61  ;;  %v2188_v61 = vadd.f32 %v6026_v37, %v2046_v52  ;;  %v7579_v28 = vld [vmem:[#allocation42_spill] sm:$0xff]  ;;  %v6469_v52 = vld [vmem:[#allocation5 + $0x270] sm:$0xff] }
 0x3d1   : > { %v3498_v47 = vpop.eup %3497  ;;  %2319 = vmatpush.msra.mxu2 %v6053_v13  ;;  %3503 = vtanh.f32 %v2191_v63  ;;  %v2199_v37 = vmul.f32 %v2185_v2, %v6051_v33  ;;  %v7560_v33 = vld [vmem:[#allocation87_spill] sm:$0xff]  ;;  %v7583_v63 = vld [vmem:[#allocation33_spill] sm:$0xff] }
 0x3d2   : > { %v3500_v51 = vpop.eup %3499  ;;  %v2086_v45 = vmul.f32 %v3498_v47, %v2084_v34  ;;  %2384 = vmatpush.msra.mxu3 %v6057_v4  ;;  %2407 = vmatpush.msrb.mxu0 %v6060_v22  ;;  %v2195_v4 = vsub.f32 1.0, %v2185_v2  ;;  %v7582_v34 = vld [vmem:[#allocation32_spill] sm:$0xff] }
 0x3d3   : > { %v2174_v6 = vadd.f32 1.0, %v3500_v51  ;;  %2320 = vmatpush.msra.mxu2 %v6064_v55  ;;  %v3502_v8 = vpop.eup %3501  ;;  %v6457_v47 = vld [vmem:[#allocation5 + $0x2d0] sm:$0xff]  ;;  %v7585_v51 = vld [vmem:[#allocation34_spill] sm:$0xff] }
 0x3d4   : > { %v6394_v46 = vadd.f32 %v2088_v41, %v2086_v45  ;;  %2385 = vmatpush.msra.mxu3 %v6069_v58  ;;  %2408 = vmatpush.msrb.mxu0 %v6078_v54  ;;  %v2184_v58 = vadd.f32 1.0, %v3502_v8  ;;  %v6463_v41 = vld [vmem:[#allocation5 + $0x2a0] sm:$0xff]  ;;  %v6484_v2 = vld [vmem:[#allocation5 + $0x210] sm:$0xff]  ;;  %v6495_v8 = vld [vmem:[#allocation5 + $0x278] sm:$0xff] }
 0x3d5   : > { %v2176_v13 = vmul.f32 0.5, %v2174_v6  ;;  %2321 = vmatpush.msra.mxu2 %v6075_v24  ;;  %v7587_v45 = vld [vmem:[#allocation30_spill] sm:$0xff] }
 0x3d6   : > { %2110 = vmatmul.f32.gmra.mxu2 %v6394_v46  ;;  %2133 = vmatmul.f32.gmra.mxu3 %v6394_v46  ;;  %v6492_v6 = vld [vmem:[#allocation5 + $0x1e0] sm:$0xff] }
 0x3d7   : > { %v2190_v22 = vmul.f32 %v2188_v61, %v2176_v13  ;;  %2156 = vmatmul.f32.gmra.mxu0 %v6394_v46  ;;  %2322 = vmatpush.msra.mxu2 %v6084_v60  ;;  %v3504_v55 = vpop.eup %3503  ;;  %v2186_v60 = vmul.f32 0.5, %v2184_v58  ;;  %v6498_v13 = vld [vmem:[#allocation5 + $0x2e0] sm:$0xff]  ;;  %v7590_v61 = vld [vmem:[#allocation36_spill] sm:$0xff] }
 0x3d8   : > { %2386 = vmatpush.msra.mxu3 %v6087_v3  ;;  %2409 = vmatpush.msrb.mxu0 %v6097_v39  ;;  %v2197_v24 = vmul.f32 %v3504_v55, %v2195_v4  ;;  %v7562_v39 = vld [vmem:[#allocation86_spill] sm:$0xff]  ;;  %v6508_v4 = vld [vmem:[#allocation5 + $0x2b0] sm:$0xff] }
 0x3d9   : > { %v2192_v54 = vadd.f32 %v3233_v1, %v2190_v22  ;;  %2323 = vmatpush.msra.mxu2 %v6094_v5  ;;  %v2196_v3 = vsub.f32 1.0, %v2186_v60  ;;  %v7561_v5 = vld [vmem:[#allocation77_spill] sm:$0xff]  ;;  %v6512_v22 = vld [vmem:[#allocation5 + $0x180] sm:$0xff] }
 0x3da   : > { %2387 = vmatpush.msra.mxu3 %v6100_v57  ;;  %2410 = vmatpush.msrb.mxu0 %v6111_v62  ;;  %v6411_v56 = vadd.f32 %v2199_v37, %v2197_v24  ;;  %v2200_v62 = vmul.f32 %v2186_v60, %v6106_v53  ;;  %v7572_v53 = vld [vmem:[#allocation80_spill] sm:$0xff]  ;;  %v6515_v55 = vld [vmem:[#allocation5 + $0x218] sm:$0xff]  ;;  %v6518_v58 = vld [vmem:[#allocation5 + $0x280] sm:$0xff] }
 0x3db   : > { %3505 = vtanh.f32 %v2192_v54  ;;  %2324 = vmatpush.msra.mxu2 %v6108_v26  ;;  %v7563_v26 = vld [vmem:[#allocation92_spill] sm:$0xff]  ;;  %v6532_v54 = vld [vmem:[#allocation5 + $0x120] sm:$0xff]  ;;  %v6535_v60 = vld [vmem:[#allocation5 + $0x1b8] sm:$0xff] }
 0x3dc   : > { %2388 = vmatpush.msra.mxu3 %v6114_v21  ;;  %2411 = vmatpush.msrb.mxu0 %v6139_v12  ;;  %v7564_v12 = vld [vmem:[#allocation91_spill] sm:$0xff]  ;;  %v6502_v1 = vld [vmem:[#allocation5 + $0x1b0] sm:$0xff] }
 0x3dd   : > { %2219 = vmatmul.f32.vlgmr.msrb.gmra.mxu1 %v6411_v56  ;;  %2325 = vmatpush.msra.mxu2 %v6121_v11  ;;  %v7565_v11 = vld [vmem:[#allocation85_spill] sm:$0xff]  ;;  %v6525_v24 = vld [vmem:[#allocation5 + $0x1e8] sm:$0xff] }
 0x3de   : > { %2242 = vmatmul.f32.vlgmr.msrb.gmra.mxu2 %v6411_v56  ;;  %2265 = vmatmul.f32.vlgmr.msrb.gmra.mxu3 %v6411_v56  ;;  %v6522_v37 = vld [vmem:[#allocation5 + $0x150] sm:$0xff] }
 0x3df   : > { %2288 = vmatmul.f32.vlgmr.msra.gmra.mxu0 %v6411_v56  ;;  %2326 = vmatpush.msra.mxu2 %v7560_v33  ;;  %v7591_v33 = vld [vmem:[#allocation37_spill] sm:$0xff] }
 0x3e0   : > { %2389 = vmatpush.msra.mxu3 %v7561_v5  ;;  %2429 = vmatpush.msrb.mxu1 %v7562_v39  ;;  %v6545_v5 = vld [vmem:[#allocation5 + $0x188] sm:$0xff]  ;;  %v6548_v39 = vld [vmem:[#allocation5 + $0xc0] sm:$0xff] }
 0x3e1   : > { %v3506_v57 = vpop.eup %3505  ;;  %2327 = vmatpush.msra.mxu2 %v7563_v26  ;;  %2412 = vmatpush.msrb.mxu0 %v7564_v12  ;;  %v6554_v26 = vld [vmem:[#allocation5 + $0x158] sm:$0xff] }
 0x3e2   : > { %v2198_v21 = vmul.f32 %v3506_v57, %v2196_v3  ;;  %2390 = vmatpush.msra.mxu3 %v7565_v11  ;;  %2430 = vmatpush.msrb.mxu1 %v7566_v15  ;;  %v6542_v3 = vld [vmem:[#allocation5 + $0xf0] sm:$0xff]  ;;  %v3893_v12 = vld [vmem:[#allocation5 + $0x2b8] sm:$0xff]  ;;  %v6563_v11 = vld [vmem:[#allocation5 + $0x128] sm:$0xff] }
 0x3e3   : > { %2328 = vmatpush.msra.mxu2 %v7567_v19  ;;  %2413 = vmatpush.msrb.mxu0 %v7568_v35  ;;  %v6551_v57 = vld [vmem:[#allocation5 + $0x1f0] sm:$0xff]  ;;  %v3897_v15 = vld [vmem:[#allocation5 + $0x288] sm:$0xff]  ;;  %v6566_v19 = vld [vmem:[#allocation5 + $0x60] sm:$0xff] }
 0x3e4   : > { %v6431_v25 = vadd.f32 %v2200_v62, %v2198_v21  ;;  %2391 = vmatpush.msra.mxu3 %v7569_v40  ;;  %2431 = vmatpush.msrb.mxu1 %v7570_v16  ;;  %v6557_v62 = vld [vmem:[#allocation5 + $0x90] sm:$0xff]  ;;  %v6560_v21 = vld [vmem:[#allocation5 + $0x1c0] sm:$0xff]  ;;  %7592 = vst [vmem:[#allocation57_spill] sm:$0xff] %v6566_v19  ;;  %v6572_v40 = vld [vmem:[#allocation5 + $0xf8] sm:$0xff] }
 0x3e5   : > { %2329 = vmatpush.msra.mxu2 %v7571_v50  ;;  %2414 = vmatpush.msrb.mxu0 %v6185_v27  ;;  %v7578_v27 = vld [vmem:[#allocation81_spill] sm:$0xff]  ;;  %7593 = vst [vmem:[#allocation53_spill] sm:$0xff] %v6572_v40 }
 0x3e6   : > { %2222 = vmatmul.f32.gmra.mxu1 %v6431_v25  ;;  %2245 = vmatmul.f32.gmra.mxu2 %v6431_v25  ;;  %v6569_v35 = vld [vmem:[#allocation5 + $0x190] sm:$0xff]  ;;  %v3901_v16 = vld [vmem:[#allocation5 + $0x258] sm:$0xff] }
 0x3e7   : > { %2268 = vmatmul.f32.gmra.mxu3 %v6431_v25  ;;  %2291 = vmatmul.f32.gmra.mxu0 %v6431_v25  ;;  %v6575_v50 = vld [vmem:[#allocation5 + $0x30] sm:$0xff] }
 0x3e8   : > { %2330 = vmatpush.msra.mxu2 %v7572_v53  ;;  %2392 = vmatpush.msra.mxu3 %v7573_v59  ;;  %7594 = vst [vmem:[#allocation49_spill] sm:$0xff] %v6575_v50  ;;  %v6578_v53 = vld [vmem:[#allocation5 + $0x160] sm:$0xff]  ;;  %v6581_v59 = vld [vmem:[#allocation5 + $0xc8] sm:$0xff] }
 0x3e9   : > { %2432 = vmatpush.msrb.mxu1 %v7574_v36  ;;  %2415 = vmatpush.msrb.mxu0 %v7575_v43  ;;  %7595 = vst [vmem:[#allocation68_spill] sm:$0xff] %v6581_v59  ;;  %v3905_v36 = vld [vmem:[#allocation5 + $0x228] sm:$0xff]  ;;  %v6584_v43 = vld [vmem:[#allocation5] sm:$0xff] }
 0x3ea   : > { %2331 = vmatpush.msra.mxu2 %v7576_v10  ;;  %2393 = vmatpush.msra.mxu3 %v7577_v0  ;;  %7596 = vst [vmem:[#allocation65_spill] sm:$0xff] %v6584_v43  ;;  %v6587_v10 = vld [vmem:[#allocation5 + $0x130] sm:$0xff]  ;;  %v6590_v0 = vld [vmem:[#allocation5 + $0x98] sm:$0xff] }
 0x3eb   : > { %2433 = vmatpush.msrb.mxu1 %v7578_v27  ;;  %2416 = vmatpush.msrb.mxu0 %v6215_v29  ;;  %v7584_v29 = vld [vmem:[#allocation72_spill] sm:$0xff]  ;;  %7597 = vst [vmem:[#allocation67_spill] sm:$0xff] %v6587_v10  ;;  %v3909_v27 = vld [vmem:[#allocation5 + $0x1f8] sm:$0xff] }
 0x3ec   : > { %2332 = vmatpush.msra.mxu2 %v7579_v28  ;;  %2394 = vmatpush.msra.mxu3 %v7580_v23  ;;  %7598 = vst [vmem:[#allocation64_spill] sm:$0xff] %v6590_v0  ;;  %v3910_v28 = vld [vmem:[#allocation5 + $0x2f0] sm:$0xff]  ;;  %v6593_v23 = vld [vmem:[#allocation5 + $0x100] sm:$0xff] }
 0x3ed   : > { %2434 = vmatpush.msrb.mxu1 %v7581_v20  ;;  %2417 = vmatpush.msrb.mxu0 %v6225_v7  ;;  %v7586_v7 = vld [vmem:[#allocation28_spill] sm:$0xff]  ;;  %7599 = vst [vmem:[#allocation58_spill] sm:$0xff] %v6593_v23 }
 0x3ee   : > { %2311 = vmatmul.f32.vlgmr.msra.gmra.mxu1 %v6411_v56  ;;  %2333 = vmatpush.msra.mxu2 %v7582_v34  ;;  %v6596_v20 = vld [vmem:[#allocation5 + $0x68] sm:$0xff] }
 0x3ef   : > { %2334 = vmatmul.f32.vlgmr.msra.gmra.mxu2 %v6411_v56  ;;  %2395 = vmatpush.msra.mxu3 %v7583_v63  ;;  %7600 = vst [vmem:[#allocation56_spill] sm:$0xff] %v6596_v20  ;;  %v3913_v34 = vld [vmem:[#allocation5 + $0x1c8] sm:$0xff]  ;;  %v3914_v63 = vld [vmem:[#allocation5 + $0x2c0] sm:$0xff] }
 0x3f0   : > { %2495 = vmatpush.msrb.mxu2 %v6457_v47  ;;  %2435 = vmatpush.msrb.mxu1 %v7584_v29  ;;  %v6599_v29 = vld [vmem:[#allocation5 + $0xd0] sm:$0xff] }
 0x3f1   : > { %2396 = vmatpush.msra.mxu3 %v7585_v51  ;;  %2418 = vmatpush.msrb.mxu0 %v6235_v14  ;;  %v6476_v14 = vld [vmem:[#allocation5 + $0x240] sm:$0xff]  ;;  %7601 = vst [vmem:[#allocation70_spill] sm:$0xff] %v6599_v29  ;;  %v6602_v51 = vld [vmem:[#allocation5 + $0x38] sm:$0xff] }
 0x3f2   : > { %2496 = vmatpush.msrb.mxu2 %v6463_v41  ;;  %2436 = vmatpush.msrb.mxu1 %v7586_v7  ;;  %7602 = vst [vmem:[#allocation71_spill] sm:$0xff] %v6602_v51  ;;  %v3917_v7 = vld [vmem:[#allocation5 + $0x198] sm:$0xff] }
 0x3f3   : > { %2397 = vmatpush.msra.mxu3 %v6222_v49  ;;  %2419 = vmatpush.msrb.mxu0 %v6246_v9  ;;  %v6480_v49 = vld [vmem:[#allocation5 + $0x2d8] sm:$0xff]  ;;  %v7588_v9 = vld [vmem:[#allocation48_spill] sm:$0xff] }
 0x3f4   : > { %2497 = vmatpush.msrb.mxu2 %v6469_v52  ;;  %2437 = vmatpush.msrb.mxu1 %v7587_v45  ;;  %v3918_v45 = vld [vmem:[#allocation5 + $0x290] sm:$0xff] }
 0x3f5   : > { %2398 = vmatpush.msra.mxu3 %v6232_v30  ;;  %2420 = vmatpush.msrb.mxu0 %v6254_v48  ;;  %v6487_v30 = vld [vmem:[#allocation5 + $0x2a8] sm:$0xff] }
 0x3f6   : > { %2314 = vmatmul.f32.gmra.mxu1 %v6431_v25  ;;  %2498 = vmatpush.msrb.mxu2 %v6476_v14  ;;  %v7589_v48 = vld [vmem:[#allocation35_spill] sm:$0xff] }
 0x3f7   : > { %2337 = vmatmul.f32.gmra.mxu2 %v6431_v25  ;;  %2518 = vmatpush.msrb.mxu3 %v6480_v49 }
 0x3f8   : > { %2438 = vmatpush.msrb.mxu1 %v7588_v9  ;;  %2499 = vmatpush.msrb.mxu2 %v6484_v2  ;;  %v6605_v9 = vld [vmem:[#allocation5 + $0xa0] sm:$0xff] }
 0x3f9   : > { %2519 = vmatpush.msrb.mxu3 %v6487_v30  ;;  %2421 = vmatpush.msrb.mxu0 %v6262_v17  ;;  %v6505_v17 = vld [vmem:[#allocation5 + $0x248] sm:$0xff]  ;;  %7603 = vst [vmem:[#allocation60_spill] sm:$0xff] %v6605_v9 }
 0x3fa   : > { %2439 = vmatpush.msrb.mxu1 %v7589_v48  ;;  %2500 = vmatpush.msrb.mxu2 %v6492_v6  ;;  %v6608_v48 = vld [vmem:[#allocation5 + $0x8] sm:$0xff] }
 0x3fb   : > { %2520 = vmatpush.msrb.mxu3 %v6495_v8  ;;  %2541 = vmatpush.msra.mxu0 %v6498_v13  ;;  %7604 = vst [vmem:[#allocation59_spill] sm:$0xff] %v6608_v48 }
 0x3fc   : > { %2440 = vmatpush.msrb.mxu1 %v7590_v61  ;;  %2501 = vmatpush.msrb.mxu2 %v6502_v1  ;;  %v3921_v61 = vld [vmem:[#allocation5 + $0x168] sm:$0xff] }
 0x3fd   : > { %2521 = vmatpush.msrb.mxu3 %v6505_v17  ;;  %2542 = vmatpush.msra.mxu0 %v6508_v4 }
 0x3fe   : > { %2441 = vmatpush.msrb.mxu1 %v6241_v44  ;;  %2502 = vmatpush.msrb.mxu2 %v6512_v22  ;;  %v6528_v44 = vld [vmem:[#allocation5 + $0x250] sm:$0xff] }
 0x3ff   : > { %2522 = vmatpush.msrb.mxu3 %v6515_v55  ;;  %2543 = vmatpush.msra.mxu0 %v6518_v58 }
 0x400   : > { %2442 = vmatpush.msrb.mxu1 %v6249_v32  ;;  %2503 = vmatpush.msrb.mxu2 %v6522_v37  ;;  %v6538_v32 = vld [vmem:[#allocation5 + $0x220] sm:$0xff] }
 0x401   : > { %2523 = vmatpush.msrb.mxu3 %v6525_v24  ;;  %2544 = vmatpush.msra.mxu0 %v6528_v44 }
 0x402   : > { %2443 = vmatpush.msrb.mxu1 %v6257_v18  ;;  %2504 = vmatpush.msrb.mxu2 %v6532_v54  ;;  %v3889_v18 = vld [vmem:[#allocation5 + $0x2e8] sm:$0xff] }
 0x403   : > { %2524 = vmatpush.msrb.mxu3 %v6535_v60  ;;  %2545 = vmatpush.msra.mxu0 %v6538_v32 }
 0x404   : > { %2444 = vmatpush.msrb.mxu1 %v7591_v33  ;;  %2505 = vmatpush.msrb.mxu2 %v6542_v3  ;;  %v3922_v33 = vld [vmem:[#allocation5 + $0x260] sm:$0xff] }
 0x405   : > { %2525 = vmatpush.msrb.mxu3 %v6545_v5  ;;  %2546 = vmatpush.msra.mxu0 %v6551_v57 }
 0x406   : > { %2564 = vmatpush.msra.mxu1 %v3889_v18  ;;  %2506 = vmatpush.msrb.mxu2 %v6548_v39  ;;  %v6611_v18 = vld [vmem:[#allocation5 + $0x70] sm:$0xff] }
 0x407   : > { %2526 = vmatpush.msrb.mxu3 %v6554_v26  ;;  %2547 = vmatpush.msra.mxu0 %v6560_v21  ;;  %7605 = vst [vmem:[#allocation74_spill] sm:$0xff] %v6611_v18 }
 0x408   : > { %2565 = vmatpush.msra.mxu1 %v3893_v12  ;;  %2507 = vmatpush.msrb.mxu2 %v6557_v62  ;;  %v3924_v12 = vld [vmem:[#allocation5 + $0x138] sm:$0xff] }
 0x409   : > { %2527 = vmatpush.msrb.mxu3 %v6563_v11  ;;  %2548 = vmatpush.msra.mxu0 %v6569_v35 }
 0x40a   : > { %2566 = vmatpush.msra.mxu1 %v3897_v15  ;;  %2508 = vmatpush.msrb.mxu2 %v6566_v19  ;;  %v7606_v15 = vld [vmem:[#allocation38_spill] sm:$0xff] }
 0x40b   : > { %2528 = vmatpush.msrb.mxu3 %v6572_v40  ;;  %2549 = vmatpush.msra.mxu0 %v6578_v53 }
 0x40c   : > { %2567 = vmatpush.msra.mxu1 %v3901_v16  ;;  %2509 = vmatpush.msrb.mxu2 %v6575_v50  ;;  %v6615_v16 = vld [vmem:[#allocation5 + $0x40] sm:$0xff] }
 0x40d   : > { %2529 = vmatpush.msrb.mxu3 %v6581_v59  ;;  %2550 = vmatpush.msra.mxu0 %v6587_v10  ;;  %7607 = vst [vmem:[#allocation75_spill] sm:$0xff] %v6615_v16 }
 0x40e   : > { %2568 = vmatpush.msra.mxu1 %v3905_v36  ;;  %2510 = vmatpush.msrb.mxu2 %v6584_v43  ;;  %v3926_v36 = vld [vmem:[#allocation5 + $0x108] sm:$0xff] }
 0x40f   : > { %2530 = vmatpush.msrb.mxu3 %v6590_v0  ;;  %2551 = vmatpush.msra.mxu0 %v6593_v23  ;;  %v3237_v0 = vld [vmem:[%s4442_s28 + $0x138] sm:$0xff] }
 0x410   : > { %2569 = vmatpush.msra.mxu1 %v3909_v27  ;;  %2587 = vmatpush.msra.mxu2 %v3910_v28  ;;  %v7608_v27 = vld [vmem:[#allocation43_spill] sm:$0xff]  ;;  %v6619_v28 = vld [vmem:[#allocation5 + $0x10] sm:$0xff] }
 0x411   : > { %2531 = vmatpush.msrb.mxu3 %v6596_v20  ;;  %2552 = vmatpush.msra.mxu0 %v6599_v29  ;;  %7609 = vst [vmem:[#allocation61_spill] sm:$0xff] %v6619_v28 }
 0x412   : > { %2570 = vmatpush.msra.mxu1 %v3913_v34  ;;  %2588 = vmatpush.msra.mxu2 %v3914_v63  ;;  %v3928_v34 = vld [vmem:[#allocation5 + $0xd8] sm:$0xff]  ;;  %v7610_v63 = vld [vmem:[#allocation44_spill] sm:$0xff] }
 0x413   : > { %2532 = vmatpush.msrb.mxu3 %v6602_v51  ;;  %2553 = vmatpush.msra.mxu0 %v6605_v9 }
 0x414   : > { %2571 = vmatpush.msra.mxu1 %v3917_v7  ;;  %2589 = vmatpush.msra.mxu2 %v3918_v45  ;;  %v3929_v7 = vld [vmem:[#allocation5 + $0xa8] sm:$0xff]  ;;  %v7611_v45 = vld [vmem:[#allocation41_spill] sm:$0xff] }
 0x415   : > { %2533 = vmatpush.msrb.mxu3 %v6608_v48  ;;  %2554 = vmatpush.msra.mxu0 %v6611_v18 }
 0x416   : > { %2572 = vmatpush.msra.mxu1 %v3921_v61  ;;  %2590 = vmatpush.msra.mxu2 %v3922_v33  ;;  %v3930_v61 = vld [vmem:[#allocation5 + $0x78] sm:$0xff]  ;;  %v7612_v33 = vld [vmem:[#allocation40_spill] sm:$0xff] }
 0x417   : > { %2555 = vmatpush.msra.mxu0 %v6615_v16 }
 0x418   : > { %2573 = vmatpush.msra.mxu1 %v3924_v12  ;;  %2591 = vmatpush.msra.mxu2 %v7606_v15  ;;  %v3931_v12 = vld [vmem:[#allocation5 + $0x48] sm:$0xff] }
 0x419   : > { %2556 = vmatpush.msra.mxu0 %v6619_v28  ;;  %v7613_v15 = vld [vmem:[#allocation51_spill] sm:$0xff] }
 0x41a   : > { %2574 = vmatpush.msra.mxu1 %v3926_v36  ;;  %2592 = vmatpush.msra.mxu2 %v7608_v27  ;;  %v3932_v36 = vld [vmem:[#allocation5 + $0x18] sm:$0xff]  ;;  %v7614_v27 = vld [vmem:[#allocation52_spill] sm:$0xff] }
 0x41c   : > { %2575 = vmatpush.msra.mxu1 %v3928_v34  ;;  %2593 = vmatpush.msra.mxu2 %v7610_v63  ;;  %v7615_v34 = vld [vmem:[#allocation47_spill] sm:$0xff]  ;;  %v7616_v63 = vld [vmem:[#allocation46_spill] sm:$0xff] }
 0x41e   : > { %2576 = vmatpush.msra.mxu1 %v3929_v7  ;;  %2594 = vmatpush.msra.mxu2 %v7611_v45  ;;  %v7617_v7 = vld [vmem:[#allocation50_spill] sm:$0xff]  ;;  %v7618_v45 = vld [vmem:[#allocation63_spill] sm:$0xff] }
 0x420   : > { %2577 = vmatpush.msra.mxu1 %v3930_v61  ;;  %2595 = vmatpush.msra.mxu2 %v7612_v33  ;;  %v7619_v61 = vld [vmem:[#allocation55_spill] sm:$0xff] }
 0x422   : > { %2578 = vmatpush.msra.mxu1 %v3931_v12  ;;  %2596 = vmatpush.msra.mxu2 %v7613_v15 }
 0x424   : > { %2579 = vmatpush.msra.mxu1 %v3932_v36  ;;  %2597 = vmatpush.msra.mxu2 %v7614_v27  ;;  %v7620_v36 = vld [vmem:[#allocation27_spill] sm:$0xff] }
 0x425   : > { %v3234_v27 = vld [vmem:[%s4442_s28 + $0x120] sm:$0xff] }
 0x426   : > { %2598 = vmatpush.msra.mxu2 %v7615_v34 }
 0x428   : > { %2599 = vmatpush.msra.mxu2 %v7616_v63 }
 0x42a   : > { %2600 = vmatpush.msra.mxu2 %v7617_v7 }
 0x42c   : > { %2601 = vmatpush.msra.mxu2 %v7618_v45 }
 0x42e   : > { %2602 = vmatpush.msra.mxu2 %v7619_v61 }
 0x44c   : > { %v2154_v33 = vpop.f32.mrf.mxu0 }
 0x451   : > { %v2108_v28 = vpop.f32.mrf.mxu2  ;;  %v2131_v12 = vpop.f32.mrf.mxu3 }
 0x454   : > { %v2157_v15 = vpop.f32.mrf.mxu0 }
 0x459   : > { %v2111_v48 = vpop.f32.mrf.mxu2  ;;  %v2134_v20 = vpop.f32.mrf.mxu3 }
 0x45a   : > { %v2220_v16 = vpop.f32.mrf.mxu1 }
 0x45b   : > { %v2341_v51 = vadd.f32 %v2220_v16, %v7620_v36 }
 0x45c   : > { %v2289_v18 = vpop.f32.mrf.mxu0 }
 0x45d   : > { %v2347_v34 = vadd.f32 %v2341_v51, %v2108_v28  ;;  %v2459_v63 = vadd.f32 %v3234_v27, %v2289_v18 }
 0x45f   : > { %v2349_v9 = vmul.f32 0.5, %v2347_v34  ;;  %v2461_v45 = vmul.f32 0.5, %v2459_v63  ;;  %v3235_v34 = vld [vmem:[%s4442_s28 + $0x128] sm:$0xff] }
 0x461   : > { %3507 = vtanh.f32 %v2349_v9  ;;  %v2243_v7 = vpop.f32.mrf.mxu2  ;;  %v2266_v9 = vpop.f32.mrf.mxu3 }
 0x462   : > { %v2342_v61 = vadd.f32 %v2243_v7, %v7558_v31  ;;  %3509 = vtanh.f32 %v2461_v45  ;;  %v7621_v7 = vld [vmem:[#allocation54_spill] sm:$0xff] }
 0x463   : > { %v2223_v43 = vpop.f32.mrf.mxu1  ;;  %v2367_v19 = vadd.f32 %v7621_v7, %v2154_v33 }
 0x464   : > { %v2344_v29 = vadd.f32 %v2223_v43, %v7620_v36  ;;  %v2357_v59 = vadd.f32 %v2342_v61, %v2131_v12  ;;  %v2292_v50 = vpop.f32.mrf.mxu0 }
 0x465   : > { %v2460_v23 = vadd.f32 %v3237_v0, %v2292_v50  ;;  %v2343_v50 = vadd.f32 %v2266_v9, %v5004_v42  ;;  %v2368_v9 = vadd.f32 %v7621_v7, %v2157_v15 }
 0x466   : > { %v2348_v16 = vadd.f32 %v2344_v29, %v2111_v48  ;;  %v2359_v40 = vmul.f32 0.5, %v2357_v59 }
 0x467   : > { %v3508_v51 = vpop.eup %3507  ;;  %v2462_v27 = vmul.f32 0.5, %v2460_v23 }
 0x468   : > { %v2353_v28 = vadd.f32 1.0, %v3508_v51  ;;  %v2350_v18 = vmul.f32 0.5, %v2348_v16  ;;  %3511 = vtanh.f32 %v2359_v40  ;;  %v3510_v61 = vpop.eup %3509 }
 0x469   : > { %v2246_v63 = vpop.f32.mrf.mxu2  ;;  %v2465_v16 = vadd.f32 1.0, %v3510_v61  ;;  %v6646_v61 = vld [vmem:[%s6836_s4] ss:$0 sm:$0xff] }
 0x46a   : > { %v2355_v10 = vmul.f32 0.5, %v2353_v28  ;;  %3513 = vtanh.f32 %v2350_v18  ;;  %v2345_v43 = vadd.f32 %v2246_v63, %v7558_v31  ;;  %v3238_v63 = vld [vmem:[%s4442_s28 + $0x140] sm:$0xff] }
 0x46b   : > { %v2312_v12 = vpop.f32.mrf.mxu1  ;;  %3515 = vtanh.f32 %v2462_v27  ;;  %v2467_v27 = vmul.f32 0.5, %v2465_v16 }
 0x46c   : > { %v2369_v59 = vmul.f32 %v2367_v19, %v2355_v10  ;;  %v2469_v0 = vadd.f32 %v3235_v34, %v2312_v12  ;;  %v2358_v29 = vadd.f32 %v2345_v43, %v2134_v20  ;;  %v2269_v19 = vpop.f32.mrf.mxu3 }
 0x46e   : > { %v3512_v40 = vpop.eup %3511  ;;  %v2371_v48 = vadd.f32 %v2369_v59, %v2343_v50  ;;  %v2471_v23 = vmul.f32 0.5, %v2469_v0  ;;  %v2360_v45 = vmul.f32 0.5, %v2358_v29  ;;  %v3236_v0 = vld [vmem:[%s4442_s28 + $0x130] sm:$0xff]  ;;  %v2346_v29 = vadd.f32 %v2269_v19, %v5004_v42 }
 0x46f   : > { %v2363_v51 = vadd.f32 1.0, %v3512_v40 }
 0x470   : > { %v3514_v33 = vpop.eup %3513  ;;  %3517 = vtanh.f32 %v2371_v48 }
 0x471   : > { %v2354_v28 = vadd.f32 1.0, %v3514_v33  ;;  %v2365_v18 = vmul.f32 0.5, %v2363_v51  ;;  %3519 = vtanh.f32 %v2471_v23  ;;  %v3516_v20 = vpop.eup %3515 }
 0x472   : > { %3521 = vtanh.f32 %v2360_v45  ;;  %v2335_v10 = vpop.f32.mrf.mxu2  ;;  %v2466_v48 = vadd.f32 1.0, %v3516_v20 }
 0x473   : > { %v2356_v34 = vmul.f32 0.5, %v2354_v28  ;;  %v2375_v43 = vsub.f32 1.0, %v2365_v18  ;;  %v2315_v12 = vpop.f32.mrf.mxu1  ;;  %v2479_v50 = vadd.f32 %v6646_v61, %v2335_v10  ;;  %v2379_v16 = vmul.f32 %v2365_v18, %v6380_v38  ;;  %v3239_v38 = vld [vmem:[%s4442_s28 + $0x148] sm:$0xff]  ;;  %v3934_v18 = vld [vmem:[#allocation5 + $0x2f8] sm:$0xff] }
 0x474   : > { %v2470_v59 = vadd.f32 %v3238_v63, %v2315_v12  ;;  %v2468_v19 = vmul.f32 0.5, %v2466_v48  ;;  %v3935_v12 = vld [vmem:[#allocation7 + $0x168] sm:$0xff]  ;;  %v3939_v48 = vld [vmem:[#allocation7 + $0x158] sm:$0xff] }
 0x475   : > { %v2370_v15 = vmul.f32 %v2368_v9, %v2356_v34  ;;  %v2481_v7 = vmul.f32 %v2479_v50, %v2467_v27  ;;  %v3936_v50 = vld [vmem:[#allocation7 + $0x170] sm:$0xff] }
 0x476   : > { %v3518_v40 = vpop.eup %3517  ;;  %v2472_v23 = vmul.f32 0.5, %v2470_v59 }
 0x477   : > { %v3520_v45 = vpop.eup %3519  ;;  %v2377_v51 = vmul.f32 %v3518_v40, %v2375_v43  ;;  %v2372_v33 = vadd.f32 %v2370_v15, %v2346_v29  ;;  %v2483_v28 = vadd.f32 %v3236_v0, %v2481_v7  ;;  %v3938_v40 = vld [vmem:[#allocation7 + $0x150] sm:$0xff] }
 0x478   : > { %v3522_v31 = vpop.eup %3521  ;;  %v2475_v36 = vadd.f32 1.0, %v3520_v45  ;;  %3523 = vtanh.f32 %v2472_v23 }
 0x479   : > { %v2364_v10 = vadd.f32 1.0, %v3522_v31  ;;  %3525 = vtanh.f32 %v2372_v33  ;;  %v6652_v63 = vadd.f32 %v2379_v16, %v2377_v51  ;;  %v3940_v16 = vld [vmem:[#allocation5 + $0x298] sm:$0xff] }
 0x47a   : > { %3527 = vtanh.f32 %v2483_v28  ;;  %v2338_v9 = vpop.f32.mrf.mxu2  ;;  %v2477_v27 = vmul.f32 0.5, %v2475_v36  ;;  %v3937_v36 = vld [vmem:[#allocation5 + $0x2c8] sm:$0xff] }
 0x47b   : > { %v2366_v20 = vmul.f32 0.5, %v2364_v10  ;;  %v2480_v34 = vadd.f32 %v6646_v61, %v2338_v9  ;;  %2399 = vmatmul.f32.vlgmr.msra.gmra.mxu3 %v6652_v63  ;;  %2422 = vmatmul.f32.vlgmr.msrb.gmra.mxu0 %v6652_v63  ;;  %v3941_v10 = vld [vmem:[#allocation7 + $0x138] sm:$0xff]  ;;  %v3942_v9 = vld [vmem:[#allocation7 + $0x140] sm:$0xff] }
 0x47c   : > { %2445 = vmatmul.f32.vlgmr.msrb.gmra.mxu1 %v6652_v63  ;;  %2610 = vmatpush.msra.mxu3 %v3934_v18  ;;  %v2487_v29 = vsub.f32 1.0, %v2477_v27  ;;  %v2491_v33 = vmul.f32 %v2477_v27, %v6411_v56  ;;  %v3946_v56 = vld [vmem:[#allocation5 + $0x238] sm:$0xff] }
 0x47d   : > { %v2376_v31 = vsub.f32 1.0, %v2366_v20  ;;  %v2482_v43 = vmul.f32 %v2480_v34, %v2468_v19  ;;  %2675 = vmatpush.msrb.mxu0 %v3935_v12  ;;  %2698 = vmatpush.msrb.mxu1 %v3936_v50  ;;  %v2380_v45 = vmul.f32 %v2366_v20, %v6394_v46  ;;  %v3943_v34 = vld [vmem:[#allocation5 + $0x268] sm:$0xff]  ;;  %v3949_v50 = vld [vmem:[#allocation7 + $0x110] sm:$0xff] }
 0x47e   : > { %v3524_v59 = vpop.eup %3523  ;;  %2611 = vmatpush.msra.mxu3 %v3937_v36  ;;  %v3945_v46 = vld [vmem:[#allocation7 + $0x128] sm:$0xff] }
 0x47f   : > { %v3526_v0 = vpop.eup %3525  ;;  %v2476_v15 = vadd.f32 1.0, %v3524_v59  ;;  %v2484_v7 = vadd.f32 %v3239_v38, %v2482_v43  ;;  %2676 = vmatpush.msrb.mxu0 %v3938_v40  ;;  %2699 = vmatpush.msrb.mxu1 %v3939_v48  ;;  %v3944_v43 = vld [vmem:[#allocation7 + $0x120] sm:$0xff]  ;;  %v3947_v20 = vld [vmem:[#allocation7 + $0x108] sm:$0xff]  ;;  %v3954_v48 = vld [vmem:[#allocation7 + $0xd8] sm:$0xff] }
 0x480   : > { %v3528_v23 = vpop.eup %3527  ;;  %2612 = vmatpush.msra.mxu3 %v3940_v16  ;;  %v2378_v51 = vmul.f32 %v3526_v0, %v2376_v31  ;;  %v3948_v12 = vld [vmem:[#allocation5 + $0x208] sm:$0xff]  ;;  %v3950_v0 = vld [vmem:[#allocation7 + $0xf0] sm:$0xff]  ;;  %v3957_v16 = vld [vmem:[#allocation7 + $0xe0] sm:$0xff] }
 0x481   : > { %v2489_v28 = vmul.f32 %v3528_v23, %v2487_v29  ;;  %3529 = vtanh.f32 %v2484_v7  ;;  %2677 = vmatpush.msrb.mxu0 %v3941_v10  ;;  %2700 = vmatpush.msrb.mxu1 %v3942_v9  ;;  %v2478_v19 = vmul.f32 0.5, %v2476_v15  ;;  %v3951_v29 = vld [vmem:[#allocation7 + $0x178] sm:$0xff]  ;;  %v3955_v23 = vld [vmem:[#allocation7 + $0x160] sm:$0xff]  ;;  %v3962_v10 = vld [vmem:[#allocation7 + $0xa8] sm:$0xff] }
 0x482   : > { %2613 = vmatpush.msra.mxu3 %v3943_v34  ;;  %v6661_v38 = vadd.f32 %v2380_v45, %v2378_v51  ;;  %v3952_v15 = vld [vmem:[#allocation5 + $0x1d8] sm:$0xff]  ;;  %v3956_v45 = vld [vmem:[#allocation5 + $0x1a8] sm:$0xff]  ;;  %v3959_v51 = vld [vmem:[#allocation7 + $0xc0] sm:$0xff] }
 0x483   : > { %v6663_v18 = vadd.f32 %v2491_v33, %v2489_v28  ;;  %2678 = vmatpush.msrb.mxu0 %v3944_v43  ;;  %2701 = vmatpush.msrb.mxu1 %v3945_v46  ;;  %v2488_v27 = vsub.f32 1.0, %v2478_v19  ;;  %v2492_v59 = vmul.f32 %v2478_v19, %v6431_v25  ;;  %v3953_v7 = vld [vmem:[#allocation7 + $0xf8] sm:$0xff]  ;;  %v3960_v33 = vld [vmem:[#allocation5 + $0x148] sm:$0xff]  ;;  %v3965_v34 = vld [vmem:[#allocation7 + $0xb0] sm:$0xff] }
 0x484   : > { %2402 = vmatmul.f32.gmra.mxu3 %v6661_v38  ;;  %2425 = vmatmul.f32.gmra.mxu0 %v6661_v38  ;;  %v3958_v25 = vld [vmem:[#allocation5 + $0x178] sm:$0xff]  ;;  %v3961_v28 = vld [vmem:[#allocation7 + $0xc8] sm:$0xff]  ;;  %v3966_v43 = vld [vmem:[#allocation7 + $0x90] sm:$0xff] }
 0x485   : > { %2448 = vmatmul.f32.gmra.mxu1 %v6661_v38  ;;  %2614 = vmatpush.msra.mxu3 %v3946_v56  ;;  %v3963_v9 = vld [vmem:[#allocation7 + $0x148] sm:$0xff]  ;;  %v3964_v19 = vld [vmem:[#allocation5 + $0x118] sm:$0xff]  ;;  %v3967_v46 = vld [vmem:[#allocation7 + $0x130] sm:$0xff] }
 0x486   : > { %2511 = vmatmul.f32.vlgmr.msrb.gmra.mxu2 %v6663_v18  ;;  %2679 = vmatpush.msrb.mxu0 %v3947_v20  ;;  %v3968_v56 = vld [vmem:[#allocation5 + $0xe8] sm:$0xff]  ;;  %v3970_v20 = vld [vmem:[#allocation5 + $0xb8] sm:$0xff] }
 0x487   : > { %v3530_v31 = vpop.eup %3529  ;;  %2615 = vmatpush.msra.mxu3 %v3948_v12  ;;  %2702 = vmatpush.msrb.mxu1 %v3949_v50  ;;  %v3972_v12 = vld [vmem:[#allocation5 + $0x88] sm:$0xff]  ;;  %v3973_v50 = vld [vmem:[#allocation7 + $0x80] sm:$0xff] }
 0x488   : > { %v2490_v36 = vmul.f32 %v3530_v31, %v2488_v27  ;;  %2680 = vmatpush.msrb.mxu0 %v3950_v0  ;;  %2721 = vmatpush.msrb.mxu2 %v3951_v29  ;;  %v3969_v27 = vld [vmem:[#allocation7 + $0x98] sm:$0xff]  ;;  %v3977_v29 = vld [vmem:[#allocation7 + $0x68] sm:$0xff] }
 0x489   : > { %2616 = vmatpush.msra.mxu3 %v3952_v15  ;;  %2703 = vmatpush.msrb.mxu1 %v3953_v7  ;;  %v3971_v31 = vld [vmem:[#allocation7 + $0x78] sm:$0xff]  ;;  %v3978_v15 = vld [vmem:[#allocation7 + $0x48] sm:$0xff]  ;;  %v3979_v7 = vld [vmem:[#allocation7 + $0x100] sm:$0xff] }
 0x48a   : > { %v6670_v40 = vadd.f32 %v2492_v59, %v2490_v36  ;;  %2681 = vmatpush.msrb.mxu0 %v3954_v48  ;;  %2722 = vmatpush.msrb.mxu2 %v3955_v23  ;;  %v3974_v59 = vld [vmem:[#allocation7 + $0x60] sm:$0xff]  ;;  %v3975_v36 = vld [vmem:[#allocation7 + $0x118] sm:$0xff]  ;;  %v3980_v48 = vld [vmem:[#allocation5 + $0x28] sm:$0xff] }
 0x48b   : > { %2617 = vmatpush.msra.mxu3 %v3956_v45  ;;  %2704 = vmatpush.msrb.mxu1 %v3957_v16  ;;  %v3976_v0 = vld [vmem:[#allocation5 + $0x58] sm:$0xff]  ;;  %v3981_v23 = vld [vmem:[#allocation7 + $0x50] sm:$0xff] }
 0x48c   : > { %2534 = vmatmul.f32.vlgmr.msrb.gmra.mxu3 %v6663_v18  ;;  %2557 = vmatmul.f32.vlgmr.msra.gmra.mxu0 %v6663_v18  ;;  %v3982_v45 = vld [vmem:[#allocation7 + $0x30] sm:$0xff]  ;;  %v3983_v16 = vld [vmem:[#allocation7 + $0x38] sm:$0xff] }
 0x48d   : > { %2580 = vmatmul.f32.vlgmr.msra.gmra.mxu1 %v6663_v18  ;;  %2618 = vmatpush.msra.mxu3 %v3958_v25  ;;  %v3984_v25 = vld [vmem:[#allocation7 + $0x18] sm:$0xff] }
 0x48e   : > { %2514 = vmatmul.f32.gmra.mxu2 %v6670_v40  ;;  %2682 = vmatpush.msrb.mxu0 %v3959_v51  ;;  %v3985_v51 = vld [vmem:[#allocation7 + $0xe8] sm:$0xff] }
 0x48f   : > { %2619 = vmatpush.msra.mxu3 %v3960_v33  ;;  %2705 = vmatpush.msrb.mxu1 %v3961_v28  ;;  %v3986_v33 = vld [vmem:[#allocation7 + $0x20] sm:$0xff] }
 0x490   : > { %2683 = vmatpush.msrb.mxu0 %v3962_v10  ;;  %2723 = vmatpush.msrb.mxu2 %v3963_v9  ;;  %v3987_v28 = vld [vmem:[#allocation7] sm:$0xff]  ;;  %v3988_v10 = vld [vmem:[#allocation7 + $0xd0] sm:$0xff]  ;;  %v3989_v9 = vld [vmem:[#allocation7 + $0x8] sm:$0xff] }
 0x491   : > { %2620 = vmatpush.msra.mxu3 %v3964_v19  ;;  %2706 = vmatpush.msrb.mxu1 %v3965_v34 }
 0x492   : > { %2684 = vmatpush.msrb.mxu0 %v3966_v43  ;;  %2724 = vmatpush.msrb.mxu2 %v3967_v46 }
 0x493   : > { %2621 = vmatpush.msra.mxu3 %v3968_v56  ;;  %2707 = vmatpush.msrb.mxu1 %v3969_v27 }
 0x494   : > { %2537 = vmatmul.f32.gmra.mxu3 %v6670_v40  ;;  %2560 = vmatmul.f32.gmra.mxu0 %v6670_v40 }
 0x495   : > { %2583 = vmatmul.f32.gmra.mxu1 %v6670_v40  ;;  %2622 = vmatpush.msra.mxu3 %v3970_v20 }
 0x496   : > { %2603 = vmatmul.f32.vlgmr.msra.gmra.mxu2 %v6663_v18  ;;  %2685 = vmatpush.msrb.mxu0 %v3971_v31 }
 0x497   : > { %2623 = vmatpush.msra.mxu3 %v3972_v12  ;;  %2708 = vmatpush.msrb.mxu1 %v3973_v50  ;;  %v7639_v12 = vld [vmem:[#allocation39_spill] sm:$0xff] }
 0x498   : > { %2686 = vmatpush.msrb.mxu0 %v3974_v59  ;;  %2725 = vmatpush.msrb.mxu2 %v3975_v36  ;;  %v3243_v59 = vld [vmem:[%s4442_s28 + $0x168] sm:$0xff] }
 0x499   : > { %2624 = vmatpush.msra.mxu3 %v3976_v0  ;;  %2709 = vmatpush.msrb.mxu1 %v3977_v29 }
 0x49a   : > { %2687 = vmatpush.msrb.mxu0 %v3978_v15  ;;  %2726 = vmatpush.msrb.mxu2 %v3979_v7 }
 0x49b   : > { %2625 = vmatpush.msra.mxu3 %v3980_v48  ;;  %2710 = vmatpush.msrb.mxu1 %v3981_v23 }
 0x49c   : > { %2626 = vmatmul.f32.vlgmr.msra.gmra.mxu3 %v6663_v18  ;;  %2688 = vmatpush.msrb.mxu0 %v3982_v45 }
 0x49d   : > { %2787 = vmatpush.msrb.mxu3 %v6457_v47  ;;  %2711 = vmatpush.msrb.mxu1 %v3983_v16  ;;  %v3990_v47 = vld [vmem:[#allocation7 + $0xb8] sm:$0xff] }
 0x49e   : > { %2606 = vmatmul.f32.gmra.mxu2 %v6670_v40  ;;  %2689 = vmatpush.msrb.mxu0 %v3984_v25 }
 0x49f   : > { %2788 = vmatpush.msrb.mxu3 %v6463_v41  ;;  %2727 = vmatpush.msrb.mxu2 %v3985_v51  ;;  %v3991_v41 = vld [vmem:[#allocation7 + $0xa0] sm:$0xff] }
 0x4a0   : > { %2712 = vmatpush.msrb.mxu1 %v3986_v33  ;;  %2690 = vmatpush.msrb.mxu0 %v3987_v28 }
 0x4a1   : > { %2789 = vmatpush.msrb.mxu3 %v6469_v52  ;;  %2728 = vmatpush.msrb.mxu2 %v3988_v10  ;;  %v3992_v52 = vld [vmem:[#allocation7 + $0x88] sm:$0xff]  ;;  %v3241_v10 = vld [vmem:[%s4442_s28 + $0x158] sm:$0xff] }
 0x4a2   : > { %2713 = vmatpush.msrb.mxu1 %v3989_v9  ;;  %2810 = vmatpush.msra.mxu0 %v6480_v49  ;;  %v3994_v49 = vld [vmem:[#allocation7 + $0x58] sm:$0xff] }
 0x4a3   : > { %2790 = vmatpush.msrb.mxu3 %v6476_v14  ;;  %2729 = vmatpush.msrb.mxu2 %v3990_v47  ;;  %v3993_v14 = vld [vmem:[#allocation7 + $0x70] sm:$0xff] }
 0x4a4   : > { %2629 = vmatmul.f32.gmra.mxu3 %v6670_v40  ;;  %2833 = vmatpush.msra.mxu1 %v6498_v13  ;;  %v7623_v13 = vld [vmem:[#allocation57_spill] sm:$0xff] }
 0x4a5   : > { %2791 = vmatpush.msrb.mxu3 %v6484_v2  ;;  %2730 = vmatpush.msrb.mxu2 %v3991_v41  ;;  %v3995_v2 = vld [vmem:[#allocation7 + $0x40] sm:$0xff] }
 0x4a6   : > { %2811 = vmatpush.msra.mxu0 %v6487_v30  ;;  %2834 = vmatpush.msra.mxu1 %v6508_v4  ;;  %v3996_v30 = vld [vmem:[#allocation7 + $0x28] sm:$0xff]  ;;  %v7626_v4 = vld [vmem:[#allocation49_spill] sm:$0xff]  ;;  %v6741_v41 = vld [vmem:[%s6837_s5] ss:$0 sm:$0xff] }
 0x4a7   : > { %2792 = vmatpush.msrb.mxu3 %v6492_v6  ;;  %2731 = vmatpush.msrb.mxu2 %v3992_v52  ;;  %v3997_v6 = vld [vmem:[#allocation7 + $0x10] sm:$0xff] }
 0x4a8   : > { %2812 = vmatpush.msra.mxu0 %v6495_v8  ;;  %2835 = vmatpush.msra.mxu1 %v6518_v58  ;;  %v7622_v8 = vld [vmem:[#allocation67_spill] sm:$0xff]  ;;  %v7629_v58 = vld [vmem:[#allocation65_spill] sm:$0xff] }
 0x4a9   : > { %2793 = vmatpush.msrb.mxu3 %v6502_v1  ;;  %2732 = vmatpush.msrb.mxu2 %v3993_v14  ;;  %v7624_v1 = vld [vmem:[#allocation53_spill] sm:$0xff] }
 0x4aa   : > { %2813 = vmatpush.msra.mxu0 %v6505_v17  ;;  %2836 = vmatpush.msra.mxu1 %v6528_v44  ;;  %v7625_v17 = vld [vmem:[#allocation58_spill] sm:$0xff]  ;;  %v7632_v44 = vld [vmem:[#allocation56_spill] sm:$0xff] }
 0x4ab   : > { %2794 = vmatpush.msrb.mxu3 %v6512_v22  ;;  %2733 = vmatpush.msrb.mxu2 %v3994_v49  ;;  %v7627_v22 = vld [vmem:[#allocation68_spill] sm:$0xff] }
 0x4ac   : > { %2814 = vmatpush.msra.mxu0 %v6515_v55  ;;  %2837 = vmatpush.msra.mxu1 %v6538_v32  ;;  %v7628_v55 = vld [vmem:[#allocation70_spill] sm:$0xff]  ;;  %v7635_v32 = vld [vmem:[#allocation75_spill] sm:$0xff] }
 0x4ad   : > { %2795 = vmatpush.msrb.mxu3 %v6522_v37  ;;  %2734 = vmatpush.msrb.mxu2 %v3995_v2  ;;  %v7630_v37 = vld [vmem:[#allocation64_spill] sm:$0xff] }
 0x4ae   : > { %2815 = vmatpush.msra.mxu0 %v6525_v24  ;;  %2838 = vmatpush.msra.mxu1 %v6551_v57  ;;  %v7631_v24 = vld [vmem:[#allocation60_spill] sm:$0xff] }
 0x4af   : > { %2796 = vmatpush.msrb.mxu3 %v6532_v54  ;;  %2735 = vmatpush.msrb.mxu2 %v3996_v30  ;;  %v7633_v54 = vld [vmem:[#allocation74_spill] sm:$0xff] }
 0x4b0   : > { %2816 = vmatpush.msra.mxu0 %v6535_v60  ;;  %2839 = vmatpush.msra.mxu1 %v6560_v21  ;;  %v7634_v60 = vld [vmem:[#allocation71_spill] sm:$0xff] }
 0x4b1   : > { %2797 = vmatpush.msrb.mxu3 %v6542_v3  ;;  %2736 = vmatpush.msrb.mxu2 %v3997_v6  ;;  %v7636_v3 = vld [vmem:[#allocation59_spill] sm:$0xff] }
 0x4b2   : > { %2817 = vmatpush.msra.mxu0 %v6545_v5  ;;  %2840 = vmatpush.msra.mxu1 %v6569_v35  ;;  %v7637_v5 = vld [vmem:[#allocation61_spill] sm:$0xff] }
 0x4b3   : > { %2798 = vmatpush.msrb.mxu3 %v6548_v39 }
 0x4b4   : > { %2818 = vmatpush.msra.mxu0 %v6554_v26  ;;  %2841 = vmatpush.msra.mxu1 %v6578_v53  ;;  %v7638_v53 = vld [vmem:[#allocation27_spill] sm:$0xff] }
 0x4b5   : > { %2799 = vmatpush.msrb.mxu3 %v6557_v62 }
 0x4b6   : > { %2819 = vmatpush.msra.mxu0 %v6563_v11  ;;  %2842 = vmatpush.msra.mxu1 %v7622_v8  ;;  %v3240_v11 = vld [vmem:[%s4442_s28 + $0x150] sm:$0xff] }
 0x4b7   : > { %2800 = vmatpush.msrb.mxu3 %v7623_v13 }
 0x4b8   : > { %2820 = vmatpush.msra.mxu0 %v7624_v1  ;;  %2843 = vmatpush.msra.mxu1 %v7625_v17 }
 0x4b9   : > { %2801 = vmatpush.msrb.mxu3 %v7626_v4 }
 0x4ba   : > { %2821 = vmatpush.msra.mxu0 %v7627_v22  ;;  %2844 = vmatpush.msra.mxu1 %v7628_v55 }
 0x4bb   : > { %2802 = vmatpush.msrb.mxu3 %v7629_v58 }
 0x4bc   : > { %2822 = vmatpush.msra.mxu0 %v7630_v37  ;;  %2845 = vmatpush.msra.mxu1 %v7631_v24 }
 0x4be   : > { %2823 = vmatpush.msra.mxu0 %v7632_v44  ;;  %2846 = vmatpush.msra.mxu1 %v7633_v54  ;;  %v3244_v44 = vld [vmem:[%s4442_s28 + $0x170] sm:$0xff] }
 0x4c0   : > { %2824 = vmatpush.msra.mxu0 %v7634_v60  ;;  %2847 = vmatpush.msra.mxu1 %v7635_v32 }
 0x4c2   : > { %2825 = vmatpush.msra.mxu0 %v7636_v3  ;;  %2848 = vmatpush.msra.mxu1 %v7637_v5 }
 0x4f8   : > { %v2423_v26 = vpop.f32.mrf.mxu0 }
 0x4f9   : > { %v2446_v39 = vpop.f32.mrf.mxu1 }
 0x4fa   : > { %v2659_v52 = vadd.f32 %v6741_v41, %v2446_v39 }
 0x4fe   : > { %v2400_v57 = vpop.f32.mrf.mxu3 }
 0x501   : > { %v2426_v46 = vpop.f32.mrf.mxu0 }
 0x502   : > { %v2449_v62 = vpop.f32.mrf.mxu1 }
 0x503   : > { %v2660_v39 = vadd.f32 %v6741_v41, %v2449_v62 }
 0x507   : > { %v2403_v21 = vpop.f32.mrf.mxu3 }
 0x509   : > { %v2512_v35 = vpop.f32.mrf.mxu2  ;;  %v2558_v16 = vpop.f32.mrf.mxu0 }
 0x50a   : > { %v2633_v19 = vadd.f32 %v2512_v35, %v7638_v53  ;;  %v2581_v34 = vpop.f32.mrf.mxu1  ;;  %v2635_v6 = vadd.f32 %v2558_v16, %v5004_v42 }
 0x50b   : > { %v2751_v43 = vadd.f32 %v3240_v11, %v2581_v34 }
 0x50c   : > { %v2639_v56 = vadd.f32 %v2633_v19, %v2400_v57 }
 0x50d   : > { %v2753_v20 = vmul.f32 0.5, %v2751_v43 }
 0x50e   : > { %v2641_v27 = vmul.f32 0.5, %v2639_v56 }
 0x50f   : > { %v2535_v31 = vpop.f32.mrf.mxu3 }
 0x510   : > { %3531 = vtanh.f32 %v2641_v27  ;;  %v2634_v50 = vadd.f32 %v2535_v31, %v7639_v12 }
 0x511   : > { %v2515_v36 = vpop.f32.mrf.mxu2  ;;  %3533 = vtanh.f32 %v2753_v20  ;;  %v2561_v3 = vpop.f32.mrf.mxu0 }
 0x512   : > { %v2649_v0 = vadd.f32 %v2634_v50, %v2423_v26  ;;  %v2636_v29 = vadd.f32 %v2515_v36, %v7638_v53  ;;  %v2584_v15 = vpop.f32.mrf.mxu1  ;;  %v3242_v26 = vld [vmem:[%s4442_s28 + $0x160] sm:$0xff]  ;;  %v2638_v19 = vadd.f32 %v2561_v3, %v5004_v42 }
 0x513   : > { %v2752_v7 = vadd.f32 %v3243_v59, %v2584_v15 }
 0x514   : > { %v2651_v48 = vmul.f32 0.5, %v2649_v0  ;;  %v2640_v23 = vadd.f32 %v2636_v29, %v2403_v21 }
 0x515   : > { %v2754_v51 = vmul.f32 0.5, %v2752_v7 }
 0x516   : > { %v3532_v45 = vpop.eup %3531  ;;  %3535 = vtanh.f32 %v2651_v48  ;;  %v2642_v25 = vmul.f32 0.5, %v2640_v23 }
 0x517   : > { %v2645_v33 = vadd.f32 1.0, %v3532_v45  ;;  %v2538_v28 = vpop.f32.mrf.mxu3  ;;  %v3534_v47 = vpop.eup %3533 }
 0x518   : > { %3537 = vtanh.f32 %v2642_v25  ;;  %v2637_v9 = vadd.f32 %v2538_v28, %v7639_v12  ;;  %v2757_v1 = vadd.f32 1.0, %v3534_v47  ;;  %v3245_v25 = vld [vmem:[%s4442_s28 + $0x178] sm:$0xff]  ;;  %s4163_s28 = sshra.s32 %s3063_s2, 4  ;;  %s4164_s28 = int_to_ptr.hbm [resolvable:$true] %s4163_s28 }
 0x519   : > { %v2647_v14 = vmul.f32 0.5, %v2645_v33  ;;  %v2604_v49 = vpop.f32.mrf.mxu2  ;;  %3539 = vtanh.f32 %v2754_v51  ;;  %s4165_s13 = scalar_lea.hbm %s4164_s28, 16  ;;  %p4170_p6 = scmp.lt.s32.totalorder %s4164_s28, %s7643_s11 }
 0x51a   : > { %v2650_v2 = vadd.f32 %v2637_v9, %v2426_v46  ;;  %v2761_v30 = vadd.f32 %v3241_v10, %v2604_v49  ;;  %v2759_v60 = vmul.f32 0.5, %v2757_v1  ;;  %p4166_p3 = scmp.ne.s32.totalorder %s4164_s28, %s4165_s13  ;;  %p4171_p7 = scmp.lt.s32.totalorder %s4169_s17, %s4165_s13 }
 0x51b   : > { %v2661_v8 = vmul.f32 %v2659_v52, %v2647_v14 }
 0x51c   : > { %v3536_v13 = vpop.eup %3535  ;;  %v2652_v17 = vmul.f32 0.5, %v2650_v2  ;;  %v2763_v4 = vmul.f32 0.5, %v2761_v30  ;;  %p4167_p4 = pnand %p4166_p3, %p4366_p11  ;;  %p4172_p8 = por %p4171_p7, %p4170_p6 }
 0x51d   : > { %v2663_v22 = vadd.f32 %v2661_v8, %v2635_v6  ;;  %v2655_v55 = vadd.f32 1.0, %v3536_v13 }
 0x51e   : > { %v3538_v58 = vpop.eup %3537  ;;  %3541 = vtanh.f32 %v2652_v17  ;;  %p4168_p5 = pneg %p4167_p4 }
 0x51f   : > { %3543 = vtanh.f32 %v2663_v22  ;;  %v2646_v37 = vadd.f32 1.0, %v3538_v58  ;;  %v2627_v24 = vpop.f32.mrf.mxu3  ;;  %v3540_v54 = vpop.eup %3539  ;;  %v2657_v32 = vmul.f32 0.5, %v2655_v55 }
 0x520   : > { %3545 = vtanh.f32 %v2763_v4  ;;  %v2771_v5 = vadd.f32 %v6646_v61, %v2627_v24  ;;  %v2758_v43 = vadd.f32 1.0, %v3540_v54  ;;  %p4173_p9 = pnand %p4172_p8, %p4168_p5 }
 0x521   : > { %v2648_v57 = vmul.f32 0.5, %v2646_v37  ;;  %v2607_v21 = vpop.f32.mrf.mxu2  ;;  %v2667_v56 = vsub.f32 1.0, %v2657_v32  ;;  %v2671_v62 = vmul.f32 %v2657_v32, %v6652_v63 }
 0x522   : > { %v2773_v11 = vmul.f32 %v2771_v5, %v2759_v60  ;;  %v2762_v35 = vadd.f32 %v3244_v44, %v2607_v21  ;;  %v2760_v29 = vmul.f32 0.5, %v2758_v43 }
 0x523   : > { %v2662_v34 = vmul.f32 %v2660_v39, %v2648_v57 }
 0x524   : > { %v3542_v46 = vpop.eup %3541  ;;  %v2775_v27 = vadd.f32 %v3242_v26, %v2773_v11  ;;  %v2764_v20 = vmul.f32 0.5, %v2762_v35 }
 0x525   : > { %v3544_v31 = vpop.eup %3543  ;;  %v2664_v50 = vadd.f32 %v2662_v34, %v2638_v19  ;;  %v2656_v59 = vadd.f32 1.0, %v3542_v46 }
 0x526   : > { %v3546_v36 = vpop.eup %3545  ;;  %v2669_v0 = vmul.f32 %v3544_v31, %v2667_v56  ;;  %3547 = vtanh.f32 %v2775_v27 }
 0x527   : > { %3549 = vtanh.f32 %v2664_v50  ;;  %v2767_v15 = vadd.f32 1.0, %v3546_v36  ;;  %v2630_v7 = vpop.f32.mrf.mxu3  ;;  %v2658_v23 = vmul.f32 0.5, %v2656_v59 }
 0x528   : > { %v6751_v48 = vadd.f32 %v2671_v62, %v2669_v0  ;;  %3551 = vtanh.f32 %v2764_v20  ;;  %v2772_v45 = vadd.f32 %v6646_v61, %v2630_v7 }
 0x529   : > { %v2769_v16 = vmul.f32 0.5, %v2767_v15  ;;  %v2668_v28 = vsub.f32 1.0, %v2658_v23  ;;  %v2672_v61 = vmul.f32 %v2658_v23, %v6661_v38 }
 0x52a   : > { %v2774_v51 = vmul.f32 %v2772_v45, %v2760_v29  ;;  %2691 = vmatmul.f32.vlgmr.msrb.gmra.mxu0 %v6751_v48  ;;  %2714 = vmatmul.f32.vlgmr.msrb.gmra.mxu1 %v6751_v48 }
 0x52b   : > { %v2779_v33 = vsub.f32 1.0, %v2769_v16  ;;  %2737 = vmatmul.f32.vlgmr.msrb.gmra.mxu2 %v6751_v48  ;;  %v2783_v47 = vmul.f32 %v2769_v16, %v6663_v18 }
 0x52c   : > { %v3548_v63 = vpop.eup %3547  ;;  %v2776_v10 = vadd.f32 %v3245_v25, %v2774_v51 }
 0x52d   : > { %v3550_v9 = vpop.eup %3549  ;;  %v2781_v52 = vmul.f32 %v3548_v63, %v2779_v33 }
 0x52e   : > { %v3552_v14 = vpop.eup %3551  ;;  %3553 = vtanh.f32 %v2776_v10  ;;  %v2670_v49 = vmul.f32 %v3550_v9, %v2668_v28 }
 0x52f   : > { %v2768_v2 = vadd.f32 1.0, %v3552_v14  ;;  %v2785_v30 = vadd.f32 %v2783_v47, %v2781_v52 }
 0x530   : > { %v6760_v6 = vadd.f32 %v2672_v61, %v2670_v49 }
 0x531   : > { %v2770_v8 = vmul.f32 0.5, %v2768_v2  ;;  %2803 = vmatmul.f32.vlgmr.msrb.gmra.mxu3 %v2785_v30 }
 0x532   : > { %2694 = vmatmul.f32.gmra.mxu0 %v6760_v6  ;;  %2717 = vmatmul.f32.gmra.mxu1 %v6760_v6 }
 0x533   : > { %v2780_v13 = vsub.f32 1.0, %v2770_v8  ;;  %2740 = vmatmul.f32.gmra.mxu2 %v6760_v6  ;;  %v2784_v1 = vmul.f32 %v2770_v8, %v6670_v40 }
 0x534   : > { %v3554_v18 = vpop.eup %3553 }
 0x535   : > { %v2782_v17 = vmul.f32 %v3554_v18, %v2780_v13  ;;  %v2972_v13 = vld [vmem:[#allocation10 + $0x78] sm:$0xff]  ;;  %v2971_v18 = vld [vmem:[#allocation10 + $0x70] sm:$0xff] }
 0x536   : > { %2977 = vmatpush.msra.mxu2 %v2972_v13 }
 0x537   : > { %v2786_v38 = vadd.f32 %v2784_v1, %v2782_v17 }
 0x538   : > { %2978 = vmatpush.msra.mxu2 %v2971_v18 }
 0x539   : > { %2806 = vmatmul.f32.gmra.mxu3 %v2786_v38 }
 0x53a   : > { %2826 = vmatmul.f32.vlgmr.msra.gmra.mxu0 %v2785_v30  ;;  %2849 = vmatmul.f32.vlgmr.msra.gmra.mxu1 %v2785_v30 }
 0x542   : > { %2829 = vmatmul.f32.gmra.mxu0 %v2786_v38  ;;  %2852 = vmatmul.f32.gmra.mxu1 %v2786_v38 }
 0x5a7   : > { %v2692_v4 = vpop.f32.mrf.mxu0  ;;  %v2715_v22 = vpop.f32.mrf.mxu1 }
 0x5ae   : > { %v2738_v57 = vpop.f32.mrf.mxu2 }
 0x5af   : > { %v2695_v55 = vpop.f32.mrf.mxu0  ;;  %v2718_v24 = vpop.f32.mrf.mxu1  ;;  %v2882_v27 = vadd.f32 %v6741_v41, %v2738_v57  ;;  %v2963_v57 = vld [vmem:[#allocation10 + $0x30] sm:$0xff] }
 0x5b4   : > { %v2804_v58 = vpop.f32.mrf.mxu3 }
 0x5b5   : > { %v2856_v37 = vadd.f32 %v2804_v58, %v7638_v53 }
 0x5b6   : > { %v2741_v62 = vpop.f32.mrf.mxu2 }
 0x5b7   : > { %v2862_v44 = vadd.f32 %v2856_v37, %v2692_v4  ;;  %v2827_v54 = vpop.f32.mrf.mxu0  ;;  %v2850_v19 = vpop.f32.mrf.mxu1  ;;  %v2883_v23 = vadd.f32 %v6741_v41, %v2741_v62  ;;  %v3013_v62 = vld [vmem:[#allocation11 + $0x58] sm:$0xff] }
 0x5b8   : > { %v2857_v60 = vadd.f32 %v2827_v54, %v7639_v12  ;;  %v2858_v50 = vadd.f32 %v2850_v19, %v5004_v42  ;;  %v2970_v54 = vld [vmem:[#allocation10 + $0x68] sm:$0xff] }
 0x5b9   : > { %v2864_v32 = vmul.f32 0.5, %v2862_v44  ;;  %2979 = vmatpush.msra.mxu2 %v2970_v54  ;;  %v2958_v19 = vld [vmem:[#allocation10 + $0x8] sm:$0xff] }
 0x5ba   : > { %v2872_v40 = vadd.f32 %v2857_v60, %v2715_v22  ;;  %v2969_v60 = vld [vmem:[#allocation10 + $0x60] sm:$0xff] }
 0x5bb   : > { %3555 = vtanh.f32 %v2864_v32  ;;  %2980 = vmatpush.msra.mxu2 %v2969_v60  ;;  %v2968_v32 = vld [vmem:[#allocation10 + $0x58] sm:$0xff] }
 0x5bc   : > { %v2874_v3 = vmul.f32 0.5, %v2872_v40  ;;  %v2807_v5 = vpop.f32.mrf.mxu3  ;;  %v2967_v40 = vld [vmem:[#allocation10 + $0x50] sm:$0xff]  ;;  %v3374_v60 = vld [vmem:[%s7641_s12] ss:$0 sm:$0xff] }
 0x5bd   : > { %v2859_v39 = vadd.f32 %v2807_v5, %v7638_v53  ;;  %2981 = vmatpush.msra.mxu2 %v2968_v32  ;;  %v2965_v5 = vld [vmem:[#allocation10 + $0x40] sm:$0xff] }
 0x5be   : > { %3557 = vtanh.f32 %v2874_v3  ;;  %v2966_v3 = vld [vmem:[#allocation10 + $0x48] sm:$0xff] }
 0x5bf   : > { %v2863_v26 = vadd.f32 %v2859_v39, %v2695_v55  ;;  %v2830_v21 = vpop.f32.mrf.mxu0  ;;  %v2853_v29 = vpop.f32.mrf.mxu1  ;;  %2982 = vmatpush.msra.mxu2 %v2967_v40  ;;  %v2964_v39 = vld [vmem:[#allocation10 + $0x38] sm:$0xff] }
 0x5c0   : > { %v2860_v11 = vadd.f32 %v2830_v21, %v7639_v12  ;;  %v2861_v16 = vadd.f32 %v2853_v29, %v5004_v42  ;;  %v4246_v42 = vmov 128.0   ;;  %v2961_v21 = vld [vmem:[#allocation10 + $0x20] sm:$0xff]  ;;  %v3012_v29 = vld [vmem:[#allocation11 + $0x50] sm:$0xff] }
 0x5c1   : > { %v3556_v35 = vpop.eup %3555  ;;  %v2865_v34 = vmul.f32 0.5, %v2863_v26  ;;  %2983 = vmatpush.msra.mxu2 %v2966_v3  ;;  %v2962_v26 = vld [vmem:[#allocation10 + $0x28] sm:$0xff] }
 0x5c2   : > { %v2868_v43 = vadd.f32 1.0, %v3556_v35  ;;  %v2873_v46 = vadd.f32 %v2860_v11, %v2718_v24  ;;  %v2960_v11 = vld [vmem:[#allocation10 + $0x18] sm:$0xff]  ;;  %v2959_v35 = vld [vmem:[#allocation10 + $0x10] sm:$0xff] }
 0x5c3   : > { %3559 = vtanh.f32 %v2865_v34  ;;  %2984 = vmatpush.msra.mxu2 %v2965_v5  ;;  %v2957_v34 = vld [vmem:[#allocation10] sm:$0xff] }
 0x5c4   : > { %v3558_v56 = vpop.eup %3557  ;;  %v2870_v20 = vmul.f32 0.5, %v2868_v43  ;;  %v2875_v31 = vmul.f32 0.5, %v2873_v46 }
 0x5c5   : > { %v2878_v59 = vadd.f32 1.0, %v3558_v56  ;;  %2985 = vmatpush.msra.mxu2 %v2964_v39 }
 0x5c6   : > { %v2884_v53 = vmul.f32 %v2882_v27, %v2870_v20  ;;  %3561 = vtanh.f32 %v2875_v31  ;;  %v3017_v27 = vld [vmem:[#allocation11 + $0x78] sm:$0xff]  ;;  %v3016_v20 = vld [vmem:[#allocation11 + $0x70] sm:$0xff]  ;;  %v3015_v31 = vld [vmem:[#allocation11 + $0x68] sm:$0xff] }
 0x5c7   : > { %v2880_v15 = vmul.f32 0.5, %v2878_v59  ;;  %2986 = vmatpush.msra.mxu2 %v2963_v57  ;;  %3022 = vmatpush.msra.mxu3 %v3017_v27  ;;  %v3014_v59 = vld [vmem:[#allocation11 + $0x60] sm:$0xff] }
 0x5c8   : > { %v2886_v36 = vadd.f32 %v2884_v53, %v2858_v50 }
 0x5c9   : > { %v3560_v0 = vpop.eup %3559  ;;  %v2890_v33 = vsub.f32 1.0, %v2880_v15  ;;  %v2894_v9 = vmul.f32 %v2880_v15, %v6751_v48  ;;  %2987 = vmatpush.msra.mxu2 %v2962_v26  ;;  %3023 = vmatpush.msra.mxu3 %v3016_v20 }
 0x5ca   : > { %3563 = vtanh.f32 %v2886_v36  ;;  %v2869_v12 = vadd.f32 1.0, %v3560_v0 }
 0x5cb   : > { %2988 = vmatpush.msra.mxu2 %v2961_v21  ;;  %3024 = vmatpush.msra.mxu3 %v3015_v31 }
 0x5cc   : > { %v3562_v7 = vpop.eup %3561  ;;  %v2871_v45 = vmul.f32 0.5, %v2869_v12 }
 0x5cd   : > { %v2879_v51 = vadd.f32 1.0, %v3562_v7  ;;  %2989 = vmatpush.msra.mxu2 %v2960_v11  ;;  %3025 = vmatpush.msra.mxu3 %v3014_v59  ;;  %v3011_v7 = vld [vmem:[#allocation11 + $0x48] sm:$0xff] }
 0x5ce   : > { %v2885_v25 = vmul.f32 %v2883_v23, %v2871_v45  ;;  %v3010_v45 = vld [vmem:[#allocation11 + $0x40] sm:$0xff] }
 0x5cf   : > { %v2881_v52 = vmul.f32 0.5, %v2879_v51  ;;  %2990 = vmatpush.msra.mxu2 %v2959_v35  ;;  %3026 = vmatpush.msra.mxu3 %v3013_v62  ;;  %v3009_v51 = vld [vmem:[#allocation11 + $0x38] sm:$0xff] }
 0x5d0   : > { %v3564_v63 = vpop.eup %3563  ;;  %v2887_v28 = vadd.f32 %v2885_v25, %v2861_v16 }
 0x5d1   : > { %v2892_v10 = vmul.f32 %v3564_v63, %v2890_v33  ;;  %v2891_v14 = vsub.f32 1.0, %v2881_v52  ;;  %v2895_v41 = vmul.f32 %v2881_v52, %v6760_v6  ;;  %2991 = vmatpush.msra.mxu2 %v2958_v19  ;;  %3027 = vmatpush.msra.mxu3 %v3012_v29 }
 0x5d2   : > { %3565 = vtanh.f32 %v2887_v28  ;;  %v3371_v28 = vld [vmem:[%s6838_s6] ss:$0 sm:$0xff] }
 0x5d3   : > { %v2896_v47 = vadd.f32 %v2894_v9, %v2892_v10  ;;  %3567 = vrcp.f32 %v4246_v42  ;;  %2992 = vmatpush.msra.mxu2 %v2957_v34  ;;  %3028 = vmatpush.msra.mxu3 %v3011_v7  ;;  %v3008_v10 = vld [vmem:[#allocation11 + $0x30] sm:$0xff] }
 0x5d5   : > { %2898 = vadd.xlane.f32.xlu0 %v2896_v47  ;;  %3029 = vmatpush.msra.mxu3 %v3010_v45 }
 0x5d7   : > { %3030 = vmatpush.msra.mxu3 %v3009_v51 }
 0x5d8   : > { %v3566_v61 = vpop.eup %3565 }
 0x5d9   : > { %v2893_v49 = vmul.f32 %v3566_v61, %v2891_v14  ;;  %v3568_v30 = vpop.eup %3567  ;;  %v3372_v14 = vld [vmem:[%s6839_s7] ss:$0 sm:$0xff]  ;;  %v3007_v61 = vld [vmem:[#allocation11 + $0x28] sm:$0xff]  ;;  %3031 = vmatpush.msra.mxu3 %v3008_v10 }
 0x5da   : > { %v2903_v8 = vmul.f32 128.0, %v3568_v30  ;;  %vm2907_vm0 = vweird.f32 %v3568_v30 }
 0x5db   : > { %v2897_v2 = vadd.f32 %v2895_v41, %v2893_v49  ;;  %3032 = vmatpush.msra.mxu3 %v3007_v61 }
 0x5dc   : > { %v2904_v1 = vsub.f32 1.0, %v2903_v8  ;;  %v3005_v8 = vld [vmem:[#allocation11 + $0x18] sm:$0xff] }
 0x5dd   : > { %2900 = vadd.xlane.f32.xlu0 %v2897_v2 }
 0x5de   : > { %v2905_v48 = vmul.f32 %v3568_v30, %v2904_v1 }
 0x5e0   : > { %v2906_v17 = vadd.f32 %v3568_v30, %v2905_v48 }
 0x5e2   : > { %v2908_v38 = vsel %vm2907_vm0, %v3568_v30, %v2906_v17 }
 0x648   : > { %v2899_v4 = vpop.xlane.xlu0 %2898 }
 0x649   : > { %v2909_v22 = vmul.f32 %v2908_v38, %v2899_v4  ;;  %v3003_v4 = vld [vmem:[#allocation11 + $0x8] sm:$0xff] }
 0x64b   : > { %v6776_v55 = vsub.f32 %v2896_v47, %v2909_v22  ;;  %v3002_v22 = vld [vmem:[#allocation11] sm:$0xff] }
 0x64d   : > { %v2913_v6 = vmul.f32 %v6776_v55, %v6776_v55 }
 0x64f   : > { %2915 = vadd.xlane.f32.xlu1 %v2913_v6 }
 0x650   : > { %v2901_v58 = vpop.xlane.xlu0 %2900 }
 0x651   : > { %v2910_v37 = vmul.f32 %v2908_v38, %v2901_v58 }
 0x653   : > { %v6780_v24 = vsub.f32 %v2897_v2, %v2910_v37  ;;  %v3006_v2 = vld [vmem:[#allocation11 + $0x20] sm:$0xff] }
 0x654   : > { %3033 = vmatpush.msra.mxu3 %v3006_v2 }
 0x655   : > { %v2914_v44 = vmul.f32 %v6780_v24, %v6780_v24 }
 0x656   : > { %3034 = vmatpush.msra.mxu3 %v3005_v8 }
 0x657   : > { %2917 = vadd.xlane.f32.xlu1 %v2914_v44 }
 0x6c2   : > { %v2916_v43 = vpop.xlane.xlu1 %2915 }
 0x6c3   : > { %v2919_v46 = vmul.f32 %v2916_v43, %v2908_v38 }
 0x6c5   : > { %v2921_v56 = vadd.f32 1e-05, %v2919_v46 }
 0x6c7   : > { %3569 = vrsqrt.f32 %v2921_v56  ;;  %vm2929_vm2 = vweird.f32 %v2921_v56 }
 0x6ca   : > { %v2918_v50 = vpop.xlane.xlu1 %2917 }
 0x6cb   : > { %v2920_v53 = vmul.f32 %v2918_v50, %v2908_v38  ;;  %v3004_v38 = vld [vmem:[#allocation11 + $0x10] sm:$0xff] }
 0x6cc   : > { %3035 = vmatpush.msra.mxu3 %v3004_v38 }
 0x6cd   : > { %v3570_v36 = vpop.eup %3569  ;;  %v2922_v0 = vadd.f32 1e-05, %v2920_v53 }
 0x6ce   : > { %v2924_v12 = vmul.f32 %v3570_v36, %v2921_v56  ;;  %vm2930_vm1 = vweird.f32 %v3570_v36  ;;  %3036 = vmatpush.msra.mxu3 %v3003_v4 }
 0x6cf   : > { %3571 = vrsqrt.f32 %v2922_v0  ;;  %vm2931_vm3 = vmor %vm2929_vm2, %vm2930_vm1  ;;  %vm2939_vm5 = vweird.f32 %v2922_v0 }
 0x6d0   : > { %v2925_v15 = vmul.f32 %v3570_v36, %v2924_v12  ;;  %3037 = vmatpush.msra.mxu3 %v3002_v22 }
 0x6d2   : > { %v2926_v23 = vmul.f32 0.5, %v2925_v15 }
 0x6d4   : > { %v2927_v16 = vsub.f32 1.5, %v2926_v23 }
 0x6d5   : > { %v3572_v25 = vpop.eup %3571 }
 0x6d6   : > { %v2928_v33 = vmul.f32 %v3570_v36, %v2927_v16  ;;  %v2934_v63 = vmul.f32 %v3572_v25, %v2922_v0  ;;  %vm2940_vm4 = vweird.f32 %v3572_v25 }
 0x6d7   : > { %vm2941_vm6 = vmor %vm2939_vm5, %vm2940_vm4 }
 0x6d8   : > { %v2932_v9 = vsel %vm2931_vm3, %v3570_v36, %v2928_v33  ;;  %v2935_v47 = vmul.f32 %v3572_v25, %v2934_v63 }
 0x6d9   : > { %v2943_v52 = vmul.f32 %v2932_v9, %v6776_v55  ;;  %v3373_v55 = vld [vmem:[%s7640_s3] ss:$0 sm:$0xff] }
 0x6da   : > { %v2936_v49 = vmul.f32 0.5, %v2935_v47 }
 0x6db   : > { %v2949_v41 = vmul.f32 %v3371_v28, %v2943_v52 }
 0x6dc   : > { %v2937_v42 = vsub.f32 1.5, %v2936_v49 }
 0x6dd   : > { %v2955_v30 = vadd.f32 %v3372_v14, %v2949_v41 }
 0x6de   : > { %v2938_v13 = vmul.f32 %v3572_v25, %v2937_v42 }
 0x6df   : > { %2993 = vmatmul.f32.vlgmr.msra.gmra.mxu2 %v2955_v30 }
 0x6e0   : > { %v2942_v18 = vsel %vm2941_vm6, %v3572_v25, %v2938_v13 }
 0x6e1   : > { %v2944_v1 = vmul.f32 %v2942_v18, %v6780_v24 }
 0x6e3   : > { %v2950_v48 = vmul.f32 %v3371_v28, %v2944_v1 }
 0x6e5   : > { %v2956_v17 = vadd.f32 %v3372_v14, %v2950_v48 }
 0x6e7   : > { %2996 = vmatmul.f32.gmra.mxu2 %v2956_v17 }
 0x762   : > { %v2994_v6 = vpop.f32.mrf.mxu2 }
 0x763   : > { %v2995_v58 = vadd.f32 %v3373_v55, %v2994_v6 }
 0x765   : > { %v3000_v37 = vmax.f32 %v2995_v58, 0.0 }
 0x767   : > { %3038 = vmatmul.f32.vlgmr.msra.gmra.mxu3 %v3000_v37 }
 0x76a   : > { %v2997_v24 = vpop.f32.mrf.mxu2 }
 0x76b   : > { %v2998_v44 = vadd.f32 %v3373_v55, %v2997_v24 }
 0x76d   : > { %v3001_v54 = vmax.f32 %v2998_v44, 0.0 }
 0x76f   : > { %3041 = vmatmul.f32.gmra.mxu3 %v3001_v54 }
 0x7ea   : > { %v3039_v32 = vpop.f32.mrf.mxu3 }
 0x7eb   : > { %v3040_v40 = vadd.f32 %v3374_v60, %v3039_v32 }
 0x7ed   : > { %3045 = vst [vmem:[%s540_s15] sm:$0xff] %v3040_v40 }
 0x7f2   : > { %v3042_v3 = vpop.f32.mrf.mxu3 }
 0x7f3   : > { %v3043_v5 = vadd.f32 %v3374_v60, %v3042_v3 }
 0x7f5   : > { %3046 = vst [vmem:[%s540_s15 + $0x8] sm:$0xff] %v3043_v5 }
 0x7f6   : > { %4176 = shalt.err (!%p4173_p9)
}
 0x7f7   : > { %s4247_s20 = smov 128   ;;  %s4248_s1 = smov 8  }
 0x7f8   : > { %3284 = dma.vmem_to_hbm [thread:$0]  (%p4366_p11), %s3061_s30, 256, %s3063_s2, %s3048_s29, %s4247_s20, %s4247_s20, %s4248_s1  }
 0x7f9 PF: > { %s7644_s18 = sld [smem:[#allocation22_spill]]  ;;  %p3303_p10 = pnand %p3191_p2, %p4370_p12 }
 0x7fb   : > { %p3304_p13 = pneg %p3303_p10 }
 0x7ff   : > { %s3077_s19 = sand.u32 1, %s7644_s18  }
 0x800   : > { %s3078_s15 = scalar_lea.sflag [#allocation4], %s3077_s19 }
 0x801   : > { %4210 = dma.done.wait (%p3304_p13), %s3078_s15, 256  }
 0x802   : > { %4212 = vsyncadd (%p3304_p13), %s3078_s15, 4294967040  ;;  %s7646_s24 = sld [smem:[#allocation23_spill]]  ;;  %s7648_s21 = smov %s4219_s22 }
 0x803   : > { %s7647_s16 = sld [smem:[#allocation24_spill]]  ;;  %s7649_s22 = smov %s4223_s23 }
 0x808   : > { %p28_p1 = scmp.ge.s32.totalorder %s7646_s24, 4  }
 0x809   : > { %s7650_s23 = smov %s7647_s16 }
 0x80a   :  { %30 = sbr.rel (!%p28_p1) target bundleno = 15 (0xf), region = 145 }
 0x80f   :  { %3084 = vsyncpa [#allocation3], 1 }
 0x810   :  { %3086 = vsyncpa [#allocation3 + $0x1], 1 }
 0x811   :  { %3087 = vsyncpa [#allocation6], 1 }
 0x812   :  { %3088 = vsyncpa [#allocation9], 1 }
 0x813   :  { %3089 = vsyncpa [#allocation12], 1 }
 0x814   :  { %3090 = vsyncpa [#allocation4], 1 }
 0x815   :  { %3092 = vsyncpa [#allocation4 + $0x1], 1 }

</bundles_post_ra>
